<compile_context>
chip_gen: v7x
topology: tpu7x:2x2x1
jax: 0.10.0
libtpu: 0.0.40
codegen_flags: <defaults>
</compile_context>

<pallas_src>
import functools

import jax
import jax.numpy as jnp
from jax.experimental import pallas as pl
from jax.experimental.pallas import tpu as pltpu

# ---------------------------------------------------------------------------
# Static configuration (padded lane widths etc.)
# ---------------------------------------------------------------------------
K = 5        # conv kernel size
PAD = 2      # 'same' padding for a 5x5 stride-1 conv
CIN_P = 16   # conv1 input  channels, zero padded (3  -> 16)
C1_P = 128   # conv1 output channels, zero padded (16 -> 128), lane dense
C2_P = 128   # conv2 output channels, zero padded (32 -> 128)
NC_P = 128   # num_classes,           zero padded (10 -> 128)


# ---------------------------------------------------------------------------
# Fused Pallas kernel (one batch element per grid step)
# ---------------------------------------------------------------------------
def _make_fused_kernel(H, W):
    Hp1, Wp1 = H + 2 * PAD, W + 2 * PAD          # padded conv1 image
    H2, W2 = H // 2, W // 2                      # after first 2x2 max pool
    Hp2, Wp2 = H2 + 2 * PAD, W2 + 2 * PAD        # padded conv2 image
    H4, W4 = H2 // 2, W2 // 2                    # after second 2x2 max pool
    S4 = H4 * W4                                 # spatial positions into fc

    F1 = Hp1 * Wp1                               # flat padded pixels, stage 1
    F2 = Hp2 * Wp2                               # flat padded pixels, stage 2
    P1, L1 = 2 * Wp1 + 2, F1 - 2 * (2 * Wp1 + 2)  # computed rows, stage 1
    P2, L2 = 2 * Wp2 + 2, F2 - 2 * (2 * Wp2 + 2)  # computed rows, stage 2

    def kernel(x1_ref, w1_ref, b1_ref, w2_ref, b2_ref, wfc_ref, bfc_ref,
               out_ref, acc1_ref, x2_ref, acc2_ref, p2_ref):

        def conv_same(src, acc_ref, w_ref, p0, length, wp, cast):
            # 5x5 'same' conv as 25 shifted matmuls over flat padded pixels.
            # Border rows of acc get garbage but are never read downstream.
            for di in range(K):
                part = None
                for dj in range(K):
                    off = (di - PAD) * wp + (dj - PAD)
                    xs = src(p0 + off, length)
                    if cast:
                        xs = xs.astype(jnp.bfloat16)
                    d = jnp.dot(xs, w_ref[di * K + dj],
                                preferred_element_type=jnp.float32)
                    part = d if part is None else part + d
                if di == 0:
                    acc_ref[pl.ds(p0, length), :] = part
                else:
                    acc_ref[pl.ds(p0, length), :] += part

        def window_max(acc_ref, base, wp, npool):
            # 2x2 window max for `npool` windows whose top-left corners start
            # at flat index `base` and step by 2 columns (strided sublane read)
            a = acc_ref[pl.ds(base, npool, stride=2), :]
            b = acc_ref[pl.ds(base + 1, npool, stride=2), :]
            c = acc_ref[pl.ds(base + wp, npool, stride=2), :]
            d = acc_ref[pl.ds(base + wp + 1, npool, stride=2), :]
            return jnp.maximum(jnp.maximum(a, b), jnp.maximum(c, d))

        # ---------------- conv1 (bias/relu folded into the pool below) ------
        conv_same(lambda s, l: x1_ref[pl.ds(s, l), :],
                  acc1_ref, w1_ref, P1, L1, Wp1, cast=False)

        # ---------------- maxpool 2x2 + bias + relu -> padded conv2 input ---
        x2_ref[...] = jnp.zeros_like(x2_ref)          # zero padding ring
        b1 = b1_ref[...]
        for io in range(H2):
            src = (2 * io + 2) * Wp1 + 2
            dst = (io + 2) * Wp2 + 2
            pooled = window_max(acc1_ref, src, Wp1, W2)
            x2_ref[pl.ds(dst, W2), :] = jnp.maximum(pooled + b1, 0.0)

        # ---------------- conv2 ----------------------------------------------
        conv_same(lambda s, l: x2_ref[pl.ds(s, l), :],
                  acc2_ref, w2_ref, P2, L2, Wp2, cast=True)

        # ---------------- maxpool 2x2 + bias + relu -> fc input --------------
        b2 = b2_ref[...]
        for io in range(H4):
            src = (2 * io + 2) * Wp2 + 2
            pooled = window_max(acc2_ref, src, Wp2, W4)
            p2_ref[pl.ds(io * W4, W4), :] = jnp.maximum(pooled + b2, 0.0)

        # ---------------- fully connected ------------------------------------
        # out[k] = sum_{s,c} p2[s, c] * wfc[s, c, k]  (fc weight pre-permuted
        # to the pooled NHWC order -> no runtime activation transpose).
        p2 = p2_ref[...].astype(jnp.bfloat16)          # (S4, C2_P)
        acc = jnp.zeros((1, NC_P), jnp.float32)
        for s in range(S4):
            acc = acc + jnp.dot(p2[s:s + 1, :], wfc_ref[s],
                                preferred_element_type=jnp.float32)
        out_ref[...] = acc + bfc_ref[...]

    scratch_shapes = [
        pltpu.VMEM((F1, C1_P), jnp.float32),   # conv1 accumulator
        pltpu.VMEM((F2, C1_P), jnp.float32),   # pooled conv1 = padded conv2 in
        pltpu.VMEM((F2, C2_P), jnp.float32),   # conv2 accumulator
        pltpu.VMEM((S4, C2_P), jnp.float32),   # pooled conv2 = fc input
    ]
    return kernel, scratch_shapes


# ---------------------------------------------------------------------------
# Parameter prep (one-time repack of PyTorch-layout weights)
# ---------------------------------------------------------------------------
def prepare_params(params, img_size):
    c1w, c1b = params["conv1_w"], params["conv1_b"]   # (16, Cin, 5, 5), (16,)
    c2w, c2b = params["conv2_w"], params["conv2_b"]   # (32, 16, 5, 5), (32,)
    fcw, fcb = params["fc_w"], params["fc_b"]         # (ncls, 32*H4*W4), (ncls,)

    co1, ci1 = c1w.shape[0], c1w.shape[1]
    co2, ci2 = c2w.shape[0], c2w.shape[1]
    ncls = fcw.shape[0]
    H4 = W4 = img_size // 4

    # conv weights -> per-tap (Cin_padded, Cout_padded) matrices, bf16
    w1 = jnp.transpose(c1w, (2, 3, 1, 0)).reshape(K * K, ci1, co1)
    w1 = jnp.pad(w1, ((0, 0), (0, CIN_P - ci1), (0, C1_P - co1)))
    w2 = jnp.transpose(c2w, (2, 3, 1, 0)).reshape(K * K, ci2, co2)
    w2 = jnp.pad(w2, ((0, 0), (0, C1_P - ci2), (0, C2_P - co2)))

    # fc weight: torch flattens NCHW as (c, h, w); kernel consumes (s=(h,w), c)
    wfc = fcw.reshape(ncls, co2, H4, W4).transpose(2, 3, 1, 0)     # (h,w,c,k)
    wfc = wfc.reshape(H4 * W4, co2, ncls)
    wfc = jnp.pad(wfc, ((0, 0), (0, C2_P - co2), (0, NC_P - ncls)))

    return {
        "w1": w1.astype(jnp.bfloat16),
        "b1": jnp.pad(c1b, (0, C1_P - co1)).reshape(1, C1_P).astype(jnp.float32),
        "w2": w2.astype(jnp.bfloat16),
        "b2": jnp.pad(c2b, (0, C2_P - co2)).reshape(1, C2_P).astype(jnp.float32),
        "wfc": wfc.astype(jnp.bfloat16),
        "bfc": jnp.pad(fcb, (0, NC_P - ncls)).reshape(1, NC_P).astype(jnp.float32),
    }


# ---------------------------------------------------------------------------
# Forward pass
# ---------------------------------------------------------------------------
@functools.partial(jax.jit, static_argnums=2)
def cnn_forward(x_nchw, prep, num_classes):
    N, C, H, W = x_nchw.shape
    F1 = (H + 2 * PAD) * (W + 2 * PAD)
    S4 = (H // 4) * (W // 4)
    kernel, scratch_shapes = _make_fused_kernel(H, W)

    # cheap layout prep of the raw input (no im2col amplification)
    x = jnp.transpose(x_nchw, (0, 2, 3, 1)).astype(jnp.float32)     # NHWC
    x = jnp.pad(x, ((0, 0), (PAD, PAD), (PAD, PAD), (0, CIN_P - C)))
    x1 = x.reshape(N, F1, CIN_P).astype(jnp.bfloat16)

    out = pl.pallas_call(
        kernel,
        out_shape=jax.ShapeDtypeStruct((N, 1, NC_P), jnp.float32),
        grid=(N,),
        in_specs=[
            pl.BlockSpec((None, F1, CIN_P), lambda n: (n, 0, 0)),
            pl.BlockSpec((K * K, CIN_P, C1_P), lambda n: (0, 0, 0)),
            pl.BlockSpec((1, C1_P), lambda n: (0, 0)),
            pl.BlockSpec((K * K, C1_P, C2_P), lambda n: (0, 0, 0)),
            pl.BlockSpec((1, C2_P), lambda n: (0, 0)),
            pl.BlockSpec((S4, C2_P, NC_P), lambda n: (0, 0, 0)),
            pl.BlockSpec((1, NC_P), lambda n: (0, 0)),
        ],
        out_specs=pl.BlockSpec((None, 1, NC_P), lambda n: (n, 0, 0)),
        scratch_shapes=scratch_shapes,
        compiler_params=pltpu.CompilerParams(
            dimension_semantics=("parallel",)),
    )(x1, prep["w1"], prep["b1"], prep["w2"], prep["b2"],
      prep["wfc"], prep["bfc"])
    return out[:, 0, :num_classes]


# ---------------------------------------------------------------------------
# Deterministic synthetic parameter init (shapes match nn.Module.__init__)
# ---------------------------------------------------------------------------
def init_params(key, img_channels=3, num_classes=10, img_size=16):
    flat = 32 * (img_size // 4) * (img_size // 4)
    k = jax.random.split(key, 6)
    scale = 0.05
    return {
        "conv1_w": scale * jax.random.normal(k[0], (16, img_channels, 5, 5), jnp.float32),
        "conv1_b": scale * jax.random.normal(k[1], (16,), jnp.float32),
        "conv2_w": scale * jax.random.normal(k[2], (32, 16, 5, 5), jnp.float32),
        "conv2_b": scale * jax.random.normal(k[3], (32,), jnp.float32),
        "fc_w":    scale * jax.random.normal(k[4], (num_classes, flat), jnp.float32),
        "fc_b":    scale * jax.random.normal(k[5], (num_classes,), jnp.float32),
    }


# Pure-JAX/XLA reference of the PyTorch module (for validation only)
def cnn_reference(x_nchw, params):
    hp = jax.lax.Precision.HIGHEST
    y = jax.lax.conv_general_dilated(
        x_nchw, params["conv1_w"], (1, 1), ((PAD, PAD), (PAD, PAD)),
        dimension_numbers=("NCHW", "OIHW", "NCHW"), precision=hp)
    y = jax.nn.relu(y + params["conv1_b"][None, :, None, None])
    y = jax.lax.reduce_window(y, -jnp.inf, jax.lax.max,
                              (1, 1, 2, 2), (1, 1, 2, 2), "VALID")
    y = jax.lax.conv_general_dilated(
        y, params["conv2_w"], (1, 1), ((PAD, PAD), (PAD, PAD)),
        dimension_numbers=("NCHW", "OIHW", "NCHW"), precision=hp)
    y = jax.nn.relu(y + params["conv2_b"][None, :, None, None])
    y = jax.lax.reduce_window(y, -jnp.inf, jax.lax.max,
                              (1, 1, 2, 2), (1, 1, 2, 2), "VALID")
    flat = y.reshape(y.shape[0], -1)
    return jnp.dot(flat, params["fc_w"].T, precision=hp) + params["fc_b"]


if __name__ == "__main__":
    key = jax.random.PRNGKey(0)
    k_param, k_input = jax.random.split(key)

    batch, img_channels, img_size, num_classes = 2, 3, 16, 10
    params = init_params(k_param, img_channels, num_classes, img_size)
    prep = prepare_params(params, img_size)
    x = jax.random.normal(k_input, (batch, img_channels, img_size, img_size),
                          jnp.float32)

    out = cnn_forward(x, prep, num_classes)
    out = jax.block_until_ready(out)
    assert out.shape == (batch, num_classes), out.shape
    assert bool(jnp.all(jnp.isfinite(out)))

    # numerical check vs. the XLA reference (bf16 matmuls -> loose tolerance)
    ref = cnn_reference(x, params)
    assert bool(jnp.allclose(out, ref, rtol=5e-2, atol=5e-2)), (
        float(jnp.max(jnp.abs(out - ref))))

    print("KERNEL_OK")
</pallas_src>

<mosaic_0001>
module attributes {stable_mosaic.version = 11 : i64} {
  func.func @kernel(%arg0: i32, %arg1: memref<1x400x16xbf16, #tpu.memory_space<vmem>>, %arg2: memref<25x16x128xbf16, #tpu.memory_space<vmem>>, %arg3: memref<1x128xf32, #tpu.memory_space<vmem>>, %arg4: memref<25x128x128xbf16, #tpu.memory_space<vmem>>, %arg5: memref<1x128xf32, #tpu.memory_space<vmem>>, %arg6: memref<16x128x128xbf16, #tpu.memory_space<vmem>>, %arg7: memref<1x128xf32, #tpu.memory_space<vmem>>, %arg8: memref<1x1x128xf32, #tpu.memory_space<vmem>>, %arg9: memref<400x128xf32, #tpu.memory_space<vmem>>, %arg10: memref<144x128xf32, #tpu.memory_space<vmem>>, %arg11: memref<144x128xf32, #tpu.memory_space<vmem>>, %arg12: memref<16x128xf32, #tpu.memory_space<vmem>>) attributes {dimension_semantics = [#tpu.dimension_semantics<parallel>], iteration_bounds = array<i64: 2>, scalar_prefetch = 0 : i64, scratch_operands = 4 : i64, tpu.core_type = #tpu.core_type<tc>, window_params = [{transform_indices = @transform_0, window_bounds = array<i64: 1, 400, 16>}, {pipeline_mode = #tpu.pipeline_mode<synchronous>, transform_indices = @transform_1, window_bounds = array<i64: 25, 16, 128>}, {pipeline_mode = #tpu.pipeline_mode<synchronous>, transform_indices = @transform_2, window_bounds = array<i64: 1, 128>}, {pipeline_mode = #tpu.pipeline_mode<synchronous>, transform_indices = @transform_3, window_bounds = array<i64: 25, 128, 128>}, {pipeline_mode = #tpu.pipeline_mode<synchronous>, transform_indices = @transform_4, window_bounds = array<i64: 1, 128>}, {pipeline_mode = #tpu.pipeline_mode<synchronous>, transform_indices = @transform_5, window_bounds = array<i64: 16, 128, 128>}, {pipeline_mode = #tpu.pipeline_mode<synchronous>, transform_indices = @transform_6, window_bounds = array<i64: 1, 128>}, {transform_indices = @transform_7, window_bounds = array<i64: 1, 1, 128>}]} {
    %c0 = arith.constant 0 : index
    %c0_0 = arith.constant 0 : index
    %c0_1 = arith.constant 0 : index
    %0 = vector.load %arg1[%c0, %c0_0, %c0_1] : memref<1x400x16xbf16, #tpu.memory_space<vmem>>, vector<1x316x16xbf16>
    %1 = vector.shape_cast %0 : vector<1x316x16xbf16> to vector<316x16xbf16>
    %c0_2 = arith.constant 0 : index
    %c0_3 = arith.constant 0 : index
    %c0_4 = arith.constant 0 : index
    %2 = vector.load %arg2[%c0_2, %c0_3, %c0_4] : memref<25x16x128xbf16, #tpu.memory_space<vmem>>, vector<1x16x128xbf16>
    %3 = vector.shape_cast %2 : vector<1x16x128xbf16> to vector<16x128xbf16>
    %cst = arith.constant dense<0.000000e+00> : vector<316x128xf32>
    %4 = tpu.matmul %1, %3, %cst {dimension_numbers = #tpu.dot_dimension_numbers<[1], [0], [0], [1], [0, 0, 1, 1], [], []>} : vector<316x16xbf16>, vector<16x128xbf16>, vector<316x128xf32> -> vector<316x128xf32>
    %c0_5 = arith.constant 0 : index
    %c1 = arith.constant 1 : index
    %c0_6 = arith.constant 0 : index
    %5 = vector.load %arg1[%c0_5, %c1, %c0_6] : memref<1x400x16xbf16, #tpu.memory_space<vmem>>, vector<1x316x16xbf16>
    %6 = vector.shape_cast %5 : vector<1x316x16xbf16> to vector<316x16xbf16>
    %c1_7 = arith.constant 1 : index
    %c0_8 = arith.constant 0 : index
    %c0_9 = arith.constant 0 : index
    %7 = vector.load %arg2[%c1_7, %c0_8, %c0_9] : memref<25x16x128xbf16, #tpu.memory_space<vmem>>, vector<1x16x128xbf16>
    %8 = vector.shape_cast %7 : vector<1x16x128xbf16> to vector<16x128xbf16>
    %cst_10 = arith.constant dense<0.000000e+00> : vector<316x128xf32>
    %9 = tpu.matmul %6, %8, %cst_10 {dimension_numbers = #tpu.dot_dimension_numbers<[1], [0], [0], [1], [0, 0, 1, 1], [], []>} : vector<316x16xbf16>, vector<16x128xbf16>, vector<316x128xf32> -> vector<316x128xf32>
    %10 = arith.addf %4, %9 : vector<316x128xf32>
    %c0_11 = arith.constant 0 : index
    %c2 = arith.constant 2 : index
    %c0_12 = arith.constant 0 : index
    %11 = vector.load %arg1[%c0_11, %c2, %c0_12] : memref<1x400x16xbf16, #tpu.memory_space<vmem>>, vector<1x316x16xbf16>
    %12 = vector.shape_cast %11 : vector<1x316x16xbf16> to vector<316x16xbf16>
    %c2_13 = arith.constant 2 : index
    %c0_14 = arith.constant 0 : index
    %c0_15 = arith.constant 0 : index
    %13 = vector.load %arg2[%c2_13, %c0_14, %c0_15] : memref<25x16x128xbf16, #tpu.memory_space<vmem>>, vector<1x16x128xbf16>
    %14 = vector.shape_cast %13 : vector<1x16x128xbf16> to vector<16x128xbf16>
    %cst_16 = arith.constant dense<0.000000e+00> : vector<316x128xf32>
    %15 = tpu.matmul %12, %14, %cst_16 {dimension_numbers = #tpu.dot_dimension_numbers<[1], [0], [0], [1], [0, 0, 1, 1], [], []>} : vector<316x16xbf16>, vector<16x128xbf16>, vector<316x128xf32> -> vector<316x128xf32>
    %16 = arith.addf %10, %15 : vector<316x128xf32>
    %c0_17 = arith.constant 0 : index
    %c3 = arith.constant 3 : index
    %c0_18 = arith.constant 0 : index
    %17 = vector.load %arg1[%c0_17, %c3, %c0_18] : memref<1x400x16xbf16, #tpu.memory_space<vmem>>, vector<1x316x16xbf16>
    %18 = vector.shape_cast %17 : vector<1x316x16xbf16> to vector<316x16xbf16>
    %c3_19 = arith.constant 3 : index
    %c0_20 = arith.constant 0 : index
    %c0_21 = arith.constant 0 : index
    %19 = vector.load %arg2[%c3_19, %c0_20, %c0_21] : memref<25x16x128xbf16, #tpu.memory_space<vmem>>, vector<1x16x128xbf16>
    %20 = vector.shape_cast %19 : vector<1x16x128xbf16> to vector<16x128xbf16>
    %cst_22 = arith.constant dense<0.000000e+00> : vector<316x128xf32>
    %21 = tpu.matmul %18, %20, %cst_22 {dimension_numbers = #tpu.dot_dimension_numbers<[1], [0], [0], [1], [0, 0, 1, 1], [], []>} : vector<316x16xbf16>, vector<16x128xbf16>, vector<316x128xf32> -> vector<316x128xf32>
    %22 = arith.addf %16, %21 : vector<316x128xf32>
    %c0_23 = arith.constant 0 : index
    %c4 = arith.constant 4 : index
    %c0_24 = arith.constant 0 : index
    %23 = vector.load %arg1[%c0_23, %c4, %c0_24] : memref<1x400x16xbf16, #tpu.memory_space<vmem>>, vector<1x316x16xbf16>
    %24 = vector.shape_cast %23 : vector<1x316x16xbf16> to vector<316x16xbf16>
    %c4_25 = arith.constant 4 : index
    %c0_26 = arith.constant 0 : index
    %c0_27 = arith.constant 0 : index
    %25 = vector.load %arg2[%c4_25, %c0_26, %c0_27] : memref<25x16x128xbf16, #tpu.memory_space<vmem>>, vector<1x16x128xbf16>
    %26 = vector.shape_cast %25 : vector<1x16x128xbf16> to vector<16x128xbf16>
    %cst_28 = arith.constant dense<0.000000e+00> : vector<316x128xf32>
    %27 = tpu.matmul %24, %26, %cst_28 {dimension_numbers = #tpu.dot_dimension_numbers<[1], [0], [0], [1], [0, 0, 1, 1], [], []>} : vector<316x16xbf16>, vector<16x128xbf16>, vector<316x128xf32> -> vector<316x128xf32>
    %28 = arith.addf %22, %27 : vector<316x128xf32>
    %c42 = arith.constant 42 : index
    %c0_29 = arith.constant 0 : index
    %29 = vector.load %arg9[%c42, %c0_29] : memref<400x128xf32, #tpu.memory_space<vmem>>, vector<316x128xf32>
    tpu.vector_store %arg9[%c42, %c0_29], %28 {strides = array<i32>} : memref<400x128xf32, #tpu.memory_space<vmem>>, vector<316x128xf32>,
    %c0_30 = arith.constant 0 : index
    %c20 = arith.constant 20 : index
    %c0_31 = arith.constant 0 : index
    %30 = vector.load %arg1[%c0_30, %c20, %c0_31] : memref<1x400x16xbf16, #tpu.memory_space<vmem>>, vector<1x316x16xbf16>
    %31 = vector.shape_cast %30 : vector<1x316x16xbf16> to vector<316x16xbf16>
    %c5 = arith.constant 5 : index
    %c0_32 = arith.constant 0 : index
    %c0_33 = arith.constant 0 : index
    %32 = vector.load %arg2[%c5, %c0_32, %c0_33] : memref<25x16x128xbf16, #tpu.memory_space<vmem>>, vector<1x16x128xbf16>
    %33 = vector.shape_cast %32 : vector<1x16x128xbf16> to vector<16x128xbf16>
    %cst_34 = arith.constant dense<0.000000e+00> : vector<316x128xf32>
    %34 = tpu.matmul %31, %33, %cst_34 {dimension_numbers = #tpu.dot_dimension_numbers<[1], [0], [0], [1], [0, 0, 1, 1], [], []>} : vector<316x16xbf16>, vector<16x128xbf16>, vector<316x128xf32> -> vector<316x128xf32>
    %c0_35 = arith.constant 0 : index
    %c21 = arith.constant 21 : index
    %c0_36 = arith.constant 0 : index
    %35 = vector.load %arg1[%c0_35, %c21, %c0_36] : memref<1x400x16xbf16, #tpu.memory_space<vmem>>, vector<1x316x16xbf16>
    %36 = vector.shape_cast %35 : vector<1x316x16xbf16> to vector<316x16xbf16>
    %c6 = arith.constant 6 : index
    %c0_37 = arith.constant 0 : index
    %c0_38 = arith.constant 0 : index
    %37 = vector.load %arg2[%c6, %c0_37, %c0_38] : memref<25x16x128xbf16, #tpu.memory_space<vmem>>, vector<1x16x128xbf16>
    %38 = vector.shape_cast %37 : vector<1x16x128xbf16> to vector<16x128xbf16>
    %cst_39 = arith.constant dense<0.000000e+00> : vector<316x128xf32>
    %39 = tpu.matmul %36, %38, %cst_39 {dimension_numbers = #tpu.dot_dimension_numbers<[1], [0], [0], [1], [0, 0, 1, 1], [], []>} : vector<316x16xbf16>, vector<16x128xbf16>, vector<316x128xf32> -> vector<316x128xf32>
    %40 = arith.addf %34, %39 : vector<316x128xf32>
    %c0_40 = arith.constant 0 : index
    %c22 = arith.constant 22 : index
    %c0_41 = arith.constant 0 : index
    %41 = vector.load %arg1[%c0_40, %c22, %c0_41] : memref<1x400x16xbf16, #tpu.memory_space<vmem>>, vector<1x316x16xbf16>
    %42 = vector.shape_cast %41 : vector<1x316x16xbf16> to vector<316x16xbf16>
    %c7 = arith.constant 7 : index
    %c0_42 = arith.constant 0 : index
    %c0_43 = arith.constant 0 : index
    %43 = vector.load %arg2[%c7, %c0_42, %c0_43] : memref<25x16x128xbf16, #tpu.memory_space<vmem>>, vector<1x16x128xbf16>
    %44 = vector.shape_cast %43 : vector<1x16x128xbf16> to vector<16x128xbf16>
    %cst_44 = arith.constant dense<0.000000e+00> : vector<316x128xf32>
    %45 = tpu.matmul %42, %44, %cst_44 {dimension_numbers = #tpu.dot_dimension_numbers<[1], [0], [0], [1], [0, 0, 1, 1], [], []>} : vector<316x16xbf16>, vector<16x128xbf16>, vector<316x128xf32> -> vector<316x128xf32>
    %46 = arith.addf %40, %45 : vector<316x128xf32>
    %c0_45 = arith.constant 0 : index
    %c23 = arith.constant 23 : index
    %c0_46 = arith.constant 0 : index
    %47 = vector.load %arg1[%c0_45, %c23, %c0_46] : memref<1x400x16xbf16, #tpu.memory_space<vmem>>, vector<1x316x16xbf16>
    %48 = vector.shape_cast %47 : vector<1x316x16xbf16> to vector<316x16xbf16>
    %c8 = arith.constant 8 : index
    %c0_47 = arith.constant 0 : index
    %c0_48 = arith.constant 0 : index
    %49 = vector.load %arg2[%c8, %c0_47, %c0_48] : memref<25x16x128xbf16, #tpu.memory_space<vmem>>, vector<1x16x128xbf16>
    %50 = vector.shape_cast %49 : vector<1x16x128xbf16> to vector<16x128xbf16>
    %cst_49 = arith.constant dense<0.000000e+00> : vector<316x128xf32>
    %51 = tpu.matmul %48, %50, %cst_49 {dimension_numbers = #tpu.dot_dimension_numbers<[1], [0], [0], [1], [0, 0, 1, 1], [], []>} : vector<316x16xbf16>, vector<16x128xbf16>, vector<316x128xf32> -> vector<316x128xf32>
    %52 = arith.addf %46, %51 : vector<316x128xf32>
    %c0_50 = arith.constant 0 : index
    %c24 = arith.constant 24 : index
    %c0_51 = arith.constant 0 : index
    %53 = vector.load %arg1[%c0_50, %c24, %c0_51] : memref<1x400x16xbf16, #tpu.memory_space<vmem>>, vector<1x316x16xbf16>
    %54 = vector.shape_cast %53 : vector<1x316x16xbf16> to vector<316x16xbf16>
    %c9 = arith.constant 9 : index
    %c0_52 = arith.constant 0 : index
    %c0_53 = arith.constant 0 : index
    %55 = vector.load %arg2[%c9, %c0_52, %c0_53] : memref<25x16x128xbf16, #tpu.memory_space<vmem>>, vector<1x16x128xbf16>
    %56 = vector.shape_cast %55 : vector<1x16x128xbf16> to vector<16x128xbf16>
    %cst_54 = arith.constant dense<0.000000e+00> : vector<316x128xf32>
    %57 = tpu.matmul %54, %56, %cst_54 {dimension_numbers = #tpu.dot_dimension_numbers<[1], [0], [0], [1], [0, 0, 1, 1], [], []>} : vector<316x16xbf16>, vector<16x128xbf16>, vector<316x128xf32> -> vector<316x128xf32>
    %58 = arith.addf %52, %57 : vector<316x128xf32>
    %c42_55 = arith.constant 42 : index
    %c0_56 = arith.constant 0 : index
    %59 = vector.load %arg9[%c42_55, %c0_56] : memref<400x128xf32, #tpu.memory_space<vmem>>, vector<316x128xf32>
    %60 = arith.addf %59, %58 : vector<316x128xf32>
    %c42_57 = arith.constant 42 : index
    %c0_58 = arith.constant 0 : index
    %61 = vector.load %arg9[%c42_57, %c0_58] : memref<400x128xf32, #tpu.memory_space<vmem>>, vector<316x128xf32>
    tpu.vector_store %arg9[%c42_57, %c0_58], %60 {strides = array<i32>} : memref<400x128xf32, #tpu.memory_space<vmem>>, vector<316x128xf32>,
    %c0_59 = arith.constant 0 : index
    %c40 = arith.constant 40 : index
    %c0_60 = arith.constant 0 : index
    %62 = vector.load %arg1[%c0_59, %c40, %c0_60] : memref<1x400x16xbf16, #tpu.memory_space<vmem>>, vector<1x316x16xbf16>
    %63 = vector.shape_cast %62 : vector<1x316x16xbf16> to vector<316x16xbf16>
    %c10 = arith.constant 10 : index
    %c0_61 = arith.constant 0 : index
    %c0_62 = arith.constant 0 : index
    %64 = vector.load %arg2[%c10, %c0_61, %c0_62] : memref<25x16x128xbf16, #tpu.memory_space<vmem>>, vector<1x16x128xbf16>
    %65 = vector.shape_cast %64 : vector<1x16x128xbf16> to vector<16x128xbf16>
    %cst_63 = arith.constant dense<0.000000e+00> : vector<316x128xf32>
    %66 = tpu.matmul %63, %65, %cst_63 {dimension_numbers = #tpu.dot_dimension_numbers<[1], [0], [0], [1], [0, 0, 1, 1], [], []>} : vector<316x16xbf16>, vector<16x128xbf16>, vector<316x128xf32> -> vector<316x128xf32>
    %c0_64 = arith.constant 0 : index
    %c41 = arith.constant 41 : index
    %c0_65 = arith.constant 0 : index
    %67 = vector.load %arg1[%c0_64, %c41, %c0_65] : memref<1x400x16xbf16, #tpu.memory_space<vmem>>, vector<1x316x16xbf16>
    %68 = vector.shape_cast %67 : vector<1x316x16xbf16> to vector<316x16xbf16>
    %c11 = arith.constant 11 : index
    %c0_66 = arith.constant 0 : index
    %c0_67 = arith.constant 0 : index
    %69 = vector.load %arg2[%c11, %c0_66, %c0_67] : memref<25x16x128xbf16, #tpu.memory_space<vmem>>, vector<1x16x128xbf16>
    %70 = vector.shape_cast %69 : vector<1x16x128xbf16> to vector<16x128xbf16>
    %cst_68 = arith.constant dense<0.000000e+00> : vector<316x128xf32>
    %71 = tpu.matmul %68, %70, %cst_68 {dimension_numbers = #tpu.dot_dimension_numbers<[1], [0], [0], [1], [0, 0, 1, 1], [], []>} : vector<316x16xbf16>, vector<16x128xbf16>, vector<316x128xf32> -> vector<316x128xf32>
    %72 = arith.addf %66, %71 : vector<316x128xf32>
    %c0_69 = arith.constant 0 : index
    %c42_70 = arith.constant 42 : index
    %c0_71 = arith.constant 0 : index
    %73 = vector.load %arg1[%c0_69, %c42_70, %c0_71] : memref<1x400x16xbf16, #tpu.memory_space<vmem>>, vector<1x316x16xbf16>
    %74 = vector.shape_cast %73 : vector<1x316x16xbf16> to vector<316x16xbf16>
    %c12 = arith.constant 12 : index
    %c0_72 = arith.constant 0 : index
    %c0_73 = arith.constant 0 : index
    %75 = vector.load %arg2[%c12, %c0_72, %c0_73] : memref<25x16x128xbf16, #tpu.memory_space<vmem>>, vector<1x16x128xbf16>
    %76 = vector.shape_cast %75 : vector<1x16x128xbf16> to vector<16x128xbf16>
    %cst_74 = arith.constant dense<0.000000e+00> : vector<316x128xf32>
    %77 = tpu.matmul %74, %76, %cst_74 {dimension_numbers = #tpu.dot_dimension_numbers<[1], [0], [0], [1], [0, 0, 1, 1], [], []>} : vector<316x16xbf16>, vector<16x128xbf16>, vector<316x128xf32> -> vector<316x128xf32>
    %78 = arith.addf %72, %77 : vector<316x128xf32>
    %c0_75 = arith.constant 0 : index
    %c43 = arith.constant 43 : index
    %c0_76 = arith.constant 0 : index
    %79 = vector.load %arg1[%c0_75, %c43, %c0_76] : memref<1x400x16xbf16, #tpu.memory_space<vmem>>, vector<1x316x16xbf16>
    %80 = vector.shape_cast %79 : vector<1x316x16xbf16> to vector<316x16xbf16>
    %c13 = arith.constant 13 : index
    %c0_77 = arith.constant 0 : index
    %c0_78 = arith.constant 0 : index
    %81 = vector.load %arg2[%c13, %c0_77, %c0_78] : memref<25x16x128xbf16, #tpu.memory_space<vmem>>, vector<1x16x128xbf16>
    %82 = vector.shape_cast %81 : vector<1x16x128xbf16> to vector<16x128xbf16>
    %cst_79 = arith.constant dense<0.000000e+00> : vector<316x128xf32>
    %83 = tpu.matmul %80, %82, %cst_79 {dimension_numbers = #tpu.dot_dimension_numbers<[1], [0], [0], [1], [0, 0, 1, 1], [], []>} : vector<316x16xbf16>, vector<16x128xbf16>, vector<316x128xf32> -> vector<316x128xf32>
    %84 = arith.addf %78, %83 : vector<316x128xf32>
    %c0_80 = arith.constant 0 : index
    %c44 = arith.constant 44 : index
    %c0_81 = arith.constant 0 : index
    %85 = vector.load %arg1[%c0_80, %c44, %c0_81] : memref<1x400x16xbf16, #tpu.memory_space<vmem>>, vector<1x316x16xbf16>
    %86 = vector.shape_cast %85 : vector<1x316x16xbf16> to vector<316x16xbf16>
    %c14 = arith.constant 14 : index
    %c0_82 = arith.constant 0 : index
    %c0_83 = arith.constant 0 : index
    %87 = vector.load %arg2[%c14, %c0_82, %c0_83] : memref<25x16x128xbf16, #tpu.memory_space<vmem>>, vector<1x16x128xbf16>
    %88 = vector.shape_cast %87 : vector<1x16x128xbf16> to vector<16x128xbf16>
    %cst_84 = arith.constant dense<0.000000e+00> : vector<316x128xf32>
    %89 = tpu.matmul %86, %88, %cst_84 {dimension_numbers = #tpu.dot_dimension_numbers<[1], [0], [0], [1], [0, 0, 1, 1], [], []>} : vector<316x16xbf16>, vector<16x128xbf16>, vector<316x128xf32> -> vector<316x128xf32>
    %90 = arith.addf %84, %89 : vector<316x128xf32>
    %c42_85 = arith.constant 42 : index
    %c0_86 = arith.constant 0 : index
    %91 = vector.load %arg9[%c42_85, %c0_86] : memref<400x128xf32, #tpu.memory_space<vmem>>, vector<316x128xf32>
    %92 = arith.addf %91, %90 : vector<316x128xf32>
    %c42_87 = arith.constant 42 : index
    %c0_88 = arith.constant 0 : index
    %93 = vector.load %arg9[%c42_87, %c0_88] : memref<400x128xf32, #tpu.memory_space<vmem>>, vector<316x128xf32>
    tpu.vector_store %arg9[%c42_87, %c0_88], %92 {strides = array<i32>} : memref<400x128xf32, #tpu.memory_space<vmem>>, vector<316x128xf32>,
    %c0_89 = arith.constant 0 : index
    %c60 = arith.constant 60 : index
    %c0_90 = arith.constant 0 : index
    %94 = vector.load %arg1[%c0_89, %c60, %c0_90] : memref<1x400x16xbf16, #tpu.memory_space<vmem>>, vector<1x316x16xbf16>
    %95 = vector.shape_cast %94 : vector<1x316x16xbf16> to vector<316x16xbf16>
    %c15 = arith.constant 15 : index
    %c0_91 = arith.constant 0 : index
    %c0_92 = arith.constant 0 : index
    %96 = vector.load %arg2[%c15, %c0_91, %c0_92] : memref<25x16x128xbf16, #tpu.memory_space<vmem>>, vector<1x16x128xbf16>
    %97 = vector.shape_cast %96 : vector<1x16x128xbf16> to vector<16x128xbf16>
    %cst_93 = arith.constant dense<0.000000e+00> : vector<316x128xf32>
    %98 = tpu.matmul %95, %97, %cst_93 {dimension_numbers = #tpu.dot_dimension_numbers<[1], [0], [0], [1], [0, 0, 1, 1], [], []>} : vector<316x16xbf16>, vector<16x128xbf16>, vector<316x128xf32> -> vector<316x128xf32>
    %c0_94 = arith.constant 0 : index
    %c61 = arith.constant 61 : index
    %c0_95 = arith.constant 0 : index
    %99 = vector.load %arg1[%c0_94, %c61, %c0_95] : memref<1x400x16xbf16, #tpu.memory_space<vmem>>, vector<1x316x16xbf16>
    %100 = vector.shape_cast %99 : vector<1x316x16xbf16> to vector<316x16xbf16>
    %c16 = arith.constant 16 : index
    %c0_96 = arith.constant 0 : index
    %c0_97 = arith.constant 0 : index
    %101 = vector.load %arg2[%c16, %c0_96, %c0_97] : memref<25x16x128xbf16, #tpu.memory_space<vmem>>, vector<1x16x128xbf16>
    %102 = vector.shape_cast %101 : vector<1x16x128xbf16> to vector<16x128xbf16>
    %cst_98 = arith.constant dense<0.000000e+00> : vector<316x128xf32>
    %103 = tpu.matmul %100, %102, %cst_98 {dimension_numbers = #tpu.dot_dimension_numbers<[1], [0], [0], [1], [0, 0, 1, 1], [], []>} : vector<316x16xbf16>, vector<16x128xbf16>, vector<316x128xf32> -> vector<316x128xf32>
    %104 = arith.addf %98, %103 : vector<316x128xf32>
    %c0_99 = arith.constant 0 : index
    %c62 = arith.constant 62 : index
    %c0_100 = arith.constant 0 : index
    %105 = vector.load %arg1[%c0_99, %c62, %c0_100] : memref<1x400x16xbf16, #tpu.memory_space<vmem>>, vector<1x316x16xbf16>
    %106 = vector.shape_cast %105 : vector<1x316x16xbf16> to vector<316x16xbf16>
    %c17 = arith.constant 17 : index
    %c0_101 = arith.constant 0 : index
    %c0_102 = arith.constant 0 : index
    %107 = vector.load %arg2[%c17, %c0_101, %c0_102] : memref<25x16x128xbf16, #tpu.memory_space<vmem>>, vector<1x16x128xbf16>
    %108 = vector.shape_cast %107 : vector<1x16x128xbf16> to vector<16x128xbf16>
    %cst_103 = arith.constant dense<0.000000e+00> : vector<316x128xf32>
    %109 = tpu.matmul %106, %108, %cst_103 {dimension_numbers = #tpu.dot_dimension_numbers<[1], [0], [0], [1], [0, 0, 1, 1], [], []>} : vector<316x16xbf16>, vector<16x128xbf16>, vector<316x128xf32> -> vector<316x128xf32>
    %110 = arith.addf %104, %109 : vector<316x128xf32>
    %c0_104 = arith.constant 0 : index
    %c63 = arith.constant 63 : index
    %c0_105 = arith.constant 0 : index
    %111 = vector.load %arg1[%c0_104, %c63, %c0_105] : memref<1x400x16xbf16, #tpu.memory_space<vmem>>, vector<1x316x16xbf16>
    %112 = vector.shape_cast %111 : vector<1x316x16xbf16> to vector<316x16xbf16>
    %c18 = arith.constant 18 : index
    %c0_106 = arith.constant 0 : index
    %c0_107 = arith.constant 0 : index
    %113 = vector.load %arg2[%c18, %c0_106, %c0_107] : memref<25x16x128xbf16, #tpu.memory_space<vmem>>, vector<1x16x128xbf16>
    %114 = vector.shape_cast %113 : vector<1x16x128xbf16> to vector<16x128xbf16>
    %cst_108 = arith.constant dense<0.000000e+00> : vector<316x128xf32>
    %115 = tpu.matmul %112, %114, %cst_108 {dimension_numbers = #tpu.dot_dimension_numbers<[1], [0], [0], [1], [0, 0, 1, 1], [], []>} : vector<316x16xbf16>, vector<16x128xbf16>, vector<316x128xf32> -> vector<316x128xf32>
    %116 = arith.addf %110, %115 : vector<316x128xf32>
    %c0_109 = arith.constant 0 : index
    %c64 = arith.constant 64 : index
    %c0_110 = arith.constant 0 : index
    %117 = vector.load %arg1[%c0_109, %c64, %c0_110] : memref<1x400x16xbf16, #tpu.memory_space<vmem>>, vector<1x316x16xbf16>
    %118 = vector.shape_cast %117 : vector<1x316x16xbf16> to vector<316x16xbf16>
    %c19 = arith.constant 19 : index
    %c0_111 = arith.constant 0 : index
    %c0_112 = arith.constant 0 : index
    %119 = vector.load %arg2[%c19, %c0_111, %c0_112] : memref<25x16x128xbf16, #tpu.memory_space<vmem>>, vector<1x16x128xbf16>
    %120 = vector.shape_cast %119 : vector<1x16x128xbf16> to vector<16x128xbf16>
    %cst_113 = arith.constant dense<0.000000e+00> : vector<316x128xf32>
    %121 = tpu.matmul %118, %120, %cst_113 {dimension_numbers = #tpu.dot_dimension_numbers<[1], [0], [0], [1], [0, 0, 1, 1], [], []>} : vector<316x16xbf16>, vector<16x128xbf16>, vector<316x128xf32> -> vector<316x128xf32>
    %122 = arith.addf %116, %121 : vector<316x128xf32>
    %c42_114 = arith.constant 42 : index
    %c0_115 = arith.constant 0 : index
    %123 = vector.load %arg9[%c42_114, %c0_115] : memref<400x128xf32, #tpu.memory_space<vmem>>, vector<316x128xf32>
    %124 = arith.addf %123, %122 : vector<316x128xf32>
    %c42_116 = arith.constant 42 : index
    %c0_117 = arith.constant 0 : index
    %125 = vector.load %arg9[%c42_116, %c0_117] : memref<400x128xf32, #tpu.memory_space<vmem>>, vector<316x128xf32>
    tpu.vector_store %arg9[%c42_116, %c0_117], %124 {strides = array<i32>} : memref<400x128xf32, #tpu.memory_space<vmem>>, vector<316x128xf32>,
    %c0_118 = arith.constant 0 : index
    %c80 = arith.constant 80 : index
    %c0_119 = arith.constant 0 : index
    %126 = vector.load %arg1[%c0_118, %c80, %c0_119] : memref<1x400x16xbf16, #tpu.memory_space<vmem>>, vector<1x316x16xbf16>
    %127 = vector.shape_cast %126 : vector<1x316x16xbf16> to vector<316x16xbf16>
    %c20_120 = arith.constant 20 : index
    %c0_121 = arith.constant 0 : index
    %c0_122 = arith.constant 0 : index
    %128 = vector.load %arg2[%c20_120, %c0_121, %c0_122] : memref<25x16x128xbf16, #tpu.memory_space<vmem>>, vector<1x16x128xbf16>
    %129 = vector.shape_cast %128 : vector<1x16x128xbf16> to vector<16x128xbf16>
    %cst_123 = arith.constant dense<0.000000e+00> : vector<316x128xf32>
    %130 = tpu.matmul %127, %129, %cst_123 {dimension_numbers = #tpu.dot_dimension_numbers<[1], [0], [0], [1], [0, 0, 1, 1], [], []>} : vector<316x16xbf16>, vector<16x128xbf16>, vector<316x128xf32> -> vector<316x128xf32>
    %c0_124 = arith.constant 0 : index
    %c81 = arith.constant 81 : index
    %c0_125 = arith.constant 0 : index
    %131 = vector.load %arg1[%c0_124, %c81, %c0_125] : memref<1x400x16xbf16, #tpu.memory_space<vmem>>, vector<1x316x16xbf16>
    %132 = vector.shape_cast %131 : vector<1x316x16xbf16> to vector<316x16xbf16>
    %c21_126 = arith.constant 21 : index
    %c0_127 = arith.constant 0 : index
    %c0_128 = arith.constant 0 : index
    %133 = vector.load %arg2[%c21_126, %c0_127, %c0_128] : memref<25x16x128xbf16, #tpu.memory_space<vmem>>, vector<1x16x128xbf16>
    %134 = vector.shape_cast %133 : vector<1x16x128xbf16> to vector<16x128xbf16>
    %cst_129 = arith.constant dense<0.000000e+00> : vector<316x128xf32>
    %135 = tpu.matmul %132, %134, %cst_129 {dimension_numbers = #tpu.dot_dimension_numbers<[1], [0], [0], [1], [0, 0, 1, 1], [], []>} : vector<316x16xbf16>, vector<16x128xbf16>, vector<316x128xf32> -> vector<316x128xf32>
    %136 = arith.addf %130, %135 : vector<316x128xf32>
    %c0_130 = arith.constant 0 : index
    %c82 = arith.constant 82 : index
    %c0_131 = arith.constant 0 : index
    %137 = vector.load %arg1[%c0_130, %c82, %c0_131] : memref<1x400x16xbf16, #tpu.memory_space<vmem>>, vector<1x316x16xbf16>
    %138 = vector.shape_cast %137 : vector<1x316x16xbf16> to vector<316x16xbf16>
    %c22_132 = arith.constant 22 : index
    %c0_133 = arith.constant 0 : index
    %c0_134 = arith.constant 0 : index
    %139 = vector.load %arg2[%c22_132, %c0_133, %c0_134] : memref<25x16x128xbf16, #tpu.memory_space<vmem>>, vector<1x16x128xbf16>
    %140 = vector.shape_cast %139 : vector<1x16x128xbf16> to vector<16x128xbf16>
    %cst_135 = arith.constant dense<0.000000e+00> : vector<316x128xf32>
    %141 = tpu.matmul %138, %140, %cst_135 {dimension_numbers = #tpu.dot_dimension_numbers<[1], [0], [0], [1], [0, 0, 1, 1], [], []>} : vector<316x16xbf16>, vector<16x128xbf16>, vector<316x128xf32> -> vector<316x128xf32>
    %142 = arith.addf %136, %141 : vector<316x128xf32>
    %c0_136 = arith.constant 0 : index
    %c83 = arith.constant 83 : index
    %c0_137 = arith.constant 0 : index
    %143 = vector.load %arg1[%c0_136, %c83, %c0_137] : memref<1x400x16xbf16, #tpu.memory_space<vmem>>, vector<1x316x16xbf16>
    %144 = vector.shape_cast %143 : vector<1x316x16xbf16> to vector<316x16xbf16>
    %c23_138 = arith.constant 23 : index
    %c0_139 = arith.constant 0 : index
    %c0_140 = arith.constant 0 : index
    %145 = vector.load %arg2[%c23_138, %c0_139, %c0_140] : memref<25x16x128xbf16, #tpu.memory_space<vmem>>, vector<1x16x128xbf16>
    %146 = vector.shape_cast %145 : vector<1x16x128xbf16> to vector<16x128xbf16>
    %cst_141 = arith.constant dense<0.000000e+00> : vector<316x128xf32>
    %147 = tpu.matmul %144, %146, %cst_141 {dimension_numbers = #tpu.dot_dimension_numbers<[1], [0], [0], [1], [0, 0, 1, 1], [], []>} : vector<316x16xbf16>, vector<16x128xbf16>, vector<316x128xf32> -> vector<316x128xf32>
    %148 = arith.addf %142, %147 : vector<316x128xf32>
    %c0_142 = arith.constant 0 : index
    %c84 = arith.constant 84 : index
    %c0_143 = arith.constant 0 : index
    %149 = vector.load %arg1[%c0_142, %c84, %c0_143] : memref<1x400x16xbf16, #tpu.memory_space<vmem>>, vector<1x316x16xbf16>
    %150 = vector.shape_cast %149 : vector<1x316x16xbf16> to vector<316x16xbf16>
    %c24_144 = arith.constant 24 : index
    %c0_145 = arith.constant 0 : index
    %c0_146 = arith.constant 0 : index
    %151 = vector.load %arg2[%c24_144, %c0_145, %c0_146] : memref<25x16x128xbf16, #tpu.memory_space<vmem>>, vector<1x16x128xbf16>
    %152 = vector.shape_cast %151 : vector<1x16x128xbf16> to vector<16x128xbf16>
    %cst_147 = arith.constant dense<0.000000e+00> : vector<316x128xf32>
    %153 = tpu.matmul %150, %152, %cst_147 {dimension_numbers = #tpu.dot_dimension_numbers<[1], [0], [0], [1], [0, 0, 1, 1], [], []>} : vector<316x16xbf16>, vector<16x128xbf16>, vector<316x128xf32> -> vector<316x128xf32>
    %154 = arith.addf %148, %153 : vector<316x128xf32>
    %c42_148 = arith.constant 42 : index
    %c0_149 = arith.constant 0 : index
    %155 = vector.load %arg9[%c42_148, %c0_149] : memref<400x128xf32, #tpu.memory_space<vmem>>, vector<316x128xf32>
    %156 = arith.addf %155, %154 : vector<316x128xf32>
    %c42_150 = arith.constant 42 : index
    %c0_151 = arith.constant 0 : index
    %157 = vector.load %arg9[%c42_150, %c0_151] : memref<400x128xf32, #tpu.memory_space<vmem>>, vector<316x128xf32>
    tpu.vector_store %arg9[%c42_150, %c0_151], %156 {strides = array<i32>} : memref<400x128xf32, #tpu.memory_space<vmem>>, vector<316x128xf32>,
    %cst_152 = arith.constant 0.000000e+00 : f32
    %158 = vector.broadcast %cst_152 : f32 to vector<144x128xf32>
    %c0_153 = arith.constant 0 : index
    %c0_154 = arith.constant 0 : index
    %159 = vector.load %arg10[%c0_153, %c0_154] : memref<144x128xf32, #tpu.memory_space<vmem>>, vector<144x128xf32>
    tpu.vector_store %arg10[%c0_153, %c0_154], %158 {strides = array<i32>} : memref<144x128xf32, #tpu.memory_space<vmem>>, vector<144x128xf32>,
    %c0_155 = arith.constant 0 : index
    %c0_156 = arith.constant 0 : index
    %160 = vector.load %arg3[%c0_155, %c0_156] : memref<1x128xf32, #tpu.memory_space<vmem>>, vector<1x128xf32>
    %c42_157 = arith.constant 42 : index
    %c0_158 = arith.constant 0 : index
    %161 = tpu.strided_load %arg9[%c42_157, %c0_158] {strides = array<i32: 2, 1>} : memref<400x128xf32, #tpu.memory_space<vmem>>, vector<8x128xf32>
    %c43_159 = arith.constant 43 : index
    %c0_160 = arith.constant 0 : index
    %162 = tpu.strided_load %arg9[%c43_159, %c0_160] {strides = array<i32: 2, 1>} : memref<400x128xf32, #tpu.memory_space<vmem>>, vector<8x128xf32>
    %c62_161 = arith.constant 62 : index
    %c0_162 = arith.constant 0 : index
    %163 = tpu.strided_load %arg9[%c62_161, %c0_162] {strides = array<i32: 2, 1>} : memref<400x128xf32, #tpu.memory_space<vmem>>, vector<8x128xf32>
    %c63_163 = arith.constant 63 : index
    %c0_164 = arith.constant 0 : index
    %164 = tpu.strided_load %arg9[%c63_163, %c0_164] {strides = array<i32: 2, 1>} : memref<400x128xf32, #tpu.memory_space<vmem>>, vector<8x128xf32>
    %165 = arith.maximumf %161, %162 : vector<8x128xf32>
    %166 = arith.maximumf %163, %164 : vector<8x128xf32>
    %167 = arith.maximumf %165, %166 : vector<8x128xf32>
    %168 = vector.broadcast %160 : vector<1x128xf32> to vector<8x128xf32>
    %169 = arith.addf %167, %168 : vector<8x128xf32>
    %cst_165 = arith.constant 0.000000e+00 : f32
    %170 = vector.broadcast %cst_165 : f32 to vector<8x128xf32>
    %171 = arith.maximumf %169, %170 : vector<8x128xf32>
    %c26 = arith.constant 26 : index
    %c0_166 = arith.constant 0 : index
    %172 = vector.load %arg10[%c26, %c0_166] : memref<144x128xf32, #tpu.memory_space<vmem>>, vector<8x128xf32>
    tpu.vector_store %arg10[%c26, %c0_166], %171 {strides = array<i32>} : memref<144x128xf32, #tpu.memory_space<vmem>>, vector<8x128xf32>,
    %c82_167 = arith.constant 82 : index
    %c0_168 = arith.constant 0 : index
    %173 = tpu.strided_load %arg9[%c82_167, %c0_168] {strides = array<i32: 2, 1>} : memref<400x128xf32, #tpu.memory_space<vmem>>, vector<8x128xf32>
    %c83_169 = arith.constant 83 : index
    %c0_170 = arith.constant 0 : index
    %174 = tpu.strided_load %arg9[%c83_169, %c0_170] {strides = array<i32: 2, 1>} : memref<400x128xf32, #tpu.memory_space<vmem>>, vector<8x128xf32>
    %c102 = arith.constant 102 : index
    %c0_171 = arith.constant 0 : index
    %175 = tpu.strided_load %arg9[%c102, %c0_171] {strides = array<i32: 2, 1>} : memref<400x128xf32, #tpu.memory_space<vmem>>, vector<8x128xf32>
    %c103 = arith.constant 103 : index
    %c0_172 = arith.constant 0 : index
    %176 = tpu.strided_load %arg9[%c103, %c0_172] {strides = array<i32: 2, 1>} : memref<400x128xf32, #tpu.memory_space<vmem>>, vector<8x128xf32>
    %177 = arith.maximumf %173, %174 : vector<8x128xf32>
    %178 = arith.maximumf %175, %176 : vector<8x128xf32>
    %179 = arith.maximumf %177, %178 : vector<8x128xf32>
    %180 = vector.broadcast %160 : vector<1x128xf32> to vector<8x128xf32>
    %181 = arith.addf %179, %180 : vector<8x128xf32>
    %cst_173 = arith.constant 0.000000e+00 : f32
    %182 = vector.broadcast %cst_173 : f32 to vector<8x128xf32>
    %183 = arith.maximumf %181, %182 : vector<8x128xf32>
    %c38 = arith.constant 38 : index
    %c0_174 = arith.constant 0 : index
    %184 = vector.load %arg10[%c38, %c0_174] : memref<144x128xf32, #tpu.memory_space<vmem>>, vector<8x128xf32>
    tpu.vector_store %arg10[%c38, %c0_174], %183 {strides = array<i32>} : memref<144x128xf32, #tpu.memory_space<vmem>>, vector<8x128xf32>,
    %c122 = arith.constant 122 : index
    %c0_175 = arith.constant 0 : index
    %185 = tpu.strided_load %arg9[%c122, %c0_175] {strides = array<i32: 2, 1>} : memref<400x128xf32, #tpu.memory_space<vmem>>, vector<8x128xf32>
    %c123 = arith.constant 123 : index
    %c0_176 = arith.constant 0 : index
    %186 = tpu.strided_load %arg9[%c123, %c0_176] {strides = array<i32: 2, 1>} : memref<400x128xf32, #tpu.memory_space<vmem>>, vector<8x128xf32>
    %c142 = arith.constant 142 : index
    %c0_177 = arith.constant 0 : index
    %187 = tpu.strided_load %arg9[%c142, %c0_177] {strides = array<i32: 2, 1>} : memref<400x128xf32, #tpu.memory_space<vmem>>, vector<8x128xf32>
    %c143 = arith.constant 143 : index
    %c0_178 = arith.constant 0 : index
    %188 = tpu.strided_load %arg9[%c143, %c0_178] {strides = array<i32: 2, 1>} : memref<400x128xf32, #tpu.memory_space<vmem>>, vector<8x128xf32>
    %189 = arith.maximumf %185, %186 : vector<8x128xf32>
    %190 = arith.maximumf %187, %188 : vector<8x128xf32>
    %191 = arith.maximumf %189, %190 : vector<8x128xf32>
    %192 = vector.broadcast %160 : vector<1x128xf32> to vector<8x128xf32>
    %193 = arith.addf %191, %192 : vector<8x128xf32>
    %cst_179 = arith.constant 0.000000e+00 : f32
    %194 = vector.broadcast %cst_179 : f32 to vector<8x128xf32>
    %195 = arith.maximumf %193, %194 : vector<8x128xf32>
    %c50 = arith.constant 50 : index
    %c0_180 = arith.constant 0 : index
    %196 = vector.load %arg10[%c50, %c0_180] : memref<144x128xf32, #tpu.memory_space<vmem>>, vector<8x128xf32>
    tpu.vector_store %arg10[%c50, %c0_180], %195 {strides = array<i32>} : memref<144x128xf32, #tpu.memory_space<vmem>>, vector<8x128xf32>,
    %c162 = arith.constant 162 : index
    %c0_181 = arith.constant 0 : index
    %197 = tpu.strided_load %arg9[%c162, %c0_181] {strides = array<i32: 2, 1>} : memref<400x128xf32, #tpu.memory_space<vmem>>, vector<8x128xf32>
    %c163 = arith.constant 163 : index
    %c0_182 = arith.constant 0 : index
    %198 = tpu.strided_load %arg9[%c163, %c0_182] {strides = array<i32: 2, 1>} : memref<400x128xf32, #tpu.memory_space<vmem>>, vector<8x128xf32>
    %c182 = arith.constant 182 : index
    %c0_183 = arith.constant 0 : index
    %199 = tpu.strided_load %arg9[%c182, %c0_183] {strides = array<i32: 2, 1>} : memref<400x128xf32, #tpu.memory_space<vmem>>, vector<8x128xf32>
    %c183 = arith.constant 183 : index
    %c0_184 = arith.constant 0 : index
    %200 = tpu.strided_load %arg9[%c183, %c0_184] {strides = array<i32: 2, 1>} : memref<400x128xf32, #tpu.memory_space<vmem>>, vector<8x128xf32>
    %201 = arith.maximumf %197, %198 : vector<8x128xf32>
    %202 = arith.maximumf %199, %200 : vector<8x128xf32>
    %203 = arith.maximumf %201, %202 : vector<8x128xf32>
    %204 = vector.broadcast %160 : vector<1x128xf32> to vector<8x128xf32>
    %205 = arith.addf %203, %204 : vector<8x128xf32>
    %cst_185 = arith.constant 0.000000e+00 : f32
    %206 = vector.broadcast %cst_185 : f32 to vector<8x128xf32>
    %207 = arith.maximumf %205, %206 : vector<8x128xf32>
    %c62_186 = arith.constant 62 : index
    %c0_187 = arith.constant 0 : index
    %208 = vector.load %arg10[%c62_186, %c0_187] : memref<144x128xf32, #tpu.memory_space<vmem>>, vector<8x128xf32>
    tpu.vector_store %arg10[%c62_186, %c0_187], %207 {strides = array<i32>} : memref<144x128xf32, #tpu.memory_space<vmem>>, vector<8x128xf32>,
    %c202 = arith.constant 202 : index
    %c0_188 = arith.constant 0 : index
    %209 = tpu.strided_load %arg9[%c202, %c0_188] {strides = array<i32: 2, 1>} : memref<400x128xf32, #tpu.memory_space<vmem>>, vector<8x128xf32>
    %c203 = arith.constant 203 : index
    %c0_189 = arith.constant 0 : index
    %210 = tpu.strided_load %arg9[%c203, %c0_189] {strides = array<i32: 2, 1>} : memref<400x128xf32, #tpu.memory_space<vmem>>, vector<8x128xf32>
    %c222 = arith.constant 222 : index
    %c0_190 = arith.constant 0 : index
    %211 = tpu.strided_load %arg9[%c222, %c0_190] {strides = array<i32: 2, 1>} : memref<400x128xf32, #tpu.memory_space<vmem>>, vector<8x128xf32>
    %c223 = arith.constant 223 : index
    %c0_191 = arith.constant 0 : index
    %212 = tpu.strided_load %arg9[%c223, %c0_191] {strides = array<i32: 2, 1>} : memref<400x128xf32, #tpu.memory_space<vmem>>, vector<8x128xf32>
    %213 = arith.maximumf %209, %210 : vector<8x128xf32>
    %214 = arith.maximumf %211, %212 : vector<8x128xf32>
    %215 = arith.maximumf %213, %214 : vector<8x128xf32>
    %216 = vector.broadcast %160 : vector<1x128xf32> to vector<8x128xf32>
    %217 = arith.addf %215, %216 : vector<8x128xf32>
    %cst_192 = arith.constant 0.000000e+00 : f32
    %218 = vector.broadcast %cst_192 : f32 to vector<8x128xf32>
    %219 = arith.maximumf %217, %218 : vector<8x128xf32>
    %c74 = arith.constant 74 : index
    %c0_193 = arith.constant 0 : index
    %220 = vector.load %arg10[%c74, %c0_193] : memref<144x128xf32, #tpu.memory_space<vmem>>, vector<8x128xf32>
    tpu.vector_store %arg10[%c74, %c0_193], %219 {strides = array<i32>} : memref<144x128xf32, #tpu.memory_space<vmem>>, vector<8x128xf32>,
    %c242 = arith.constant 242 : index
    %c0_194 = arith.constant 0 : index
    %221 = tpu.strided_load %arg9[%c242, %c0_194] {strides = array<i32: 2, 1>} : memref<400x128xf32, #tpu.memory_space<vmem>>, vector<8x128xf32>
    %c243 = arith.constant 243 : index
    %c0_195 = arith.constant 0 : index
    %222 = tpu.strided_load %arg9[%c243, %c0_195] {strides = array<i32: 2, 1>} : memref<400x128xf32, #tpu.memory_space<vmem>>, vector<8x128xf32>
    %c262 = arith.constant 262 : index
    %c0_196 = arith.constant 0 : index
    %223 = tpu.strided_load %arg9[%c262, %c0_196] {strides = array<i32: 2, 1>} : memref<400x128xf32, #tpu.memory_space<vmem>>, vector<8x128xf32>
    %c263 = arith.constant 263 : index
    %c0_197 = arith.constant 0 : index
    %224 = tpu.strided_load %arg9[%c263, %c0_197] {strides = array<i32: 2, 1>} : memref<400x128xf32, #tpu.memory_space<vmem>>, vector<8x128xf32>
    %225 = arith.maximumf %221, %222 : vector<8x128xf32>
    %226 = arith.maximumf %223, %224 : vector<8x128xf32>
    %227 = arith.maximumf %225, %226 : vector<8x128xf32>
    %228 = vector.broadcast %160 : vector<1x128xf32> to vector<8x128xf32>
    %229 = arith.addf %227, %228 : vector<8x128xf32>
    %cst_198 = arith.constant 0.000000e+00 : f32
    %230 = vector.broadcast %cst_198 : f32 to vector<8x128xf32>
    %231 = arith.maximumf %229, %230 : vector<8x128xf32>
    %c86 = arith.constant 86 : index
    %c0_199 = arith.constant 0 : index
    %232 = vector.load %arg10[%c86, %c0_199] : memref<144x128xf32, #tpu.memory_space<vmem>>, vector<8x128xf32>
    tpu.vector_store %arg10[%c86, %c0_199], %231 {strides = array<i32>} : memref<144x128xf32, #tpu.memory_space<vmem>>, vector<8x128xf32>,
    %c282 = arith.constant 282 : index
    %c0_200 = arith.constant 0 : index
    %233 = tpu.strided_load %arg9[%c282, %c0_200] {strides = array<i32: 2, 1>} : memref<400x128xf32, #tpu.memory_space<vmem>>, vector<8x128xf32>
    %c283 = arith.constant 283 : index
    %c0_201 = arith.constant 0 : index
    %234 = tpu.strided_load %arg9[%c283, %c0_201] {strides = array<i32: 2, 1>} : memref<400x128xf32, #tpu.memory_space<vmem>>, vector<8x128xf32>
    %c302 = arith.constant 302 : index
    %c0_202 = arith.constant 0 : index
    %235 = tpu.strided_load %arg9[%c302, %c0_202] {strides = array<i32: 2, 1>} : memref<400x128xf32, #tpu.memory_space<vmem>>, vector<8x128xf32>
    %c303 = arith.constant 303 : index
    %c0_203 = arith.constant 0 : index
    %236 = tpu.strided_load %arg9[%c303, %c0_203] {strides = array<i32: 2, 1>} : memref<400x128xf32, #tpu.memory_space<vmem>>, vector<8x128xf32>
    %237 = arith.maximumf %233, %234 : vector<8x128xf32>
    %238 = arith.maximumf %235, %236 : vector<8x128xf32>
    %239 = arith.maximumf %237, %238 : vector<8x128xf32>
    %240 = vector.broadcast %160 : vector<1x128xf32> to vector<8x128xf32>
    %241 = arith.addf %239, %240 : vector<8x128xf32>
    %cst_204 = arith.constant 0.000000e+00 : f32
    %242 = vector.broadcast %cst_204 : f32 to vector<8x128xf32>
    %243 = arith.maximumf %241, %242 : vector<8x128xf32>
    %c98 = arith.constant 98 : index
    %c0_205 = arith.constant 0 : index
    %244 = vector.load %arg10[%c98, %c0_205] : memref<144x128xf32, #tpu.memory_space<vmem>>, vector<8x128xf32>
    tpu.vector_store %arg10[%c98, %c0_205], %243 {strides = array<i32>} : memref<144x128xf32, #tpu.memory_space<vmem>>, vector<8x128xf32>,
    %c322 = arith.constant 322 : index
    %c0_206 = arith.constant 0 : index
    %245 = tpu.strided_load %arg9[%c322, %c0_206] {strides = array<i32: 2, 1>} : memref<400x128xf32, #tpu.memory_space<vmem>>, vector<8x128xf32>
    %c323 = arith.constant 323 : index
    %c0_207 = arith.constant 0 : index
    %246 = tpu.strided_load %arg9[%c323, %c0_207] {strides = array<i32: 2, 1>} : memref<400x128xf32, #tpu.memory_space<vmem>>, vector<8x128xf32>
    %c342 = arith.constant 342 : index
    %c0_208 = arith.constant 0 : index
    %247 = tpu.strided_load %arg9[%c342, %c0_208] {strides = array<i32: 2, 1>} : memref<400x128xf32, #tpu.memory_space<vmem>>, vector<8x128xf32>
    %c343 = arith.constant 343 : index
    %c0_209 = arith.constant 0 : index
    %248 = tpu.strided_load %arg9[%c343, %c0_209] {strides = array<i32: 2, 1>} : memref<400x128xf32, #tpu.memory_space<vmem>>, vector<8x128xf32>
    %249 = arith.maximumf %245, %246 : vector<8x128xf32>
    %250 = arith.maximumf %247, %248 : vector<8x128xf32>
    %251 = arith.maximumf %249, %250 : vector<8x128xf32>
    %252 = vector.broadcast %160 : vector<1x128xf32> to vector<8x128xf32>
    %253 = arith.addf %251, %252 : vector<8x128xf32>
    %cst_210 = arith.constant 0.000000e+00 : f32
    %254 = vector.broadcast %cst_210 : f32 to vector<8x128xf32>
    %255 = arith.maximumf %253, %254 : vector<8x128xf32>
    %c110 = arith.constant 110 : index
    %c0_211 = arith.constant 0 : index
    %256 = vector.load %arg10[%c110, %c0_211] : memref<144x128xf32, #tpu.memory_space<vmem>>, vector<8x128xf32>
    tpu.vector_store %arg10[%c110, %c0_211], %255 {strides = array<i32>} : memref<144x128xf32, #tpu.memory_space<vmem>>, vector<8x128xf32>,
    %c0_212 = arith.constant 0 : index
    %c0_213 = arith.constant 0 : index
    %257 = vector.load %arg10[%c0_212, %c0_213] : memref<144x128xf32, #tpu.memory_space<vmem>>, vector<92x128xf32>
    %258 = arith.truncf %257 : vector<92x128xf32> to vector<92x128xbf16>
    %c0_214 = arith.constant 0 : index
    %c0_215 = arith.constant 0 : index
    %c0_216 = arith.constant 0 : index
    %259 = vector.load %arg4[%c0_214, %c0_215, %c0_216] : memref<25x128x128xbf16, #tpu.memory_space<vmem>>, vector<1x128x128xbf16>
    %260 = vector.shape_cast %259 : vector<1x128x128xbf16> to vector<128x128xbf16>
    %cst_217 = arith.constant dense<0.000000e+00> : vector<92x128xf32>
    %261 = tpu.matmul %258, %260, %cst_217 {dimension_numbers = #tpu.dot_dimension_numbers<[1], [0], [0], [1], [0, 0, 1, 1], [], []>} : vector<92x128xbf16>, vector<128x128xbf16>, vector<92x128xf32> -> vector<92x128xf32>
    %c1_218 = arith.constant 1 : index
    %c0_219 = arith.constant 0 : index
    %262 = vector.load %arg10[%c1_218, %c0_219] : memref<144x128xf32, #tpu.memory_space<vmem>>, vector<92x128xf32>
    %263 = arith.truncf %262 : vector<92x128xf32> to vector<92x128xbf16>
    %c1_220 = arith.constant 1 : index
    %c0_221 = arith.constant 0 : index
    %c0_222 = arith.constant 0 : index
    %264 = vector.load %arg4[%c1_220, %c0_221, %c0_222] : memref<25x128x128xbf16, #tpu.memory_space<vmem>>, vector<1x128x128xbf16>
    %265 = vector.shape_cast %264 : vector<1x128x128xbf16> to vector<128x128xbf16>
    %cst_223 = arith.constant dense<0.000000e+00> : vector<92x128xf32>
    %266 = tpu.matmul %263, %265, %cst_223 {dimension_numbers = #tpu.dot_dimension_numbers<[1], [0], [0], [1], [0, 0, 1, 1], [], []>} : vector<92x128xbf16>, vector<128x128xbf16>, vector<92x128xf32> -> vector<92x128xf32>
    %267 = arith.addf %261, %266 : vector<92x128xf32>
    %c2_224 = arith.constant 2 : index
    %c0_225 = arith.constant 0 : index
    %268 = vector.load %arg10[%c2_224, %c0_225] : memref<144x128xf32, #tpu.memory_space<vmem>>, vector<92x128xf32>
    %269 = arith.truncf %268 : vector<92x128xf32> to vector<92x128xbf16>
    %c2_226 = arith.constant 2 : index
    %c0_227 = arith.constant 0 : index
    %c0_228 = arith.constant 0 : index
    %270 = vector.load %arg4[%c2_226, %c0_227, %c0_228] : memref<25x128x128xbf16, #tpu.memory_space<vmem>>, vector<1x128x128xbf16>
    %271 = vector.shape_cast %270 : vector<1x128x128xbf16> to vector<128x128xbf16>
    %cst_229 = arith.constant dense<0.000000e+00> : vector<92x128xf32>
    %272 = tpu.matmul %269, %271, %cst_229 {dimension_numbers = #tpu.dot_dimension_numbers<[1], [0], [0], [1], [0, 0, 1, 1], [], []>} : vector<92x128xbf16>, vector<128x128xbf16>, vector<92x128xf32> -> vector<92x128xf32>
    %273 = arith.addf %267, %272 : vector<92x128xf32>
    %c3_230 = arith.constant 3 : index
    %c0_231 = arith.constant 0 : index
    %274 = vector.load %arg10[%c3_230, %c0_231] : memref<144x128xf32, #tpu.memory_space<vmem>>, vector<92x128xf32>
    %275 = arith.truncf %274 : vector<92x128xf32> to vector<92x128xbf16>
    %c3_232 = arith.constant 3 : index
    %c0_233 = arith.constant 0 : index
    %c0_234 = arith.constant 0 : index
    %276 = vector.load %arg4[%c3_232, %c0_233, %c0_234] : memref<25x128x128xbf16, #tpu.memory_space<vmem>>, vector<1x128x128xbf16>
    %277 = vector.shape_cast %276 : vector<1x128x128xbf16> to vector<128x128xbf16>
    %cst_235 = arith.constant dense<0.000000e+00> : vector<92x128xf32>
    %278 = tpu.matmul %275, %277, %cst_235 {dimension_numbers = #tpu.dot_dimension_numbers<[1], [0], [0], [1], [0, 0, 1, 1], [], []>} : vector<92x128xbf16>, vector<128x128xbf16>, vector<92x128xf32> -> vector<92x128xf32>
    %279 = arith.addf %273, %278 : vector<92x128xf32>
    %c4_236 = arith.constant 4 : index
    %c0_237 = arith.constant 0 : index
    %280 = vector.load %arg10[%c4_236, %c0_237] : memref<144x128xf32, #tpu.memory_space<vmem>>, vector<92x128xf32>
    %281 = arith.truncf %280 : vector<92x128xf32> to vector<92x128xbf16>
    %c4_238 = arith.constant 4 : index
    %c0_239 = arith.constant 0 : index
    %c0_240 = arith.constant 0 : index
    %282 = vector.load %arg4[%c4_238, %c0_239, %c0_240] : memref<25x128x128xbf16, #tpu.memory_space<vmem>>, vector<1x128x128xbf16>
    %283 = vector.shape_cast %282 : vector<1x128x128xbf16> to vector<128x128xbf16>
    %cst_241 = arith.constant dense<0.000000e+00> : vector<92x128xf32>
    %284 = tpu.matmul %281, %283, %cst_241 {dimension_numbers = #tpu.dot_dimension_numbers<[1], [0], [0], [1], [0, 0, 1, 1], [], []>} : vector<92x128xbf16>, vector<128x128xbf16>, vector<92x128xf32> -> vector<92x128xf32>
    %285 = arith.addf %279, %284 : vector<92x128xf32>
    %c26_242 = arith.constant 26 : index
    %c0_243 = arith.constant 0 : index
    %286 = vector.load %arg11[%c26_242, %c0_243] : memref<144x128xf32, #tpu.memory_space<vmem>>, vector<92x128xf32>
    tpu.vector_store %arg11[%c26_242, %c0_243], %285 {strides = array<i32>} : memref<144x128xf32, #tpu.memory_space<vmem>>, vector<92x128xf32>,
    %c12_244 = arith.constant 12 : index
    %c0_245 = arith.constant 0 : index
    %287 = vector.load %arg10[%c12_244, %c0_245] : memref<144x128xf32, #tpu.memory_space<vmem>>, vector<92x128xf32>
    %288 = arith.truncf %287 : vector<92x128xf32> to vector<92x128xbf16>
    %c5_246 = arith.constant 5 : index
    %c0_247 = arith.constant 0 : index
    %c0_248 = arith.constant 0 : index
    %289 = vector.load %arg4[%c5_246, %c0_247, %c0_248] : memref<25x128x128xbf16, #tpu.memory_space<vmem>>, vector<1x128x128xbf16>
    %290 = vector.shape_cast %289 : vector<1x128x128xbf16> to vector<128x128xbf16>
    %cst_249 = arith.constant dense<0.000000e+00> : vector<92x128xf32>
    %291 = tpu.matmul %288, %290, %cst_249 {dimension_numbers = #tpu.dot_dimension_numbers<[1], [0], [0], [1], [0, 0, 1, 1], [], []>} : vector<92x128xbf16>, vector<128x128xbf16>, vector<92x128xf32> -> vector<92x128xf32>
    %c13_250 = arith.constant 13 : index
    %c0_251 = arith.constant 0 : index
    %292 = vector.load %arg10[%c13_250, %c0_251] : memref<144x128xf32, #tpu.memory_space<vmem>>, vector<92x128xf32>
    %293 = arith.truncf %292 : vector<92x128xf32> to vector<92x128xbf16>
    %c6_252 = arith.constant 6 : index
    %c0_253 = arith.constant 0 : index
    %c0_254 = arith.constant 0 : index
    %294 = vector.load %arg4[%c6_252, %c0_253, %c0_254] : memref<25x128x128xbf16, #tpu.memory_space<vmem>>, vector<1x128x128xbf16>
    %295 = vector.shape_cast %294 : vector<1x128x128xbf16> to vector<128x128xbf16>
    %cst_255 = arith.constant dense<0.000000e+00> : vector<92x128xf32>
    %296 = tpu.matmul %293, %295, %cst_255 {dimension_numbers = #tpu.dot_dimension_numbers<[1], [0], [0], [1], [0, 0, 1, 1], [], []>} : vector<92x128xbf16>, vector<128x128xbf16>, vector<92x128xf32> -> vector<92x128xf32>
    %297 = arith.addf %291, %296 : vector<92x128xf32>
    %c14_256 = arith.constant 14 : index
    %c0_257 = arith.constant 0 : index
    %298 = vector.load %arg10[%c14_256, %c0_257] : memref<144x128xf32, #tpu.memory_space<vmem>>, vector<92x128xf32>
    %299 = arith.truncf %298 : vector<92x128xf32> to vector<92x128xbf16>
    %c7_258 = arith.constant 7 : index
    %c0_259 = arith.constant 0 : index
    %c0_260 = arith.constant 0 : index
    %300 = vector.load %arg4[%c7_258, %c0_259, %c0_260] : memref<25x128x128xbf16, #tpu.memory_space<vmem>>, vector<1x128x128xbf16>
    %301 = vector.shape_cast %300 : vector<1x128x128xbf16> to vector<128x128xbf16>
    %cst_261 = arith.constant dense<0.000000e+00> : vector<92x128xf32>
    %302 = tpu.matmul %299, %301, %cst_261 {dimension_numbers = #tpu.dot_dimension_numbers<[1], [0], [0], [1], [0, 0, 1, 1], [], []>} : vector<92x128xbf16>, vector<128x128xbf16>, vector<92x128xf32> -> vector<92x128xf32>
    %303 = arith.addf %297, %302 : vector<92x128xf32>
    %c15_262 = arith.constant 15 : index
    %c0_263 = arith.constant 0 : index
    %304 = vector.load %arg10[%c15_262, %c0_263] : memref<144x128xf32, #tpu.memory_space<vmem>>, vector<92x128xf32>
    %305 = arith.truncf %304 : vector<92x128xf32> to vector<92x128xbf16>
    %c8_264 = arith.constant 8 : index
    %c0_265 = arith.constant 0 : index
    %c0_266 = arith.constant 0 : index
    %306 = vector.load %arg4[%c8_264, %c0_265, %c0_266] : memref<25x128x128xbf16, #tpu.memory_space<vmem>>, vector<1x128x128xbf16>
    %307 = vector.shape_cast %306 : vector<1x128x128xbf16> to vector<128x128xbf16>
    %cst_267 = arith.constant dense<0.000000e+00> : vector<92x128xf32>
    %308 = tpu.matmul %305, %307, %cst_267 {dimension_numbers = #tpu.dot_dimension_numbers<[1], [0], [0], [1], [0, 0, 1, 1], [], []>} : vector<92x128xbf16>, vector<128x128xbf16>, vector<92x128xf32> -> vector<92x128xf32>
    %309 = arith.addf %303, %308 : vector<92x128xf32>
    %c16_268 = arith.constant 16 : index
    %c0_269 = arith.constant 0 : index
    %310 = vector.load %arg10[%c16_268, %c0_269] : memref<144x128xf32, #tpu.memory_space<vmem>>, vector<92x128xf32>
    %311 = arith.truncf %310 : vector<92x128xf32> to vector<92x128xbf16>
    %c9_270 = arith.constant 9 : index
    %c0_271 = arith.constant 0 : index
    %c0_272 = arith.constant 0 : index
    %312 = vector.load %arg4[%c9_270, %c0_271, %c0_272] : memref<25x128x128xbf16, #tpu.memory_space<vmem>>, vector<1x128x128xbf16>
    %313 = vector.shape_cast %312 : vector<1x128x128xbf16> to vector<128x128xbf16>
    %cst_273 = arith.constant dense<0.000000e+00> : vector<92x128xf32>
    %314 = tpu.matmul %311, %313, %cst_273 {dimension_numbers = #tpu.dot_dimension_numbers<[1], [0], [0], [1], [0, 0, 1, 1], [], []>} : vector<92x128xbf16>, vector<128x128xbf16>, vector<92x128xf32> -> vector<92x128xf32>
    %315 = arith.addf %309, %314 : vector<92x128xf32>
    %c26_274 = arith.constant 26 : index
    %c0_275 = arith.constant 0 : index
    %316 = vector.load %arg11[%c26_274, %c0_275] : memref<144x128xf32, #tpu.memory_space<vmem>>, vector<92x128xf32>
    %317 = arith.addf %316, %315 : vector<92x128xf32>
    %c26_276 = arith.constant 26 : index
    %c0_277 = arith.constant 0 : index
    %318 = vector.load %arg11[%c26_276, %c0_277] : memref<144x128xf32, #tpu.memory_space<vmem>>, vector<92x128xf32>
    tpu.vector_store %arg11[%c26_276, %c0_277], %317 {strides = array<i32>} : memref<144x128xf32, #tpu.memory_space<vmem>>, vector<92x128xf32>,
    %c24_278 = arith.constant 24 : index
    %c0_279 = arith.constant 0 : index
    %319 = vector.load %arg10[%c24_278, %c0_279] : memref<144x128xf32, #tpu.memory_space<vmem>>, vector<92x128xf32>
    %320 = arith.truncf %319 : vector<92x128xf32> to vector<92x128xbf16>
    %c10_280 = arith.constant 10 : index
    %c0_281 = arith.constant 0 : index
    %c0_282 = arith.constant 0 : index
    %321 = vector.load %arg4[%c10_280, %c0_281, %c0_282] : memref<25x128x128xbf16, #tpu.memory_space<vmem>>, vector<1x128x128xbf16>
    %322 = vector.shape_cast %321 : vector<1x128x128xbf16> to vector<128x128xbf16>
    %cst_283 = arith.constant dense<0.000000e+00> : vector<92x128xf32>
    %323 = tpu.matmul %320, %322, %cst_283 {dimension_numbers = #tpu.dot_dimension_numbers<[1], [0], [0], [1], [0, 0, 1, 1], [], []>} : vector<92x128xbf16>, vector<128x128xbf16>, vector<92x128xf32> -> vector<92x128xf32>
    %c25 = arith.constant 25 : index
    %c0_284 = arith.constant 0 : index
    %324 = vector.load %arg10[%c25, %c0_284] : memref<144x128xf32, #tpu.memory_space<vmem>>, vector<92x128xf32>
    %325 = arith.truncf %324 : vector<92x128xf32> to vector<92x128xbf16>
    %c11_285 = arith.constant 11 : index
    %c0_286 = arith.constant 0 : index
    %c0_287 = arith.constant 0 : index
    %326 = vector.load %arg4[%c11_285, %c0_286, %c0_287] : memref<25x128x128xbf16, #tpu.memory_space<vmem>>, vector<1x128x128xbf16>
    %327 = vector.shape_cast %326 : vector<1x128x128xbf16> to vector<128x128xbf16>
    %cst_288 = arith.constant dense<0.000000e+00> : vector<92x128xf32>
    %328 = tpu.matmul %325, %327, %cst_288 {dimension_numbers = #tpu.dot_dimension_numbers<[1], [0], [0], [1], [0, 0, 1, 1], [], []>} : vector<92x128xbf16>, vector<128x128xbf16>, vector<92x128xf32> -> vector<92x128xf32>
    %329 = arith.addf %323, %328 : vector<92x128xf32>
    %c26_289 = arith.constant 26 : index
    %c0_290 = arith.constant 0 : index
    %330 = vector.load %arg10[%c26_289, %c0_290] : memref<144x128xf32, #tpu.memory_space<vmem>>, vector<92x128xf32>
    %331 = arith.truncf %330 : vector<92x128xf32> to vector<92x128xbf16>
    %c12_291 = arith.constant 12 : index
    %c0_292 = arith.constant 0 : index
    %c0_293 = arith.constant 0 : index
    %332 = vector.load %arg4[%c12_291, %c0_292, %c0_293] : memref<25x128x128xbf16, #tpu.memory_space<vmem>>, vector<1x128x128xbf16>
    %333 = vector.shape_cast %332 : vector<1x128x128xbf16> to vector<128x128xbf16>
    %cst_294 = arith.constant dense<0.000000e+00> : vector<92x128xf32>
    %334 = tpu.matmul %331, %333, %cst_294 {dimension_numbers = #tpu.dot_dimension_numbers<[1], [0], [0], [1], [0, 0, 1, 1], [], []>} : vector<92x128xbf16>, vector<128x128xbf16>, vector<92x128xf32> -> vector<92x128xf32>
    %335 = arith.addf %329, %334 : vector<92x128xf32>
    %c27 = arith.constant 27 : index
    %c0_295 = arith.constant 0 : index
    %336 = vector.load %arg10[%c27, %c0_295] : memref<144x128xf32, #tpu.memory_space<vmem>>, vector<92x128xf32>
    %337 = arith.truncf %336 : vector<92x128xf32> to vector<92x128xbf16>
    %c13_296 = arith.constant 13 : index
    %c0_297 = arith.constant 0 : index
    %c0_298 = arith.constant 0 : index
    %338 = vector.load %arg4[%c13_296, %c0_297, %c0_298] : memref<25x128x128xbf16, #tpu.memory_space<vmem>>, vector<1x128x128xbf16>
    %339 = vector.shape_cast %338 : vector<1x128x128xbf16> to vector<128x128xbf16>
    %cst_299 = arith.constant dense<0.000000e+00> : vector<92x128xf32>
    %340 = tpu.matmul %337, %339, %cst_299 {dimension_numbers = #tpu.dot_dimension_numbers<[1], [0], [0], [1], [0, 0, 1, 1], [], []>} : vector<92x128xbf16>, vector<128x128xbf16>, vector<92x128xf32> -> vector<92x128xf32>
    %341 = arith.addf %335, %340 : vector<92x128xf32>
    %c28 = arith.constant 28 : index
    %c0_300 = arith.constant 0 : index
    %342 = vector.load %arg10[%c28, %c0_300] : memref<144x128xf32, #tpu.memory_space<vmem>>, vector<92x128xf32>
    %343 = arith.truncf %342 : vector<92x128xf32> to vector<92x128xbf16>
    %c14_301 = arith.constant 14 : index
    %c0_302 = arith.constant 0 : index
    %c0_303 = arith.constant 0 : index
    %344 = vector.load %arg4[%c14_301, %c0_302, %c0_303] : memref<25x128x128xbf16, #tpu.memory_space<vmem>>, vector<1x128x128xbf16>
    %345 = vector.shape_cast %344 : vector<1x128x128xbf16> to vector<128x128xbf16>
    %cst_304 = arith.constant dense<0.000000e+00> : vector<92x128xf32>
    %346 = tpu.matmul %343, %345, %cst_304 {dimension_numbers = #tpu.dot_dimension_numbers<[1], [0], [0], [1], [0, 0, 1, 1], [], []>} : vector<92x128xbf16>, vector<128x128xbf16>, vector<92x128xf32> -> vector<92x128xf32>
    %347 = arith.addf %341, %346 : vector<92x128xf32>
    %c26_305 = arith.constant 26 : index
    %c0_306 = arith.constant 0 : index
    %348 = vector.load %arg11[%c26_305, %c0_306] : memref<144x128xf32, #tpu.memory_space<vmem>>, vector<92x128xf32>
    %349 = arith.addf %348, %347 : vector<92x128xf32>
    %c26_307 = arith.constant 26 : index
    %c0_308 = arith.constant 0 : index
    %350 = vector.load %arg11[%c26_307, %c0_308] : memref<144x128xf32, #tpu.memory_space<vmem>>, vector<92x128xf32>
    tpu.vector_store %arg11[%c26_307, %c0_308], %349 {strides = array<i32>} : memref<144x128xf32, #tpu.memory_space<vmem>>, vector<92x128xf32>,
    %c36 = arith.constant 36 : index
    %c0_309 = arith.constant 0 : index
    %351 = vector.load %arg10[%c36, %c0_309] : memref<144x128xf32, #tpu.memory_space<vmem>>, vector<92x128xf32>
    %352 = arith.truncf %351 : vector<92x128xf32> to vector<92x128xbf16>
    %c15_310 = arith.constant 15 : index
    %c0_311 = arith.constant 0 : index
    %c0_312 = arith.constant 0 : index
    %353 = vector.load %arg4[%c15_310, %c0_311, %c0_312] : memref<25x128x128xbf16, #tpu.memory_space<vmem>>, vector<1x128x128xbf16>
    %354 = vector.shape_cast %353 : vector<1x128x128xbf16> to vector<128x128xbf16>
    %cst_313 = arith.constant dense<0.000000e+00> : vector<92x128xf32>
    %355 = tpu.matmul %352, %354, %cst_313 {dimension_numbers = #tpu.dot_dimension_numbers<[1], [0], [0], [1], [0, 0, 1, 1], [], []>} : vector<92x128xbf16>, vector<128x128xbf16>, vector<92x128xf32> -> vector<92x128xf32>
    %c37 = arith.constant 37 : index
    %c0_314 = arith.constant 0 : index
    %356 = vector.load %arg10[%c37, %c0_314] : memref<144x128xf32, #tpu.memory_space<vmem>>, vector<92x128xf32>
    %357 = arith.truncf %356 : vector<92x128xf32> to vector<92x128xbf16>
    %c16_315 = arith.constant 16 : index
    %c0_316 = arith.constant 0 : index
    %c0_317 = arith.constant 0 : index
    %358 = vector.load %arg4[%c16_315, %c0_316, %c0_317] : memref<25x128x128xbf16, #tpu.memory_space<vmem>>, vector<1x128x128xbf16>
    %359 = vector.shape_cast %358 : vector<1x128x128xbf16> to vector<128x128xbf16>
    %cst_318 = arith.constant dense<0.000000e+00> : vector<92x128xf32>
    %360 = tpu.matmul %357, %359, %cst_318 {dimension_numbers = #tpu.dot_dimension_numbers<[1], [0], [0], [1], [0, 0, 1, 1], [], []>} : vector<92x128xbf16>, vector<128x128xbf16>, vector<92x128xf32> -> vector<92x128xf32>
    %361 = arith.addf %355, %360 : vector<92x128xf32>
    %c38_319 = arith.constant 38 : index
    %c0_320 = arith.constant 0 : index
    %362 = vector.load %arg10[%c38_319, %c0_320] : memref<144x128xf32, #tpu.memory_space<vmem>>, vector<92x128xf32>
    %363 = arith.truncf %362 : vector<92x128xf32> to vector<92x128xbf16>
    %c17_321 = arith.constant 17 : index
    %c0_322 = arith.constant 0 : index
    %c0_323 = arith.constant 0 : index
    %364 = vector.load %arg4[%c17_321, %c0_322, %c0_323] : memref<25x128x128xbf16, #tpu.memory_space<vmem>>, vector<1x128x128xbf16>
    %365 = vector.shape_cast %364 : vector<1x128x128xbf16> to vector<128x128xbf16>
    %cst_324 = arith.constant dense<0.000000e+00> : vector<92x128xf32>
    %366 = tpu.matmul %363, %365, %cst_324 {dimension_numbers = #tpu.dot_dimension_numbers<[1], [0], [0], [1], [0, 0, 1, 1], [], []>} : vector<92x128xbf16>, vector<128x128xbf16>, vector<92x128xf32> -> vector<92x128xf32>
    %367 = arith.addf %361, %366 : vector<92x128xf32>
    %c39 = arith.constant 39 : index
    %c0_325 = arith.constant 0 : index
    %368 = vector.load %arg10[%c39, %c0_325] : memref<144x128xf32, #tpu.memory_space<vmem>>, vector<92x128xf32>
    %369 = arith.truncf %368 : vector<92x128xf32> to vector<92x128xbf16>
    %c18_326 = arith.constant 18 : index
    %c0_327 = arith.constant 0 : index
    %c0_328 = arith.constant 0 : index
    %370 = vector.load %arg4[%c18_326, %c0_327, %c0_328] : memref<25x128x128xbf16, #tpu.memory_space<vmem>>, vector<1x128x128xbf16>
    %371 = vector.shape_cast %370 : vector<1x128x128xbf16> to vector<128x128xbf16>
    %cst_329 = arith.constant dense<0.000000e+00> : vector<92x128xf32>
    %372 = tpu.matmul %369, %371, %cst_329 {dimension_numbers = #tpu.dot_dimension_numbers<[1], [0], [0], [1], [0, 0, 1, 1], [], []>} : vector<92x128xbf16>, vector<128x128xbf16>, vector<92x128xf32> -> vector<92x128xf32>
    %373 = arith.addf %367, %372 : vector<92x128xf32>
    %c40_330 = arith.constant 40 : index
    %c0_331 = arith.constant 0 : index
    %374 = vector.load %arg10[%c40_330, %c0_331] : memref<144x128xf32, #tpu.memory_space<vmem>>, vector<92x128xf32>
    %375 = arith.truncf %374 : vector<92x128xf32> to vector<92x128xbf16>
    %c19_332 = arith.constant 19 : index
    %c0_333 = arith.constant 0 : index
    %c0_334 = arith.constant 0 : index
    %376 = vector.load %arg4[%c19_332, %c0_333, %c0_334] : memref<25x128x128xbf16, #tpu.memory_space<vmem>>, vector<1x128x128xbf16>
    %377 = vector.shape_cast %376 : vector<1x128x128xbf16> to vector<128x128xbf16>
    %cst_335 = arith.constant dense<0.000000e+00> : vector<92x128xf32>
    %378 = tpu.matmul %375, %377, %cst_335 {dimension_numbers = #tpu.dot_dimension_numbers<[1], [0], [0], [1], [0, 0, 1, 1], [], []>} : vector<92x128xbf16>, vector<128x128xbf16>, vector<92x128xf32> -> vector<92x128xf32>
    %379 = arith.addf %373, %378 : vector<92x128xf32>
    %c26_336 = arith.constant 26 : index
    %c0_337 = arith.constant 0 : index
    %380 = vector.load %arg11[%c26_336, %c0_337] : memref<144x128xf32, #tpu.memory_space<vmem>>, vector<92x128xf32>
    %381 = arith.addf %380, %379 : vector<92x128xf32>
    %c26_338 = arith.constant 26 : index
    %c0_339 = arith.constant 0 : index
    %382 = vector.load %arg11[%c26_338, %c0_339] : memref<144x128xf32, #tpu.memory_space<vmem>>, vector<92x128xf32>
    tpu.vector_store %arg11[%c26_338, %c0_339], %381 {strides = array<i32>} : memref<144x128xf32, #tpu.memory_space<vmem>>, vector<92x128xf32>,
    %c48 = arith.constant 48 : index
    %c0_340 = arith.constant 0 : index
    %383 = vector.load %arg10[%c48, %c0_340] : memref<144x128xf32, #tpu.memory_space<vmem>>, vector<92x128xf32>
    %384 = arith.truncf %383 : vector<92x128xf32> to vector<92x128xbf16>
    %c20_341 = arith.constant 20 : index
    %c0_342 = arith.constant 0 : index
    %c0_343 = arith.constant 0 : index
    %385 = vector.load %arg4[%c20_341, %c0_342, %c0_343] : memref<25x128x128xbf16, #tpu.memory_space<vmem>>, vector<1x128x128xbf16>
    %386 = vector.shape_cast %385 : vector<1x128x128xbf16> to vector<128x128xbf16>
    %cst_344 = arith.constant dense<0.000000e+00> : vector<92x128xf32>
    %387 = tpu.matmul %384, %386, %cst_344 {dimension_numbers = #tpu.dot_dimension_numbers<[1], [0], [0], [1], [0, 0, 1, 1], [], []>} : vector<92x128xbf16>, vector<128x128xbf16>, vector<92x128xf32> -> vector<92x128xf32>
    %c49 = arith.constant 49 : index
    %c0_345 = arith.constant 0 : index
    %388 = vector.load %arg10[%c49, %c0_345] : memref<144x128xf32, #tpu.memory_space<vmem>>, vector<92x128xf32>
    %389 = arith.truncf %388 : vector<92x128xf32> to vector<92x128xbf16>
    %c21_346 = arith.constant 21 : index
    %c0_347 = arith.constant 0 : index
    %c0_348 = arith.constant 0 : index
    %390 = vector.load %arg4[%c21_346, %c0_347, %c0_348] : memref<25x128x128xbf16, #tpu.memory_space<vmem>>, vector<1x128x128xbf16>
    %391 = vector.shape_cast %390 : vector<1x128x128xbf16> to vector<128x128xbf16>
    %cst_349 = arith.constant dense<0.000000e+00> : vector<92x128xf32>
    %392 = tpu.matmul %389, %391, %cst_349 {dimension_numbers = #tpu.dot_dimension_numbers<[1], [0], [0], [1], [0, 0, 1, 1], [], []>} : vector<92x128xbf16>, vector<128x128xbf16>, vector<92x128xf32> -> vector<92x128xf32>
    %393 = arith.addf %387, %392 : vector<92x128xf32>
    %c50_350 = arith.constant 50 : index
    %c0_351 = arith.constant 0 : index
    %394 = vector.load %arg10[%c50_350, %c0_351] : memref<144x128xf32, #tpu.memory_space<vmem>>, vector<92x128xf32>
    %395 = arith.truncf %394 : vector<92x128xf32> to vector<92x128xbf16>
    %c22_352 = arith.constant 22 : index
    %c0_353 = arith.constant 0 : index
    %c0_354 = arith.constant 0 : index
    %396 = vector.load %arg4[%c22_352, %c0_353, %c0_354] : memref<25x128x128xbf16, #tpu.memory_space<vmem>>, vector<1x128x128xbf16>
    %397 = vector.shape_cast %396 : vector<1x128x128xbf16> to vector<128x128xbf16>
    %cst_355 = arith.constant dense<0.000000e+00> : vector<92x128xf32>
    %398 = tpu.matmul %395, %397, %cst_355 {dimension_numbers = #tpu.dot_dimension_numbers<[1], [0], [0], [1], [0, 0, 1, 1], [], []>} : vector<92x128xbf16>, vector<128x128xbf16>, vector<92x128xf32> -> vector<92x128xf32>
    %399 = arith.addf %393, %398 : vector<92x128xf32>
    %c51 = arith.constant 51 : index
    %c0_356 = arith.constant 0 : index
    %400 = vector.load %arg10[%c51, %c0_356] : memref<144x128xf32, #tpu.memory_space<vmem>>, vector<92x128xf32>
    %401 = arith.truncf %400 : vector<92x128xf32> to vector<92x128xbf16>
    %c23_357 = arith.constant 23 : index
    %c0_358 = arith.constant 0 : index
    %c0_359 = arith.constant 0 : index
    %402 = vector.load %arg4[%c23_357, %c0_358, %c0_359] : memref<25x128x128xbf16, #tpu.memory_space<vmem>>, vector<1x128x128xbf16>
    %403 = vector.shape_cast %402 : vector<1x128x128xbf16> to vector<128x128xbf16>
    %cst_360 = arith.constant dense<0.000000e+00> : vector<92x128xf32>
    %404 = tpu.matmul %401, %403, %cst_360 {dimension_numbers = #tpu.dot_dimension_numbers<[1], [0], [0], [1], [0, 0, 1, 1], [], []>} : vector<92x128xbf16>, vector<128x128xbf16>, vector<92x128xf32> -> vector<92x128xf32>
    %405 = arith.addf %399, %404 : vector<92x128xf32>
    %c52 = arith.constant 52 : index
    %c0_361 = arith.constant 0 : index
    %406 = vector.load %arg10[%c52, %c0_361] : memref<144x128xf32, #tpu.memory_space<vmem>>, vector<92x128xf32>
    %407 = arith.truncf %406 : vector<92x128xf32> to vector<92x128xbf16>
    %c24_362 = arith.constant 24 : index
    %c0_363 = arith.constant 0 : index
    %c0_364 = arith.constant 0 : index
    %408 = vector.load %arg4[%c24_362, %c0_363, %c0_364] : memref<25x128x128xbf16, #tpu.memory_space<vmem>>, vector<1x128x128xbf16>
    %409 = vector.shape_cast %408 : vector<1x128x128xbf16> to vector<128x128xbf16>
    %cst_365 = arith.constant dense<0.000000e+00> : vector<92x128xf32>
    %410 = tpu.matmul %407, %409, %cst_365 {dimension_numbers = #tpu.dot_dimension_numbers<[1], [0], [0], [1], [0, 0, 1, 1], [], []>} : vector<92x128xbf16>, vector<128x128xbf16>, vector<92x128xf32> -> vector<92x128xf32>
    %411 = arith.addf %405, %410 : vector<92x128xf32>
    %c26_366 = arith.constant 26 : index
    %c0_367 = arith.constant 0 : index
    %412 = vector.load %arg11[%c26_366, %c0_367] : memref<144x128xf32, #tpu.memory_space<vmem>>, vector<92x128xf32>
    %413 = arith.addf %412, %411 : vector<92x128xf32>
    %c26_368 = arith.constant 26 : index
    %c0_369 = arith.constant 0 : index
    %414 = vector.load %arg11[%c26_368, %c0_369] : memref<144x128xf32, #tpu.memory_space<vmem>>, vector<92x128xf32>
    tpu.vector_store %arg11[%c26_368, %c0_369], %413 {strides = array<i32>} : memref<144x128xf32, #tpu.memory_space<vmem>>, vector<92x128xf32>,
    %c0_370 = arith.constant 0 : index
    %c0_371 = arith.constant 0 : index
    %415 = vector.load %arg5[%c0_370, %c0_371] : memref<1x128xf32, #tpu.memory_space<vmem>>, vector<1x128xf32>
    %c26_372 = arith.constant 26 : index
    %c0_373 = arith.constant 0 : index
    %416 = tpu.strided_load %arg11[%c26_372, %c0_373] {strides = array<i32: 2, 1>} : memref<144x128xf32, #tpu.memory_space<vmem>>, vector<4x128xf32>
    %c27_374 = arith.constant 27 : index
    %c0_375 = arith.constant 0 : index
    %417 = tpu.strided_load %arg11[%c27_374, %c0_375] {strides = array<i32: 2, 1>} : memref<144x128xf32, #tpu.memory_space<vmem>>, vector<4x128xf32>
    %c38_376 = arith.constant 38 : index
    %c0_377 = arith.constant 0 : index
    %418 = tpu.strided_load %arg11[%c38_376, %c0_377] {strides = array<i32: 2, 1>} : memref<144x128xf32, #tpu.memory_space<vmem>>, vector<4x128xf32>
    %c39_378 = arith.constant 39 : index
    %c0_379 = arith.constant 0 : index
    %419 = tpu.strided_load %arg11[%c39_378, %c0_379] {strides = array<i32: 2, 1>} : memref<144x128xf32, #tpu.memory_space<vmem>>, vector<4x128xf32>
    %420 = arith.maximumf %416, %417 : vector<4x128xf32>
    %421 = arith.maximumf %418, %419 : vector<4x128xf32>
    %422 = arith.maximumf %420, %421 : vector<4x128xf32>
    %423 = vector.broadcast %415 : vector<1x128xf32> to vector<4x128xf32>
    %424 = arith.addf %422, %423 : vector<4x128xf32>
    %cst_380 = arith.constant 0.000000e+00 : f32
    %425 = vector.broadcast %cst_380 : f32 to vector<4x128xf32>
    %426 = arith.maximumf %424, %425 : vector<4x128xf32>
    %c0_381 = arith.constant 0 : index
    %c0_382 = arith.constant 0 : index
    %427 = vector.load %arg12[%c0_381, %c0_382] : memref<16x128xf32, #tpu.memory_space<vmem>>, vector<4x128xf32>
    tpu.vector_store %arg12[%c0_381, %c0_382], %426 {strides = array<i32>} : memref<16x128xf32, #tpu.memory_space<vmem>>, vector<4x128xf32>,
    %c50_383 = arith.constant 50 : index
    %c0_384 = arith.constant 0 : index
    %428 = tpu.strided_load %arg11[%c50_383, %c0_384] {strides = array<i32: 2, 1>} : memref<144x128xf32, #tpu.memory_space<vmem>>, vector<4x128xf32>
    %c51_385 = arith.constant 51 : index
    %c0_386 = arith.constant 0 : index
    %429 = tpu.strided_load %arg11[%c51_385, %c0_386] {strides = array<i32: 2, 1>} : memref<144x128xf32, #tpu.memory_space<vmem>>, vector<4x128xf32>
    %c62_387 = arith.constant 62 : index
    %c0_388 = arith.constant 0 : index
    %430 = tpu.strided_load %arg11[%c62_387, %c0_388] {strides = array<i32: 2, 1>} : memref<144x128xf32, #tpu.memory_space<vmem>>, vector<4x128xf32>
    %c63_389 = arith.constant 63 : index
    %c0_390 = arith.constant 0 : index
    %431 = tpu.strided_load %arg11[%c63_389, %c0_390] {strides = array<i32: 2, 1>} : memref<144x128xf32, #tpu.memory_space<vmem>>, vector<4x128xf32>
    %432 = arith.maximumf %428, %429 : vector<4x128xf32>
    %433 = arith.maximumf %430, %431 : vector<4x128xf32>
    %434 = arith.maximumf %432, %433 : vector<4x128xf32>
    %435 = vector.broadcast %415 : vector<1x128xf32> to vector<4x128xf32>
    %436 = arith.addf %434, %435 : vector<4x128xf32>
    %cst_391 = arith.constant 0.000000e+00 : f32
    %437 = vector.broadcast %cst_391 : f32 to vector<4x128xf32>
    %438 = arith.maximumf %436, %437 : vector<4x128xf32>
    %c4_392 = arith.constant 4 : index
    %c0_393 = arith.constant 0 : index
    %439 = vector.load %arg12[%c4_392, %c0_393] : memref<16x128xf32, #tpu.memory_space<vmem>>, vector<4x128xf32>
    tpu.vector_store %arg12[%c4_392, %c0_393], %438 {strides = array<i32>} : memref<16x128xf32, #tpu.memory_space<vmem>>, vector<4x128xf32>,
    %c74_394 = arith.constant 74 : index
    %c0_395 = arith.constant 0 : index
    %440 = tpu.strided_load %arg11[%c74_394, %c0_395] {strides = array<i32: 2, 1>} : memref<144x128xf32, #tpu.memory_space<vmem>>, vector<4x128xf32>
    %c75 = arith.constant 75 : index
    %c0_396 = arith.constant 0 : index
    %441 = tpu.strided_load %arg11[%c75, %c0_396] {strides = array<i32: 2, 1>} : memref<144x128xf32, #tpu.memory_space<vmem>>, vector<4x128xf32>
    %c86_397 = arith.constant 86 : index
    %c0_398 = arith.constant 0 : index
    %442 = tpu.strided_load %arg11[%c86_397, %c0_398] {strides = array<i32: 2, 1>} : memref<144x128xf32, #tpu.memory_space<vmem>>, vector<4x128xf32>
    %c87 = arith.constant 87 : index
    %c0_399 = arith.constant 0 : index
    %443 = tpu.strided_load %arg11[%c87, %c0_399] {strides = array<i32: 2, 1>} : memref<144x128xf32, #tpu.memory_space<vmem>>, vector<4x128xf32>
    %444 = arith.maximumf %440, %441 : vector<4x128xf32>
    %445 = arith.maximumf %442, %443 : vector<4x128xf32>
    %446 = arith.maximumf %444, %445 : vector<4x128xf32>
    %447 = vector.broadcast %415 : vector<1x128xf32> to vector<4x128xf32>
    %448 = arith.addf %446, %447 : vector<4x128xf32>
    %cst_400 = arith.constant 0.000000e+00 : f32
    %449 = vector.broadcast %cst_400 : f32 to vector<4x128xf32>
    %450 = arith.maximumf %448, %449 : vector<4x128xf32>
    %c8_401 = arith.constant 8 : index
    %c0_402 = arith.constant 0 : index
    %451 = vector.load %arg12[%c8_401, %c0_402] : memref<16x128xf32, #tpu.memory_space<vmem>>, vector<4x128xf32>
    tpu.vector_store %arg12[%c8_401, %c0_402], %450 {strides = array<i32>} : memref<16x128xf32, #tpu.memory_space<vmem>>, vector<4x128xf32>,
    %c98_403 = arith.constant 98 : index
    %c0_404 = arith.constant 0 : index
    %452 = tpu.strided_load %arg11[%c98_403, %c0_404] {strides = array<i32: 2, 1>} : memref<144x128xf32, #tpu.memory_space<vmem>>, vector<4x128xf32>
    %c99 = arith.constant 99 : index
    %c0_405 = arith.constant 0 : index
    %453 = tpu.strided_load %arg11[%c99, %c0_405] {strides = array<i32: 2, 1>} : memref<144x128xf32, #tpu.memory_space<vmem>>, vector<4x128xf32>
    %c110_406 = arith.constant 110 : index
    %c0_407 = arith.constant 0 : index
    %454 = tpu.strided_load %arg11[%c110_406, %c0_407] {strides = array<i32: 2, 1>} : memref<144x128xf32, #tpu.memory_space<vmem>>, vector<4x128xf32>
    %c111 = arith.constant 111 : index
    %c0_408 = arith.constant 0 : index
    %455 = tpu.strided_load %arg11[%c111, %c0_408] {strides = array<i32: 2, 1>} : memref<144x128xf32, #tpu.memory_space<vmem>>, vector<4x128xf32>
    %456 = arith.maximumf %452, %453 : vector<4x128xf32>
    %457 = arith.maximumf %454, %455 : vector<4x128xf32>
    %458 = arith.maximumf %456, %457 : vector<4x128xf32>
    %459 = vector.broadcast %415 : vector<1x128xf32> to vector<4x128xf32>
    %460 = arith.addf %458, %459 : vector<4x128xf32>
    %cst_409 = arith.constant 0.000000e+00 : f32
    %461 = vector.broadcast %cst_409 : f32 to vector<4x128xf32>
    %462 = arith.maximumf %460, %461 : vector<4x128xf32>
    %c12_410 = arith.constant 12 : index
    %c0_411 = arith.constant 0 : index
    %463 = vector.load %arg12[%c12_410, %c0_411] : memref<16x128xf32, #tpu.memory_space<vmem>>, vector<4x128xf32>
    tpu.vector_store %arg12[%c12_410, %c0_411], %462 {strides = array<i32>} : memref<16x128xf32, #tpu.memory_space<vmem>>, vector<4x128xf32>,
    %c0_412 = arith.constant 0 : index
    %c0_413 = arith.constant 0 : index
    %464 = vector.load %arg12[%c0_412, %c0_413] : memref<16x128xf32, #tpu.memory_space<vmem>>, vector<16x128xf32>
    %465 = arith.truncf %464 : vector<16x128xf32> to vector<16x128xbf16>
    %cst_414 = arith.constant 0.000000e+00 : f32
    %466 = vector.broadcast %cst_414 : f32 to vector<1x128xf32>
    %467 = vector.extract_strided_slice %465 {offsets = [0, 0], sizes = [1, 128], strides = [1, 1]} : vector<16x128xbf16> to vector<1x128xbf16>
    %c0_415 = arith.constant 0 : index
    %c0_416 = arith.constant 0 : index
    %c0_417 = arith.constant 0 : index
    %468 = vector.load %arg6[%c0_415, %c0_416, %c0_417] : memref<16x128x128xbf16, #tpu.memory_space<vmem>>, vector<1x128x128xbf16>
    %469 = vector.shape_cast %468 : vector<1x128x128xbf16> to vector<128x128xbf16>
    %cst_418 = arith.constant dense<0.000000e+00> : vector<1x128xf32>
    %470 = tpu.matmul %467, %469, %cst_418 {dimension_numbers = #tpu.dot_dimension_numbers<[1], [0], [0], [1], [0, 0, 1, 1], [], []>} : vector<1x128xbf16>, vector<128x128xbf16>, vector<1x128xf32> -> vector<1x128xf32>
    %471 = arith.addf %466, %470 : vector<1x128xf32>
    %472 = vector.extract_strided_slice %465 {offsets = [1, 0], sizes = [1, 128], strides = [1, 1]} : vector<16x128xbf16> to vector<1x128xbf16>
    %c1_419 = arith.constant 1 : index
    %c0_420 = arith.constant 0 : index
    %c0_421 = arith.constant 0 : index
    %473 = vector.load %arg6[%c1_419, %c0_420, %c0_421] : memref<16x128x128xbf16, #tpu.memory_space<vmem>>, vector<1x128x128xbf16>
    %474 = vector.shape_cast %473 : vector<1x128x128xbf16> to vector<128x128xbf16>
    %cst_422 = arith.constant dense<0.000000e+00> : vector<1x128xf32>
    %475 = tpu.matmul %472, %474, %cst_422 {dimension_numbers = #tpu.dot_dimension_numbers<[1], [0], [0], [1], [0, 0, 1, 1], [], []>} : vector<1x128xbf16>, vector<128x128xbf16>, vector<1x128xf32> -> vector<1x128xf32>
    %476 = arith.addf %471, %475 : vector<1x128xf32>
    %477 = vector.extract_strided_slice %465 {offsets = [2, 0], sizes = [1, 128], strides = [1, 1]} : vector<16x128xbf16> to vector<1x128xbf16>
    %c2_423 = arith.constant 2 : index
    %c0_424 = arith.constant 0 : index
    %c0_425 = arith.constant 0 : index
    %478 = vector.load %arg6[%c2_423, %c0_424, %c0_425] : memref<16x128x128xbf16, #tpu.memory_space<vmem>>, vector<1x128x128xbf16>
    %479 = vector.shape_cast %478 : vector<1x128x128xbf16> to vector<128x128xbf16>
    %cst_426 = arith.constant dense<0.000000e+00> : vector<1x128xf32>
    %480 = tpu.matmul %477, %479, %cst_426 {dimension_numbers = #tpu.dot_dimension_numbers<[1], [0], [0], [1], [0, 0, 1, 1], [], []>} : vector<1x128xbf16>, vector<128x128xbf16>, vector<1x128xf32> -> vector<1x128xf32>
    %481 = arith.addf %476, %480 : vector<1x128xf32>
    %482 = vector.extract_strided_slice %465 {offsets = [3, 0], sizes = [1, 128], strides = [1, 1]} : vector<16x128xbf16> to vector<1x128xbf16>
    %c3_427 = arith.constant 3 : index
    %c0_428 = arith.constant 0 : index
    %c0_429 = arith.constant 0 : index
    %483 = vector.load %arg6[%c3_427, %c0_428, %c0_429] : memref<16x128x128xbf16, #tpu.memory_space<vmem>>, vector<1x128x128xbf16>
    %484 = vector.shape_cast %483 : vector<1x128x128xbf16> to vector<128x128xbf16>
    %cst_430 = arith.constant dense<0.000000e+00> : vector<1x128xf32>
    %485 = tpu.matmul %482, %484, %cst_430 {dimension_numbers = #tpu.dot_dimension_numbers<[1], [0], [0], [1], [0, 0, 1, 1], [], []>} : vector<1x128xbf16>, vector<128x128xbf16>, vector<1x128xf32> -> vector<1x128xf32>
    %486 = arith.addf %481, %485 : vector<1x128xf32>
    %487 = vector.extract_strided_slice %465 {offsets = [4, 0], sizes = [1, 128], strides = [1, 1]} : vector<16x128xbf16> to vector<1x128xbf16>
    %c4_431 = arith.constant 4 : index
    %c0_432 = arith.constant 0 : index
    %c0_433 = arith.constant 0 : index
    %488 = vector.load %arg6[%c4_431, %c0_432, %c0_433] : memref<16x128x128xbf16, #tpu.memory_space<vmem>>, vector<1x128x128xbf16>
    %489 = vector.shape_cast %488 : vector<1x128x128xbf16> to vector<128x128xbf16>
    %cst_434 = arith.constant dense<0.000000e+00> : vector<1x128xf32>
    %490 = tpu.matmul %487, %489, %cst_434 {dimension_numbers = #tpu.dot_dimension_numbers<[1], [0], [0], [1], [0, 0, 1, 1], [], []>} : vector<1x128xbf16>, vector<128x128xbf16>, vector<1x128xf32> -> vector<1x128xf32>
    %491 = arith.addf %486, %490 : vector<1x128xf32>
    %492 = vector.extract_strided_slice %465 {offsets = [5, 0], sizes = [1, 128], strides = [1, 1]} : vector<16x128xbf16> to vector<1x128xbf16>
    %c5_435 = arith.constant 5 : index
    %c0_436 = arith.constant 0 : index
    %c0_437 = arith.constant 0 : index
    %493 = vector.load %arg6[%c5_435, %c0_436, %c0_437] : memref<16x128x128xbf16, #tpu.memory_space<vmem>>, vector<1x128x128xbf16>
    %494 = vector.shape_cast %493 : vector<1x128x128xbf16> to vector<128x128xbf16>
    %cst_438 = arith.constant dense<0.000000e+00> : vector<1x128xf32>
    %495 = tpu.matmul %492, %494, %cst_438 {dimension_numbers = #tpu.dot_dimension_numbers<[1], [0], [0], [1], [0, 0, 1, 1], [], []>} : vector<1x128xbf16>, vector<128x128xbf16>, vector<1x128xf32> -> vector<1x128xf32>
    %496 = arith.addf %491, %495 : vector<1x128xf32>
    %497 = vector.extract_strided_slice %465 {offsets = [6, 0], sizes = [1, 128], strides = [1, 1]} : vector<16x128xbf16> to vector<1x128xbf16>
    %c6_439 = arith.constant 6 : index
    %c0_440 = arith.constant 0 : index
    %c0_441 = arith.constant 0 : index
    %498 = vector.load %arg6[%c6_439, %c0_440, %c0_441] : memref<16x128x128xbf16, #tpu.memory_space<vmem>>, vector<1x128x128xbf16>
    %499 = vector.shape_cast %498 : vector<1x128x128xbf16> to vector<128x128xbf16>
    %cst_442 = arith.constant dense<0.000000e+00> : vector<1x128xf32>
    %500 = tpu.matmul %497, %499, %cst_442 {dimension_numbers = #tpu.dot_dimension_numbers<[1], [0], [0], [1], [0, 0, 1, 1], [], []>} : vector<1x128xbf16>, vector<128x128xbf16>, vector<1x128xf32> -> vector<1x128xf32>
    %501 = arith.addf %496, %500 : vector<1x128xf32>
    %502 = vector.extract_strided_slice %465 {offsets = [7, 0], sizes = [1, 128], strides = [1, 1]} : vector<16x128xbf16> to vector<1x128xbf16>
    %c7_443 = arith.constant 7 : index
    %c0_444 = arith.constant 0 : index
    %c0_445 = arith.constant 0 : index
    %503 = vector.load %arg6[%c7_443, %c0_444, %c0_445] : memref<16x128x128xbf16, #tpu.memory_space<vmem>>, vector<1x128x128xbf16>
    %504 = vector.shape_cast %503 : vector<1x128x128xbf16> to vector<128x128xbf16>
    %cst_446 = arith.constant dense<0.000000e+00> : vector<1x128xf32>
    %505 = tpu.matmul %502, %504, %cst_446 {dimension_numbers = #tpu.dot_dimension_numbers<[1], [0], [0], [1], [0, 0, 1, 1], [], []>} : vector<1x128xbf16>, vector<128x128xbf16>, vector<1x128xf32> -> vector<1x128xf32>
    %506 = arith.addf %501, %505 : vector<1x128xf32>
    %507 = vector.extract_strided_slice %465 {offsets = [8, 0], sizes = [1, 128], strides = [1, 1]} : vector<16x128xbf16> to vector<1x128xbf16>
    %c8_447 = arith.constant 8 : index
    %c0_448 = arith.constant 0 : index
    %c0_449 = arith.constant 0 : index
    %508 = vector.load %arg6[%c8_447, %c0_448, %c0_449] : memref<16x128x128xbf16, #tpu.memory_space<vmem>>, vector<1x128x128xbf16>
    %509 = vector.shape_cast %508 : vector<1x128x128xbf16> to vector<128x128xbf16>
    %cst_450 = arith.constant dense<0.000000e+00> : vector<1x128xf32>
    %510 = tpu.matmul %507, %509, %cst_450 {dimension_numbers = #tpu.dot_dimension_numbers<[1], [0], [0], [1], [0, 0, 1, 1], [], []>} : vector<1x128xbf16>, vector<128x128xbf16>, vector<1x128xf32> -> vector<1x128xf32>
    %511 = arith.addf %506, %510 : vector<1x128xf32>
    %512 = vector.extract_strided_slice %465 {offsets = [9, 0], sizes = [1, 128], strides = [1, 1]} : vector<16x128xbf16> to vector<1x128xbf16>
    %c9_451 = arith.constant 9 : index
    %c0_452 = arith.constant 0 : index
    %c0_453 = arith.constant 0 : index
    %513 = vector.load %arg6[%c9_451, %c0_452, %c0_453] : memref<16x128x128xbf16, #tpu.memory_space<vmem>>, vector<1x128x128xbf16>
    %514 = vector.shape_cast %513 : vector<1x128x128xbf16> to vector<128x128xbf16>
    %cst_454 = arith.constant dense<0.000000e+00> : vector<1x128xf32>
    %515 = tpu.matmul %512, %514, %cst_454 {dimension_numbers = #tpu.dot_dimension_numbers<[1], [0], [0], [1], [0, 0, 1, 1], [], []>} : vector<1x128xbf16>, vector<128x128xbf16>, vector<1x128xf32> -> vector<1x128xf32>
    %516 = arith.addf %511, %515 : vector<1x128xf32>
    %517 = vector.extract_strided_slice %465 {offsets = [10, 0], sizes = [1, 128], strides = [1, 1]} : vector<16x128xbf16> to vector<1x128xbf16>
    %c10_455 = arith.constant 10 : index
    %c0_456 = arith.constant 0 : index
    %c0_457 = arith.constant 0 : index
    %518 = vector.load %arg6[%c10_455, %c0_456, %c0_457] : memref<16x128x128xbf16, #tpu.memory_space<vmem>>, vector<1x128x128xbf16>
    %519 = vector.shape_cast %518 : vector<1x128x128xbf16> to vector<128x128xbf16>
    %cst_458 = arith.constant dense<0.000000e+00> : vector<1x128xf32>
    %520 = tpu.matmul %517, %519, %cst_458 {dimension_numbers = #tpu.dot_dimension_numbers<[1], [0], [0], [1], [0, 0, 1, 1], [], []>} : vector<1x128xbf16>, vector<128x128xbf16>, vector<1x128xf32> -> vector<1x128xf32>
    %521 = arith.addf %516, %520 : vector<1x128xf32>
    %522 = vector.extract_strided_slice %465 {offsets = [11, 0], sizes = [1, 128], strides = [1, 1]} : vector<16x128xbf16> to vector<1x128xbf16>
    %c11_459 = arith.constant 11 : index
    %c0_460 = arith.constant 0 : index
    %c0_461 = arith.constant 0 : index
    %523 = vector.load %arg6[%c11_459, %c0_460, %c0_461] : memref<16x128x128xbf16, #tpu.memory_space<vmem>>, vector<1x128x128xbf16>
    %524 = vector.shape_cast %523 : vector<1x128x128xbf16> to vector<128x128xbf16>
    %cst_462 = arith.constant dense<0.000000e+00> : vector<1x128xf32>
    %525 = tpu.matmul %522, %524, %cst_462 {dimension_numbers = #tpu.dot_dimension_numbers<[1], [0], [0], [1], [0, 0, 1, 1], [], []>} : vector<1x128xbf16>, vector<128x128xbf16>, vector<1x128xf32> -> vector<1x128xf32>
    %526 = arith.addf %521, %525 : vector<1x128xf32>
    %527 = vector.extract_strided_slice %465 {offsets = [12, 0], sizes = [1, 128], strides = [1, 1]} : vector<16x128xbf16> to vector<1x128xbf16>
    %c12_463 = arith.constant 12 : index
    %c0_464 = arith.constant 0 : index
    %c0_465 = arith.constant 0 : index
    %528 = vector.load %arg6[%c12_463, %c0_464, %c0_465] : memref<16x128x128xbf16, #tpu.memory_space<vmem>>, vector<1x128x128xbf16>
    %529 = vector.shape_cast %528 : vector<1x128x128xbf16> to vector<128x128xbf16>
    %cst_466 = arith.constant dense<0.000000e+00> : vector<1x128xf32>
    %530 = tpu.matmul %527, %529, %cst_466 {dimension_numbers = #tpu.dot_dimension_numbers<[1], [0], [0], [1], [0, 0, 1, 1], [], []>} : vector<1x128xbf16>, vector<128x128xbf16>, vector<1x128xf32> -> vector<1x128xf32>
    %531 = arith.addf %526, %530 : vector<1x128xf32>
    %532 = vector.extract_strided_slice %465 {offsets = [13, 0], sizes = [1, 128], strides = [1, 1]} : vector<16x128xbf16> to vector<1x128xbf16>
    %c13_467 = arith.constant 13 : index
    %c0_468 = arith.constant 0 : index
    %c0_469 = arith.constant 0 : index
    %533 = vector.load %arg6[%c13_467, %c0_468, %c0_469] : memref<16x128x128xbf16, #tpu.memory_space<vmem>>, vector<1x128x128xbf16>
    %534 = vector.shape_cast %533 : vector<1x128x128xbf16> to vector<128x128xbf16>
    %cst_470 = arith.constant dense<0.000000e+00> : vector<1x128xf32>
    %535 = tpu.matmul %532, %534, %cst_470 {dimension_numbers = #tpu.dot_dimension_numbers<[1], [0], [0], [1], [0, 0, 1, 1], [], []>} : vector<1x128xbf16>, vector<128x128xbf16>, vector<1x128xf32> -> vector<1x128xf32>
    %536 = arith.addf %531, %535 : vector<1x128xf32>
    %537 = vector.extract_strided_slice %465 {offsets = [14, 0], sizes = [1, 128], strides = [1, 1]} : vector<16x128xbf16> to vector<1x128xbf16>
    %c14_471 = arith.constant 14 : index
    %c0_472 = arith.constant 0 : index
    %c0_473 = arith.constant 0 : index
    %538 = vector.load %arg6[%c14_471, %c0_472, %c0_473] : memref<16x128x128xbf16, #tpu.memory_space<vmem>>, vector<1x128x128xbf16>
    %539 = vector.shape_cast %538 : vector<1x128x128xbf16> to vector<128x128xbf16>
    %cst_474 = arith.constant dense<0.000000e+00> : vector<1x128xf32>
    %540 = tpu.matmul %537, %539, %cst_474 {dimension_numbers = #tpu.dot_dimension_numbers<[1], [0], [0], [1], [0, 0, 1, 1], [], []>} : vector<1x128xbf16>, vector<128x128xbf16>, vector<1x128xf32> -> vector<1x128xf32>
    %541 = arith.addf %536, %540 : vector<1x128xf32>
    %542 = vector.extract_strided_slice %465 {offsets = [15, 0], sizes = [1, 128], strides = [1, 1]} : vector<16x128xbf16> to vector<1x128xbf16>
    %c15_475 = arith.constant 15 : index
    %c0_476 = arith.constant 0 : index
    %c0_477 = arith.constant 0 : index
    %543 = vector.load %arg6[%c15_475, %c0_476, %c0_477] : memref<16x128x128xbf16, #tpu.memory_space<vmem>>, vector<1x128x128xbf16>
    %544 = vector.shape_cast %543 : vector<1x128x128xbf16> to vector<128x128xbf16>
    %cst_478 = arith.constant dense<0.000000e+00> : vector<1x128xf32>
    %545 = tpu.matmul %542, %544, %cst_478 {dimension_numbers = #tpu.dot_dimension_numbers<[1], [0], [0], [1], [0, 0, 1, 1], [], []>} : vector<1x128xbf16>, vector<128x128xbf16>, vector<1x128xf32> -> vector<1x128xf32>
    %546 = arith.addf %541, %545 : vector<1x128xf32>
    %c0_479 = arith.constant 0 : index
    %c0_480 = arith.constant 0 : index
    %547 = vector.load %arg7[%c0_479, %c0_480] : memref<1x128xf32, #tpu.memory_space<vmem>>, vector<1x128xf32>
    %548 = arith.addf %546, %547 : vector<1x128xf32>
    %c0_481 = arith.constant 0 : index
    %c0_482 = arith.constant 0 : index
    %c0_483 = arith.constant 0 : index
    %549 = vector.load %arg8[%c0_481, %c0_482, %c0_483] : memref<1x1x128xf32, #tpu.memory_space<vmem>>, vector<1x1x128xf32>
    %550 = vector.shape_cast %549 : vector<1x1x128xf32> to vector<1x128xf32>
    %551 = vector.shape_cast %548 : vector<1x128xf32> to vector<1x1x128xf32>
    tpu.vector_store %arg8[%c0_481, %c0_482, %c0_483], %551 {strides = array<i32>} : memref<1x1x128xf32, #tpu.memory_space<vmem>>, vector<1x1x128xf32>,
    return
  }
  func.func @transform_0(%arg0: i32) -> (i32, i32, i32) {
    %c0_i32 = arith.constant 0 : i32
    %c0_i32_0 = arith.constant 0 : i32
    %c0_i32_1 = arith.constant 0 : i32
    return %arg0, %c0_i32, %c0_i32_0 : i32, i32, i32
  }
  func.func @transform_1(%arg0: i32) -> (i32, i32, i32) {
    %c0_i32 = arith.constant 0 : i32
    %c0_i32_0 = arith.constant 0 : i32
    %c0_i32_1 = arith.constant 0 : i32
    %c0_i32_2 = arith.constant 0 : i32
    return %c0_i32, %c0_i32_0, %c0_i32_1 : i32, i32, i32
  }
  func.func @transform_2(%arg0: i32) -> (i32, i32) {
    %c0_i32 = arith.constant 0 : i32
    %c0_i32_0 = arith.constant 0 : i32
    %c0_i32_1 = arith.constant 0 : i32
    return %c0_i32, %c0_i32_0 : i32, i32
  }
  func.func @transform_3(%arg0: i32) -> (i32, i32, i32) {
    %c0_i32 = arith.constant 0 : i32
    %c0_i32_0 = arith.constant 0 : i32
    %c0_i32_1 = arith.constant 0 : i32
    %c0_i32_2 = arith.constant 0 : i32
    return %c0_i32, %c0_i32_0, %c0_i32_1 : i32, i32, i32
  }
  func.func @transform_4(%arg0: i32) -> (i32, i32) {
    %c0_i32 = arith.constant 0 : i32
    %c0_i32_0 = arith.constant 0 : i32
    %c0_i32_1 = arith.constant 0 : i32
    return %c0_i32, %c0_i32_0 : i32, i32
  }
  func.func @transform_5(%arg0: i32) -> (i32, i32, i32) {
    %c0_i32 = arith.constant 0 : i32
    %c0_i32_0 = arith.constant 0 : i32
    %c0_i32_1 = arith.constant 0 : i32
    %c0_i32_2 = arith.constant 0 : i32
    return %c0_i32, %c0_i32_0, %c0_i32_1 : i32, i32, i32
  }
  func.func @transform_6(%arg0: i32) -> (i32, i32) {
    %c0_i32 = arith.constant 0 : i32
    %c0_i32_0 = arith.constant 0 : i32
    %c0_i32_1 = arith.constant 0 : i32
    return %c0_i32, %c0_i32_0 : i32, i32
  }
  func.func @transform_7(%arg0: i32) -> (i32, i32, i32) {
    %c0_i32 = arith.constant 0 : i32
    %c0_i32_0 = arith.constant 0 : i32
    %c0_i32_1 = arith.constant 0 : i32
    return %arg0, %c0_i32, %c0_i32_0 : i32, i32, i32
  }
}

</mosaic_0001>

<bundles_post_ra>
// kernel: cnn_forward.1
= control target key start
LH: loop header
LB: loop body
LE: loop exit
PB: predicated region body
PF: predicated region fallthrough
CT: control target
= control target key end

     0   :  { %12 = vsyncpa [#allocation7], 0  ;;  %s27408_s0 = inlined_call_operand.vmem [shape: bf16[2,400,16], index: 0, kind: input, shape index: {}]   ;;  %s27409_s1 = inlined_call_operand.vmem [shape: bf16[25,16,128], index: 1, kind: input, shape index: {}]   ;;  %s27410_s2 = inlined_call_operand.vmem [shape: f32[1,128], index: 2, kind: input, shape index: {}]   ;;  %s27411_s3 = inlined_call_operand.hbm [shape: bf16[25,128,128], index: 3, kind: input, shape index: {}]   ;;  %s27412_s4 = inlined_call_operand.vmem [shape: f32[1,128], index: 4, kind: input, shape index: {}]   ;;  %s27413_s5 = inlined_call_operand.vmem [shape: bf16[16,128,128], index: 5, kind: input, shape index: {}]   ;;  %s27414_s6 = inlined_call_operand.vmem [shape: f32[1,128], index: 6, kind: input, shape index: {}]   ;;  %s27415_s7 = inlined_call_operand.hbm [shape: f32[2,1,128], index: 7, kind: output, shape index: {}]  }
   0x1   :  { %13 = vsyncpa [#allocation8], 0 }
   0x2   :  { %15 = vsyncpa [#allocation8 + $0x1], 0  ;;  %s23331_s24 = smov 0   ;;  %s23333_s25 = smov 0  }
   0x3   :  { %s23335_s26 = smov 0   ;;  %s23337_s27 = smov 0  }
   0x4 LB: > { %s23352_s28 = sadd.s32 4294967295, %s23282_s27   ;;  %s16863_s29 = sadd.s32 4294967294, %s23282_s27   ;;  %s23282_s27 = sphi %s23337_s27, %s27809_s27   ;;  %s23278_s26 = sphi %s23335_s26, %s27808_s26   ;;  %s23274_s25 = sphi %s23333_s25, %s27807_s25   ;;  %s23270_s24 = sphi %s23331_s24, %s27806_s24  }
   0x5   : > { %s23356_s30 = sadd.s32 1, %s23282_s27   ;;  %s180_s8 = sadd.s32 1, %s23278_s26 }
   0x6   : > { %s177_s9 = ssub.s32 %s23282_s27, %s23356_s30  ;;  %p190_p0 = scmp.ne.s32.totalorder %s23278_s26, %s23274_s25 }
   0x7   : > { %p178_p1 = scmp.eq.s32.totalorder %s177_s9, 0  ;;  %p191_p2 = scmp.eq.s32.totalorder %s23352_s28, 1 }
   0x8   : > { %p196_p3 = scmp.ne.s32.totalorder %s23274_s25, %s23270_s24  ;;  %p197_p4 = scmp.eq.s32.totalorder %s16863_s29, 1 }
   0x9   : > { %s23367_s10 = scalar_select %p178_p1, %s23278_s26, %s180_s8  }
   0xa   : > { %p23369_p5 = por %p191_p2, %p190_p0  ;;  %p23373_p6 = por %p197_p4, %p196_p3 }
   0xb   : > { %p16864_p7 = scmp.ge.s32.totalorder %s23282_s27, 1  ;;  %p204_p8 = scmp.lt.s32.totalorder %s23282_s27, 3 }
   0xc   : > { %s27579_s11 = scalar_select %p23369_p5, 1, 0 }
   0xd   : > { %s27580_s12 = scalar_select %p23373_p6, 1, 0 }
   0xe   : > { %p27416_p9 = scmp.eq.s32.totalorder %s23352_s28, 0  ;;  %p23380_p10 = pnand %p16864_p7, %p204_p8 }
   0xf   : > { %s23284_s14 = smov [#allocation6]   ;;  %s23188_s19 = scalar_lea.hbm %s27411_s3, 25600 }
  0x10   : > { %s27581_s13 = scalar_select %p23380_p10, 1, 0 }
  0x11   : > { %s222_s15 = sshll.u32 %s23284_s14, 4  ;;  %p22560_p11 = pneg %p23380_p10  ;;  %s223_s15 = int_to_ptr.vmem [resolvable:$true] %s222_s15 }
  0x12   : > { %p23189_p13 = scmp.ne.s32.totalorder %s27411_s3, %s23188_s19  ;;  %p23195_p3 = scmp.lt.u32.totalorder %s23188_s19, %s27411_s3 }
  0x13   : > { %p23388_p12 = pnand %p27416_p9, %p22560_p11 }
  0x15   : > { %p23190_p0 = pneg %p23388_p12 }
  0x17   : > { %p23191_p1 = pnand %p23190_p0, %p23189_p13 }
  0x19   : > { %p23192_p2 = pneg %p23191_p1 }
  0x1b   : > { %p23197_p4 = pnand %p23195_p3, %p23192_p2 }
  0x1d   : > { %23200 = shalt.err (!%p23197_p4)
}
  0x1e   : > { %s23201_s29 = scalar_lea.vmem %s223_s15, 25600  ;;  %p23209_p9 = scmp.lt.s32.totalorder %s223_s15, %s223_s15 }
  0x1f   : > { %p23202_p7 = scmp.ne.s32.totalorder %s223_s15, %s23201_s29  ;;  %p23210_p6 = scmp.lt.s32.totalorder %s23201_s29, %s23201_s29 }
  0x21   : > { %p23204_p8 = pnand %p23202_p7, %p23190_p0  ;;  %p23211_p5 = por %p23210_p6, %p23209_p9 }
  0x23   : > { %p23205_p11 = pneg %p23204_p8 }
  0x25   : > { %p23212_p10 = pnand %p23211_p5, %p23205_p11 }
  0x27   : > { %23215 = shalt.err (!%p23212_p10)
}
  0x28   : > { %s23285_s8 = smov 64   ;;  %s23286_s9 = smov 4  }
  0x29   : > { %22563 = dma.hbm_to_vmem [thread:$0]  (!%p23388_p12), %s27411_s3, 25600, %s223_s15, [#allocation7], %s23285_s8, %s23285_s8, %s23286_s9  }
  0x2a   : > { %p27583_p13 = scmp.ne.s32.totalorder %s27581_s13, 0 }
  0x2c   : > { %255 = sbr.rel (%p27583_p13) target bundleno = 3653 (0xe45), region = 48 }
  0x33   : > { %p27584_p1 = scmp.eq.s32.totalorder %s23352_s28, 0 }
  0x35   : > { %23261 = dma.done.wait (%p27584_p1), [#allocation7], 25600   ;;  %p27585_p0 = pmov %p27584_p1 }
  0x36   : > { %p286_p5 = scmp.lt.s32.totalorder %s23352_s28, 1  ;;  %v22608_v0 = vld [vmem:[%s27409_s1 + $0x20] sm:$0xff]   ;;  %vm604_vm0 = vcmask 130048   ;;  %vm1850_vm1 = vcmask 1045504   ;;  %v22614_v7 = vld [vmem:[%s27409_s1 + $0x30] sm:$0xff]   ;;  %v23467_v23 = vld [vmem:[%s27409_s1 + $0x28] sm:$0xff]  }
  0x37   : > { %23263 = vsyncadd (%p27585_p0), [#allocation7], 4294941696  ;;  %19361 = vmatprep.subr.bf16.mxu0 %v22608_v0  ;;  %v22637_v31 = vld [vmem:[%s27409_s1 + $0x8] sm:$0xff]   ;;  %vm438_vm2 = vsmask.f32 7424  ;;  %vm1108_vm4 = vcmask 1046528  }
  0x38   : > { %s287_s18 = scalar_select %p286_p5, %s23352_s28, 1  ;;  %19362 = vmatpush3.bf16.msra.mxu0 %v22608_v0  ;;  %19193 = vmatprep.subr.bf16.mxu1 %v22637_v31  ;;  %vm2379_vm3 = vsmask.f32 5376  ;;  %vm3128_vm5 = vcmask 1044480   ;;  %vm1454_vm6 = vsmask.f32 6400 }
  0x39   : > { %19403 = vmatprep.subr.bf16.mxu0 %v22614_v7  ;;  %19194 = vmatpush3.bf16.msra.mxu1 %v22637_v31  ;;  %vm3476_vm7 = vsmask.f32 4352  ;;  %vm23289_vm8 = vmmov 0   ;;  %s284_s14 = sand.u32 1, %s23274_s25   ;;  %p27804_p9 = scmp.ne.s32.totalorder %s27579_s11, 0 }
  0x3a   : > { %s22553_s19 = smul.u32 200, %s287_s18  ;;  %s285_s20 = scalar_lea.vmem [#allocation9], %s284_s14 }
  0x3b   : > { %s16796_s16 = sshll.u32 %s285_s20, 4  ;;  %s16784_s13 = scalar_lea.sflag [#allocation8], %s284_s14  ;;  %s27368_s16 = int_to_ptr.vmem [resolvable:$true] %s16796_s16 }
  0x3c   : > { %s23419_s21 = scalar_lea.vmem %s27408_s0, %s22553_s19  ;;  %s18171_s19 = sshll.u32 %s23352_s28, 4 }
  0x3d   : > { %v293_v1 = vld [vmem:[%s23419_s21 + $0x4] sm:$0xf]  ;;  %v23426_v2 = vld [vmem:[%s23419_s21 + $0x8] sm:$0xff]   ;;  %v1843_v3 = vld [vmem:[%s23419_s21] sm:$0xc]  ;;  %s27366_s22 = scalar_lea.hbm %s27415_s7, %s18171_s19  ;;  %s23216_s28 = scalar_lea.vmem %s27368_s16, 16 }
  0x3e   : > { %v16985_v4 = vcombine.low %v1843_v3, %v293_v1  ;;  %v1852_v5 = vrot.slane %v23426_v2, 2  ;;  %v23431_v6 = vld [vmem:[%s23419_s21 + $0x10] sm:$0xff]   ;;  %v23438_v10 = vld [vmem:[%s23419_s21 + $0x18] sm:$0xff]   ;;  %v23441_v11 = vld [vmem:[%s23419_s21 + $0x20] sm:$0xff]   ;;  %v27463_v59 = vshll.u32 %v23426_v2, 16  ;;  %v27452_v63 = vshrl.u32 %v23426_v2, 16  ;;  %p23217_p6 = scmp.ne.s32.totalorder %s27368_s16, %s23216_s28 }
  0x3f   : > { %v1854_v9 = vrot.slane %v23431_v6, 2  ;;  %v1856_v14 = vrot.slane %v23438_v10, 2  ;;  %v23447_v15 = vld [vmem:[%s23419_s21 + $0x28] sm:$0xff]   ;;  %v1858_v17 = vrot.slane %v23441_v11, 2  ;;  %v23457_v20 = vld [vmem:[%s23419_s21 + $0x30] sm:$0xff]   ;;  %v23461_v22 = vld [vmem:[%s23419_s21 + $0x38] sm:$0xff]  }
  0x40   : > { %v1851_v8 = vrot.slane %v16985_v4, 2  ;;  %27586 = vst [vmem:[#allocation12_spill] sm:$0xff] %v23447_v15  ;;  %v1860_v18 = vrot.slane %v23447_v15, 2  ;;  %27587 = vst [vmem:[#allocation13_spill] sm:$0xff] %v23457_v20  ;;  %v1862_v24 = vrot.slane %v23457_v20, 2  ;;  %v1864_v25 = vrot.slane %v23461_v22, 2  ;;  %p23218_p10 = pnand %p23217_p6, %p27804_p9 }
  0x41   : > { %v1855_v13 = vsel %vm1850_vm1, %v1852_v5, %v1854_v9  ;;  %v1857_v16 = vsel %vm1850_vm1, %v1854_v9, %v1856_v14  ;;  %v1859_v19 = vsel %vm1850_vm1, %v1856_v14, %v1858_v17  ;;  %27588 = vst [vmem:[#allocation14_spill] sm:$0xff] %v23461_v22  ;;  %v23475_v27 = vld [vmem:[%s23419_s21 + $0x40] sm:$0xff]   ;;  %v23480_v30 = vld [vmem:[%s23419_s21 + $0x48] sm:$0xff]   ;;  %v23491_v34 = vld [vmem:[%s23419_s21 + $0x50] sm:$0xff]   ;;  %v449_v4 = vrot.slane %v27463_v59, 1  ;;  %s23290_s23 = smov [#allocation9]  }
  0x42   : > { %v1853_v12 = vsel %vm1850_vm1, %v1851_v8, %v1852_v5  ;;  %v1861_v21 = vsel %vm1850_vm1, %v1858_v17, %v1860_v18  ;;  %v1863_v26 = vsel %vm1850_vm1, %v1860_v18, %v1862_v24  ;;  %27589 = vst [vmem:[#allocation15_spill] sm:$0xff] %v23475_v27  ;;  %v292_v28 = vld [vmem:[%s23419_s21] sm:$0xf]  ;;  %v1865_v29 = vsel %vm1850_vm1, %v1862_v24, %v1864_v25  ;;  %v2229_v35 = vld [vmem:[%s23419_s21 + $0x8] sm:$0xc]  ;;  %v23507_v47 = vld [vmem:[%s23419_s21 + $0x58] sm:$0xff]   ;;  %p23219_p12 = pneg %p23218_p10 }
  0x43   : > { %19363 = vmatprep.mubr.msk.bf16.mxu0 %vm604_vm0, %v1853_v12  ;;  %27590 = vst [vmem:[#allocation16_spill] sm:$0xff] %v23480_v30  ;;  %v23486_v32 = vcombine.low %v292_v28, %v293_v1  ;;  %v1866_v33 = vrot.slane %v23475_v27, 2  ;;  %27591 = vst [vmem:[#allocation17_spill] sm:$0xff] %v23491_v34  ;;  %v2230_v36 = vld [vmem:[%s23419_s21 + $0xc] sm:$0xf]  ;;  %v1868_v37 = vrot.slane %v23480_v30, 2  ;;  %v453_v18 = vor.u32 %v27452_v63, %v449_v4 }
  0x44   : > { %19364 = vmatmul.mubr.msk.bf16.vlgmr.msra.gmra.mrb[0].mxu0 %vm604_vm0, %v1855_v13  ;;  %v2231_v38 = vld [vmem:[%s23419_s21 + $0x10] sm:$0xf]  ;;  %v2232_v39 = vld [vmem:[%s23419_s21 + $0x14] sm:$0xf]  ;;  %v23498_v40 = vcombine.low %v2229_v35, %v2230_v36  ;;  %v2233_v41 = vld [vmem:[%s23419_s21 + $0x18] sm:$0xf] }
  0x45   : > { %19404 = vmatpush3.bf16.msra.mxu0 %v22614_v7  ;;  %19367 = vmatprep.mubr.msk.bf16.mxu0 %vm604_vm0, %v1857_v16  ;;  %v2234_v42 = vld [vmem:[%s23419_s21 + $0x1c] sm:$0xf]  ;;  %v1867_v43 = vsel %vm1850_vm1, %v1864_v25, %v1866_v33  ;;  %v1870_v44 = vrot.slane %v23491_v34, 2  ;;  %v442_v45 = vshll.u32 %v23486_v32, 16  ;;  %v1869_v46 = vsel %vm1850_vm1, %v1866_v33, %v1868_v37  ;;  %27592 = vst [vmem:[#allocation18_spill] sm:$0xff] %v23507_v47  ;;  %v23514_v51 = vld [vmem:[%s23419_s21 + $0x60] sm:$0xff]  }
  0x46   : > { %19445 = vmatprep.subr.bf16.mxu0 %v23467_v23  ;;  %v23509_v48 = vcombine.low %v2231_v38, %v2232_v39  ;;  %v2235_v49 = vld [vmem:[%s23419_s21 + $0x20] sm:$0xf]  ;;  %v2236_v50 = vld [vmem:[%s23419_s21 + $0x24] sm:$0xf]  ;;  %27593 = vst [vmem:[#allocation19_spill] sm:$0xff] %v23514_v51  ;;  %v23516_v52 = vcombine.low %v2233_v41, %v2234_v42  ;;  %v440_v53 = vshrl.u32 %v23486_v32, 16 }
  0x47   : > { %v2381_v54 = vshrl.u32 %v23498_v40, 16  ;;  %v2384_v55 = vshll.u32 %v23498_v40, 16  ;;  %v1871_v56 = vsel %vm1850_vm1, %v1868_v37, %v1870_v44  ;;  %v23524_v57 = vcombine.low %v2235_v49, %v2236_v50  ;;  %v2237_v14 = vld [vmem:[%s23419_s21 + $0x28] sm:$0xf]  ;;  %v2238_v16 = vld [vmem:[%s23419_s21 + $0x2c] sm:$0xf] }
  0x48   : > { %v444_v58 = vrot.slane %v442_v45, 1  ;;  %v1872_v60 = vrot.slane %v23507_v47, 2  ;;  %v27451_v61 = vshrl.u32 %v23509_v48, 16  ;;  %v27450_v62 = vshll.u32 %v23509_v48, 16  ;;  %v2239_v25 = vld [vmem:[%s23419_s21 + $0x30] sm:$0xf] }
  0x49   : > { %v27419_v0 = vrot.slane %v23514_v51, 2  ;;  %v27449_v1 = vshrl.u32 %v23516_v52, 16  ;;  %v2383_v5 = vrot.slane %v2381_v54, 2  ;;  %v2386_v7 = vrot.slane %v2384_v55, 3  ;;  %v2241_v36 = vld [vmem:[%s23419_s21 + $0x38] sm:$0xf] }
  0x4a   : > { %v445_v3 = vor.u32 %v444_v58, %v440_v53  ;;  %v27448_v8 = vshll.u32 %v23516_v52, 16  ;;  %v27462_v9 = vshll.u32 %v23431_v6, 16  ;;  %v27447_v12 = vshrl.u32 %v23524_v57, 16  ;;  %v2242_v37 = vld [vmem:[%s23419_s21 + $0x3c] sm:$0xf]  ;;  %v22656_v45 = vld [vmem:[%s27409_s1] sm:$0xff]  }
  0x4b   : > { %v27444_v13 = vshll.u32 %v23524_v57, 16  ;;  %v2394_v24 = vrot.slane %v27450_v62, 3  ;;  %v2400_v28 = vrot.slane %v27449_v1, 2  ;;  %v27461_v31 = vshrl.u32 %v23431_v6, 16  ;;  %19235 = vmatprep.subr.bf16.mxu1 %v22656_v45  ;;  %v2261_v62 = vld [vmem:[%s23419_s21 + $0x88] sm:$0xf] }
  0x4c   : > { %19368 = vmatmul.mubr.msk.bf16.gmra.mrb[4].mxu0 %vm604_vm0, %v1859_v19  ;;  %v450_v17 = vsel %vm438_vm2, %v445_v3, %v449_v4  ;;  %v1873_v19 = vsel %vm1850_vm1, %v1870_v44, %v1872_v60  ;;  %v2403_v33 = vrot.slane %v27448_v8, 3  ;;  %v23560_v35 = vcombine.low %v2237_v14, %v2238_v16  ;;  %v2243_v3 = vld [vmem:[%s23419_s21 + $0x40] sm:$0xf]  ;;  %v2244_v4 = vld [vmem:[%s23419_s21 + $0x44] sm:$0xf]  ;;  %s23220_s29 = sshll.u32 %s23290_s23, 4  ;;  %s23221_s29 = int_to_ptr.vmem [resolvable:$false] %s23220_s29 }
  0x4d   : > { %19371 = vmatprep.mubr.msk.bf16.mxu0 %vm604_vm0, %v1861_v21  ;;  %v2391_v21 = vrot.slane %v27451_v61, 2  ;;  %19195 = vmatprep.mubr.msk.bf16.mxu1 %vm604_vm0, %v450_v17  ;;  %v27425_v39 = vshll.u32 %v23438_v10, 16  ;;  %v2387_v41 = vor.u32 %v2386_v7, %v2383_v5  ;;  %v2409_v42 = vrot.slane %v27447_v12, 2  ;;  %v23746_v61 = vld [vmem:[%s23419_s21 + $0x68] sm:$0xff]   ;;  %s23222_s8 = scalar_lea.vmem %s23221_s29, 32  ;;  %p23223_p2 = scmp.lt.s32.totalorder %s27368_s16, %s23221_s29 }
  0x4e   : > { %v27426_v53 = vshrl.u32 %v23438_v10, 16  ;;  %v27421_v54 = vshll.u32 %v23441_v11, 16  ;;  %v27424_v55 = vshrl.u32 %v23441_v11, 16  ;;  %v23585_v58 = vcombine.low %v2241_v36, %v2242_v37  ;;  %v2262_v63 = vld [vmem:[%s23419_s21 + $0x8c] sm:$0xf]  ;;  %p23224_p3 = scmp.lt.s32.totalorder %s23222_s8, %s23216_s28 }
  0x4f   : > { %v465_v50 = vrot.slane %v27425_v39, 1  ;;  %v1875_v7 = vsel %vm1850_vm1, %v1872_v60, %v27419_v0  ;;  %v27435_v14 = vshll.u32 %v23560_v35, 16  ;;  %v27420_v60 = vshll.u32 %v23447_v15, 16 }
  0x50   : > { %v473_v17 = vrot.slane %v27421_v54, 1  ;;  %v2250_v54 = vld [vmem:[%s23419_s21 + $0x5c] sm:$0xf]  ;;  %v27454_v12 = vshll.u32 %v23507_v47, 16  ;;  %p23225_p4 = por %p23224_p3, %p23223_p2 }
  0x51   : > { %v469_v16 = vor.u32 %v27426_v53, %v465_v50  ;;  %v2251_v53 = vld [vmem:[%s23419_s21 + $0x60] sm:$0xf] }
  0x52   : > { %v477_v37 = vor.u32 %v27424_v55, %v473_v17  ;;  %p23226_p7 = pnand %p23225_p4, %p23219_p12 }
  0x53   : > { %v474_v36 = vsel %vm438_vm2, %v469_v16, %v473_v17  ;;  %v2249_v17 = vld [vmem:[%s23419_s21 + $0x58] sm:$0xf] }
  0x54   : > { %19372 = vmatmul.mubr.msk.bf16.gmra.mrb[8].mxu0 %vm604_vm0, %v1863_v26  ;;  %v457_v26 = vrot.slane %v27462_v9, 1  ;;  %v23798_v9 = vld [vmem:[%s23419_s21 + $0x78] sm:$0xff]  }
  0x55   : > { %19375 = vmatprep.mubr.msk.bf16.mxu0 %vm604_vm0, %v1865_v29  ;;  %v2240_v29 = vld [vmem:[%s23419_s21 + $0x34] sm:$0xf] }
  0x56   : > { %v458_v38 = vsel %vm438_vm2, %v453_v18, %v457_v26  ;;  %v461_v44 = vor.u32 %v27461_v31, %v457_v26  ;;  %v23577_v49 = vcombine.low %v2239_v25, %v2240_v29  ;;  %v2246_v25 = vld [vmem:[%s23419_s21 + $0x4c] sm:$0xf]  ;;  %v2266_v31 = vld [vmem:[%s23419_s21 + $0x9c] sm:$0xf] }
  0x57   : > { %19196 = vmatmul.mubr.msk.bf16.vlgmr.msra.gmra.mrb[0].mxu1 %vm604_vm0, %v458_v38  ;;  %v2247_v38 = vld [vmem:[%s23419_s21 + $0x50] sm:$0xf] }
  0x58   : > { %v466_v5 = vsel %vm438_vm2, %v461_v44, %v465_v50  ;;  %19236 = vmatpush3.bf16.msra.mxu1 %v22656_v45  ;;  %v27431_v29 = vshll.u32 %v23577_v49, 16  ;;  %v2421_v44 = vrot.slane %v27435_v14, 3  ;;  %v27428_v45 = vshll.u32 %v23585_v58, 16 }
  0x59   : > { %19199 = vmatprep.mubr.msk.bf16.mxu1 %vm604_vm0, %v466_v5  ;;  %v23623_v50 = vcombine.low %v2243_v3, %v2244_v4  ;;  %v27422_v5 = vshll.u32 %v23457_v20, 16 }
  0x5a   : > { %v2430_v4 = vrot.slane %v27431_v29, 3 }
  0x5c   : > { %19376 = vmatmul.mubr.msk.bf16.gmra.mrb[12].mxu0 %vm604_vm0, %v1867_v43  ;;  %v2412_v43 = vrot.slane %v27444_v13, 3  ;;  %v27460_v13 = vshrl.u32 %v23480_v30, 16 }
  0x5d   : > { %19379 = vmatprep.mubr.msk.bf16.mxu0 %vm604_vm0, %v1869_v46  ;;  %v2395_v46 = vor.u32 %v2394_v24, %v2391_v21  ;;  %v27432_v21 = vshrl.u32 %v23577_v49, 16  ;;  %v2245_v24 = vld [vmem:[%s23419_s21 + $0x48] sm:$0xf] }
  0x5e   : > { %v23604_v26 = vor.u32 %v2412_v43, %v2409_v42  ;;  %v481_v42 = vrot.slane %v27420_v60, 1  ;;  %v27423_v43 = vshrl.u32 %v23447_v15, 16  ;;  %v23634_v60 = vcombine.low %v2245_v24, %v2246_v25 }
  0x5f   : > { %v2396_v18 = vsel %vm2379_vm3, %v2387_v41, %v2395_v46  ;;  %v2248_v41 = vld [vmem:[%s23419_s21 + $0x54] sm:$0xf]  ;;  %19200 = vmatmul.mubr.msk.bf16.gmra.mrb[4].mxu1 %vm604_vm0, %v474_v36  ;;  %v2427_v16 = vrot.slane %v27432_v21, 2  ;;  %v27429_v24 = vshll.u32 %v23461_v22, 16  ;;  %v27437_v21 = vshrl.u32 %v23475_v27, 16 }
  0x60   : > { %v482_v0 = vsel %vm438_vm2, %v477_v37, %v481_v42  ;;  %v485_v3 = vor.u32 %v27423_v43, %v481_v42  ;;  %v27433_v37 = vshrl.u32 %v23623_v50, 16  ;;  %v23651_v42 = vcombine.low %v2247_v38, %v2248_v41  ;;  %v2252_v38 = vld [vmem:[%s23419_s21 + $0x64] sm:$0xf] }
  0x61   : > { %19203 = vmatprep.mubr.msk.bf16.mxu1 %vm604_vm0, %v482_v0  ;;  %v2439_v0 = vrot.slane %v27428_v45, 3  ;;  %v23654_v43 = vcombine.low %v2249_v17, %v2250_v54  ;;  %v497_v39 = vrot.slane %v27429_v24, 1  ;;  %v27436_v54 = vshrl.u32 %v23461_v22, 16  ;;  %v2253_v45 = vld [vmem:[%s23419_s21 + $0x68] sm:$0xf] }
  0x62   : > { %v27434_v17 = vshll.u32 %v23475_v27, 16  ;;  %v2254_v24 = vld [vmem:[%s23419_s21 + $0x6c] sm:$0xf]  ;;  %v2445_v29 = vrot.slane %v27433_v37, 2 }
  0x64   : > { %19380 = vmatmul.mubr.msk.bf16.gmra.mrb[16].mxu0 %vm604_vm0, %v1871_v56  ;;  %v27440_v56 = vshrl.u32 %v23560_v35, 16 }
  0x65   : > { %19383 = vmatprep.mubr.msk.bf16.mxu0 %vm604_vm0, %v1873_v19  ;;  %v2404_v19 = vor.u32 %v2403_v33, %v2400_v28  ;;  %v27430_v33 = vshrl.u32 %v23585_v58, 16 }
  0x66   : > { %v2418_v28 = vrot.slane %v27440_v56, 2  ;;  %v27455_v56 = vshll.u32 %v23491_v34, 16 }
  0x67   : > { %v2436_v36 = vrot.slane %v27430_v33, 2 }
  0x68   : > { %v2422_v25 = vor.u32 %v2421_v44, %v2418_v28  ;;  %v23663_v28 = vld [vmem:[%s27409_s1 + $0x38] sm:$0xff]   ;;  %v27441_v44 = vshrl.u32 %v23634_v60, 16 }
  0x6c   : > { %19384 = vmatmul.mubr.msk.bf16.gmra.mrb[20].mxu0 %vm604_vm0, %v1875_v7  ;;  %v2405_v7 = vsel %vm2379_vm3, %v2395_v46, %v2404_v19  ;;  %v489_v46 = vrot.slane %v27422_v5, 1  ;;  %v27438_v5 = vshll.u32 %v23623_v50, 16 }
  0x6d   : > { %19405 = vmatprep.mubr.msk.bf16.mxu0 %vm604_vm0, %v2396_v18  ;;  %v2414_v18 = vsel %vm2379_vm3, %v2404_v19, %v23604_v26  ;;  %v27427_v19 = vshrl.u32 %v23457_v20, 16 }
  0x6e   : > { %v490_v41 = vsel %vm438_vm2, %v485_v3, %v489_v46  ;;  %v27442_v3 = vshll.u32 %v23634_v60, 16  ;;  %v2448_v37 = vrot.slane %v27438_v5, 3  ;;  %v2440_v5 = vor.u32 %v2439_v0, %v2436_v36  ;;  %v2260_v0 = vld [vmem:[%s23419_s21 + $0x84] sm:$0xf] }
  0x6f   : > { %v493_v55 = vor.u32 %v27427_v19, %v489_v46  ;;  %v2431_v19 = vor.u32 %v2430_v4, %v2427_v16  ;;  %v27443_v46 = vshrl.u32 %v23651_v42, 16  ;;  %v27446_v16 = vshrl.u32 %v23654_v43, 16  ;;  %19204 = vmatmul.mubr.msk.bf16.gmra.mrb[8].mxu1 %vm604_vm0, %v490_v41 }
  0x70   : > { %v501_v4 = vor.u32 %v27436_v54, %v497_v39  ;;  %v23696_v41 = vcombine.low %v2251_v53, %v2252_v38  ;;  %v23708_v54 = vcombine.low %v2253_v45, %v2254_v24  ;;  %v2255_v53 = vld [vmem:[%s23419_s21 + $0x70] sm:$0xf]  ;;  %v2256_v38 = vld [vmem:[%s23419_s21 + $0x74] sm:$0xf]  ;;  %v2258_v45 = vld [vmem:[%s23419_s21 + $0x7c] sm:$0xf]  ;;  %v2449_v8 = vor.u32 %v2448_v37, %v2445_v29 }
  0x71   : > { %v498_v33 = vsel %vm438_vm2, %v493_v55, %v497_v39  ;;  %v27439_v55 = vshll.u32 %v23480_v30, 16  ;;  %v2463_v39 = vrot.slane %v27443_v46, 2  ;;  %v2257_v46 = vld [vmem:[%s23419_s21 + $0x78] sm:$0xf]  ;;  %v23739_v1 = vcombine.low %v2255_v53, %v2256_v38 }
  0x72   : > { %19207 = vmatprep.mubr.msk.bf16.mxu1 %vm604_vm0, %v498_v33  ;;  %v2457_v33 = vrot.slane %v27442_v3, 3  ;;  %v23719_v3 = vrot.slane %v27446_v16, 2  ;;  %v27456_v36 = vshrl.u32 %v23696_v41, 16  ;;  %v27457_v16 = vshrl.u32 %v23491_v34, 16 }
  0x73   : > { %v513_v14 = vrot.slane %v27439_v55, 1  ;;  %v27453_v55 = vshll.u32 %v23654_v43, 16  ;;  %v27464_v37 = vshll.u32 %v23708_v54, 16  ;;  %v23754_v53 = vcombine.low %v2257_v46, %v2258_v45 }
  0x74   : > { %19406 = vmatmul.mubr.msk.bf16.vlgmr.msra.gmra.mrb[0].mxu0 %vm604_vm0, %v2405_v7  ;;  %v27445_v7 = vshll.u32 %v23651_v42, 16  ;;  %v2450_v45 = vsel %vm2379_vm3, %v2440_v5, %v2449_v8 }
  0x75   : > { %19446 = vmatpush3.bf16.msra.mxu0 %v23467_v23  ;;  %19409 = vmatprep.mubr.msk.bf16.mxu0 %vm604_vm0, %v2414_v18  ;;  %v505_v23 = vrot.slane %v27434_v17, 1  ;;  %v2423_v18 = vsel %vm2379_vm3, %v23604_v26, %v2422_v25  ;;  %v2454_v26 = vrot.slane %v27441_v44, 2  ;;  %v517_v29 = vor.u32 %v27460_v13, %v513_v14 }
  0x76   : > { %19487 = vmatprep.subr.bf16.mxu0 %v23663_v28  ;;  %v2466_v44 = vrot.slane %v27445_v7, 3  ;;  %v27470_v13 = vshll.u32 %v23746_v61, 16 }
  0x77   : > { %v509_v17 = vor.u32 %v27437_v21, %v505_v23  ;;  %v2432_v21 = vsel %vm2379_vm3, %v2422_v25, %v2431_v19  ;;  %v506_v24 = vsel %vm438_vm2, %v501_v4, %v505_v23  ;;  %v2259_v25 = vld [vmem:[%s23419_s21 + $0x80] sm:$0xf]  ;;  %v27458_v23 = vshll.u32 %v23696_v41, 16 }
  0x78   : > { %v27459_v4 = vshrl.u32 %v23708_v54, 16  ;;  %19208 = vmatmul.mubr.msk.bf16.gmra.mrb[12].mxu1 %vm604_vm0, %v506_v24  ;;  %v529_v24 = vrot.slane %v27454_v12, 1  ;;  %v23772_v46 = vcombine.low %v2259_v25, %v2260_v0  ;;  %v27465_v12 = vshrl.u32 %v23739_v1, 16 }
  0x79   : > { %v514_v7 = vsel %vm438_vm2, %v509_v17, %v513_v14  ;;  %v521_v17 = vrot.slane %v27455_v56, 1  ;;  %v27466_v56 = vshll.u32 %v23514_v51, 16  ;;  %v27468_v25 = vshrl.u32 %v23507_v47, 16 }
  0x7a   : > { %19211 = vmatprep.mubr.msk.bf16.mxu1 %vm604_vm0, %v514_v7  ;;  %v23766_v7 = vrot.slane %v27458_v23, 3  ;;  %v23770_v14 = vrot.slane %v27459_v4, 2  ;;  %v27469_v4 = vshrl.u32 %v23514_v51, 16  ;;  %v23806_v59 = vrot.slane %v27465_v12, 2 }
  0x7b   : > { %v525_v38 = vor.u32 %v27457_v16, %v521_v17  ;;  %v23778_v16 = vcombine.low %v2261_v62, %v2262_v63  ;;  %v522_v23 = vsel %vm438_vm2, %v517_v29, %v521_v17  ;;  %v23790_v62 = vld [vmem:[%s23419_s21 + $0x70] sm:$0xff]   ;;  %v2467_v63 = vor.u32 %v2466_v44, %v2463_v39  ;;  %v23827_v17 = vld [vmem:[%s23419_s21 + $0x80] sm:$0xff]  }
  0x7c   : > { %19410 = vmatmul.mubr.msk.bf16.gmra.mrb[4].mxu0 %vm604_vm0, %v2423_v18  ;;  %v23737_v18 = vrot.slane %v27453_v55, 3  ;;  %v2458_v55 = vor.u32 %v2457_v33, %v2454_v26  ;;  %v2263_v26 = vld [vmem:[%s23419_s21 + $0x90] sm:$0xf]  ;;  %v2264_v33 = vld [vmem:[%s23419_s21 + $0x94] sm:$0xf]  ;;  %v537_v44 = vrot.slane %v27466_v56, 1  ;;  %v533_v12 = vor.u32 %v27468_v25, %v529_v24 }
  0x7d   : > { %19413 = vmatprep.mubr.msk.bf16.mxu0 %vm604_vm0, %v2432_v21  ;;  %v2441_v21 = vsel %vm2379_vm3, %v2431_v19, %v2440_v5  ;;  %v23762_v19 = vrot.slane %v27456_v36, 2  ;;  %v27467_v36 = vshll.u32 %v23739_v1, 16  ;;  %v27473_v5 = vshrl.u32 %v23754_v53, 16 }
  0x7e   : > { %v530_v0 = vsel %vm438_vm2, %v525_v38, %v529_v24  ;;  %v23802_v38 = vrot.slane %v27464_v37, 3  ;;  %v541_v29 = vor.u32 %v27469_v4, %v537_v44  ;;  %v545_v56 = vrot.slane %v27470_v13, 1  ;;  %v2267_v4 = vld [vmem:[%s23419_s21 + $0xa0] sm:$0xf]  ;;  %v23846_v13 = vld [vmem:[%s23419_s21 + $0x88] sm:$0xff]  }
  0x7f   : > { %v23814_v39 = vrot.slane %v27467_v36, 3  ;;  %v23831_v36 = vrot.slane %v27473_v5, 2  ;;  %v23841_v25 = vcombine.low %v2263_v26, %v2264_v33  ;;  %27596 = vst [vmem:[#allocation20_spill] sm:$0xff] %v23846_v13  ;;  %v2468_v51 = vsel %vm2379_vm3, %v2458_v55, %v2467_v63 }
  0x80   : > { %19212 = vmatmul.mubr.msk.bf16.gmra.mrb[16].mxu1 %vm604_vm0, %v522_v23  ;;  %v2268_v23 = vld [vmem:[%s23419_s21 + $0xa4] sm:$0xf]  ;;  %v27597_v5 = vshll.u32 %v23772_v46, 16  ;;  %v27482_v34 = vshll.u32 %v23790_v62, 16  ;;  %v2476_v26 = vor.u32 %v23737_v18, %v23719_v3  ;;  %v538_v33 = vsel %vm438_vm2, %v533_v12, %v537_v44  ;;  %v23873_v12 = vld [vmem:[%s23419_s21 + $0x98] sm:$0xf] }
  0x81   : > { %19215 = vmatprep.mubr.msk.bf16.mxu1 %vm604_vm0, %v530_v0  ;;  %v27594_v0 = vshll.u32 %v23754_v53, 16  ;;  %v334_v18 = vld [vmem:[%s23419_s21 + $0x9c] sm:$0x7]  ;;  %v27488_v44 = vshrl.u32 %v23841_v25, 16  ;;  %v23882_v30 = vcombine.low %v2267_v4, %v2268_v23  ;;  %v27601_v23 = vshrl.u32 %v23790_v62, 16 }
  0x82   : > { %v23851_v47 = vrot.slane %v27597_v5, 3  ;;  %v2477_v4 = vsel %vm2379_vm3, %v2467_v63, %v2476_v26  ;;  %v27602_v3 = vshll.u32 %v23841_v25, 16  ;;  %v27604_v20 = vshll.u32 %v23827_v17, 16 }
  0x83   : > { %v23835_v37 = vrot.slane %v27594_v0, 3  ;;  %v27495_v15 = vshrl.u32 %v23827_v17, 16  ;;  %v27494_v22 = vshrl.u32 %v23846_v13, 16  ;;  %v2494_v63 = vor.u32 %v23802_v38, %v23770_v14 }
  0x84   : > { %19414 = vmatmul.mubr.msk.bf16.gmra.mrb[8].mxu0 %vm604_vm0, %v2441_v21  ;;  %v2265_v21 = vld [vmem:[%s23419_s21 + $0x98] sm:$0xf] }
  0x85   : > { %19417 = vmatprep.mubr.msk.bf16.mxu0 %vm604_vm0, %v2450_v45  ;;  %v2459_v45 = vsel %vm2379_vm3, %v2449_v8, %v2458_v55  ;;  %v27595_v8 = vshrl.u32 %v23772_v46, 16  ;;  %v23853_v0 = vcombine.low %v2265_v21, %v2266_v31  ;;  %v27598_v55 = vshrl.u32 %v23778_v16, 16 }
  0x86   : > { %v27599_v31 = vshll.u32 %v23778_v16, 16  ;;  %v546_v21 = vsel %vm438_vm2, %v541_v29, %v545_v56  ;;  %v553_v29 = vrot.slane %v27482_v34, 1 }
  0x87   : > { %v23839_v24 = vrot.slane %v27595_v8, 2  ;;  %v27483_v8 = vshrl.u32 %v23746_v61, 16  ;;  %v23864_v27 = vrot.slane %v27598_v55, 2 }
  0x88   : > { %v23868_v5 = vrot.slane %v27599_v31, 3  ;;  %19216 = vmatmul.mubr.msk.bf16.gmra.mrb[20].mxu1 %vm604_vm0, %v538_v33  ;;  %v23895_v31 = vld [vmem:[%s23419_s21 + $0x90] sm:$0xff]   ;;  %v557_v33 = vor.u32 %v27601_v23, %v553_v29  ;;  %v27496_v23 = vshrl.u32 %v23798_v9, 16 }
  0x89   : > { %19219 = vmatprep.mubr.msk.bf16.mxu1 %vm604_vm0, %v546_v21  ;;  %v2535_v21 = vrot.slane %v27488_v44, 2  ;;  %v569_v44 = vrot.slane %v27604_v20, 1 }
  0x8c   : > { %19418 = vmatmul.mubr.msk.bf16.gmra.mrb[12].mxu0 %vm604_vm0, %v2459_v45  ;;  %v2485_v45 = vor.u32 %v23766_v7, %v23762_v19  ;;  %v27600_v19 = vshll.u32 %v23798_v9, 16 }
  0x8d   : > { %19421 = vmatprep.mubr.msk.bf16.mxu0 %vm604_vm0, %v2468_v51  ;;  %v549_v51 = vor.u32 %v27483_v8, %v545_v56  ;;  %v2538_v56 = vrot.slane %v27602_v3, 3  ;;  %v23906_v8 = vcombine.low %v23873_v12, %v334_v18  ;;  %v27605_v18 = vshll.u32 %v23846_v13, 16 }
  0x8e   : > { %v561_v7 = vrot.slane %v27600_v19, 1  ;;  %v2486_v34 = vsel %vm2379_vm3, %v2476_v26, %v2485_v45  ;;  %v27603_v19 = vshrl.u32 %v23853_v0, 16 }
  0x8f   : > { %v554_v26 = vsel %vm438_vm2, %v549_v51, %v553_v29  ;;  %v27492_v29 = vshll.u32 %v23895_v31, 16  ;;  %v591_v20 = vshll.u32 %v23906_v8, 16  ;;  %v2503_v51 = vor.u32 %v23814_v39, %v23806_v59 }
  0x90   : > { %v2544_v55 = vrot.slane %v27603_v19, 2  ;;  %v562_v3 = vsel %vm438_vm2, %v557_v33, %v561_v7  ;;  %v577_v19 = vrot.slane %v27605_v18, 1  ;;  %19220 = vmatmul.mubr.msk.bf16.gmra.mrb[24].mxu1 %vm604_vm0, %v554_v26  ;;  %v2495_v33 = vsel %vm2379_vm3, %v2485_v45, %v2494_v63 }
  0x91   : > { %19223 = vmatprep.mubr.msk.bf16.mxu1 %vm604_vm0, %v562_v3  ;;  %v2504_v14 = vsel %vm2379_vm3, %v2494_v63, %v2503_v51  ;;  %v27491_v59 = vshll.u32 %v23882_v30, 16  ;;  %v27493_v26 = vshrl.u32 %v23895_v31, 16  ;;  %v585_v45 = vrot.slane %v27492_v29, 1 }
  0x92   : > { %v593_v3 = vrot.slane %v591_v20, 1  ;;  %v581_v63 = vor.u32 %v27494_v22, %v577_v19  ;;  %v2860_v29 = vrot.slane %v23882_v30, 2 }
  0x93   : > { %v589_v18 = vor.u32 %v27493_v26, %v585_v45  ;;  %v3136_v26 = vrot.slane %v23560_v35, 3 }
  0x94   : > { %19422 = vmatmul.mubr.msk.bf16.gmra.mrb[16].mxu0 %vm604_vm0, %v2477_v4  ;;  %v565_v4 = vor.u32 %v27496_v23, %v561_v7  ;;  %v2512_v7 = vor.u32 %v23835_v37, %v23831_v36  ;;  %v586_v20 = vsel %vm438_vm2, %v581_v63, %v585_v45 }
  0x95   : > { %19425 = vmatprep.mubr.msk.bf16.mxu0 %vm604_vm0, %v2486_v34  ;;  %v573_v34 = vor.u32 %v27495_v15, %v569_v44 }
  0x96   : > { %v570_v38 = vsel %vm438_vm2, %v565_v4, %v569_v44  ;;  %v2521_v44 = vor.u32 %v23851_v47, %v23839_v24  ;;  %v2513_v36 = vsel %vm2379_vm3, %v2503_v51, %v2512_v7  ;;  %v27606_v47 = vshll.u32 %v23853_v0, 16 }
  0x97   : > { %v578_v39 = vsel %vm438_vm2, %v573_v34, %v577_v19  ;;  %v27607_v4 = vshrl.u32 %v23882_v30, 16  ;;  %v2530_v19 = vor.u32 %v23868_v5, %v23864_v27  ;;  %v2556_v51 = vrot.slane %v27491_v59, 3 }
  0x98   : > { %19224 = vmatmul.mubr.msk.bf16.gmra.mrb[28].mxu1 %vm604_vm0, %v570_v38  ;;  %v2522_v37 = vsel %vm2379_vm3, %v2512_v7, %v2521_v44  ;;  %v2547_v24 = vrot.slane %v27606_v47, 3  ;;  %v2539_v38 = vor.u32 %v2538_v56, %v2535_v21  ;;  %v2858_v59 = vrot.slane %v23853_v0, 2 }
  0x99   : > { %19227 = vmatprep.mubr.msk.bf16.mxu1 %vm604_vm0, %v578_v39  ;;  %v2553_v34 = vrot.slane %v27607_v4, 2  ;;  %v23972_v39 = vld [vmem:[%s23419_s21 + $0xa8] ss:$0 sps:$4 sm:$0x11]   ;;  %v2531_v7 = vsel %vm2379_vm3, %v2521_v44, %v2530_v19  ;;  %v24009_v4 = vld [vmem:[%s23419_s21 + $0x18] sm:$0xff]  }
  0x9a   : > { %v2540_v45 = vsel %vm2379_vm3, %v2530_v19, %v2539_v38  ;;  %v2548_v27 = vor.u32 %v2547_v24, %v2544_v55  ;;  %v2560_v5 = vshll.u32 %v23972_v39, 16  ;;  %v22660_v55 = vld [vmem:[%s27409_s1 + $0x10] sm:$0xff]   ;;  %v2828_v24 = vrot.slane %v23524_v57, 2 }
  0x9b   : > { %v2557_v21 = vor.u32 %v2556_v51, %v2553_v34  ;;  %19277 = vmatprep.subr.bf16.mxu1 %v22660_v55  ;;  %v24014_v34 = vld [vmem:[%s23419_s21 + $0x20] sm:$0xff]  }
  0x9c   : > { %19426 = vmatmul.mubr.msk.bf16.gmra.mrb[20].mxu0 %vm604_vm0, %v2495_v33  ;;  %v594_v33 = vsel %vm438_vm2, %v589_v18, %v593_v3  ;;  %v2549_v56 = vsel %vm2379_vm3, %v2539_v38, %v2548_v27  ;;  %v2823_v18 = vrot.slane %v23498_v40, 2  ;;  %v2826_v40 = vrot.slane %v23516_v52, 2 }
  0x9d   : > { %19429 = vmatprep.mubr.msk.bf16.mxu0 %vm604_vm0, %v2504_v14  ;;  %v595_v14 = vshrl.u32 %v23906_v8, 16  ;;  %v2558_v44 = vsel %vm2379_vm3, %v2548_v27, %v2557_v21  ;;  %v2832_v38 = vrot.slane %v23577_v49, 2  ;;  %v2834_v27 = vrot.slane %v23585_v58, 2 }
  0x9e   : > { %v2829_v51 = vsel %vm1850_vm1, %v2826_v40, %v2828_v24 }
  0x9f   : > { %v597_v63 = vor.u32 %v595_v14, %v593_v3  ;;  %v2562_v3 = vrot.slane %v2560_v5, 3  ;;  %v2830_v14 = vrot.slane %v23560_v35, 2  ;;  %v2836_v5 = vrot.slane %v23623_v50, 2 }
  0xa0   : > { %19228 = vmatmul.mubr.msk.bf16.gmra.mrb[32].mxu1 %vm604_vm0, %v586_v20 }
  0xa1   : > { %19231 = vmatprep.mubr.msk.bf16.mxu1 %vm604_vm0, %v594_v33  ;;  %v2563_v20 = vsel %vm2379_vm3, %v2557_v21, %v2562_v3  ;;  %v24021_v33 = vld [vmem:[%s27409_s1 + $0x40] sm:$0xff]   ;;  %v24048_v21 = vld [vmem:[%s23419_s21 + $0x38] sm:$0xff]   ;;  %v2837_v3 = vsel %vm1850_vm1, %v2834_v27, %v2836_v5 }
  0xa4   : > { %19430 = vmatmul.mubr.msk.bf16.gmra.mrb[24].mxu0 %vm604_vm0, %v2513_v36  ;;  %v2824_v36 = vrot.slane %v23509_v48, 2 }
  0xa5   : > { %19433 = vmatprep.mubr.msk.bf16.mxu0 %vm604_vm0, %v2522_v37  ;;  %v23998_v37 = vld [vmem:[%s23419_s21 + $0x10] sm:$0xff]  }
  0xa6   : > { %v2825_v47 = vsel %vm1850_vm1, %v2823_v18, %v2824_v36  ;;  %v2827_v19 = vsel %vm1850_vm1, %v2824_v36, %v2826_v40  ;;  %v2840_v18 = vrot.slane %v23651_v42, 2  ;;  %v24064_v36 = vld [vmem:[%s23419_s21 + $0x48] sm:$0xff]  }
  0xa8   : > { %19232 = vmatmul.mubr.msk.bf16.gmra.mrb[36].mxu1 %vm604_vm0, %v597_v63  ;;  %v2833_v63 = vsel %vm1850_vm1, %v2830_v14, %v2832_v38 }
  0xa9   : > { %19237 = vmatprep.mubr.msk.bf16.mxu1 %vm604_vm0, %v23486_v32  ;;  %v23993_v32 = vld [vmem:[%s23419_s21 + $0x8] sm:$0xff]  }
  0xac   : > { %19434 = vmatmul.mubr.msk.bf16.gmra.mrb[28].mxu0 %vm604_vm0, %v2531_v7  ;;  %v24031_v7 = vld [vmem:[%s23419_s21 + $0x28] sm:$0xff]  }
  0xad   : > { %19437 = vmatprep.mubr.msk.bf16.mxu0 %vm604_vm0, %v2540_v45  ;;  %v24037_v45 = vld [vmem:[%s23419_s21 + $0x30] sm:$0xff]  }
  0xb0   : > { %19238 = vmatmul.mubr.msk.bf16.vlgmr.msra.gmra.mrb[0].mxu1 %vm604_vm0, %v23993_v32 }
  0xb1   : > { %19241 = vmatprep.mubr.msk.bf16.mxu1 %vm604_vm0, %v23998_v37  ;;  %19278 = vmatpush3.bf16.msra.mxu1 %v22660_v55  ;;  %v2838_v55 = vrot.slane %v23634_v60, 2 }
  0xb3   : > { %v2841_v40 = vsel %vm1850_vm1, %v2838_v55, %v2840_v18 }
  0xb4   : > { %19438 = vmatmul.mubr.msk.bf16.gmra.mrb[32].mxu0 %vm604_vm0, %v2549_v56  ;;  %v24053_v56 = vld [vmem:[%s23419_s21 + $0x40] sm:$0xff]  }
  0xb5   : > { %19441 = vmatprep.mubr.msk.bf16.mxu0 %vm604_vm0, %v2558_v44  ;;  %v2835_v44 = vsel %vm1850_vm1, %v2832_v38, %v2834_v27  ;;  %v2848_v27 = vrot.slane %v23739_v1, 2 }
  0xb8   : > { %19242 = vmatmul.mubr.msk.bf16.gmra.mrb[4].mxu1 %vm604_vm0, %v24009_v4 }
  0xb9   : > { %19245 = vmatprep.mubr.msk.bf16.mxu1 %vm604_vm0, %v24014_v34 }
  0xbc   : > { %19442 = vmatmul.mubr.msk.bf16.gmra.mrb[36].mxu0 %vm604_vm0, %v2563_v20  ;;  %v24069_v20 = vld [vmem:[%s23419_s21 + $0x50] sm:$0xff]  }
  0xbd   : > { %19447 = vmatprep.mubr.msk.bf16.mxu0 %vm604_vm0, %v2825_v47  ;;  %v2839_v47 = vsel %vm1850_vm1, %v2836_v5, %v2838_v55  ;;  %v27608_v55 = vshll.u32 %v23426_v2, 16 }
  0xc0   : > { %19246 = vmatmul.mubr.msk.bf16.gmra.mrb[8].mxu1 %vm604_vm0, %v24031_v7 }
  0xc1   : > { %19249 = vmatprep.mubr.msk.bf16.mxu1 %vm604_vm0, %v24037_v45 }
  0xc4   : > { %19448 = vmatmul.mubr.msk.bf16.vlgmr.msra.gmra.mrb[0].mxu0 %vm604_vm0, %v2827_v19  ;;  %v2844_v19 = vrot.slane %v23696_v41, 2 }
  0xc5   : > { %19488 = vmatpush3.bf16.msra.mxu0 %v23663_v28  ;;  %19451 = vmatprep.mubr.msk.bf16.mxu0 %vm604_vm0, %v2829_v51  ;;  %v2831_v28 = vsel %vm1850_vm1, %v2828_v24, %v2830_v14  ;;  %v2842_v24 = vrot.slane %v23654_v43, 2  ;;  %v24080_v51 = vld [vmem:[%s23419_s21 + $0x58] sm:$0xff]   ;;  %v24085_v14 = vld [vmem:[%s23419_s21 + $0x60] sm:$0xff]  }
  0xc6   : > { %19529 = vmatprep.subr.bf16.mxu0 %v24021_v33 }
  0xc7   : > { %v2843_v38 = vsel %vm1850_vm1, %v2840_v18, %v2842_v24  ;;  %v24104_v18 = vrot.slane %v27608_v55, 2  ;;  %v23131_v55 = vld [vmem:[%s23419_s21 + $0x4] sm:$0xf] }
  0xc8   : > { %19250 = vmatmul.mubr.msk.bf16.gmra.mrb[12].mxu1 %vm604_vm0, %v24048_v21 }
  0xc9   : > { %19253 = vmatprep.mubr.msk.bf16.mxu1 %vm604_vm0, %v24053_v56 }
  0xcc   : > { %19452 = vmatmul.mubr.msk.bf16.gmra.mrb[4].mxu0 %vm604_vm0, %v2831_v28  ;;  %v2845_v28 = vsel %vm1850_vm1, %v2842_v24, %v2844_v19  ;;  %v27610_v24 = vshrl.u32 %v23431_v6, 16 }
  0xcd   : > { %19455 = vmatprep.mubr.msk.bf16.mxu0 %vm604_vm0, %v2833_v63  ;;  %v2846_v63 = vrot.slane %v23708_v54, 2 }
  0xcf   : > { %v2847_v5 = vsel %vm1850_vm1, %v2844_v19, %v2846_v63  ;;  %v2850_v19 = vrot.slane %v23754_v53, 2 }
  0xd0   : > { %19254 = vmatmul.mubr.msk.bf16.gmra.mrb[16].mxu1 %vm604_vm0, %v24064_v36 }
  0xd1   : > { %19257 = vmatprep.mubr.msk.bf16.mxu1 %vm604_vm0, %v24069_v20 }
  0xd4   : > { %19456 = vmatmul.mubr.msk.bf16.gmra.mrb[8].mxu0 %vm604_vm0, %v2835_v44  ;;  %v2849_v44 = vsel %vm1850_vm1, %v2846_v63, %v2848_v27  ;;  %v2854_v63 = vrot.slane %v23778_v16, 2 }
  0xd5   : > { %19459 = vmatprep.mubr.msk.bf16.mxu0 %vm604_vm0, %v2837_v3  ;;  %v1101_v3 = vld [vmem:[%s23419_s21] sm:$0xe] }
  0xd8   : > { %19258 = vmatmul.mubr.msk.bf16.gmra.mrb[20].mxu1 %vm604_vm0, %v24080_v51 }
  0xd9   : > { %19261 = vmatprep.mubr.msk.bf16.mxu1 %vm604_vm0, %v24085_v14 }
  0xdc   : > { %19460 = vmatmul.mubr.msk.bf16.gmra.mrb[12].mxu0 %vm604_vm0, %v2839_v47  ;;  %v27609_v47 = vshll.u32 %v23431_v6, 16  ;;  %v2851_v6 = vsel %vm1850_vm1, %v2848_v27, %v2850_v19 }
  0xdd   : > { %19463 = vmatprep.mubr.msk.bf16.mxu0 %vm604_vm0, %v2841_v40 }
  0xde   : > { %v1468_v40 = vrot.slane %v27609_v47, 2  ;;  %v3121_v47 = vld [vmem:[%s23419_s21 + $0x8] sm:$0x8] }
  0xe0   : > { %19262 = vmatmul.mubr.msk.bf16.gmra.mrb[24].mxu1 %vm604_vm0, %v23746_v61 }
  0xe1   : > { %19265 = vmatprep.mubr.msk.bf16.mxu1 %vm604_vm0, %v23790_v62 }
  0xe4   : > { %19464 = vmatmul.mubr.msk.bf16.gmra.mrb[16].mxu0 %vm604_vm0, %v2843_v38  ;;  %v1467_v38 = vrot.slane %v27610_v24, 1  ;;  %v2856_v24 = vrot.slane %v23841_v25, 2 }
  0xe5   : > { %19467 = vmatprep.mubr.msk.bf16.mxu0 %vm604_vm0, %v2845_v28  ;;  %v2852_v28 = vrot.slane %v23772_v46, 2 }
  0xe7   : > { %v2855_v15 = vsel %vm1850_vm1, %v2852_v28, %v2854_v63 }
  0xe8   : > { %19266 = vmatmul.mubr.msk.bf16.gmra.mrb[28].mxu1 %vm604_vm0, %v23798_v9 }
  0xe9   : > { %19269 = vmatprep.mubr.msk.bf16.mxu1 %vm604_vm0, %v23827_v17 }
  0xec   : > { %19468 = vmatmul.mubr.msk.bf16.gmra.mrb[20].mxu0 %vm604_vm0, %v2847_v5  ;;  %v24120_v5 = vcombine.low %v1101_v3, %v23131_v55  ;;  %v331_v55 = vld [vmem:[%s23419_s21 + $0x9c] sm:$0x3] }
  0xed   : > { %19471 = vmatprep.mubr.msk.bf16.mxu0 %vm604_vm0, %v2849_v44  ;;  %v2853_v44 = vsel %vm1850_vm1, %v2850_v19, %v2852_v28  ;;  %v1110_v19 = vrot.slane %v23993_v32, 1  ;;  %v16913_v23 = vcombine.low %v23873_v12, %v331_v55  ;;  %v3134_v32 = vrot.slane %v23524_v57, 3 }
  0xee   : > { %v1109_v27 = vrot.slane %v24120_v5, 1  ;;  %v1114_v28 = vrot.slane %v24009_v4, 1  ;;  %v2861_v12 = vsel %vm1850_vm1, %v2858_v59, %v2860_v29  ;;  %v3138_v55 = vrot.slane %v23577_v49, 3 }
  0xf0   : > { %19270 = vmatmul.mubr.msk.bf16.gmra.mrb[32].mxu1 %vm604_vm0, %v23846_v13  ;;  %v1111_v13 = vsel %vm1108_vm4, %v1109_v27, %v1110_v19  ;;  %v3140_v27 = vrot.slane %v23585_v58, 3 }
  0xf1   : > { %19273 = vmatprep.mubr.msk.bf16.mxu1 %vm604_vm0, %v23895_v31 }
  0xf4   : > { %19472 = vmatmul.mubr.msk.bf16.gmra.mrb[24].mxu0 %vm604_vm0, %v2851_v6  ;;  %v23132_v6 = vld [vmem:[%s23419_s21 + $0xc] sm:$0xf] }
  0xf5   : > { %19475 = vmatprep.mubr.msk.bf16.mxu0 %vm604_vm0, %v2853_v44  ;;  %v24140_v22 = vcombine.low %v3121_v47, %v23132_v6  ;;  %v2857_v44 = vsel %vm1850_vm1, %v2854_v63, %v2856_v24  ;;  %v1112_v47 = vrot.slane %v23998_v37, 1  ;;  %v3146_v6 = vrot.slane %v23651_v42, 3 }
  0xf7   : > { %v3129_v3 = vrot.slane %v24140_v22, 3  ;;  %v1113_v63 = vsel %vm1108_vm4, %v1110_v19, %v1112_v47  ;;  %v1115_v37 = vsel %vm1108_vm4, %v1112_v47, %v1114_v28  ;;  %v24170_v19 = vor.u32 %v1468_v40, %v1467_v38  ;;  %v24188_v38 = vld [vmem:[%s27409_s1 + $0x20] sm:$0xff]  }
  0xf8   : > { %19274 = vmatmul.mubr.msk.bf16.gmra.mrb[36].mxu1 %vm604_vm0, %v16913_v23  ;;  %v22662_v23 = vld [vmem:[%s27409_s1 + $0x18] sm:$0xff]   ;;  %v1118_v47 = vrot.slane %v24031_v7, 1 }
  0xf9   : > { %19279 = vmatprep.mubr.msk.bf16.mxu1 %vm604_vm0, %v1111_v13  ;;  %v27611_v13 = vshrl.u32 %v23426_v2, 16  ;;  %19319 = vmatprep.subr.bf16.mxu1 %v22662_v23 }
  0xfb   : > { %v1463_v4 = vrot.slane %v27611_v13, 1 }
  0xfc   : > { %19476 = vmatmul.mubr.msk.bf16.gmra.mrb[28].mxu0 %vm604_vm0, %v2855_v15  ;;  %v2859_v15 = vsel %vm1850_vm1, %v2856_v24, %v2858_v59  ;;  %v3142_v59 = vrot.slane %v23623_v50, 3  ;;  %v3144_v24 = vrot.slane %v23634_v60, 3 }
  0xfd   : > { %19479 = vmatprep.mubr.msk.bf16.mxu0 %vm604_vm0, %v2857_v44  ;;  %v1116_v44 = vrot.slane %v24014_v34, 1  ;;  %v24177_v2 = vor.u32 %v24104_v18, %v1463_v4  ;;  %v27612_v34 = vrot.slane %v23509_v48, 3  ;;  %v27613_v4 = vrot.slane %v23516_v52, 3 }
  0xff   : > { %v24183_v40 = vsel %vm1454_vm6, %v24177_v2, %v24170_v19  ;;  %v3131_v7 = vsel %vm3128_vm5, %v3129_v3, %v27612_v34  ;;  %v1117_v18 = vsel %vm1108_vm4, %v1114_v28, %v1116_v44  ;;  %v1120_v3 = vrot.slane %v24037_v45, 1 }
 0x100   : > { %19280 = vmatmul.mubr.msk.bf16.vlgmr.msra.gmra.mrb[0].mxu1 %vm604_vm0, %v1113_v63  ;;  %v3152_v63 = vrot.slane %v23708_v54, 3  ;;  %v1122_v28 = vrot.slane %v24048_v21, 1  ;;  %v27615_v45 = vmov %v27613_v4 }
 0x101   : > { %19283 = vmatprep.mubr.msk.bf16.mxu1 %vm604_vm0, %v1115_v37  ;;  %19320 = vmatpush3.bf16.msra.mxu1 %v22662_v23  ;;  %v1119_v37 = vsel %vm1108_vm4, %v1116_v44, %v1118_v47  ;;  %v27614_v44 = vmov %v27612_v34  ;;  %v3135_v21 = vsel %vm3128_vm5, %v27615_v45, %v3134_v32  ;;  %v3162_v23 = vrot.slane %v23841_v25, 3 }
 0x102   : > { %21263 = vmatprep.subr.bf16.mxu1 %v24188_v38  ;;  %v3133_v34 = vsel %vm3128_vm5, %v27614_v44, %v27613_v4  ;;  %v1123_v13 = vsel %vm1108_vm4, %v1120_v3, %v1122_v28  ;;  %v1124_v4 = vrot.slane %v24053_v56, 1  ;;  %v3139_v56 = vsel %vm3128_vm5, %v3136_v26, %v3138_v55 }
 0x104   : > { %19480 = vmatmul.mubr.msk.bf16.gmra.mrb[32].mxu0 %vm604_vm0, %v2859_v15  ;;  %v3148_v15 = vrot.slane %v23654_v43, 3 }
 0x105   : > { %19483 = vmatprep.mubr.msk.bf16.mxu0 %vm604_vm0, %v2861_v12  ;;  %v3150_v12 = vrot.slane %v23696_v41, 3 }
 0x108   : > { %19284 = vmatmul.mubr.msk.bf16.gmra.mrb[4].mxu1 %vm604_vm0, %v1117_v18  ;;  %v3158_v18 = vrot.slane %v23772_v46, 3 }
 0x109   : > { %19287 = vmatprep.mubr.msk.bf16.mxu1 %vm604_vm0, %v1119_v37  ;;  %v3160_v37 = vrot.slane %v23778_v16, 3 }
 0x10c   : > { %19484 = vmatmul.mubr.msk.bf16.gmra.mrb[36].mxu0 %vm604_vm0, %v2860_v29  ;;  %v24210_v29 = vld [vmem:[%s27409_s1 + $0x48] sm:$0xff]  }
 0x10d   : > { %19489 = vmatprep.mubr.msk.bf16.mxu0 %vm604_vm0, %v3131_v7  ;;  %v1121_v7 = vsel %vm1108_vm4, %v1118_v47, %v1120_v3  ;;  %v1126_v47 = vrot.slane %v24064_v36, 1  ;;  %v1125_v36 = vsel %vm1108_vm4, %v1122_v28, %v1124_v4 }
 0x10f   : > { %v1127_v3 = vsel %vm1108_vm4, %v1124_v4, %v1126_v47 }
 0x110   : > { %19288 = vmatmul.mubr.msk.bf16.gmra.mrb[8].mxu1 %vm604_vm0, %v1121_v7  ;;  %v3481_v7 = vshll.u32 %v24140_v22, 16 }
 0x111   : > { %19291 = vmatprep.mubr.msk.bf16.mxu1 %vm604_vm0, %v1123_v13  ;;  %v1128_v13 = vrot.slane %v24069_v20, 1  ;;  %v3141_v20 = vsel %vm3128_vm5, %v3138_v55, %v3140_v27 }
 0x114   : > { %19490 = vmatmul.mubr.msk.bf16.vlgmr.msra.gmra.mrb[0].mxu0 %vm604_vm0, %v3133_v34 }
 0x115   : > { %19530 = vmatpush3.bf16.msra.mxu0 %v24021_v33  ;;  %19493 = vmatprep.mubr.msk.bf16.mxu0 %vm604_vm0, %v3135_v21  ;;  %v3137_v33 = vsel %vm3128_vm5, %v3134_v32, %v3136_v26  ;;  %v1130_v21 = vrot.slane %v24080_v51, 1  ;;  %v3478_v32 = vshrl.u32 %v24140_v22, 16  ;;  %v27616_v26 = vshrl.u32 %v23509_v48, 16 }
 0x116   : > { %19571 = vmatprep.subr.bf16.mxu0 %v24210_v29  ;;  %v3143_v22 = vsel %vm3128_vm5, %v3140_v27, %v3142_v59  ;;  %v27618_v51 = vshrl.u32 %v23516_v52, 16 }
 0x117   : > { %v24258_v28 = vrot.slane %v27616_v26, 3  ;;  %v24284_v55 = vrot.slane %v3478_v32, 3  ;;  %v24286_v26 = vrot.slane %v3481_v7, 4  ;;  %v23135_v32 = vld [vmem:[%s23419_s21 + $0x70] sm:$0xff]  }
 0x118   : > { %19292 = vmatmul.mubr.msk.bf16.gmra.mrb[12].mxu1 %vm604_vm0, %v1125_v36  ;;  %v1129_v36 = vsel %vm1108_vm4, %v1126_v47, %v1128_v13  ;;  %v1136_v7 = vrot.slane %v23135_v32, 1 }
 0x119   : > { %19295 = vmatprep.mubr.msk.bf16.mxu1 %vm604_vm0, %v1127_v3  ;;  %v1131_v3 = vsel %vm1108_vm4, %v1128_v13, %v1130_v21  ;;  %v27621_v13 = vshll.u32 %v23524_v57, 16 }
 0x11b   : > { %v24300_v34 = vrot.slane %v27621_v13, 4  ;;  %v27624_v13 = vshrl.u32 %v23577_v49, 16 }
 0x11c   : > { %19494 = vmatmul.mubr.msk.bf16.gmra.mrb[4].mxu0 %vm604_vm0, %v3137_v33  ;;  %v27617_v33 = vshll.u32 %v23509_v48, 16  ;;  %v1132_v48 = vrot.slane %v24085_v14, 1  ;;  %v23134_v14 = vld [vmem:[%s23419_s21 + $0x68] sm:$0xff]  }
 0x11d   : > { %19497 = vmatprep.mubr.msk.bf16.mxu0 %vm604_vm0, %v3139_v56  ;;  %v24279_v56 = vrot.slane %v27618_v51, 3  ;;  %v1134_v45 = vrot.slane %v23134_v14, 1  ;;  %v27620_v51 = vshrl.u32 %v23524_v57, 16  ;;  %v23136_v14 = vld [vmem:[%s23419_s21 + $0x78] sm:$0xff]   ;;  %v3145_v57 = vsel %vm3128_vm5, %v3142_v59, %v3144_v24 }
 0x11e   : > { %v24262_v4 = vrot.slane %v27617_v33, 4  ;;  %v27619_v33 = vshll.u32 %v23516_v52, 16  ;;  %v24329_v32 = vrot.slane %v27624_v13, 3  ;;  %v23138_v13 = vld [vmem:[%s23419_s21 + $0x88] sm:$0xff]  }
 0x11f   : > { %v24296_v47 = vrot.slane %v27620_v51, 3  ;;  %v1138_v51 = vrot.slane %v23136_v14, 1 }
 0x120   : > { %v24290_v27 = vrot.slane %v27619_v33, 4  ;;  %19296 = vmatmul.mubr.msk.bf16.gmra.mrb[16].mxu1 %vm604_vm0, %v1129_v36  ;;  %v3147_v36 = vsel %vm3128_vm5, %v3144_v24, %v3146_v6 }
 0x121   : > { %19299 = vmatprep.mubr.msk.bf16.mxu1 %vm604_vm0, %v1131_v3  ;;  %v1133_v3 = vsel %vm1108_vm4, %v1130_v21, %v1132_v48  ;;  %v27626_v21 = vshrl.u32 %v23585_v58, 16 }
 0x123   : > { %v24339_v14 = vrot.slane %v27626_v21, 3 }
 0x124   : > { %19498 = vmatmul.mubr.msk.bf16.gmra.mrb[8].mxu0 %vm604_vm0, %v3141_v20  ;;  %v27622_v20 = vshrl.u32 %v23560_v35, 16 }
 0x125   : > { %19501 = vmatprep.mubr.msk.bf16.mxu0 %vm604_vm0, %v3143_v22  ;;  %v27623_v22 = vshll.u32 %v23560_v35, 16  ;;  %v1135_v35 = vsel %vm1108_vm4, %v1132_v48, %v1134_v45  ;;  %v3151_v48 = vsel %vm3128_vm5, %v3148_v15, %v3150_v12 }
 0x126   : > { %v24305_v52 = vrot.slane %v27622_v20, 3  ;;  %v27625_v20 = vshll.u32 %v23577_v49, 16  ;;  %v3149_v49 = vsel %vm3128_vm5, %v3146_v6, %v3148_v15  ;;  %v27628_v6 = vshrl.u32 %v23623_v50, 16 }
 0x127   : > { %v24311_v33 = vrot.slane %v27623_v22, 4  ;;  %v23137_v22 = vld [vmem:[%s23419_s21 + $0x80] sm:$0xff]   ;;  %v27629_v15 = vshll.u32 %v23623_v50, 16  ;;  %v3153_v50 = vsel %vm3128_vm5, %v3150_v12, %v3152_v63  ;;  %v1456_v12 = vshrl.u32 %v24120_v5, 16 }
 0x128   : > { %v24333_v59 = vrot.slane %v27625_v20, 4  ;;  %v1140_v24 = vrot.slane %v23137_v22, 1  ;;  %19300 = vmatmul.mubr.msk.bf16.gmra.mrb[20].mxu1 %vm604_vm0, %v1133_v3  ;;  %v27627_v3 = vshll.u32 %v23585_v58, 16  ;;  %v1142_v20 = vrot.slane %v23138_v13, 1 }
 0x129   : > { %19303 = vmatprep.mubr.msk.bf16.mxu1 %vm604_vm0, %v1135_v35  ;;  %v24364_v22 = vrot.slane %v27628_v6, 3  ;;  %v24368_v21 = vrot.slane %v27629_v15, 4  ;;  %v27631_v58 = vshll.u32 %v23634_v60, 16  ;;  %v27632_v13 = vrot.slane %v23739_v1, 3 }
 0x12a   : > { %v24358_v35 = vrot.slane %v27627_v3, 4  ;;  %v27634_v15 = vshll.u32 %v23651_v42, 16 }
 0x12b   : > { %v24378_v3 = vrot.slane %v27631_v58, 4 }
 0x12c   : > { %19502 = vmatmul.mubr.msk.bf16.gmra.mrb[12].mxu0 %vm604_vm0, %v3145_v57  ;;  %v1137_v57 = vsel %vm1108_vm4, %v1134_v45, %v1136_v7  ;;  %v23139_v45 = vld [vmem:[%s23419_s21 + $0x90] sm:$0xff]  }
 0x12d   : > { %19505 = vmatprep.mubr.msk.bf16.mxu0 %vm604_vm0, %v3147_v36  ;;  %v1139_v36 = vsel %vm1108_vm4, %v1136_v7, %v1138_v51  ;;  %v27630_v7 = vshrl.u32 %v23634_v60, 16  ;;  %v1141_v60 = vsel %vm1108_vm4, %v1138_v51, %v1140_v24  ;;  %v27635_v51 = vrot.slane %v23754_v53, 3 }
 0x12f   : > { %v24373_v44 = vrot.slane %v27630_v7, 3 }
 0x130   : > { %19304 = vmatmul.mubr.msk.bf16.gmra.mrb[24].mxu1 %vm604_vm0, %v1137_v57  ;;  %v3155_v57 = vsel %vm3128_vm5, %v3152_v63, %v27632_v13  ;;  %v1459_v63 = vshll.u32 %v24120_v5, 16 }
 0x131   : > { %19307 = vmatprep.mubr.msk.bf16.mxu1 %vm604_vm0, %v1139_v36  ;;  %v27633_v36 = vshrl.u32 %v23651_v42, 16  ;;  %v27637_v42 = vmov %v27635_v51 }
 0x132   : > { %v3159_v58 = vsel %vm3128_vm5, %v27637_v42, %v3158_v18  ;;  %v27642_v42 = vld [vmem:[#allocation12_spill] sm:$0xff] }
 0x133   : > { %v24397_v6 = vrot.slane %v27633_v36, 3  ;;  %v27639_v36 = vshll.u32 %v23438_v10, 16 }
 0x134   : > { %19506 = vmatmul.mubr.msk.bf16.gmra.mrb[16].mxu0 %vm604_vm0, %v3149_v49  ;;  %v1144_v49 = vrot.slane %v23139_v45, 1  ;;  %v24401_v45 = vrot.slane %v27634_v15, 4 }
 0x135   : > { %19509 = vmatprep.mubr.msk.bf16.mxu0 %vm604_vm0, %v3151_v48  ;;  %v1146_v48 = vrot.slane %v23906_v8, 1  ;;  %v1143_v8 = vsel %vm1108_vm4, %v1140_v24, %v1142_v20  ;;  %v27636_v24 = vmov %v27632_v13  ;;  %v1458_v13 = vrot.slane %v1456_v12, 1 }
 0x136   : > { %v3157_v7 = vsel %vm3128_vm5, %v27636_v24, %v27635_v51  ;;  %v1472_v15 = vrot.slane %v27639_v36, 2  ;;  %v27648_v36 = vrot.slane %v23853_v0, 3 }
 0x137   : > { %v1147_v5 = vsel %vm1108_vm4, %v1144_v49, %v1146_v48 }
 0x138   : > { %19308 = vmatmul.mubr.msk.bf16.gmra.mrb[28].mxu1 %vm604_vm0, %v1141_v60  ;;  %v27638_v60 = vshrl.u32 %v23438_v10, 16  ;;  %v3163_v10 = vsel %vm3128_vm5, %v3160_v37, %v3162_v23 }
 0x139   : > { %19311 = vmatprep.mubr.msk.bf16.mxu1 %vm604_vm0, %v1143_v8 }
 0x13a   : > { %v1471_v8 = vrot.slane %v27638_v60, 1 }
 0x13c   : > { %19510 = vmatmul.mubr.msk.bf16.gmra.mrb[20].mxu0 %vm604_vm0, %v3153_v50  ;;  %v1145_v50 = vsel %vm1108_vm4, %v1142_v20, %v1144_v49  ;;  %v3161_v20 = vsel %vm3128_vm5, %v3158_v18, %v3160_v37  ;;  %v27640_v49 = vshrl.u32 %v23441_v11, 16 }
 0x13d   : > { %19513 = vmatprep.mubr.msk.bf16.mxu0 %vm604_vm0, %v3155_v57  ;;  %v1461_v57 = vrot.slane %v1459_v63, 2  ;;  %v27641_v63 = vshll.u32 %v23441_v11, 16  ;;  %v27645_v11 = vld [vmem:[#allocation13_spill] sm:$0xff] }
 0x13e   : > { %v1475_v12 = vrot.slane %v27640_v49, 1  ;;  %v27647_v37 = vshll.u32 %v27645_v11, 16 }
 0x13f   : > { %v1462_v51 = vor.u32 %v1461_v57, %v1458_v13  ;;  %v1476_v24 = vrot.slane %v27641_v63, 2  ;;  %v27646_v13 = vshrl.u32 %v27645_v11, 16 }
 0x140   : > { %19312 = vmatmul.mubr.msk.bf16.gmra.mrb[32].mxu1 %vm604_vm0, %v1145_v50  ;;  %v27644_v50 = vshll.u32 %v27642_v42, 16  ;;  %v1484_v60 = vrot.slane %v27647_v37, 2  ;;  %v3484_v37 = vor.u32 %v24286_v26, %v24284_v55 }
 0x141   : > { %19315 = vmatprep.mubr.msk.bf16.mxu1 %vm604_vm0, %v1147_v5  ;;  %v1483_v57 = vrot.slane %v27646_v13, 1 }
 0x142   : > { %v1480_v5 = vrot.slane %v27644_v50, 2 }
 0x144   : > { %19514 = vmatmul.mubr.msk.bf16.gmra.mrb[24].mxu0 %vm604_vm0, %v3157_v7  ;;  %v1466_v7 = vsel %vm1454_vm6, %v1462_v51, %v24177_v2  ;;  %v1473_v2 = vor.u32 %v1472_v15, %v1471_v8  ;;  %v3165_v51 = vsel %vm3128_vm5, %v3162_v23, %v27648_v36  ;;  %v27654_v23 = vld [vmem:[#allocation15_spill] sm:$0xff] }
 0x145   : > { %19517 = vmatprep.mubr.msk.bf16.mxu0 %vm604_vm0, %v3159_v58  ;;  %v27643_v58 = vshrl.u32 %v27642_v42, 16  ;;  %v27656_v11 = vshll.u32 %v27654_v23, 16 }
 0x146   : > { %v1474_v63 = vsel %vm1454_vm6, %v24170_v19, %v1473_v2  ;;  %v3487_v19 = vor.u32 %v24262_v4, %v24258_v28  ;;  %v27659_v28 = vld [vmem:[#allocation16_spill] sm:$0xff] }
 0x147   : > { %v1479_v18 = vrot.slane %v27643_v58, 1  ;;  %v27655_v58 = vshrl.u32 %v27654_v23, 16  ;;  %v1492_v13 = vrot.slane %v27656_v11, 2  ;;  %v27660_v4 = vshrl.u32 %v27659_v28, 16 }
 0x148   : > { %19316 = vmatmul.mubr.msk.bf16.gmra.mrb[36].mxu1 %vm604_vm0, %v1146_v48  ;;  %v27650_v48 = vmov %v27648_v36  ;;  %v1477_v36 = vor.u32 %v1476_v24, %v1475_v12  ;;  %v3488_v55 = vsel %vm3476_vm7, %v3484_v37, %v3487_v19 }
 0x149   : > { %19321 = vmatprep.mubr.msk.bf16.mxu1 %vm604_vm0, %v1466_v7  ;;  %v1491_v50 = vrot.slane %v27655_v58, 1  ;;  %v1495_v12 = vrot.slane %v27660_v4, 1  ;;  %v24513_v58 = vld [vmem:[%s27409_s1 + $0x58] sm:$0xff]  }
 0x14a   : > { %v1478_v26 = vsel %vm1454_vm6, %v1473_v2, %v1477_v36 }
 0x14c   : > { %19518 = vmatmul.mubr.msk.bf16.gmra.mrb[28].mxu0 %vm604_vm0, %v3161_v20  ;;  %v27649_v20 = vrot.slane %v23882_v30, 3 }
 0x14d   : > { %19521 = vmatprep.mubr.msk.bf16.mxu0 %vm604_vm0, %v3163_v10  ;;  %v27651_v10 = vld [vmem:[#allocation14_spill] sm:$0xff] }
 0x14e   : > { %v3167_v49 = vsel %vm3128_vm5, %v27650_v48, %v27649_v20  ;;  %v27652_v7 = vshrl.u32 %v27651_v10, 16  ;;  %v27653_v15 = vshll.u32 %v27651_v10, 16  ;;  %v27657_v20 = vrot.slane %v23972_v39, 3 }
 0x14f   : > { %v27658_v48 = vrot.slane %v23882_v30, 3  ;;  %v3491_v39 = vor.u32 %v24290_v27, %v24279_v56 }
 0x150   : > { %v1487_v8 = vrot.slane %v27652_v7, 1  ;;  %v1488_v42 = vrot.slane %v27653_v15, 2  ;;  %19322 = vmatmul.mubr.msk.bf16.vlgmr.msra.gmra.mrb[0].mxu1 %vm604_vm0, %v24183_v40  ;;  %v3495_v7 = vor.u32 %v24300_v34, %v24296_v47  ;;  %v1485_v15 = vor.u32 %v1484_v60, %v1483_v57  ;;  %v27665_v47 = vld [vmem:[#allocation18_spill] sm:$0xff] }
 0x151   : > { %19325 = vmatprep.mubr.msk.bf16.mxu1 %vm604_vm0, %v1474_v63  ;;  %21264 = vmatpush3.bf16.msra.mxu1 %v24188_v38  ;;  %v27661_v38 = vshll.u32 %v27659_v28, 16  ;;  %v3492_v56 = vsel %vm3476_vm7, %v3487_v19, %v3491_v39  ;;  %v27666_v37 = vshrl.u32 %v27665_v47, 16  ;;  %v27667_v57 = vshll.u32 %v27665_v47, 16 }
 0x152   : > { %v1489_v23 = vor.u32 %v1488_v42, %v1487_v8  ;;  %v3496_v27 = vsel %vm3476_vm7, %v3491_v39, %v3495_v7  ;;  %v3499_v8 = vor.u32 %v24311_v33, %v24305_v52  ;;  %v27668_v42 = vld [vmem:[#allocation19_spill] sm:$0xff]  ;;  %v27672_v28 = vshll.u32 %v23746_v61, 16 }
 0x153   : > { %v1496_v24 = vrot.slane %v27661_v38, 2  ;;  %v1504_v60 = vrot.slane %v27667_v57, 2  ;;  %v27669_v19 = vshrl.u32 %v27668_v42, 16  ;;  %v27679_v47 = vshrl.u32 %v23798_v9, 16 }
 0x154   : > { %19522 = vmatmul.mubr.msk.bf16.gmra.mrb[32].mxu0 %vm604_vm0, %v3165_v51  ;;  %v1481_v51 = vor.u32 %v1480_v5, %v1479_v18  ;;  %v27662_v18 = vld [vmem:[#allocation17_spill] sm:$0xff]  ;;  %v1490_v34 = vsel %vm1454_vm6, %v1485_v15, %v1489_v23  ;;  %v1512_v4 = vrot.slane %v27672_v28, 2 }
 0x155   : > { %19525 = vmatprep.mubr.msk.bf16.mxu0 %vm604_vm0, %v3167_v49  ;;  %v3169_v49 = vsel %vm3128_vm5, %v27658_v48, %v27657_v20  ;;  %v27663_v5 = vshrl.u32 %v27662_v18, 16  ;;  %v27664_v2 = vshll.u32 %v27662_v18, 16  ;;  %v27670_v20 = vshll.u32 %v27668_v42, 16 }
 0x156   : > { %v1482_v40 = vsel %vm1454_vm6, %v1477_v36, %v1481_v51  ;;  %v1486_v11 = vsel %vm1454_vm6, %v1481_v51, %v1485_v15  ;;  %v1503_v36 = vrot.slane %v27666_v37, 1  ;;  %v1507_v51 = vrot.slane %v27669_v19, 1 }
 0x157   : > { %v1499_v63 = vrot.slane %v27663_v5, 1  ;;  %v1500_v10 = vrot.slane %v27664_v2, 2  ;;  %v1508_v48 = vrot.slane %v27670_v20, 2  ;;  %v27676_v15 = vshll.u32 %v23696_v41, 16 }
 0x158   : > { %19326 = vmatmul.mubr.msk.bf16.gmra.mrb[4].mxu1 %vm604_vm0, %v1478_v26  ;;  %v3500_v26 = vsel %vm3476_vm7, %v3495_v7, %v3499_v8  ;;  %v1505_v38 = vor.u32 %v1504_v60, %v1503_v36  ;;  %v1519_v37 = vrot.slane %v27679_v47, 1 }
 0x159   : > { %19329 = vmatprep.mubr.msk.bf16.mxu1 %vm604_vm0, %v1482_v40 }
 0x15c   : > { %19526 = vmatmul.mubr.msk.bf16.gmra.mrb[36].mxu0 %vm604_vm0, %v3169_v49  ;;  %v3503_v49 = vor.u32 %v24333_v59, %v24329_v32  ;;  %v27671_v32 = vshrl.u32 %v23746_v61, 16 }
 0x15d   : > { %19531 = vmatprep.mubr.msk.bf16.mxu0 %vm604_vm0, %v3488_v55  ;;  %v1497_v55 = vor.u32 %v1496_v24, %v1495_v12  ;;  %v1501_v12 = vor.u32 %v1500_v10, %v1499_v63  ;;  %v27673_v63 = vshrl.u32 %v23654_v43, 16  ;;  %v27675_v10 = vshrl.u32 %v23696_v41, 16 }
 0x15e   : > { %v3504_v52 = vsel %vm3476_vm7, %v3499_v8, %v3503_v49  ;;  %v1511_v59 = vrot.slane %v27671_v32, 1  ;;  %v27680_v41 = vshll.u32 %v23798_v9, 16  ;;  %v27681_v8 = vshrl.u32 %v23708_v54, 16 }
 0x15f   : > { %v1502_v61 = vsel %vm1454_vm6, %v1497_v55, %v1501_v12  ;;  %v3521_v2 = vrot.slane %v27673_v63, 3  ;;  %v3525_v7 = vrot.slane %v27675_v10, 3 }
 0x160   : > { %19330 = vmatmul.mubr.msk.bf16.gmra.mrb[8].mxu1 %vm604_vm0, %v1486_v11  ;;  %v1513_v5 = vor.u32 %v1512_v4, %v1511_v59  ;;  %v27678_v11 = vshll.u32 %v23790_v62, 16  ;;  %v1520_v36 = vrot.slane %v27680_v41, 2  ;;  %v3529_v19 = vrot.slane %v27681_v8, 3  ;;  %v23140_v4 = vld [vmem:[%s23419_s21 + $0x98] sm:$0xf] }
 0x161   : > { %19333 = vmatprep.mubr.msk.bf16.mxu1 %vm604_vm0, %v1490_v34  ;;  %v27686_v59 = vshll.u32 %v23827_v17, 16 }
 0x162   : > { %v1516_v34 = vrot.slane %v27678_v11, 2 }
 0x163   : > { %v1524_v28 = vrot.slane %v27686_v59, 2  ;;  %v27702_v59 = vshrl.u32 %v23882_v30, 16 }
 0x164   : > { %19532 = vmatmul.mubr.msk.bf16.vlgmr.msra.gmra.mrb[0].mxu0 %vm604_vm0, %v3492_v56  ;;  %v27677_v56 = vshrl.u32 %v23790_v62, 16  ;;  %v27682_v62 = vshll.u32 %v23708_v54, 16 }
 0x165   : > { %19572 = vmatpush3.bf16.msra.mxu0 %v24210_v29  ;;  %19535 = vmatprep.mubr.msk.bf16.mxu0 %vm604_vm0, %v3496_v27  ;;  %v1493_v29 = vor.u32 %v1492_v13, %v1491_v50  ;;  %v3507_v50 = vor.u32 %v24358_v35, %v24339_v14  ;;  %v3511_v13 = vor.u32 %v24368_v21, %v24364_v22 }
 0x166   : > { %19613 = vmatprep.subr.bf16.mxu0 %v24513_v58  ;;  %v3515_v14 = vor.u32 %v24378_v3, %v24373_v44  ;;  %v1506_v35 = vsel %vm1454_vm6, %v1501_v12, %v1505_v38  ;;  %v3519_v22 = vor.u32 %v24401_v45, %v24397_v6  ;;  %v1509_v21 = vor.u32 %v1508_v48, %v1507_v51  ;;  %v1447_v48 = vld [vmem:[%s23419_s21 + $0x9c] sm:$0xf]  ;;  %v27687_v12 = vld [vmem:[#allocation20_spill] sm:$0xff] }
 0x167   : > { %v1494_v33 = vsel %vm1454_vm6, %v1489_v23, %v1493_v29  ;;  %v1498_v40 = vsel %vm1454_vm6, %v1493_v29, %v1497_v55  ;;  %v3508_v24 = vsel %vm3476_vm7, %v3503_v49, %v3507_v50  ;;  %v3512_v39 = vsel %vm3476_vm7, %v3507_v50, %v3511_v13 }
 0x168   : > { %19334 = vmatmul.mubr.msk.bf16.gmra.mrb[12].mxu1 %vm604_vm0, %v1494_v33  ;;  %v3516_v18 = vsel %vm3476_vm7, %v3511_v13, %v3515_v14  ;;  %v27674_v44 = vshll.u32 %v23654_v43, 16  ;;  %v3526_v6 = vrot.slane %v27676_v15, 4  ;;  %v3520_v45 = vsel %vm3476_vm7, %v3515_v14, %v3519_v22 }
 0x169   : > { %19337 = vmatprep.mubr.msk.bf16.mxu1 %vm604_vm0, %v1498_v40  ;;  %v1510_v23 = vsel %vm1454_vm6, %v1505_v38, %v1509_v21  ;;  %v1515_v27 = vrot.slane %v27677_v56, 1  ;;  %v1514_v43 = vsel %vm1454_vm6, %v1509_v21, %v1513_v5  ;;  %v3530_v51 = vrot.slane %v27682_v62, 4 }
 0x16a   : > { %v3522_v3 = vrot.slane %v27674_v44, 4  ;;  %v3527_v60 = vor.u32 %v3526_v6, %v3525_v7  ;;  %v1521_v49 = vor.u32 %v1520_v36, %v1519_v37  ;;  %v27683_v29 = vshrl.u32 %v23739_v1, 16 }
 0x16b   : > { %v1517_v20 = vor.u32 %v1516_v34, %v1515_v27  ;;  %v27685_v40 = vshrl.u32 %v23827_v17, 16  ;;  %v24606_v50 = vcombine.low %v23140_v4, %v1447_v48  ;;  %v27690_v14 = vshrl.u32 %v23754_v53, 16 }
 0x16c   : > { %19536 = vmatmul.mubr.msk.bf16.gmra.mrb[4].mxu0 %vm604_vm0, %v3500_v26  ;;  %v3523_v57 = vor.u32 %v3522_v3, %v3521_v2  ;;  %v3533_v55 = vrot.slane %v27683_v29, 3  ;;  %v27684_v26 = vshll.u32 %v23739_v1, 16  ;;  %v27688_v1 = vshrl.u32 %v27687_v12, 16 }
 0x16d   : > { %19539 = vmatprep.mubr.msk.bf16.mxu0 %vm604_vm0, %v3504_v52  ;;  %v1518_v54 = vsel %vm1454_vm6, %v1513_v5, %v1517_v20  ;;  %v1523_v32 = vrot.slane %v27685_v40, 1  ;;  %v1522_v13 = vsel %vm1454_vm6, %v1517_v20, %v1521_v49  ;;  %v3537_v17 = vrot.slane %v27690_v14, 3 }
 0x16e   : > { %v3524_v9 = vsel %vm3476_vm7, %v3519_v22, %v3523_v57  ;;  %v3534_v52 = vrot.slane %v27684_v26, 4  ;;  %v3528_v33 = vsel %vm3476_vm7, %v3523_v57, %v3527_v60  ;;  %v1527_v38 = vrot.slane %v27688_v1, 1  ;;  %v24656_v26 = vld [vmem:[%s23419_s21 + $0xa8] sm:$0x3] }
 0x16f   : > { %v27691_v22 = vshll.u32 %v23754_v53, 16  ;;  %v1536_v5 = vshrl.u32 %v24606_v50, 16  ;;  %v1539_v63 = vshll.u32 %v24606_v50, 16  ;;  %v27692_v3 = vshrl.u32 %v23772_v46, 16 }
 0x170   : > { %19338 = vmatmul.mubr.msk.bf16.gmra.mrb[16].mxu1 %vm604_vm0, %v1502_v61  ;;  %v3531_v61 = vor.u32 %v3530_v51, %v3529_v19  ;;  %v27693_v7 = vshll.u32 %v23772_v46, 16  ;;  %v27695_v56 = vshll.u32 %v23895_v31, 16  ;;  %v27696_v37 = vshrl.u32 %v23778_v16, 16 }
 0x171   : > { %19341 = vmatprep.mubr.msk.bf16.mxu1 %vm604_vm0, %v1506_v35  ;;  %v3535_v35 = vor.u32 %v3534_v52, %v3533_v55  ;;  %v3538_v21 = vrot.slane %v27691_v22, 4  ;;  %v3541_v10 = vrot.slane %v27692_v3, 3  ;;  %v1538_v34 = vrot.slane %v1536_v5, 1  ;;  %v23144_v3 = vld [vmem:[%s23419_s21 + $0x80] sm:$0xff]  }
 0x172   : > { %v3532_v44 = vsel %vm3476_vm7, %v3527_v60, %v3531_v61  ;;  %v3542_v15 = vrot.slane %v27693_v7, 4  ;;  %v1532_v27 = vrot.slane %v27695_v56, 2  ;;  %v3545_v41 = vrot.slane %v27696_v37, 3  ;;  %v23145_v7 = vld [vmem:[%s23419_s21 + $0x88] sm:$0xff]  }
 0x173   : > { %v3536_v6 = vsel %vm3476_vm7, %v3531_v61, %v3535_v35  ;;  %v3539_v46 = vor.u32 %v3538_v21, %v3537_v17  ;;  %v27697_v36 = vshll.u32 %v23778_v16, 16  ;;  %v27698_v19 = vshrl.u32 %v23841_v25, 16 }
 0x174   : > { %19540 = vmatmul.mubr.msk.bf16.gmra.mrb[8].mxu0 %vm604_vm0, %v3508_v24  ;;  %v27689_v24 = vshll.u32 %v27687_v12, 16  ;;  %v3543_v47 = vor.u32 %v3542_v15, %v3541_v10  ;;  %v27699_v51 = vshll.u32 %v23841_v25, 16  ;;  %v27700_v29 = vshrl.u32 %v23853_v0, 16 }
 0x175   : > { %19543 = vmatprep.mubr.msk.bf16.mxu0 %vm604_vm0, %v3512_v39  ;;  %v3540_v8 = vsel %vm3476_vm7, %v3535_v35, %v3539_v46  ;;  %v3549_v62 = vrot.slane %v27698_v19, 3  ;;  %v27701_v25 = vshll.u32 %v23853_v0, 16  ;;  %v27703_v4 = vshll.u32 %v23882_v30, 16  ;;  %v23142_v30 = vld [vmem:[%s23419_s21 + $0x70] sm:$0xff]   ;;  %v23143_v35 = vld [vmem:[%s23419_s21 + $0x78] sm:$0xff]  }
 0x176   : > { %v1528_v39 = vrot.slane %v27689_v24, 2  ;;  %v3550_v20 = vrot.slane %v27699_v51, 4  ;;  %v3544_v48 = vsel %vm3476_vm7, %v3539_v46, %v3543_v47  ;;  %v3553_v55 = vrot.slane %v27700_v29, 3  ;;  %v23150_v46 = vld [vmem:[%s23419_s21 + $0x18] sm:$0xf] }
 0x177   : > { %v17100_v12 = vcombine.low %v24656_v26, %v24656_v26  ;;  %v27704_v1 = vrot.slane %v27668_v42, 2  ;;  %v1878_v17 = vrot.slane %v23142_v30, 2  ;;  %v1880_v22 = vrot.slane %v23143_v35, 2  ;;  %v23154_v19 = vld [vmem:[%s23419_s21 + $0x28] sm:$0xf] }
 0x178   : > { %19342 = vmatmul.mubr.msk.bf16.gmra.mrb[20].mxu1 %vm604_vm0, %v1510_v23  ;;  %v1529_v2 = vor.u32 %v1528_v39, %v1527_v38  ;;  %v3551_v52 = vor.u32 %v3550_v20, %v3549_v62  ;;  %v1882_v10 = vrot.slane %v23144_v3, 2  ;;  %v1884_v15 = vrot.slane %v23145_v7, 2  ;;  %v23155_v51 = vld [vmem:[%s23419_s21 + $0x2c] sm:$0xf]  ;;  %v23156_v20 = vld [vmem:[%s23419_s21 + $0x30] sm:$0xf] }
 0x179   : > { %19345 = vmatprep.mubr.msk.bf16.mxu1 %vm604_vm0, %v1514_v43  ;;  %v1541_v43 = vrot.slane %v1539_v63, 2  ;;  %v3562_v39 = vshrl.u32 %v17100_v12, 16  ;;  %v3565_v61 = vshll.u32 %v17100_v12, 16  ;;  %v1888_v37 = vrot.slane %v24606_v50, 2  ;;  %v23153_v50 = vld [vmem:[%s23419_s21 + $0x24] sm:$0xf] }
 0x17a   : > { %v1883_v56 = vsel %vm1850_vm1, %v1880_v22, %v1882_v10  ;;  %v17127_v62 = vcombine.low %v23153_v50, %v23154_v19  ;;  %v23160_v29 = vld [vmem:[%s23419_s21 + $0x40] sm:$0xf]  ;;  %v23173_v30 = vld [vmem:[%s23419_s21 + $0x74] sm:$0xf]  ;;  %v23179_v3 = vld [vmem:[%s23419_s21 + $0x8c] sm:$0xf] }
 0x17b   : > { %v1542_v60 = vor.u32 %v1541_v43, %v1538_v34  ;;  %v3564_v21 = vrot.slane %v3562_v39, 3  ;;  %v23149_v43 = vld [vmem:[%s23419_s21 + $0x14] sm:$0xf]  ;;  %v23168_v12 = vld [vmem:[%s23419_s21 + $0x60] sm:$0xf] }
 0x17c   : > { %19544 = vmatmul.mubr.msk.bf16.gmra.mrb[12].mxu0 %vm604_vm0, %v3516_v18  ;;  %v1525_v18 = vor.u32 %v1524_v28, %v1523_v32  ;;  %v3557_v28 = vrot.slane %v27702_v59, 3  ;;  %v23165_v59 = vld [vmem:[%s23419_s21 + $0x54] sm:$0xf]  ;;  %v23171_v39 = vld [vmem:[%s23419_s21 + $0x6c] sm:$0xf] }
 0x17d   : > { %19547 = vmatprep.mubr.msk.bf16.mxu0 %vm604_vm0, %v3520_v45  ;;  %v27694_v45 = vshrl.u32 %v23895_v31, 16  ;;  %v3546_v31 = vrot.slane %v27697_v36, 4  ;;  %v23152_v36 = vld [vmem:[%s23419_s21 + $0x20] sm:$0xf] }
 0x17e   : > { %v1526_v53 = vsel %vm1454_vm6, %v1521_v49, %v1525_v18  ;;  %v1530_v11 = vsel %vm1454_vm6, %v1525_v18, %v1529_v2  ;;  %v3567_v18 = vrot.slane %v3565_v61, 4  ;;  %v23172_v61 = vld [vmem:[%s23419_s21 + $0x70] sm:$0xf] }
 0x17f   : > { %v1531_v23 = vrot.slane %v27694_v45, 1  ;;  %v23147_v45 = vld [vmem:[%s23419_s21 + $0x10] sm:$0xf] }
 0x180   : > { %19346 = vmatmul.mubr.msk.bf16.gmra.mrb[24].mxu1 %vm604_vm0, %v1518_v54  ;;  %v23141_v54 = vld [vmem:[%s23419_s21 + $0x68] sm:$0xff]  }
 0x181   : > { %19349 = vmatprep.mubr.msk.bf16.mxu1 %vm604_vm0, %v1522_v13  ;;  %v1533_v57 = vor.u32 %v1532_v27, %v1531_v23  ;;  %v1876_v40 = vrot.slane %v23141_v54, 2  ;;  %v3558_v13 = vrot.slane %v27703_v4, 4  ;;  %v1885_v27 = vsel %vm1850_vm1, %v1882_v10, %v1884_v15  ;;  %v23163_v54 = vld [vmem:[%s23419_s21 + $0x4c] sm:$0xf]  ;;  %v23180_v10 = vld [vmem:[%s23419_s21 + $0x90] sm:$0xf] }
 0x182   : > { %v17140_v7 = vcombine.low %v23179_v3, %v23180_v10  ;;  %v24872_v10 = vld [vmem:[%s23419_s21 + $0x64] sm:$0xff]  }
 0x183   : > { %v1534_v49 = vsel %vm1454_vm6, %v1529_v2, %v1533_v57  ;;  %v1543_v16 = vsel %vm1454_vm6, %v1533_v57, %v1542_v60  ;;  %v1877_v38 = vsel %vm1850_vm1, %v27704_v1, %v1876_v40  ;;  %v3559_v14 = vor.u32 %v3558_v13, %v3557_v28  ;;  %v24708_v57 = vld [vmem:[%s27409_s1 + $0x50] sm:$0xff]   ;;  %v23166_v28 = vld [vmem:[%s23419_s21 + $0x58] sm:$0xf]  ;;  %v23167_v13 = vld [vmem:[%s23419_s21 + $0x5c] sm:$0xf] }
 0x184   : > { %19548 = vmatmul.mubr.msk.bf16.gmra.mrb[16].mxu0 %vm604_vm0, %v3524_v9  ;;  %v3547_v9 = vor.u32 %v3546_v31, %v3545_v41  ;;  %v1879_v63 = vsel %vm1850_vm1, %v1876_v40, %v1878_v17  ;;  %v1881_v2 = vsel %vm1850_vm1, %v1878_v17, %v1880_v22  ;;  %v23151_v41 = vld [vmem:[%s23419_s21 + $0x1c] sm:$0xf]  ;;  %v23164_v40 = vld [vmem:[%s23419_s21 + $0x50] sm:$0xf]  ;;  %v17133_v4 = vcombine.low %v23165_v59, %v23166_v28  ;;  %v23169_v1 = vld [vmem:[%s23419_s21 + $0x64] sm:$0xf] }
 0x185   : > { %19551 = vmatprep.mubr.msk.bf16.mxu0 %vm604_vm0, %v3528_v33  ;;  %v3554_v33 = vrot.slane %v27701_v25, 4  ;;  %v17126_v31 = vcombine.low %v23151_v41, %v23152_v36  ;;  %v23162_v25 = vld [vmem:[%s23419_s21 + $0x48] sm:$0xf]  ;;  %v23174_v17 = vld [vmem:[%s23419_s21 + $0x78] sm:$0xf] }
 0x186   : > { %v3548_v32 = vsel %vm3476_vm7, %v3543_v47, %v3547_v9  ;;  %v3552_v0 = vsel %vm3476_vm7, %v3547_v9, %v3551_v52  ;;  %v17125_v47 = vcombine.low %v23149_v43, %v23150_v46  ;;  %v23159_v9 = vld [vmem:[%s23419_s21 + $0x3c] sm:$0xf]  ;;  %v17137_v35 = vcombine.low %v23173_v30, %v23174_v17  ;;  %v24826_v59 = vld [vmem:[%s23419_s21 + $0x44] sm:$0xff]  }
 0x187   : > { %v3555_v24 = vor.u32 %v3554_v33, %v3553_v55  ;;  %v17130_v55 = vcombine.low %v23159_v9, %v23160_v29  ;;  %v23175_v22 = vld [vmem:[%s23419_s21 + $0x7c] sm:$0xf] }
 0x188   : > { %19350 = vmatmul.mubr.msk.bf16.gmra.mrb[28].mxu1 %vm604_vm0, %v1526_v53  ;;  %v23146_v53 = vld [vmem:[%s23419_s21 + $0xc] sm:$0xf]  ;;  %v24809_v9 = vld [vmem:[%s23419_s21 + $0x3c] sm:$0xff]  }
 0x189   : > { %19353 = vmatprep.mubr.msk.bf16.mxu1 %vm604_vm0, %v1530_v11  ;;  %v3556_v42 = vsel %vm3476_vm7, %v3551_v52, %v3555_v24  ;;  %v3560_v5 = vsel %vm3476_vm7, %v3555_v24, %v3559_v14  ;;  %v17124_v23 = vcombine.low %v23146_v53, %v23147_v45  ;;  %v23148_v11 = vld [vmem:[%s23419_s21 + $0x90] sm:$0xff]   ;;  %v23161_v52 = vld [vmem:[%s23419_s21 + $0x44] sm:$0xf] }
 0x18a   : > { %v1886_v34 = vrot.slane %v23148_v11, 2  ;;  %v17131_v33 = vcombine.low %v23161_v52, %v23162_v25  ;;  %v23181_v45 = vld [vmem:[%s23419_s21 + $0x94] sm:$0xf]  ;;  %v23184_v11 = vld [vmem:[%s23419_s21 + $0xa0] sm:$0xf] }
 0x18c   : > { %19552 = vmatmul.mubr.msk.bf16.gmra.mrb[20].mxu0 %vm604_vm0, %v3532_v44  ;;  %v3568_v44 = vor.u32 %v3567_v18, %v3564_v21  ;;  %v4311_v18 = vld [vmem:[%s23419_s21 + $0x14] sm:$0xf] }
 0x18d   : > { %19555 = vmatprep.mubr.msk.bf16.mxu0 %vm604_vm0, %v3536_v6 }
 0x18e   : > { %v3569_v6 = vsel %vm3476_vm7, %v3559_v14, %v3568_v44  ;;  %v17136_v14 = vcombine.low %v23171_v39, %v23172_v61 }
 0x190   : > { %19354 = vmatmul.mubr.msk.bf16.gmra.mrb[32].mxu1 %vm604_vm0, %v1534_v49  ;;  %v23158_v49 = vld [vmem:[%s23419_s21 + $0x38] sm:$0xf] }
 0x191   : > { %19357 = vmatprep.mubr.msk.bf16.mxu1 %vm604_vm0, %v1543_v16 }
 0x194   : > { %19556 = vmatmul.mubr.msk.bf16.gmra.mrb[24].mxu0 %vm604_vm0, %v3540_v8  ;;  %v1889_v8 = vsel %vm1850_vm1, %v1886_v34, %v1888_v37 }
 0x195   : > { %19559 = vmatprep.mubr.msk.bf16.mxu0 %vm604_vm0, %v3544_v48  ;;  %v17128_v48 = vcombine.low %v23155_v51, %v23156_v20 }
 0x198   : > { %19358 = vmatmul.mubr.msk.bf16.gmra.mrb[36].mxu1 %vm604_vm0, %v1542_v60  ;;  %v1887_v60 = vsel %vm1850_vm1, %v1884_v15, %v1886_v34 }
 0x199   : > { %19387 = vmatprep.mubr.msk.bf16.mxu1 %vm604_vm0, %v1877_v38  ;;  %v23170_v38 = vld [vmem:[%s23419_s21 + $0x68] sm:$0xf] }
 0x19a   : > { %v17135_v24 = vcombine.low %v23169_v1, %v23170_v38  ;;  %v4502_v1 = vshrl.u32 %v24809_v9, 16 }
 0x19c   : > { %19560 = vmatmul.mubr.msk.bf16.gmra.mrb[28].mxu0 %vm604_vm0, %v3548_v32  ;;  %v17132_v32 = vcombine.low %v23163_v54, %v23164_v40  ;;  %v4498_v54 = vshll.u32 %v24809_v9, 16  ;;  %v24820_v40 = vld [vmem:[%s27409_s1 + $0x60] sm:$0xff]  }
 0x19d   : > { %19563 = vmatprep.mubr.msk.bf16.mxu0 %vm604_vm0, %v3552_v0  ;;  %v17134_v0 = vcombine.low %v23167_v13, %v23168_v12  ;;  %v24837_v12 = vld [vmem:[%s23419_s21 + $0x4c] sm:$0xff]  }
 0x19e   : > { %v4500_v13 = vrot.slane %v4498_v54, 1  ;;  %v4514_v39 = vshll.u32 %v24837_v12, 16 }
 0x1a0   : > { %19388 = vmatmul.mubr.msk.bf16.vlgmr.msra.gmra.mrb[24].mxu1 %vm604_vm0, %v1879_v63  ;;  %v23177_v63 = vld [vmem:[%s23419_s21 + $0x84] sm:$0xf]  ;;  %v4504_v30 = vor.u32 %v4502_v1, %v4500_v13 }
 0x1a1   : > { %19391 = vmatprep.mubr.msk.bf16.mxu1 %vm604_vm0, %v1881_v2  ;;  %v23178_v2 = vld [vmem:[%s23419_s21 + $0x88] sm:$0xf] }
 0x1a2   : > { %v17139_v44 = vcombine.low %v23177_v63, %v23178_v2 }
 0x1a4   : > { %19564 = vmatmul.mubr.msk.bf16.gmra.mrb[32].mxu0 %vm604_vm0, %v3556_v42  ;;  %v23176_v42 = vld [vmem:[%s23419_s21 + $0x80] sm:$0xf] }
 0x1a5   : > { %19567 = vmatprep.mubr.msk.bf16.mxu0 %vm604_vm0, %v3560_v5  ;;  %v17138_v21 = vcombine.low %v23175_v22, %v23176_v42  ;;  %v24757_v5 = vld [vmem:[%s23419_s21 + $0x18] sm:$0xf]  ;;  %v24860_v22 = vld [vmem:[%s23419_s21 + $0x5c] sm:$0xff]  }
 0x1a6   : > { %v24764_v15 = vcombine.low %v4311_v18, %v24757_v5  ;;  %v4518_v18 = vshrl.u32 %v24837_v12, 16 }
 0x1a8   : > { %19392 = vmatmul.mubr.msk.bf16.gmra.mrb[28].mxu1 %vm604_vm0, %v1883_v56  ;;  %v4461_v53 = vshll.u32 %v24764_v15, 16  ;;  %v4459_v43 = vshrl.u32 %v24764_v15, 16 }
 0x1a9   : > { %19395 = vmatprep.mubr.msk.bf16.mxu1 %vm604_vm0, %v1885_v27  ;;  %v23183_v27 = vld [vmem:[%s23419_s21 + $0x9c] sm:$0xf] }
 0x1aa   : > { %v17142_v34 = vcombine.low %v23183_v27, %v23184_v11  ;;  %v4463_v46 = vrot.slane %v4461_v53, 1  ;;  %v4534_v11 = vshrl.u32 %v24860_v22, 16 }
 0x1ac   : > { %19568 = vmatmul.mubr.msk.bf16.gmra.mrb[36].mxu0 %vm604_vm0, %v3569_v6  ;;  %v24769_v6 = vld [vmem:[%s23419_s21 + $0x1c] sm:$0xff]   ;;  %v4464_v41 = vor.u32 %v4463_v46, %v4459_v43  ;;  %v4542_v43 = vshrl.u32 %v24872_v10, 16 }
 0x1ad   : > { %19573 = vmatprep.mubr.msk.bf16.mxu0 %vm604_vm0, %v17124_v23  ;;  %v23182_v23 = vld [vmem:[%s23419_s21 + $0x98] sm:$0xf]  ;;  %v4470_v19 = vshrl.u32 %v24769_v6, 16 }
 0x1ae   : > { %v17141_v56 = vcombine.low %v23181_v45, %v23182_v23  ;;  %v24882_v23 = vld [vmem:[%s23419_s21 + $0x6c] sm:$0xff]  }
 0x1af   : > { %v4546_v46 = vshll.u32 %v24882_v23, 16 }
 0x1b0   : > { %19396 = vmatmul.mubr.msk.bf16.gmra.mrb[32].mxu1 %vm604_vm0, %v1887_v60  ;;  %v23185_v60 = vld [vmem:[%s23419_s21 + $0xa4] sm:$0xf] }
 0x1b1   : > { %19399 = vmatprep.mubr.msk.bf16.mxu1 %vm604_vm0, %v1889_v8  ;;  %v17143_v8 = vcombine.low %v23185_v60, %v24656_v26 }
 0x1b4   : > { %19574 = vmatmul.mubr.msk.bf16.vlgmr.msra.gmra.mrb[0].mxu0 %vm604_vm0, %v17125_v47  ;;  %v4466_v47 = vshll.u32 %v24769_v6, 16 }
 0x1b5   : > { %19614 = vmatpush3.bf16.msra.mxu0 %v24513_v58  ;;  %19577 = vmatprep.mubr.msk.bf16.mxu0 %vm604_vm0, %v17126_v31  ;;  %v23157_v58 = vld [vmem:[%s23419_s21 + $0x34] sm:$0xf]  ;;  %v24786_v31 = vld [vmem:[%s23419_s21 + $0x2c] sm:$0xff]  }
 0x1b6   : > { %19655 = vmatprep.subr.bf16.mxu0 %v24708_v57  ;;  %v17129_v16 = vcombine.low %v23157_v58, %v23158_v49  ;;  %v4468_v36 = vrot.slane %v4466_v47, 1  ;;  %v4482_v20 = vshll.u32 %v24786_v31, 16  ;;  %v24799_v58 = vld [vmem:[%s23419_s21 + $0x34] sm:$0xff]   ;;  %v4486_v52 = vshrl.u32 %v24786_v31, 16 }
 0x1b7   : > { %v4490_v29 = vshll.u32 %v24799_v58, 16 }
 0x1b8   : > { %19400 = vmatmul.mubr.msk.bf16.gmra.mrb[36].mxu1 %vm604_vm0, %v1888_v37  ;;  %v24780_v37 = vld [vmem:[%s23419_s21 + $0x24] sm:$0xff]   ;;  %v4472_v26 = vor.u32 %v4470_v19, %v4468_v36 }
 0x1b9   : > { %v4474_v50 = vshll.u32 %v24780_v37, 16  ;;  %v4478_v51 = vshrl.u32 %v24780_v37, 16 }
 0x1bc   : > { %19578 = vmatmul.mubr.msk.bf16.gmra.mrb[4].mxu0 %vm604_vm0, %v17127_v62  ;;  %v4469_v62 = vsel %vm438_vm2, %v4464_v41, %v4468_v36  ;;  %v24894_v36 = vld [vmem:[%s23419_s21 + $0x74] sm:$0xff]  }
 0x1bd   : > { %19581 = vmatprep.mubr.msk.bf16.mxu0 %vm604_vm0, %v17128_v48  ;;  %v4476_v48 = vrot.slane %v4474_v50, 1 }
 0x1bf   : > { %v4480_v49 = vor.u32 %v4478_v51, %v4476_v48 }
 0x1c4   : > { %19582 = vmatmul.mubr.msk.bf16.gmra.mrb[8].mxu0 %vm604_vm0, %v17129_v16  ;;  %v4484_v16 = vrot.slane %v4482_v20, 1 }
 0x1c5   : > { %19585 = vmatprep.mubr.msk.bf16.mxu0 %vm604_vm0, %v17130_v55  ;;  %v4477_v55 = vsel %vm438_vm2, %v4472_v26, %v4476_v48  ;;  %v24904_v48 = vld [vmem:[%s23419_s21 + $0x7c] sm:$0xff]   ;;  %v27511_v26 = vshll.u32 %v24894_v36, 16 }
 0x1c6   : > { %v4485_v25 = vsel %vm438_vm2, %v4480_v49, %v4484_v16  ;;  %v4488_v28 = vor.u32 %v4486_v52, %v4484_v16  ;;  %v4550_v16 = vshrl.u32 %v24882_v23, 16 }
 0x1cc   : > { %19586 = vmatmul.mubr.msk.bf16.gmra.mrb[12].mxu0 %vm604_vm0, %v17131_v33  ;;  %v4494_v33 = vshrl.u32 %v24799_v58, 16 }
 0x1cd   : > { %19589 = vmatprep.mubr.msk.bf16.mxu0 %vm604_vm0, %v17132_v32  ;;  %v4492_v32 = vrot.slane %v4490_v29, 1 }
 0x1d4   : > { %19590 = vmatmul.mubr.msk.bf16.gmra.mrb[16].mxu0 %vm604_vm0, %v17133_v4  ;;  %v4496_v4 = vor.u32 %v4494_v33, %v4492_v32 }
 0x1d5   : > { %19593 = vmatprep.mubr.msk.bf16.mxu0 %vm604_vm0, %v17134_v0  ;;  %v4506_v0 = vshll.u32 %v24826_v59, 16 }
 0x1d6   : > { %v4501_v38 = vsel %vm438_vm2, %v4496_v4, %v4500_v13  ;;  %v24916_v4 = vld [vmem:[%s23419_s21 + $0x84] sm:$0xff]  }
 0x1d7   : > { %v4508_v61 = vrot.slane %v4506_v0, 1 }
 0x1dc   : > { %19594 = vmatmul.mubr.msk.bf16.gmra.mrb[20].mxu0 %vm604_vm0, %v17135_v24  ;;  %v4510_v24 = vshrl.u32 %v24826_v59, 16 }
 0x1dd   : > { %19597 = vmatprep.mubr.msk.bf16.mxu0 %vm604_vm0, %v17136_v14  ;;  %v24850_v14 = vld [vmem:[%s23419_s21 + $0x54] sm:$0xff]  }
 0x1de   : > { %v4512_v17 = vor.u32 %v4510_v24, %v4508_v61  ;;  %v4522_v42 = vshll.u32 %v24850_v14, 16  ;;  %v4526_v2 = vshrl.u32 %v24850_v14, 16 }
 0x1e0   : > { %v4524_v3 = vrot.slane %v4522_v42, 1 }
 0x1e2   : > { %v4528_v53 = vor.u32 %v4526_v2, %v4524_v3 }
 0x1e4   : > { %19598 = vmatmul.mubr.msk.bf16.gmra.mrb[24].mxu0 %vm604_vm0, %v17137_v35  ;;  %v4516_v35 = vrot.slane %v4514_v39, 1 }
 0x1e5   : > { %19601 = vmatprep.mubr.msk.bf16.mxu0 %vm604_vm0, %v17138_v21  ;;  %v4509_v21 = vsel %vm438_vm2, %v4504_v30, %v4508_v61  ;;  %v24926_v61 = vld [vmem:[%s23419_s21 + $0x8c] sm:$0xff]   ;;  %v27501_v30 = vshll.u32 %v24916_v4, 16 }
 0x1e6   : > { %v4517_v63 = vsel %vm438_vm2, %v4512_v17, %v4516_v35 }
 0x1ec   : > { %19602 = vmatmul.mubr.msk.bf16.gmra.mrb[28].mxu0 %vm604_vm0, %v17139_v44  ;;  %v4530_v44 = vshll.u32 %v24860_v22, 16 }
 0x1ed   : > { %19605 = vmatprep.mubr.msk.bf16.mxu0 %vm604_vm0, %v17140_v7  ;;  %v4520_v7 = vor.u32 %v4518_v18, %v4516_v35  ;;  %v27510_v35 = vshrl.u32 %v24904_v48, 16 }
 0x1ee   : > { %v4532_v45 = vrot.slane %v4530_v44, 1 }
 0x1ef   : > { %v4525_v27 = vsel %vm438_vm2, %v4520_v7, %v4524_v3  ;;  %v27502_v3 = vshrl.u32 %v24916_v4, 16  ;;  %v27499_v7 = vshll.u32 %v24926_v61, 16 }
 0x1f0   : > { %v4536_v60 = vor.u32 %v4534_v11, %v4532_v45 }
 0x1f4   : > { %19606 = vmatmul.mubr.msk.bf16.gmra.mrb[32].mxu0 %vm604_vm0, %v17141_v56  ;;  %v4538_v56 = vshll.u32 %v24872_v10, 16 }
 0x1f5   : > { %19609 = vmatprep.mubr.msk.bf16.mxu0 %vm604_vm0, %v17142_v34  ;;  %v4533_v34 = vsel %vm438_vm2, %v4528_v53, %v4532_v45 }
 0x1f6   : > { %v4540_v41 = vrot.slane %v4538_v56, 1 }
 0x1f8   : > { %v4541_v49 = vsel %vm438_vm2, %v4536_v60, %v4540_v41 }
 0x1fc   : > { %19610 = vmatmul.mubr.msk.bf16.gmra.mrb[36].mxu0 %vm604_vm0, %v17143_v8  ;;  %v4544_v8 = vor.u32 %v4542_v43, %v4540_v41 }
 0x1fd   : > { %19615 = vmatprep.mubr.msk.bf16.mxu0 %vm604_vm0, %v4469_v62  ;;  %v4548_v62 = vrot.slane %v4546_v46, 1 }
 0x1ff   : > { %v4552_v13 = vor.u32 %v4550_v16, %v4548_v62 }
 0x204   : > { %19616 = vmatmul.mubr.msk.bf16.vlgmr.msra.gmra.mrb[0].mxu0 %vm604_vm0, %v4477_v55  ;;  %v4549_v55 = vsel %vm438_vm2, %v4544_v8, %v4548_v62  ;;  %v4580_v62 = vrot.slane %v27499_v7, 1 }
 0x205   : > { %19656 = vmatpush3.bf16.msra.mxu0 %v24708_v57  ;;  %19619 = vmatprep.mubr.msk.bf16.mxu0 %vm604_vm0, %v4485_v25  ;;  %v4493_v57 = vsel %vm438_vm2, %v4488_v28, %v4492_v32  ;;  %v4558_v25 = vshrl.u32 %v24894_v36, 16  ;;  %v27506_v32 = vshll.u32 %v24904_v48, 16  ;;  %v4556_v28 = vrot.slane %v27511_v26, 1 }
 0x206   : > { %19697 = vmatprep.subr.bf16.mxu0 %v24820_v40 }
 0x207   : > { %v4557_v17 = vsel %vm438_vm2, %v4552_v13, %v4556_v28  ;;  %v27505_v13 = vshrl.u32 %v24926_v61, 16 }
 0x20c   : > { %19620 = vmatmul.mubr.msk.bf16.gmra.mrb[4].mxu0 %vm604_vm0, %v4493_v57  ;;  %v4560_v57 = vor.u32 %v4558_v25, %v4556_v28 }
 0x20d   : > { %19623 = vmatprep.mubr.msk.bf16.mxu0 %vm604_vm0, %v4501_v38  ;;  %v4564_v38 = vrot.slane %v27506_v32, 1 }
 0x20f   : > { %v4568_v60 = vor.u32 %v27510_v35, %v4564_v38 }
 0x214   : > { %19624 = vmatmul.mubr.msk.bf16.gmra.mrb[8].mxu0 %vm604_vm0, %v4509_v21 }
 0x215   : > { %19627 = vmatprep.mubr.msk.bf16.mxu0 %vm604_vm0, %v4517_v63  ;;  %v4565_v63 = vsel %vm438_vm2, %v4560_v57, %v4564_v38 }
 0x21c   : > { %19628 = vmatmul.mubr.msk.bf16.gmra.mrb[12].mxu0 %vm604_vm0, %v4525_v27  ;;  %v4572_v27 = vrot.slane %v27501_v30, 1 }
 0x21d   : > { %19631 = vmatprep.mubr.msk.bf16.mxu0 %vm604_vm0, %v4533_v34  ;;  %v24938_v34 = vld [vmem:[%s23419_s21 + $0x94] sm:$0xff]  }
 0x21e   : > { %v4576_v8 = vor.u32 %v27502_v3, %v4572_v27  ;;  %v4573_v28 = vsel %vm438_vm2, %v4568_v60, %v4572_v27  ;;  %v27503_v38 = vshrl.u32 %v24938_v34, 16  ;;  %v24964_v60 = vld [vmem:[%s23419_s21 + $0xa4] sm:$0xff]  }
 0x223   : > { %v19323_v21 = vpop.f32.mrb[0].mxu1 }
 0x224   : > { %19632 = vmatmul.mubr.msk.bf16.gmra.mrb[16].mxu0 %vm604_vm0, %v4541_v49  ;;  %21265 = vst [vmem:[#allocation2 + $0x3a] sm:$0xff] %v19323_v21  ;;  %v1644_v53 = vpop.f32.mrb[1].mxu1  ;;  %v24948_v49 = vld [vmem:[%s23419_s21 + $0x9c] sm:$0xff]  }
 0x225   : > { %19635 = vmatprep.mubr.msk.bf16.mxu0 %vm604_vm0, %v4549_v55  ;;  %21268 = vst [vmem:[#allocation2 + $0x2a] sm:$0xff] %v1644_v53  ;;  %v19324_v45 = vpop.f32.mrb[2].mxu1  ;;  %v27500_v55 = vshll.u32 %v24938_v34, 16  ;;  %v27504_v21 = vshll.u32 %v24948_v49, 16  ;;  %v24957_v53 = vld [vmem:[%s23419_s21 + $0xac] sm:$0xf] }
 0x226   : > { %21271 = vst [vmem:[#allocation2 + $0x42] sm:$0xff] %v19324_v45  ;;  %v1647_v41 = vpop.f32.mrb[3].mxu1  ;;  %v4354_v45 = vld [vmem:[%s23419_s21 + $0xb0] sm:$0x7]  ;;  %v27509_v30 = vshrl.u32 %v24948_v49, 16 }
 0x227   : > { %21274 = vst [vmem:[#allocation2 + $0x32] sm:$0xff] %v1647_v41  ;;  %v4588_v27 = vrot.slane %v27500_v55, 1  ;;  %v27507_v55 = vshll.u32 %v24964_v60, 16 }
 0x229   : > { %v4592_v7 = vor.u32 %v27503_v38, %v4588_v27 }
 0x22b   : > { %v19327_v57 = vpop.f32.mrb[4].mxu1 }
 0x22c   : > { %19636 = vmatmul.mubr.msk.bf16.gmra.mrb[20].mxu0 %vm604_vm0, %v4557_v17  ;;  %v4581_v17 = vsel %vm438_vm2, %v4576_v8, %v4580_v62  ;;  %21277 = vst [vmem:[#allocation2 + $0x5a] sm:$0xff] %v19327_v57  ;;  %v4584_v57 = vor.u32 %v27505_v13, %v4580_v62  ;;  %v27508_v62 = vshrl.u32 %v24964_v60, 16 }
 0x22d   : > { %19639 = vmatprep.mubr.msk.bf16.mxu0 %vm604_vm0, %v4565_v63  ;;  %v1660_v63 = vpop.f32.mrb[5].mxu1 }
 0x22e   : > { %21280 = vst [vmem:[#allocation2 + $0x4a] sm:$0xff] %v1660_v63  ;;  %v19328_v41 = vpop.f32.mrb[6].mxu1  ;;  %v4596_v63 = vrot.slane %v27504_v21, 1 }
 0x22f   : > { %21283 = vst [vmem:[#allocation2 + $0x62] sm:$0xff] %v19328_v41  ;;  %v1663_v8 = vpop.f32.mrb[7].mxu1  ;;  %v4589_v41 = vsel %vm438_vm2, %v4584_v57, %v4588_v27 }
 0x230   : > { %21286 = vst [vmem:[#allocation2 + $0x52] sm:$0xff] %v1663_v8  ;;  %v4597_v3 = vsel %vm438_vm2, %v4592_v7, %v4596_v63  ;;  %v4600_v7 = vor.u32 %v27509_v30, %v4596_v63 }
 0x234   : > { %19640 = vmatmul.mubr.msk.bf16.gmra.mrb[24].mxu0 %vm604_vm0, %v4573_v28  ;;  %v24974_v28 = vcombine.low %v24957_v53, %v4354_v45  ;;  %v4604_v45 = vrot.slane %v27507_v55, 1 }
 0x235   : > { %19643 = vmatprep.mubr.msk.bf16.mxu0 %vm604_vm0, %v4581_v17  ;;  %v19331_v17 = vpop.f32.mrb[8].mxu1 }
 0x236   : > { %v4610_v8 = vshll.u32 %v24974_v28, 16  ;;  %21289 = vst [vmem:[#allocation2 + $0x7a] sm:$0xff] %v19331_v17  ;;  %v1676_v38 = vpop.f32.mrb[9].mxu1  ;;  %v4608_v57 = vor.u32 %v27508_v62, %v4604_v45 }
 0x237   : > { %21292 = vst [vmem:[#allocation2 + $0x6a] sm:$0xff] %v1676_v38  ;;  %v19332_v21 = vpop.f32.mrb[10].mxu1  ;;  %v4605_v38 = vsel %vm438_vm2, %v4600_v7, %v4604_v45 }
 0x238   : > { %21295 = vst [vmem:[#allocation2 + $0x82] sm:$0xff] %v19332_v21  ;;  %v1679_v27 = vpop.f32.mrb[11].mxu1  ;;  %v4612_v17 = vrot.slane %v4610_v8, 1 }
 0x239   : > { %21298 = vst [vmem:[#allocation2 + $0x72] sm:$0xff] %v1679_v27 }
 0x23b   : > { %v19335_v13 = vpop.f32.mrb[12].mxu1 }
 0x23c   : > { %19644 = vmatmul.mubr.msk.bf16.gmra.mrb[28].mxu0 %vm604_vm0, %v4589_v41  ;;  %v4613_v41 = vsel %vm438_vm2, %v4608_v57, %v4612_v17  ;;  %21301 = vst [vmem:[#allocation2 + $0x9a] sm:$0xff] %v19335_v13  ;;  %v1692_v32 = vpop.f32.mrb[13].mxu1  ;;  %v25001_v57 = vld [vmem:[%s27409_s1 + $0x68] sm:$0xff]  }
 0x23d   : > { %19647 = vmatprep.mubr.msk.bf16.mxu0 %vm604_vm0, %v4597_v3  ;;  %21304 = vst [vmem:[#allocation2 + $0x8a] sm:$0xff] %v1692_v32  ;;  %v19336_v21 = vpop.f32.mrb[14].mxu1  ;;  %v4614_v3 = vshrl.u32 %v24974_v28, 16 }
 0x23e   : > { %21307 = vst [vmem:[#allocation2 + $0xa2] sm:$0xff] %v19336_v21  ;;  %v1695_v63 = vpop.f32.mrb[15].mxu1 }
 0x23f   : > { %21310 = vst [vmem:[#allocation2 + $0x92] sm:$0xff] %v1695_v63  ;;  %v4616_v27 = vor.u32 %v4614_v3, %v4612_v17 }
 0x243   : > { %v19339_v8 = vpop.f32.mrb[16].mxu1 }
 0x244   : > { %19648 = vmatmul.mubr.msk.bf16.gmra.mrb[32].mxu0 %vm604_vm0, %v4605_v38  ;;  %21313 = vst [vmem:[#allocation2 + $0xba] sm:$0xff] %v19339_v8  ;;  %v1708_v45 = vpop.f32.mrb[17].mxu1 }
 0x245   : > { %19651 = vmatprep.mubr.msk.bf16.mxu0 %vm604_vm0, %v4613_v41  ;;  %21316 = vst [vmem:[#allocation2 + $0xaa] sm:$0xff] %v1708_v45  ;;  %v19340_v7 = vpop.f32.mrb[18].mxu1 }
 0x246   : > { %21319 = vst [vmem:[#allocation2 + $0xc2] sm:$0xff] %v19340_v7  ;;  %v1711_v32 = vpop.f32.mrb[19].mxu1 }
 0x247   : > { %21322 = vst [vmem:[#allocation2 + $0xb2] sm:$0xff] %v1711_v32 }
 0x24b   : > { %v19343_v13 = vpop.f32.mrb[20].mxu1 }
 0x24c   : > { %19652 = vmatmul.mubr.msk.bf16.gmra.mrb[40].mxu0 %vm604_vm0, %v4616_v27  ;;  %21325 = vst [vmem:[#allocation2 + $0xda] sm:$0xff] %v19343_v13  ;;  %v1724_v17 = vpop.f32.mrb[21].mxu1 }
 0x24d   : > { %19657 = vmatprep.mubr.msk.bf16.mxu0 %vm604_vm0, %v24764_v15  ;;  %21328 = vst [vmem:[#allocation2 + $0xca] sm:$0xff] %v1724_v17  ;;  %v19344_v38 = vpop.f32.mrb[22].mxu1 }
 0x24e   : > { %21331 = vst [vmem:[#allocation2 + $0xe2] sm:$0xff] %v19344_v38  ;;  %v1727_v41 = vpop.f32.mrb[23].mxu1  ;;  %v5119_v38 = vld [vmem:[%s23419_s21 + $0x14] sm:$0xe] }
 0x24f   : > { %21334 = vst [vmem:[#allocation2 + $0xd2] sm:$0xff] %v1727_v41 }
 0x254   : > { %19658 = vmatmul.mubr.msk.bf16.vlgmr.msra.gmra.mrb[0].mxu0 %vm604_vm0, %v24769_v6 }
 0x255   : > { %19698 = vmatpush3.bf16.msra.mxu0 %v24820_v40  ;;  %19661 = vmatprep.mubr.msk.bf16.mxu0 %vm604_vm0, %v24780_v37 }
 0x256   : > { %19739 = vmatprep.subr.bf16.mxu0 %v25001_v57 }
 0x25c   : > { %19662 = vmatmul.mubr.msk.bf16.gmra.mrb[4].mxu0 %vm604_vm0, %v24786_v31 }
 0x25d   : > { %19665 = vmatprep.mubr.msk.bf16.mxu0 %vm604_vm0, %v24799_v58 }
 0x264   : > { %19666 = vmatmul.mubr.msk.bf16.gmra.mrb[8].mxu0 %vm604_vm0, %v24809_v9 }
 0x265   : > { %19669 = vmatprep.mubr.msk.bf16.mxu0 %vm604_vm0, %v24826_v59 }
 0x26c   : > { %19670 = vmatmul.mubr.msk.bf16.gmra.mrb[12].mxu0 %vm604_vm0, %v24837_v12 }
 0x26d   : > { %19673 = vmatprep.mubr.msk.bf16.mxu0 %vm604_vm0, %v24850_v14 }
 0x273   : > { %v19389_v15 = vpop.f32.mrb[24].mxu1 }
 0x274   : > { %19674 = vmatmul.mubr.msk.bf16.gmra.mrb[16].mxu0 %vm604_vm0, %v24860_v22  ;;  %21337 = vst [vmem:[#allocation2 + $0xfa] sm:$0xff] %v19389_v15  ;;  %v2086_v40 = vpop.f32.mrb[25].mxu1  ;;  %v25039_v15 = vcombine.low %v5119_v38, %v24757_v5 }
 0x275   : > { %19677 = vmatprep.mubr.msk.bf16.mxu0 %vm604_vm0, %v24872_v10  ;;  %21340 = vst [vmem:[#allocation2 + $0xea] sm:$0xff] %v2086_v40  ;;  %v19390_v21 = vpop.f32.mrb[26].mxu1 }
 0x276   : > { %21343 = vst [vmem:[#allocation2 + $0x102] sm:$0xff] %v19390_v21  ;;  %v2089_v3 = vpop.f32.mrb[27].mxu1 }
 0x277   : > { %21346 = vst [vmem:[#allocation2 + $0xf2] sm:$0xff] %v2089_v3 }
 0x27b   : > { %v19393_v63 = vpop.f32.mrb[28].mxu1 }
 0x27c   : > { %19678 = vmatmul.mubr.msk.bf16.gmra.mrb[20].mxu0 %vm604_vm0, %v24882_v23  ;;  %21349 = vst [vmem:[#allocation2 + $0x11a] sm:$0xff] %v19393_v63  ;;  %v2102_v27 = vpop.f32.mrb[29].mxu1  ;;  %v4350_v63 = vld [vmem:[%s23419_s21 + $0xb0] sm:$0x3] }
 0x27d   : > { %19681 = vmatprep.mubr.msk.bf16.mxu0 %vm604_vm0, %v24894_v36  ;;  %21352 = vst [vmem:[#allocation2 + $0x10a] sm:$0xff] %v2102_v27  ;;  %v19394_v8 = vpop.f32.mrb[30].mxu1  ;;  %v5126_v27 = vrot.slane %v25039_v15, 1 }
 0x27e   : > { %21355 = vst [vmem:[#allocation2 + $0x122] sm:$0xff] %v19394_v8  ;;  %v2105_v45 = vpop.f32.mrb[31].mxu1  ;;  %v5127_v8 = vrot.slane %v24769_v6, 1 }
 0x27f   : > { %21358 = vst [vmem:[#allocation2 + $0x112] sm:$0xff] %v2105_v45  ;;  %v17210_v45 = vcombine.low %v24957_v53, %v4350_v63  ;;  %v5133_v63 = vrot.slane %v24799_v58, 1 }
 0x283   : > { %v19397_v7 = vpop.f32.mrb[32].mxu1 }
 0x284   : > { %19682 = vmatmul.mubr.msk.bf16.gmra.mrb[24].mxu0 %vm604_vm0, %v24904_v48  ;;  %21361 = vst [vmem:[#allocation2 + $0x13a] sm:$0xff] %v19397_v7  ;;  %v2118_v32 = vpop.f32.mrb[33].mxu1  ;;  %v5128_v7 = vsel %vm1108_vm4, %v5126_v27, %v5127_v8  ;;  %v5135_v27 = vrot.slane %v24809_v9, 1 }
 0x285   : > { %19685 = vmatprep.mubr.msk.bf16.mxu0 %vm604_vm0, %v24916_v4  ;;  %21364 = vst [vmem:[#allocation2 + $0x12a] sm:$0xff] %v2118_v32  ;;  %v19398_v13 = vpop.f32.mrb[34].mxu1  ;;  %v5129_v32 = vrot.slane %v24780_v37, 1 }
 0x286   : > { %21367 = vst [vmem:[#allocation2 + $0x142] sm:$0xff] %v19398_v13  ;;  %v2121_v17 = vpop.f32.mrb[35].mxu1  ;;  %v5131_v13 = vrot.slane %v24786_v31, 1 }
 0x287   : > { %21370 = vst [vmem:[#allocation2 + $0x132] sm:$0xff] %v2121_v17  ;;  %v5130_v17 = vsel %vm1108_vm4, %v5127_v8, %v5129_v32 }
 0x288   : > { %v5132_v38 = vsel %vm1108_vm4, %v5129_v32, %v5131_v13  ;;  %v5134_v8 = vsel %vm1108_vm4, %v5131_v13, %v5133_v63  ;;  %v5141_v13 = vrot.slane %v24850_v14, 1 }
 0x28b   : > { %v19401_v41 = vpop.f32.mrb[36].mxu1 }
 0x28c   : > { %19686 = vmatmul.mubr.msk.bf16.gmra.mrb[28].mxu0 %vm604_vm0, %v24926_v61  ;;  %v2134_v40 = vpop.f32.mrb[37].mxu1 }
 0x28d   : > { %19689 = vmatprep.mubr.msk.bf16.mxu0 %vm604_vm0, %v24938_v34  ;;  %v19402_v21 = vpop.f32.mrb[38].mxu1 }
 0x28e   : > { %2228 = vst [vmem:[#allocation2 + $0x162] sm:$0xf] %v19402_v21  ;;  %v2137_v3 = vpop.f32.mrb[39].mxu1  ;;  %v25059_v21 = vld [vmem:[%s27409_s1 + $0x70] sm:$0xff]  }
 0x294   : > { %19690 = vmatmul.mubr.msk.bf16.gmra.mrb[32].mxu0 %vm604_vm0, %v24948_v49 }
 0x295   : > { %19693 = vmatprep.mubr.msk.bf16.mxu0 %vm604_vm0, %v24964_v60 }
 0x29c   : > { %19694 = vmatmul.mubr.msk.bf16.gmra.mrb[40].mxu0 %vm604_vm0, %v17210_v45  ;;  %v5136_v45 = vsel %vm1108_vm4, %v5133_v63, %v5135_v27 }
 0x29d   : > { %19699 = vmatprep.mubr.msk.bf16.mxu0 %vm604_vm0, %v5128_v7  ;;  %v5137_v7 = vrot.slane %v24826_v59, 1 }
 0x29f   : > { %v5138_v32 = vsel %vm1108_vm4, %v5135_v27, %v5137_v7  ;;  %v5145_v27 = vrot.slane %v24872_v10, 1 }
 0x2a4   : > { %19700 = vmatmul.mubr.msk.bf16.vlgmr.msra.gmra.mrb[0].mxu0 %vm604_vm0, %v5130_v17 }
 0x2a5   : > { %19740 = vmatpush3.bf16.msra.mxu0 %v25001_v57  ;;  %19703 = vmatprep.mubr.msk.bf16.mxu0 %vm604_vm0, %v5132_v38  ;;  %v5139_v57 = vrot.slane %v24837_v12, 1  ;;  %v5143_v38 = vrot.slane %v24860_v22, 1 }
 0x2a6   : > { %19781 = vmatprep.subr.bf16.mxu0 %v25059_v21 }
 0x2a7   : > { %v5140_v17 = vsel %vm1108_vm4, %v5137_v7, %v5139_v57  ;;  %v5142_v63 = vsel %vm1108_vm4, %v5139_v57, %v5141_v13  ;;  %v5146_v7 = vsel %vm1108_vm4, %v5143_v38, %v5145_v27  ;;  %v5149_v57 = vrot.slane %v24894_v36, 1 }
 0x2ac   : > { %19704 = vmatmul.mubr.msk.bf16.gmra.mrb[4].mxu0 %vm604_vm0, %v5134_v8  ;;  %v5144_v8 = vsel %vm1108_vm4, %v5141_v13, %v5143_v38  ;;  %v5153_v38 = vrot.slane %v24916_v4, 1 }
 0x2ad   : > { %19707 = vmatprep.mubr.msk.bf16.mxu0 %vm604_vm0, %v5136_v45  ;;  %v5147_v45 = vrot.slane %v24882_v23, 1 }
 0x2af   : > { %v5150_v13 = vsel %vm1108_vm4, %v5147_v45, %v5149_v57 }
 0x2b4   : > { %19708 = vmatmul.mubr.msk.bf16.gmra.mrb[8].mxu0 %vm604_vm0, %v5138_v32  ;;  %v5148_v32 = vsel %vm1108_vm4, %v5145_v27, %v5147_v45 }
 0x2b5   : > { %19711 = vmatprep.mubr.msk.bf16.mxu0 %vm604_vm0, %v5140_v17  ;;  %v5151_v17 = vrot.slane %v24904_v48, 1 }
 0x2b7   : > { %v5154_v35 = vsel %vm1108_vm4, %v5151_v17, %v5153_v38 }
 0x2bc   : > { %19712 = vmatmul.mubr.msk.bf16.gmra.mrb[12].mxu0 %vm604_vm0, %v5142_v63  ;;  %v5152_v63 = vsel %vm1108_vm4, %v5149_v57, %v5151_v17 }
 0x2bd   : > { %19715 = vmatprep.mubr.msk.bf16.mxu0 %vm604_vm0, %v5144_v8  ;;  %v5155_v8 = vrot.slane %v24926_v61, 1 }
 0x2bf   : > { %v5156_v57 = vsel %vm1108_vm4, %v5153_v38, %v5155_v8 }
 0x2c4   : > { %19716 = vmatmul.mubr.msk.bf16.gmra.mrb[16].mxu0 %vm604_vm0, %v5146_v7  ;;  %v4230_v7 = vld [vmem:[#allocation2 + $0x162] sm:$0xf] }
 0x2c5   : > { %19719 = vmatprep.mubr.msk.bf16.mxu0 %vm604_vm0, %v5148_v32 }
 0x2cc   : > { %19720 = vmatmul.mubr.msk.bf16.gmra.mrb[20].mxu0 %vm604_vm0, %v5150_v13 }
 0x2cd   : > { %19723 = vmatprep.mubr.msk.bf16.mxu0 %vm604_vm0, %v5152_v63 }
 0x2cf   : > { %v19611_v27 = vpop.f32.mrb[36].mxu0 }
 0x2d0   : > { %v4269_v55 = vadd.f32 %v19611_v27, %v19401_v41  ;;  %v4136_v32 = vpop.f32.mrb[37].mxu0  ;;  %v5157_v41 = vrot.slane %v24938_v34, 1  ;;  %v5479_v27 = vrot.slane %v4470_v19, 1  ;;  %v5487_v19 = vrot.slane %v4486_v52, 1 }
 0x2d1   : > { %v4267_v62 = vadd.f32 %v4136_v32, %v2134_v40  ;;  %v19612_v30 = vpop.f32.mrb[38].mxu0  ;;  %v5159_v40 = vrot.slane %v24948_v49, 1  ;;  %v5495_v52 = vrot.slane %v4502_v1, 1 }
 0x2d2   : > { %4309 = vst [vmem:[#allocation2 + $0x15a] sm:$0xff] %v4269_v55  ;;  %v4270_v45 = vadd.f32 %v19612_v30, %v4230_v7  ;;  %v4139_v26 = vpop.f32.mrb[39].mxu0  ;;  %v5158_v63 = vsel %vm1108_vm4, %v5155_v8, %v5157_v41  ;;  %v5163_v30 = vrot.slane %v24974_v28, 1  ;;  %v5480_v7 = vrot.slane %v4466_v47, 2 }
 0x2d3   : > { %4307 = vst [vmem:[#allocation2 + $0x14a] sm:$0xff] %v4267_v62  ;;  %v4268_v13 = vadd.f32 %v4139_v26, %v2137_v3  ;;  %v5160_v55 = vsel %vm1108_vm4, %v5157_v41, %v5159_v40  ;;  %v5161_v26 = vrot.slane %v24964_v60, 1  ;;  %v5475_v62 = vshll.u32 %v25039_v15, 16 }
 0x2d4   : > { %4310 = vst [vmem:[#allocation2 + $0x162] sm:$0xf] %v4270_v45  ;;  %19724 = vmatmul.mubr.msk.bf16.gmra.mrb[24].mxu0 %vm604_vm0, %v5154_v35  ;;  %v5472_v35 = vshrl.u32 %v25039_v15, 16  ;;  %v5481_v32 = vor.u32 %v5480_v7, %v5479_v27  ;;  %v5483_v15 = vrot.slane %v4478_v51, 1  ;;  %v5484_v45 = vrot.slane %v4474_v50, 2 }
 0x2d5   : > { %4308 = vst [vmem:[#allocation2 + $0x152] sm:$0xff] %v4268_v13  ;;  %19727 = vmatprep.mubr.msk.bf16.mxu0 %vm604_vm0, %v5156_v57  ;;  %v5162_v3 = vsel %vm1108_vm4, %v5159_v40, %v5161_v26  ;;  %v5164_v17 = vsel %vm1108_vm4, %v5161_v26, %v5163_v30  ;;  %v5477_v8 = vrot.slane %v5475_v62, 2  ;;  %v5488_v47 = vrot.slane %v4482_v20, 2 }
 0x2d6   : > { %v5474_v38 = vrot.slane %v5472_v35, 1  ;;  %v5485_v13 = vor.u32 %v5484_v45, %v5483_v15  ;;  %v5491_v51 = vrot.slane %v4494_v33, 1  ;;  %v5492_v50 = vrot.slane %v4490_v29, 2 }
 0x2d7   : > { %v5489_v41 = vor.u32 %v5488_v47, %v5487_v19  ;;  %v5496_v20 = vrot.slane %v4498_v54, 2  ;;  %v5499_v54 = vrot.slane %v4510_v24, 1  ;;  %v5500_v26 = vrot.slane %v4506_v0, 2 }
 0x2d8   : > { %v5478_v28 = vor.u32 %v5477_v8, %v5474_v38  ;;  %v5486_v40 = vsel %vm1454_vm6, %v5481_v32, %v5485_v13  ;;  %v5493_v29 = vor.u32 %v5492_v50, %v5491_v51  ;;  %v5503_v35 = vrot.slane %v4518_v18, 1 }
 0x2d9   : > { %v5497_v33 = vor.u32 %v5496_v20, %v5495_v52  ;;  %v5501_v62 = vor.u32 %v5500_v26, %v5499_v54  ;;  %v5507_v24 = vrot.slane %v4526_v2, 1  ;;  %v5508_v0 = vrot.slane %v4522_v42, 2 }
 0x2da   : > { %v5482_v57 = vsel %vm1454_vm6, %v5478_v28, %v5481_v32  ;;  %v5494_v1 = vsel %vm1454_vm6, %v5489_v41, %v5493_v29  ;;  %v5511_v18 = vrot.slane %v4534_v11, 1  ;;  %v5515_v2 = vrot.slane %v4542_v43, 1 }
 0x2db   : > { %v5509_v8 = vor.u32 %v5508_v0, %v5507_v24  ;;  %v5516_v42 = vrot.slane %v4538_v56, 2  ;;  %v5519_v11 = vrot.slane %v4550_v16, 1  ;;  %v5523_v43 = vrot.slane %v4558_v25, 1 }
 0x2dc   : > { %19728 = vmatmul.mubr.msk.bf16.gmra.mrb[28].mxu0 %vm604_vm0, %v5158_v63  ;;  %v5490_v63 = vsel %vm1454_vm6, %v5485_v13, %v5489_v41  ;;  %v27705_v56 = vshll.u32 %v24894_v36, 16  ;;  %v27706_v16 = vshrl.u32 %v24904_v48, 16  ;;  %v27708_v51 = vshrl.u32 %v24916_v4, 16 }
 0x2dd   : > { %19731 = vmatprep.mubr.msk.bf16.mxu0 %vm604_vm0, %v5160_v55  ;;  %v25143_v55 = vld [vmem:[%s27409_s1 + $0x80] sm:$0xff]   ;;  %v5517_v32 = vor.u32 %v5516_v42, %v5515_v2 }
 0x2de   : > { %v5527_v47 = vrot.slane %v27706_v16, 1  ;;  %v5531_v50 = vrot.slane %v27708_v51, 1  ;;  %v5859_v16 = vld [vmem:[%s23419_s21 + $0x14] sm:$0xc]  ;;  %v5869_v51 = vrot.slane %v24780_v37, 2  ;;  %v5875_v37 = vrot.slane %v24809_v9, 2 }
 0x2df   : > { %v5881_v9 = vrot.slane %v24850_v14, 2  ;;  %v5889_v14 = vrot.slane %v24894_v36, 2 }
 0x2e4   : > { %19732 = vmatmul.mubr.msk.bf16.gmra.mrb[32].mxu0 %vm604_vm0, %v5162_v3 }
 0x2e5   : > { %19735 = vmatprep.mubr.msk.bf16.mxu0 %vm604_vm0, %v5164_v17  ;;  %v5502_v17 = vsel %vm1454_vm6, %v5497_v33, %v5501_v62 }
 0x2ec   : > { %19736 = vmatmul.mubr.msk.bf16.gmra.mrb[40].mxu0 %vm604_vm0, %v5163_v30  ;;  %v5498_v30 = vsel %vm1454_vm6, %v5493_v29, %v5497_v33  ;;  %v27710_v29 = vshrl.u32 %v24926_v61, 16 }
 0x2ed   : > { %19741 = vmatprep.mubr.msk.bf16.mxu0 %vm604_vm0, %v5482_v57  ;;  %v5524_v57 = vrot.slane %v27705_v56, 2 }
 0x2ee   : > { %v5535_v33 = vrot.slane %v27710_v29, 1  ;;  %v5877_v29 = vrot.slane %v24826_v59, 2  ;;  %v5885_v59 = vrot.slane %v24872_v10, 2 }
 0x2ef   : > { %v5525_v41 = vor.u32 %v5524_v57, %v5523_v43 }
 0x2f4   : > { %19742 = vmatmul.mubr.msk.bf16.vlgmr.msra.gmra.mrb[0].mxu0 %vm604_vm0, %v5486_v40 }
 0x2f5   : > { %19782 = vmatpush3.bf16.msra.mxu0 %v25059_v21  ;;  %19745 = vmatprep.mubr.msk.bf16.mxu0 %vm604_vm0, %v5490_v63  ;;  %v5504_v21 = vrot.slane %v4514_v39, 2  ;;  %v5512_v39 = vrot.slane %v4530_v44, 2  ;;  %v5520_v44 = vrot.slane %v4546_v46, 2  ;;  %v27707_v46 = vshll.u32 %v24904_v48, 16 }
 0x2f6   : > { %19823 = vmatprep.subr.bf16.mxu0 %v25143_v55  ;;  %v27709_v63 = vshll.u32 %v24916_v4, 16 }
 0x2f7   : > { %v5505_v3 = vor.u32 %v5504_v21, %v5503_v35  ;;  %v5513_v27 = vor.u32 %v5512_v39, %v5511_v18  ;;  %v5521_v15 = vor.u32 %v5520_v44, %v5519_v11  ;;  %v5528_v13 = vrot.slane %v27707_v46, 2  ;;  %v5464_v35 = vld [vmem:[%s23419_s21 + $0xb0] sm:$0xf] }
 0x2f8   : > { %v5532_v52 = vrot.slane %v27709_v63, 2  ;;  %v27715_v39 = vshll.u32 %v24948_v49, 16  ;;  %v27716_v44 = vshrl.u32 %v24964_v60, 16 }
 0x2f9   : > { %v5506_v38 = vsel %vm1454_vm6, %v5501_v62, %v5505_v3  ;;  %v5510_v7 = vsel %vm1454_vm6, %v5505_v3, %v5509_v8  ;;  %v5514_v28 = vsel %vm1454_vm6, %v5509_v8, %v5513_v27  ;;  %v5518_v45 = vsel %vm1454_vm6, %v5513_v27, %v5517_v32 }
 0x2fa   : > { %v5522_v19 = vsel %vm1454_vm6, %v5517_v32, %v5521_v15  ;;  %v5529_v40 = vor.u32 %v5528_v13, %v5527_v47  ;;  %v5526_v25 = vsel %vm1454_vm6, %v5521_v15, %v5525_v41  ;;  %v5533_v26 = vor.u32 %v5532_v52, %v5531_v50  ;;  %v25252_v52 = vld [vmem:[%s27409_s1 + $0x78] sm:$0xff]  }
 0x2fb   : > { %v27712_v62 = vshrl.u32 %v24938_v34, 16  ;;  %v5544_v8 = vrot.slane %v27715_v39, 2  ;;  %v25221_v27 = vcombine.low %v24957_v53, %v5464_v35  ;;  %v5547_v32 = vrot.slane %v27716_v44, 1  ;;  %v25327_v44 = vld [vmem:[%s23419_s21 + $0x30] sm:$0xf] }
 0x2fc   : > { %19746 = vmatmul.mubr.msk.bf16.gmra.mrb[4].mxu0 %vm604_vm0, %v5494_v1  ;;  %v5530_v20 = vsel %vm1454_vm6, %v5525_v41, %v5529_v40  ;;  %v27711_v1 = vshll.u32 %v24926_v61, 16  ;;  %v5534_v21 = vsel %vm1454_vm6, %v5529_v40, %v5533_v26  ;;  %v27717_v15 = vshll.u32 %v24964_v60, 16 }
 0x2fd   : > { %19749 = vmatprep.mubr.msk.bf16.mxu0 %vm604_vm0, %v5498_v30  ;;  %v5539_v3 = vrot.slane %v27712_v62, 1  ;;  %v5552_v42 = vshrl.u32 %v25221_v27, 16  ;;  %v17282_v13 = vcombine.low %v5859_v16, %v24757_v5  ;;  %v5867_v40 = vrot.slane %v24769_v6, 2 }
 0x2fe   : > { %v5536_v54 = vrot.slane %v27711_v1, 2  ;;  %v5548_v53 = vrot.slane %v27717_v15, 2  ;;  %v5871_v50 = vrot.slane %v24786_v31, 2  ;;  %v5873_v6 = vrot.slane %v24799_v58, 2  ;;  %v25333_v15 = vld [vmem:[%s23419_s21 + $0x38] sm:$0xf] }
 0x2ff   : > { %v5554_v43 = vrot.slane %v5552_v42, 1  ;;  %v5866_v41 = vrot.slane %v17282_v13, 2  ;;  %v5870_v63 = vsel %vm1850_vm1, %v5867_v40, %v5869_v51  ;;  %v5883_v1 = vrot.slane %v24860_v22, 2 }
 0x300   : > { %v5537_v30 = vor.u32 %v5536_v54, %v5535_v33  ;;  %v5549_v57 = vor.u32 %v5548_v53, %v5547_v32  ;;  %v5872_v5 = vsel %vm1850_vm1, %v5869_v51, %v5871_v50  ;;  %v5874_v31 = vsel %vm1850_vm1, %v5871_v50, %v5873_v6  ;;  %v25330_v32 = vld [vmem:[%s23419_s21 + $0x34] sm:$0xf]  ;;  %v25359_v51 = vld [vmem:[%s23419_s21 + $0x40] sm:$0xf]  ;;  %v25362_v50 = vld [vmem:[%s23419_s21 + $0x44] sm:$0xf] }
 0x301   : > { %v5878_v33 = vsel %vm1850_vm1, %v5875_v37, %v5877_v29  ;;  %v5891_v22 = vrot.slane %v24904_v48, 2  ;;  %v5895_v62 = vrot.slane %v24926_v61, 2  ;;  %v5897_v48 = vrot.slane %v24938_v34, 2  ;;  %v25304_v61 = vld [vmem:[%s23419_s21 + $0x28] sm:$0xf] }
 0x302   : > { %v5538_v0 = vsel %vm1454_vm6, %v5533_v26, %v5537_v30  ;;  %v5884_v26 = vsel %vm1850_vm1, %v5881_v9, %v5883_v1 }
 0x304   : > { %19750 = vmatmul.mubr.msk.bf16.gmra.mrb[8].mxu0 %vm604_vm0, %v5502_v17  ;;  %v27713_v17 = vshll.u32 %v24938_v34, 16 }
 0x305   : > { %19753 = vmatprep.mubr.msk.bf16.mxu0 %vm604_vm0, %v5506_v38  ;;  %v27714_v38 = vshrl.u32 %v24948_v49, 16 }
 0x306   : > { %v5540_v24 = vrot.slane %v27713_v17, 2  ;;  %v5899_v17 = vrot.slane %v24948_v49, 2  ;;  %v5901_v49 = vrot.slane %v24964_v60, 2 }
 0x307   : > { %v5543_v18 = vrot.slane %v27714_v38, 1  ;;  %v5898_v38 = vsel %vm1850_vm1, %v5895_v62, %v5897_v48 }
 0x308   : > { %v5900_v39 = vsel %vm1850_vm1, %v5897_v48, %v5899_v17  ;;  %v5902_v60 = vsel %vm1850_vm1, %v5899_v17, %v5901_v49  ;;  %v25423_v48 = vld [vmem:[%s27409_s1 + $0x88] sm:$0xff]  }
 0x309   : > { %v5545_v2 = vor.u32 %v5544_v8, %v5543_v18  ;;  %v5903_v8 = vrot.slane %v25221_v27, 2 }
 0x30b   : > { %v5550_v47 = vsel %vm1454_vm6, %v5545_v2, %v5549_v57 }
 0x30c   : > { %19754 = vmatmul.mubr.msk.bf16.gmra.mrb[12].mxu0 %vm604_vm0, %v5510_v7  ;;  %v5541_v7 = vor.u32 %v5540_v24, %v5539_v3  ;;  %v6324_v24 = vld [vmem:[%s23419_s21 + $0x1c] sm:$0xc] }
 0x30d   : > { %19757 = vmatprep.mubr.msk.bf16.mxu0 %vm604_vm0, %v5514_v28  ;;  %v5555_v28 = vshll.u32 %v25221_v27, 16  ;;  %v5904_v27 = vsel %vm1850_vm1, %v5901_v49, %v5903_v8 }
 0x30e   : > { %v5542_v11 = vsel %vm1454_vm6, %v5537_v30, %v5541_v7  ;;  %v5886_v30 = vsel %vm1850_vm1, %v5883_v1, %v5885_v59 }
 0x30f   : > { %v5557_v56 = vrot.slane %v5555_v28, 2 }
 0x314   : > { %19758 = vmatmul.mubr.msk.bf16.gmra.mrb[16].mxu0 %vm604_vm0, %v5518_v45  ;;  %v5546_v45 = vsel %vm1454_vm6, %v5541_v7, %v5545_v2  ;;  %v25321_v2 = vld [vmem:[%s23419_s21 + $0x2c] sm:$0xf] }
 0x315   : > { %19761 = vmatprep.mubr.msk.bf16.mxu0 %vm604_vm0, %v5522_v19  ;;  %v5558_v19 = vor.u32 %v5557_v56, %v5554_v43 }
 0x317   : > { %v5559_v46 = vsel %vm1454_vm6, %v5549_v57, %v5558_v19 }
 0x31c   : > { %19762 = vmatmul.mubr.msk.bf16.gmra.mrb[20].mxu0 %vm604_vm0, %v5526_v25  ;;  %v5868_v25 = vsel %vm1850_vm1, %v5866_v41, %v5867_v40 }
 0x31d   : > { %19765 = vmatprep.mubr.msk.bf16.mxu0 %vm604_vm0, %v5530_v20  ;;  %v5876_v20 = vsel %vm1850_vm1, %v5873_v6, %v5875_v37 }
 0x324   : > { %19766 = vmatmul.mubr.msk.bf16.gmra.mrb[24].mxu0 %vm604_vm0, %v5534_v21  ;;  %v5893_v21 = vrot.slane %v24916_v4, 2  ;;  %v25301_v4 = vld [vmem:[%s23419_s21 + $0x24] sm:$0xf] }
 0x325   : > { %19769 = vmatprep.mubr.msk.bf16.mxu0 %vm604_vm0, %v5538_v0  ;;  %v25298_v0 = vld [vmem:[%s23419_s21 + $0x20] sm:$0xf]  ;;  %v25313_v34 = vcombine.low %v25301_v4, %v25304_v61 }
 0x326   : > { %v5894_v3 = vsel %vm1850_vm1, %v5891_v22, %v5893_v21  ;;  %v5896_v36 = vsel %vm1850_vm1, %v5893_v21, %v5895_v62  ;;  %v25308_v18 = vcombine.low %v6324_v24, %v25298_v0 }
 0x327   : > { %v27537_v28 = vshrl.u32 %v25313_v34, 16 }
 0x328   : > { %v6475_v7 = vshrl.u32 %v25308_v18, 16  ;;  %v6478_v42 = vshll.u32 %v25308_v18, 16 }
 0x329   : > { %v6485_v56 = vrot.slane %v27537_v28, 2  ;;  %v25584_v28 = vld [vmem:[%s23419_s21 + $0xa4] sm:$0xf] }
 0x32a   : > { %v6477_v53 = vrot.slane %v6475_v7, 2  ;;  %v6480_v43 = vrot.slane %v6478_v42, 3  ;;  %v25433_v7 = vld [vmem:[%s23419_s21 + $0x5c] sm:$0xf]  ;;  %v25436_v42 = vld [vmem:[%s23419_s21 + $0x60] sm:$0xf] }
 0x32b   : > { %27725 = vst [vmem:[#allocation19_spill] sm:$0xff] %v25584_v28 }
 0x32c   : > { %19770 = vmatmul.mubr.msk.bf16.gmra.mrb[28].mxu0 %vm604_vm0, %v5542_v11  ;;  %v27535_v11 = vshll.u32 %v25313_v34, 16 }
 0x32d   : > { %19773 = vmatprep.mubr.msk.bf16.mxu0 %vm604_vm0, %v5546_v45  ;;  %v25339_v45 = vcombine.low %v25321_v2, %v25327_v44 }
 0x32e   : > { %v6488_v57 = vrot.slane %v27535_v11, 3  ;;  %v25578_v11 = vld [vmem:[%s23419_s21 + $0x9c] sm:$0xf] }
 0x32f   : > { %v27533_v16 = vshrl.u32 %v25339_v45, 16  ;;  %27723 = vst [vmem:[#allocation17_spill] sm:$0xff] %v25578_v11 }
 0x330   : > { %v6489_v13 = vor.u32 %v6488_v57, %v6485_v56  ;;  %v25452_v56 = vcombine.low %v25433_v7, %v25436_v42 }
 0x334   : > { %19774 = vmatmul.mubr.msk.bf16.gmra.mrb[32].mxu0 %vm604_vm0, %v5550_v47  ;;  %v27532_v47 = vshll.u32 %v25339_v45, 16 }
 0x335   : > { %19777 = vmatprep.mubr.msk.bf16.mxu0 %vm604_vm0, %v5559_v46  ;;  %v6481_v46 = vor.u32 %v6480_v43, %v6477_v53 }
 0x336   : > { %v6497_v6 = vrot.slane %v27532_v47, 3 }
 0x33c   : > { %19778 = vmatmul.mubr.msk.bf16.gmra.mrb[40].mxu0 %vm604_vm0, %v5558_v19  ;;  %v25347_v19 = vcombine.low %v25330_v32, %v25333_v15 }
 0x33d   : > { %19783 = vmatprep.mubr.msk.bf16.mxu0 %vm604_vm0, %v5868_v25  ;;  %v25356_v25 = vld [vmem:[%s23419_s21 + $0x3c] sm:$0xf] }
 0x33e   : > { %v27531_v41 = vshrl.u32 %v25347_v19, 16  ;;  %v27528_v40 = vshll.u32 %v25347_v19, 16  ;;  %v25373_v37 = vcombine.low %v25356_v25, %v25359_v51 }
 0x344   : > { %19784 = vmatmul.mubr.msk.bf16.vlgmr.msra.gmra.mrb[0].mxu0 %vm604_vm0, %v5870_v63  ;;  %v25365_v63 = vld [vmem:[%s23419_s21 + $0x48] sm:$0xf] }
 0x345   : > { %19824 = vmatpush3.bf16.msra.mxu0 %v25143_v55  ;;  %19787 = vmatprep.mubr.msk.bf16.mxu0 %vm604_vm0, %v5872_v5  ;;  %v5879_v55 = vrot.slane %v24837_v12, 2  ;;  %v5887_v12 = vrot.slane %v24882_v23, 2  ;;  %v5892_v23 = vsel %vm1850_vm1, %v5889_v14, %v5891_v22  ;;  %v6494_v5 = vrot.slane %v27533_v16, 2 }
 0x346   : > { %19865 = vmatprep.subr.bf16.mxu0 %v25252_v52 }
 0x347   : > { %v5880_v58 = vsel %vm1850_vm1, %v5877_v29, %v5879_v55  ;;  %v5882_v54 = vsel %vm1850_vm1, %v5879_v55, %v5881_v9  ;;  %v5888_v35 = vsel %vm1850_vm1, %v5885_v59, %v5887_v12  ;;  %v5890_v10 = vsel %vm1850_vm1, %v5887_v12, %v5889_v14  ;;  %v25391_v59 = vld [vmem:[%s23419_s21 + $0x4c] sm:$0xf]  ;;  %v25394_v12 = vld [vmem:[%s23419_s21 + $0x50] sm:$0xf] }
 0x348   : > { %v6506_v29 = vrot.slane %v27528_v40, 3  ;;  %v25382_v55 = vcombine.low %v25362_v50, %v25365_v63  ;;  %v27525_v9 = vshll.u32 %v25373_v37, 16  ;;  %v25551_v40 = vld [vmem:[%s23419_s21 + $0x98] sm:$0xf] }
 0x349   : > { %27722 = vst [vmem:[#allocation16_spill] sm:$0xff] %v25551_v40 }
 0x34c   : > { %19788 = vmatmul.mubr.msk.bf16.gmra.mrb[4].mxu0 %vm604_vm0, %v5874_v31  ;;  %v6490_v31 = vsel %vm2379_vm3, %v6481_v46, %v6489_v13 }
 0x34d   : > { %19791 = vmatprep.mubr.msk.bf16.mxu0 %vm604_vm0, %v5876_v20  ;;  %v6503_v20 = vrot.slane %v27531_v41, 2 }
 0x34f   : > { %v6507_v1 = vor.u32 %v6506_v29, %v6503_v20  ;;  %v27512_v20 = vshll.u32 %v25452_v56, 16 }
 0x354   : > { %19792 = vmatmul.mubr.msk.bf16.gmra.mrb[8].mxu0 %vm604_vm0, %v5878_v33  ;;  %v6498_v33 = vor.u32 %v6497_v6, %v6494_v5 }
 0x355   : > { %19795 = vmatprep.mubr.msk.bf16.mxu0 %vm604_vm0, %v5880_v58  ;;  %v27527_v58 = vshrl.u32 %v25373_v37, 16 }
 0x356   : > { %v6499_v14 = vsel %vm2379_vm3, %v6489_v13, %v6498_v33  ;;  %v6508_v21 = vsel %vm2379_vm3, %v6498_v33, %v6507_v1 }
 0x357   : > { %v6512_v22 = vrot.slane %v27527_v58, 2  ;;  %v25548_v58 = vld [vmem:[%s23419_s21 + $0x94] sm:$0xf] }
 0x358   : > { %27721 = vst [vmem:[#allocation15_spill] sm:$0xff] %v25548_v58 }
 0x35c   : > { %19796 = vmatmul.mubr.msk.bf16.gmra.mrb[12].mxu0 %vm604_vm0, %v5882_v54  ;;  %v27523_v54 = vshrl.u32 %v25382_v55, 16 }
 0x35d   : > { %19799 = vmatprep.mubr.msk.bf16.mxu0 %vm604_vm0, %v5884_v26  ;;  %v27522_v26 = vshll.u32 %v25382_v55, 16 }
 0x35e   : > { %v6521_v62 = vrot.slane %v27523_v54, 2 }
 0x364   : > { %19800 = vmatmul.mubr.msk.bf16.gmra.mrb[16].mxu0 %vm604_vm0, %v5886_v30  ;;  %v25397_v30 = vld [vmem:[%s23419_s21 + $0x54] sm:$0xf] }
 0x365   : > { %19803 = vmatprep.mubr.msk.bf16.mxu0 %vm604_vm0, %v5888_v35  ;;  %v25400_v35 = vld [vmem:[%s23419_s21 + $0x58] sm:$0xf] }
 0x36c   : > { %19804 = vmatmul.mubr.msk.bf16.gmra.mrb[20].mxu0 %vm604_vm0, %v5890_v10  ;;  %v6515_v10 = vrot.slane %v27525_v9, 3  ;;  %v25542_v9 = vld [vmem:[%s23419_s21 + $0x8c] sm:$0xf] }
 0x36d   : > { %19807 = vmatprep.mubr.msk.bf16.mxu0 %vm604_vm0, %v5892_v23  ;;  %v25409_v23 = vcombine.low %v25391_v59, %v25394_v12  ;;  %27719 = vst [vmem:[#allocation13_spill] sm:$0xff] %v25542_v9 }
 0x36e   : > { %v6516_v17 = vor.u32 %v6515_v10, %v6512_v22  ;;  %v25473_v22 = vld [vmem:[%s23419_s21 + $0x70] sm:$0xf]  ;;  %v25476_v10 = vld [vmem:[%s23419_s21 + $0x74] sm:$0xf] }
 0x36f   : > { %v27521_v24 = vshrl.u32 %v25409_v23, 16 }
 0x371   : > { %v6530_v53 = vrot.slane %v27521_v24, 2 }
 0x374   : > { %19808 = vmatmul.mubr.msk.bf16.gmra.mrb[24].mxu0 %vm604_vm0, %v5894_v3  ;;  %v6524_v3 = vrot.slane %v27522_v26, 3 }
 0x375   : > { %19811 = vmatprep.mubr.msk.bf16.mxu0 %vm604_vm0, %v5896_v36  ;;  %v25418_v36 = vcombine.low %v25397_v30, %v25400_v35 }
 0x377   : > { %v27517_v49 = vshrl.u32 %v25418_v36, 16 }
 0x379   : > { %v6539_v46 = vrot.slane %v27517_v49, 2  ;;  %v25512_v49 = vld [vmem:[%s23419_s21 + $0x84] sm:$0xf] }
 0x37c   : > { %19812 = vmatmul.mubr.msk.bf16.gmra.mrb[28].mxu0 %vm604_vm0, %v5898_v38  ;;  %v27518_v38 = vshll.u32 %v25409_v23, 16 }
 0x37d   : > { %19815 = vmatprep.mubr.msk.bf16.mxu0 %vm604_vm0, %v5900_v39  ;;  %v6525_v39 = vor.u32 %v6524_v3, %v6521_v62 }
 0x37e   : > { %v6533_v43 = vrot.slane %v27518_v38, 3  ;;  %v25515_v38 = vld [vmem:[%s23419_s21 + $0x88] sm:$0xf] }
 0x37f   : > { %v6526_v57 = vsel %vm2379_vm3, %v6516_v17, %v6525_v39  ;;  %27718 = vst [vmem:[#allocation12_spill] sm:$0xff] %v25515_v38 }
 0x380   : > { %v6534_v6 = vor.u32 %v6533_v43, %v6530_v53 }
 0x382   : > { %v6535_v62 = vsel %vm2379_vm3, %v6525_v39, %v6534_v6 }
 0x384   : > { %19816 = vmatmul.mubr.msk.bf16.gmra.mrb[32].mxu0 %vm604_vm0, %v5902_v60  ;;  %v25440_v60 = vld [vmem:[%s23419_s21 + $0x64] sm:$0xf] }
 0x385   : > { %19819 = vmatprep.mubr.msk.bf16.mxu0 %vm604_vm0, %v5904_v27  ;;  %v6517_v27 = vsel %vm2379_vm3, %v6507_v1, %v6516_v17  ;;  %v6551_v17 = vrot.slane %v27512_v20, 3 }
 0x38c   : > { %19820 = vmatmul.mubr.msk.bf16.gmra.mrb[40].mxu0 %vm604_vm0, %v5903_v8  ;;  %v27515_v8 = vshll.u32 %v25418_v36, 16 }
 0x38d   : > { %19825 = vmatprep.mubr.msk.bf16.mxu0 %vm604_vm0, %v6490_v31  ;;  %v27513_v31 = vshrl.u32 %v25452_v56, 16 }
 0x38e   : > { %v6542_v13 = vrot.slane %v27515_v8, 3  ;;  %v25506_v8 = vld [vmem:[%s23419_s21 + $0x7c] sm:$0xf] }
 0x38f   : > { %v6548_v3 = vrot.slane %v27513_v31, 2 }
 0x390   : > { %v6543_v29 = vor.u32 %v6542_v13, %v6539_v46 }
 0x391   : > { %v6552_v46 = vor.u32 %v6551_v17, %v6548_v3 }
 0x392   : > { %v6544_v53 = vsel %vm2379_vm3, %v6534_v6, %v6543_v29 }
 0x394   : > { %19826 = vmatmul.mubr.msk.bf16.vlgmr.msra.gmra.mrb[0].mxu0 %vm604_vm0, %v6499_v14  ;;  %v25470_v14 = vld [vmem:[%s23419_s21 + $0x6c] sm:$0xf] }
 0x395   : > { %19866 = vmatpush3.bf16.msra.mxu0 %v25252_v52  ;;  %19829 = vmatprep.mubr.msk.bf16.mxu0 %vm604_vm0, %v6508_v21  ;;  %v25443_v52 = vld [vmem:[%s23419_s21 + $0x68] sm:$0xf]  ;;  %v25479_v21 = vld [vmem:[%s23419_s21 + $0x78] sm:$0xf] }
 0x396   : > { %19907 = vmatprep.subr.bf16.mxu0 %v25423_v48  ;;  %v25461_v5 = vcombine.low %v25440_v60, %v25443_v52 }
 0x398   : > { %v27514_v33 = vshrl.u32 %v25461_v5, 16  ;;  %v27516_v1 = vshll.u32 %v25461_v5, 16 }
 0x39a   : > { %v6557_v43 = vrot.slane %v27514_v33, 2  ;;  %v6560_v39 = vrot.slane %v27516_v1, 3  ;;  %v25509_v1 = vld [vmem:[%s23419_s21 + $0x80] sm:$0xf] }
 0x39c   : > { %19830 = vmatmul.mubr.msk.bf16.gmra.mrb[4].mxu0 %vm604_vm0, %v6517_v27  ;;  %v25488_v27 = vcombine.low %v25470_v14, %v25473_v22  ;;  %v6561_v6 = vor.u32 %v6560_v39, %v6557_v43 }
 0x39d   : > { %19833 = vmatprep.mubr.msk.bf16.mxu0 %vm604_vm0, %v6526_v57  ;;  %v25497_v57 = vcombine.low %v25476_v10, %v25479_v21 }
 0x39e   : > { %v27519_v13 = vshrl.u32 %v25488_v27, 16  ;;  %v27520_v20 = vshll.u32 %v25488_v27, 16  ;;  %v6562_v43 = vsel %vm2379_vm3, %v6552_v46, %v6561_v6 }
 0x39f   : > { %v27524_v31 = vshrl.u32 %v25497_v57, 16  ;;  %v27526_v33 = vshll.u32 %v25497_v57, 16 }
 0x3a0   : > { %v6566_v3 = vrot.slane %v27519_v13, 2  ;;  %v6569_v17 = vrot.slane %v27520_v20, 3  ;;  %v25533_v13 = vcombine.low %v25512_v49, %v25515_v38 }
 0x3a1   : > { %v6575_v39 = vrot.slane %v27524_v31, 2 }
 0x3a2   : > { %v6570_v20 = vor.u32 %v6569_v17, %v6566_v3  ;;  %v27534_v54 = vshrl.u32 %v25533_v13, 16  ;;  %v27536_v31 = vshll.u32 %v25533_v13, 16 }
 0x3a4   : > { %19834 = vmatmul.mubr.msk.bf16.gmra.mrb[8].mxu0 %vm604_vm0, %v6535_v62  ;;  %v6553_v62 = vsel %vm2379_vm3, %v6543_v29, %v6552_v46  ;;  %v6578_v29 = vrot.slane %v27526_v33, 3  ;;  %v25545_v33 = vld [vmem:[%s23419_s21 + $0x90] sm:$0xf] }
 0x3a5   : > { %19837 = vmatprep.mubr.msk.bf16.mxu0 %vm604_vm0, %v6544_v53  ;;  %v25524_v53 = vcombine.low %v25506_v8, %v25509_v1  ;;  %27720 = vst [vmem:[#allocation14_spill] sm:$0xff] %v25545_v33 }
 0x3a6   : > { %v6579_v46 = vor.u32 %v6578_v29, %v6575_v39  ;;  %v6593_v29 = vrot.slane %v27534_v54, 2 }
 0x3a7   : > { %v27529_v24 = vshrl.u32 %v25524_v53, 16  ;;  %v27530_v26 = vshll.u32 %v25524_v53, 16 }
 0x3a8   : > { %v6580_v39 = vsel %vm2379_vm3, %v6570_v20, %v6579_v46 }
 0x3a9   : > { %v6584_v3 = vrot.slane %v27529_v24, 2  ;;  %v6587_v17 = vrot.slane %v27530_v26, 3  ;;  %v25569_v24 = vcombine.low %v25548_v58, %v25551_v40  ;;  %v25587_v40 = vld [vmem:[%s23419_s21 + $0xa8] sm:$0xf]  ;;  %v25614_v58 = vld [vmem:[%s23419_s21 + $0xac] sm:$0xf] }
 0x3aa   : > { %27726 = vst [vmem:[#allocation20_spill] sm:$0xff] %v25587_v40  ;;  %27727 = vst [vmem:[#allocation21_spill] sm:$0xff] %v25614_v58 }
 0x3ab   : > { %v6588_v26 = vor.u32 %v6587_v17, %v6584_v3  ;;  %v27544_v16 = vshrl.u32 %v25569_v24, 16  ;;  %v27546_v54 = vshll.u32 %v25569_v24, 16 }
 0x3ac   : > { %19838 = vmatmul.mubr.msk.bf16.gmra.mrb[12].mxu0 %vm604_vm0, %v6553_v62  ;;  %v6571_v62 = vsel %vm2379_vm3, %v6561_v6, %v6570_v20  ;;  %v6596_v6 = vrot.slane %v27536_v31, 3  ;;  %v25581_v31 = vld [vmem:[%s23419_s21 + $0xa0] sm:$0xf] }
 0x3ad   : > { %19841 = vmatprep.mubr.msk.bf16.mxu0 %vm604_vm0, %v6562_v43  ;;  %v25560_v43 = vcombine.low %v25542_v9, %v25545_v33  ;;  %27724 = vst [vmem:[#allocation18_spill] sm:$0xff] %v25581_v31 }
 0x3ae   : > { %v6597_v20 = vor.u32 %v6596_v6, %v6593_v29  ;;  %v6611_v6 = vrot.slane %v27544_v16, 2 }
 0x3af   : > { %v27539_v41 = vshrl.u32 %v25560_v43, 16  ;;  %v27540_v47 = vshll.u32 %v25560_v43, 16 }
 0x3b0   : > { %v6598_v29 = vsel %vm2379_vm3, %v6588_v26, %v6597_v20 }
 0x3b1   : > { %v6602_v3 = vrot.slane %v27539_v41, 2  ;;  %v6605_v17 = vrot.slane %v27540_v47, 3  ;;  %v25605_v41 = vcombine.low %v25584_v28, %v25587_v40  ;;  %v25620_v40 = vld [vmem:[%s23419_s21 + $0xb4] sm:$0xf]  ;;  %v25623_v28 = vld [vmem:[%s23419_s21 + $0xb8] sm:$0xf] }
 0x3b2   : > { %27729 = vst [vmem:[#allocation23_spill] sm:$0xff] %v25620_v40  ;;  %27730 = vst [vmem:[#allocation24_spill] sm:$0xff] %v25623_v28 }
 0x3b3   : > { %v6606_v47 = vor.u32 %v6605_v17, %v6602_v3  ;;  %v27553_v33 = vshrl.u32 %v25605_v41, 16  ;;  %v27555_v16 = vshll.u32 %v25605_v41, 16 }
 0x3b4   : > { %19842 = vmatmul.mubr.msk.bf16.gmra.mrb[16].mxu0 %vm604_vm0, %v6571_v62  ;;  %v6589_v62 = vsel %vm2379_vm3, %v6579_v46, %v6588_v26  ;;  %v6614_v46 = vrot.slane %v27546_v54, 3  ;;  %v25617_v54 = vld [vmem:[%s23419_s21 + $0xb0] sm:$0xf] }
 0x3b5   : > { %19845 = vmatprep.mubr.msk.bf16.mxu0 %vm604_vm0, %v6580_v39  ;;  %v25596_v39 = vcombine.low %v25578_v11, %v25581_v31  ;;  %27728 = vst [vmem:[#allocation22_spill] sm:$0xff] %v25617_v54  ;;  %v6632_v38 = vrot.slane %v27555_v16, 3 }
 0x3b6   : > { %v6615_v26 = vor.u32 %v6614_v46, %v6611_v6  ;;  %v6629_v46 = vrot.slane %v27553_v33, 2 }
 0x3b7   : > { %v27551_v31 = vshrl.u32 %v25596_v39, 16  ;;  %v27550_v11 = vshll.u32 %v25596_v39, 16 }
 0x3b8   : > { %v6616_v6 = vsel %vm2379_vm3, %v6606_v47, %v6615_v26 }
 0x3b9   : > { %v6620_v3 = vrot.slane %v27551_v31, 2  ;;  %v6623_v17 = vrot.slane %v27550_v11, 3 }
 0x3bb   : > { %v6624_v11 = vor.u32 %v6623_v17, %v6620_v3 }
 0x3bc   : > { %19846 = vmatmul.mubr.msk.bf16.gmra.mrb[20].mxu0 %vm604_vm0, %v6589_v62  ;;  %v6607_v62 = vsel %vm2379_vm3, %v6597_v20, %v6606_v47  ;;  %v25641_v20 = vcombine.low %v25620_v40, %v25623_v28 }
 0x3bd   : > { %19849 = vmatprep.mubr.msk.bf16.mxu0 %vm604_vm0, %v6598_v29  ;;  %v25632_v29 = vcombine.low %v25614_v58, %v25617_v54  ;;  %v6633_v54 = vor.u32 %v6632_v38, %v6629_v46  ;;  %v6625_v16 = vsel %vm2379_vm3, %v6615_v26, %v6624_v11  ;;  %v25662_v26 = vld [vmem:[%s23419_s21 + $0xbc] ss:$0 sps:$4 sm:$0x11]  }
 0x3be   : > { %v27559_v33 = vshrl.u32 %v25641_v20, 16  ;;  %v27560_v58 = vshll.u32 %v25641_v20, 16 }
 0x3bf   : > { %v27557_v31 = vshrl.u32 %v25632_v29, 16  ;;  %v27558_v47 = vshll.u32 %v25632_v29, 16 }
 0x3c0   : > { %v6647_v3 = vrot.slane %v27559_v33, 2  ;;  %v6650_v38 = vrot.slane %v27560_v58, 3  ;;  %v6917_v58 = vrot.slane %v25308_v18, 2  ;;  %v25682_v18 = vld [vmem:[%s27409_s1 + $0x90] sm:$0xff]  }
 0x3c1   : > { %v6638_v28 = vrot.slane %v27557_v31, 2 }
 0x3c2   : > { %v6651_v46 = vor.u32 %v6650_v38, %v6647_v3 }
 0x3c4   : > { %19850 = vmatmul.mubr.msk.bf16.gmra.mrb[24].mxu0 %vm604_vm0, %v6607_v62  ;;  %v6641_v62 = vrot.slane %v27558_v47, 3  ;;  %v6654_v47 = vshll.u32 %v25662_v26, 16 }
 0x3c5   : > { %19853 = vmatprep.mubr.msk.bf16.mxu0 %vm604_vm0, %v6616_v6  ;;  %v6634_v6 = vsel %vm2379_vm3, %v6624_v11, %v6633_v54 }
 0x3c6   : > { %v6642_v17 = vor.u32 %v6641_v62, %v6638_v28  ;;  %v6656_v33 = vrot.slane %v6654_v47, 3 }
 0x3c8   : > { %v6643_v31 = vsel %vm2379_vm3, %v6633_v54, %v6642_v17  ;;  %v6652_v11 = vsel %vm2379_vm3, %v6642_v17, %v6651_v46  ;;  %v6657_v28 = vsel %vm2379_vm3, %v6651_v46, %v6656_v33  ;;  %v6920_v54 = vrot.slane %v25339_v45, 2 }
 0x3c9   : > { %v6926_v33 = vrot.slane %v25382_v55, 2  ;;  %v6928_v17 = vrot.slane %v25409_v23, 2 }
 0x3cb   : > { %v6929_v46 = vsel %vm1850_vm1, %v6926_v33, %v6928_v17 }
 0x3cc   : > { %19854 = vmatmul.mubr.msk.bf16.gmra.mrb[28].mxu0 %vm604_vm0, %v6625_v16  ;;  %v6918_v16 = vrot.slane %v25313_v34, 2 }
 0x3cd   : > { %19857 = vmatprep.mubr.msk.bf16.mxu0 %vm604_vm0, %v6634_v6  ;;  %v6922_v6 = vrot.slane %v25347_v19, 2 }
 0x3ce   : > { %v6919_v62 = vsel %vm1850_vm1, %v6917_v58, %v6918_v16  ;;  %v6924_v58 = vrot.slane %v25373_v37, 2 }
 0x3cf   : > { %v6923_v47 = vsel %vm1850_vm1, %v6920_v54, %v6922_v6 }
 0x3d0   : > { %v6925_v3 = vsel %vm1850_vm1, %v6922_v6, %v6924_v58  ;;  %v6927_v38 = vsel %vm1850_vm1, %v6924_v58, %v6926_v33  ;;  %v6936_v6 = vrot.slane %v25488_v27, 2  ;;  %v6940_v33 = vrot.slane %v25524_v53, 2 }
 0x3d4   : > { %19858 = vmatmul.mubr.msk.bf16.gmra.mrb[32].mxu0 %vm604_vm0, %v6643_v31  ;;  %v6921_v31 = vsel %vm1850_vm1, %v6918_v16, %v6920_v54  ;;  %v6932_v16 = vrot.slane %v25452_v56, 2 }
 0x3d5   : > { %19861 = vmatprep.mubr.msk.bf16.mxu0 %vm604_vm0, %v6652_v11 }
 0x3dc   : > { %19862 = vmatmul.mubr.msk.bf16.gmra.mrb[44].mxu0 %vm604_vm0, %v6657_v28  ;;  %v6934_v28 = vrot.slane %v25461_v5, 2 }
 0x3dd   : > { %19867 = vmatprep.mubr.msk.bf16.mxu0 %vm604_vm0, %v6919_v62 }
 0x3de   : > { %v6935_v54 = vsel %vm1850_vm1, %v6932_v16, %v6934_v28 }
 0x3e4   : > { %19868 = vmatmul.mubr.msk.bf16.vlgmr.msra.gmra.mrb[0].mxu0 %vm604_vm0, %v6921_v31  ;;  %v6938_v31 = vrot.slane %v25497_v57, 2 }
 0x3e5   : > { %19908 = vmatpush3.bf16.msra.mxu0 %v25423_v48  ;;  %19871 = vmatprep.mubr.msk.bf16.mxu0 %vm604_vm0, %v6923_v47  ;;  %v6930_v48 = vrot.slane %v25418_v36, 2  ;;  %v6937_v47 = vsel %vm1850_vm1, %v6934_v28, %v6936_v6  ;;  %v6948_v28 = vrot.slane %v25596_v39, 2 }
 0x3e6   : > { %19949 = vmatprep.subr.bf16.mxu0 %v25682_v18  ;;  %v6939_v58 = vsel %vm1850_vm1, %v6936_v6, %v6938_v31 }
 0x3e7   : > { %v6931_v11 = vsel %vm1850_vm1, %v6928_v17, %v6930_v48  ;;  %v6933_v62 = vsel %vm1850_vm1, %v6930_v48, %v6932_v16  ;;  %v6944_v48 = vrot.slane %v25560_v43, 2 }
 0x3ec   : > { %19872 = vmatmul.mubr.msk.bf16.gmra.mrb[4].mxu0 %vm604_vm0, %v6925_v3  ;;  %v6942_v3 = vrot.slane %v25533_v13, 2 }
 0x3ed   : > { %19875 = vmatprep.mubr.msk.bf16.mxu0 %vm604_vm0, %v6927_v38  ;;  %v6941_v38 = vsel %vm1850_vm1, %v6938_v31, %v6940_v33  ;;  %v6952_v31 = vrot.slane %v25632_v29, 2 }
 0x3ee   : > { %v6943_v17 = vsel %vm1850_vm1, %v6940_v33, %v6942_v3 }
 0x3f4   : > { %19876 = vmatmul.mubr.msk.bf16.gmra.mrb[8].mxu0 %vm604_vm0, %v6929_v46  ;;  %v6946_v46 = vrot.slane %v25569_v24, 2 }
 0x3f5   : > { %19879 = vmatprep.mubr.msk.bf16.mxu0 %vm604_vm0, %v6931_v11  ;;  %v6945_v11 = vsel %vm1850_vm1, %v6942_v3, %v6944_v48 }
 0x3f6   : > { %v6947_v16 = vsel %vm1850_vm1, %v6944_v48, %v6946_v46  ;;  %v7223_v48 = vrot.slane %v25313_v34, 3 }
 0x3fc   : > { %19880 = vmatmul.mubr.msk.bf16.gmra.mrb[12].mxu0 %vm604_vm0, %v6933_v62  ;;  %v6950_v62 = vrot.slane %v25605_v41, 2 }
 0x3fd   : > { %19883 = vmatprep.mubr.msk.bf16.mxu0 %vm604_vm0, %v6935_v54  ;;  %v6949_v54 = vsel %vm1850_vm1, %v6946_v46, %v6948_v28 }
 0x3fe   : > { %v6951_v6 = vsel %vm1850_vm1, %v6948_v28, %v6950_v62  ;;  %v6953_v33 = vsel %vm1850_vm1, %v6950_v62, %v6952_v31 }
 0x404   : > { %19884 = vmatmul.mubr.msk.bf16.gmra.mrb[16].mxu0 %vm604_vm0, %v6937_v47  ;;  %v6954_v47 = vrot.slane %v25641_v20, 2 }
 0x405   : > { %19887 = vmatprep.mubr.msk.bf16.mxu0 %vm604_vm0, %v6939_v58  ;;  %v7215_v58 = vld [vmem:[%s23419_s21 + $0x1c] sm:$0x8] }
 0x406   : > { %v6955_v3 = vsel %vm1850_vm1, %v6952_v31, %v6954_v47  ;;  %v7231_v31 = vrot.slane %v25382_v55, 3 }
 0x40c   : > { %19888 = vmatmul.mubr.msk.bf16.gmra.mrb[20].mxu0 %vm604_vm0, %v6941_v38  ;;  %v25736_v38 = vcombine.low %v7215_v58, %v25298_v0 }
 0x40d   : > { %19891 = vmatprep.mubr.msk.bf16.mxu0 %vm604_vm0, %v6943_v17 }
 0x40e   : > { %v7222_v17 = vrot.slane %v25736_v38, 3 }
 0x410   : > { %v7224_v46 = vsel %vm3128_vm5, %v7222_v17, %v7223_v48 }
 0x414   : > { %19892 = vmatmul.mubr.msk.bf16.gmra.mrb[24].mxu0 %vm604_vm0, %v6945_v11  ;;  %v7225_v11 = vrot.slane %v25339_v45, 3 }
 0x415   : > { %19895 = vmatprep.mubr.msk.bf16.mxu0 %vm604_vm0, %v6947_v16  ;;  %v7227_v16 = vrot.slane %v25347_v19, 3 }
 0x416   : > { %v7226_v28 = vsel %vm3128_vm5, %v7223_v48, %v7225_v11  ;;  %v7237_v48 = vrot.slane %v25452_v56, 3 }
 0x417   : > { %v7228_v62 = vsel %vm3128_vm5, %v7225_v11, %v7227_v16 }
 0x41c   : > { %19896 = vmatmul.mubr.msk.bf16.gmra.mrb[28].mxu0 %vm604_vm0, %v6949_v54  ;;  %v25752_v54 = vld [vmem:[%s27409_s1 + $0x98] sm:$0xff]  }
 0x41d   : > { %19899 = vmatprep.mubr.msk.bf16.mxu0 %vm604_vm0, %v6951_v6  ;;  %v7229_v6 = vrot.slane %v25373_v37, 3 }
 0x41f   : > { %v7232_v58 = vsel %vm3128_vm5, %v7229_v6, %v7231_v31 }
 0x424   : > { %19900 = vmatmul.mubr.msk.bf16.gmra.mrb[32].mxu0 %vm604_vm0, %v6953_v33  ;;  %v7233_v33 = vrot.slane %v25409_v23, 3 }
 0x425   : > { %19903 = vmatprep.mubr.msk.bf16.mxu0 %vm604_vm0, %v6955_v3 }
 0x426   : > { %v7234_v3 = vsel %vm3128_vm5, %v7231_v31, %v7233_v33 }
 0x42c   : > { %19904 = vmatmul.mubr.msk.bf16.gmra.mrb[44].mxu0 %vm604_vm0, %v6954_v47  ;;  %v7230_v47 = vsel %vm3128_vm5, %v7227_v16, %v7229_v6 }
 0x42d   : > { %19909 = vmatprep.mubr.msk.bf16.mxu0 %vm604_vm0, %v7224_v46  ;;  %v7239_v46 = vrot.slane %v25461_v5, 3 }
 0x42f   : > { %v7240_v16 = vsel %vm3128_vm5, %v7237_v48, %v7239_v46 }
 0x434   : > { %19910 = vmatmul.mubr.msk.bf16.vlgmr.msra.gmra.mrb[0].mxu0 %vm604_vm0, %v7226_v28  ;;  %v7241_v28 = vrot.slane %v25488_v27, 3 }
 0x435   : > { %19950 = vmatpush3.bf16.msra.mxu0 %v25682_v18  ;;  %19913 = vmatprep.mubr.msk.bf16.mxu0 %vm604_vm0, %v7228_v62  ;;  %v7235_v18 = vrot.slane %v25418_v36, 3  ;;  %v7243_v62 = vrot.slane %v25497_v57, 3 }
 0x436   : > { %19991 = vmatprep.subr.bf16.mxu0 %v25752_v54  ;;  %v7242_v6 = vsel %vm3128_vm5, %v7239_v46, %v7241_v28 }
 0x437   : > { %v7236_v17 = vsel %vm3128_vm5, %v7233_v33, %v7235_v18  ;;  %v7238_v11 = vsel %vm3128_vm5, %v7235_v18, %v7237_v48  ;;  %v7244_v31 = vsel %vm3128_vm5, %v7241_v28, %v7243_v62 }
 0x43c   : > { %19914 = vmatmul.mubr.msk.bf16.gmra.mrb[4].mxu0 %vm604_vm0, %v7230_v47  ;;  %v7245_v47 = vrot.slane %v25524_v53, 3 }
 0x43d   : > { %19917 = vmatprep.mubr.msk.bf16.mxu0 %vm604_vm0, %v7232_v58  ;;  %v7247_v58 = vrot.slane %v25533_v13, 3 }
 0x43e   : > { %v7246_v33 = vsel %vm3128_vm5, %v7243_v62, %v7245_v47 }
 0x43f   : > { %v7248_v18 = vsel %vm3128_vm5, %v7245_v47, %v7247_v58  ;;  %v7253_v47 = vrot.slane %v25596_v39, 3 }
 0x444   : > { %19918 = vmatmul.mubr.msk.bf16.gmra.mrb[8].mxu0 %vm604_vm0, %v7234_v3  ;;  %v7249_v3 = vrot.slane %v25560_v43, 3 }
 0x445   : > { %19921 = vmatprep.mubr.msk.bf16.mxu0 %vm604_vm0, %v7236_v17  ;;  %v7251_v17 = vrot.slane %v25569_v24, 3 }
 0x446   : > { %v7250_v28 = vsel %vm3128_vm5, %v7247_v58, %v7249_v3  ;;  %v7257_v58 = vrot.slane %v25632_v29, 3 }
 0x44c   : > { %19922 = vmatmul.mubr.msk.bf16.gmra.mrb[12].mxu0 %vm604_vm0, %v7238_v11 }
 0x44d   : > { %19925 = vmatprep.mubr.msk.bf16.mxu0 %vm604_vm0, %v7240_v16  ;;  %v6243_v16 = vld [vmem:[#allocation2 + $0x162] sm:$0xf] }
 0x454   : > { %19926 = vmatmul.mubr.msk.bf16.gmra.mrb[16].mxu0 %vm604_vm0, %v7242_v6 }
 0x455   : > { %19929 = vmatprep.mubr.msk.bf16.mxu0 %vm604_vm0, %v7244_v31  ;;  %v7252_v31 = vsel %vm3128_vm5, %v7249_v3, %v7251_v17  ;;  %v7259_v3 = vrot.slane %v25641_v20, 3 }
 0x45c   : > { %19930 = vmatmul.mubr.msk.bf16.gmra.mrb[20].mxu0 %vm604_vm0, %v7246_v33  ;;  %v7255_v33 = vrot.slane %v25605_v41, 3 }
 0x45d   : > { %19933 = vmatprep.mubr.msk.bf16.mxu0 %vm604_vm0, %v7248_v18  ;;  %v7254_v18 = vsel %vm3128_vm5, %v7251_v17, %v7253_v47 }
 0x45f   : > { %v25790_v48 = vpop.f32.mrb[40].mxu0 }
 0x460   : > { %27731 = vst [vmem:[#allocation25_spill] sm:$0xff] %v25790_v48  ;;  %v25792_v46 = vpop.f32.mrb[41].mxu0  ;;  %v7261_v48 = vrot.slane %v25662_v26, 3 }
 0x461   : > { %27732 = vst [vmem:[#allocation26_spill] sm:$0xff] %v25792_v46  ;;  %v19822_v11 = vpop.f32.mrb[42].mxu0  ;;  %v7256_v46 = vsel %vm3128_vm5, %v7253_v47, %v7255_v33  ;;  %v27734_v47 = vshrl.u32 %v25313_v34, 16 }
 0x462   : > { %v6283_v6 = vadd.f32 %v19822_v11, %v6243_v16  ;;  %v25795_v62 = vpop.f32.mrb[43].mxu0  ;;  %v7570_v11 = vshrl.u32 %v25736_v38, 16  ;;  %v7573_v16 = vshll.u32 %v25736_v38, 16 }
 0x463   : > { %27733 = vst [vmem:[#allocation27_spill] sm:$0xff] %v25795_v62  ;;  %v7577_v62 = vrot.slane %v27734_v47, 3 }
 0x464   : > { %6323 = vst [vmem:[#allocation2 + $0x162] sm:$0xf] %v6283_v6  ;;  %19934 = vmatmul.mubr.msk.bf16.gmra.mrb[24].mxu0 %vm604_vm0, %v7250_v28  ;;  %v7258_v28 = vsel %vm3128_vm5, %v7255_v33, %v7257_v58  ;;  %v7260_v6 = vsel %vm3128_vm5, %v7257_v58, %v7259_v3  ;;  %v7575_v17 = vrot.slane %v7573_v16, 4  ;;  %v7262_v33 = vsel %vm3128_vm5, %v7259_v3, %v7261_v48 }
 0x465   : > { %19937 = vmatprep.mubr.msk.bf16.mxu0 %vm604_vm0, %v7252_v31  ;;  %v7572_v31 = vrot.slane %v7570_v11, 3  ;;  %v27736_v58 = vshrl.u32 %v25339_v45, 16  ;;  %v27737_v16 = vshll.u32 %v25339_v45, 16  ;;  %v27740_v3 = vshrl.u32 %v25373_v37, 16 }
 0x467   : > { %v7576_v40 = vor.u32 %v7575_v17, %v7572_v31  ;;  %v7581_v11 = vrot.slane %v27736_v58, 3  ;;  %v7582_v9 = vrot.slane %v27737_v16, 4  ;;  %v7589_v45 = vrot.slane %v27740_v3, 3 }
 0x468   : > { %v27741_v31 = vshll.u32 %v25373_v37, 16  ;;  %v27743_v58 = vshll.u32 %v25382_v55, 16 }
 0x469   : > { %v7583_v26 = vor.u32 %v7582_v9, %v7581_v11  ;;  %v25844_v9 = vld [vmem:[%s27409_s1 + $0xa8] sm:$0xff]  }
 0x46c   : > { %19938 = vmatmul.mubr.msk.bf16.gmra.mrb[28].mxu0 %vm604_vm0, %v7254_v18  ;;  %v27735_v18 = vshll.u32 %v25313_v34, 16  ;;  %v27738_v34 = vshrl.u32 %v25347_v19, 16 }
 0x46d   : > { %19941 = vmatprep.mubr.msk.bf16.mxu0 %vm604_vm0, %v7256_v46 }
 0x46e   : > { %v7578_v46 = vrot.slane %v27735_v18, 4  ;;  %v7585_v18 = vrot.slane %v27738_v34, 3 }
 0x470   : > { %v7579_v38 = vor.u32 %v7578_v46, %v7577_v62  ;;  %v27742_v46 = vshrl.u32 %v25382_v55, 16  ;;  %v27744_v55 = vshrl.u32 %v25409_v23, 16 }
 0x472   : > { %v7580_v47 = vsel %vm3476_vm7, %v7576_v40, %v7579_v38  ;;  %v7584_v62 = vsel %vm3476_vm7, %v7579_v38, %v7583_v26  ;;  %v7590_v40 = vrot.slane %v27741_v31, 4  ;;  %v7597_v16 = vrot.slane %v27744_v55, 3 }
 0x473   : > { %v27749_v31 = vshll.u32 %v25452_v56, 16  ;;  %v27753_v55 = vshll.u32 %v25488_v27, 16 }
 0x474   : > { %19942 = vmatmul.mubr.msk.bf16.gmra.mrb[32].mxu0 %vm604_vm0, %v7258_v28  ;;  %v27739_v28 = vshll.u32 %v25347_v19, 16  ;;  %v7593_v19 = vrot.slane %v27742_v46, 3  ;;  %v7591_v37 = vor.u32 %v7590_v40, %v7589_v45  ;;  %v27748_v45 = vshrl.u32 %v25452_v56, 16 }
 0x475   : > { %19945 = vmatprep.mubr.msk.bf16.mxu0 %vm604_vm0, %v7260_v6  ;;  %v7606_v40 = vrot.slane %v27749_v31, 4  ;;  %v27750_v46 = vshrl.u32 %v25461_v5, 16  ;;  %v27759_v31 = vshll.u32 %v25533_v13, 16 }
 0x476   : > { %v7586_v6 = vrot.slane %v27739_v28, 4  ;;  %v27746_v28 = vshrl.u32 %v25418_v36, 16 }
 0x478   : > { %v7587_v48 = vor.u32 %v7586_v6, %v7585_v18  ;;  %v7601_v6 = vrot.slane %v27746_v28, 3 }
 0x47a   : > { %v7588_v17 = vsel %vm3476_vm7, %v7583_v26, %v7587_v48  ;;  %v7592_v11 = vsel %vm3476_vm7, %v7587_v48, %v7591_v37 }
 0x47c   : > { %19946 = vmatmul.mubr.msk.bf16.gmra.mrb[44].mxu0 %vm604_vm0, %v7262_v33  ;;  %v7594_v33 = vrot.slane %v27743_v58, 4 }
 0x47d   : > { %19951 = vmatprep.mubr.msk.bf16.mxu0 %vm604_vm0, %v7580_v47  ;;  %v27745_v47 = vshll.u32 %v25409_v23, 16  ;;  %v7605_v23 = vrot.slane %v27748_v45, 3 }
 0x47e   : > { %v7595_v38 = vor.u32 %v7594_v33, %v7593_v19  ;;  %v27751_v19 = vshll.u32 %v25461_v5, 16 }
 0x47f   : > { %v7598_v34 = vrot.slane %v27745_v47, 4  ;;  %v7607_v33 = vor.u32 %v7606_v40, %v7605_v23  ;;  %v27758_v23 = vshrl.u32 %v25533_v13, 16  ;;  %v7626_v40 = vrot.slane %v27759_v31, 4 }
 0x480   : > { %v7596_v18 = vsel %vm3476_vm7, %v7591_v37, %v7595_v38  ;;  %v7610_v58 = vrot.slane %v27751_v19, 4  ;;  %v27760_v19 = vshrl.u32 %v25560_v43, 16 }
 0x484   : > { %19952 = vmatmul.mubr.msk.bf16.vlgmr.msra.gmra.mrb[0].mxu0 %vm604_vm0, %v7584_v62  ;;  %v7599_v62 = vor.u32 %v7598_v34, %v7597_v16  ;;  %v7614_v16 = vrot.slane %v27753_v55, 4  ;;  %v27754_v34 = vshrl.u32 %v25497_v57, 16 }
 0x485   : > { %19992 = vmatpush3.bf16.msra.mxu0 %v25752_v54  ;;  %19955 = vmatprep.mubr.msk.bf16.mxu0 %vm604_vm0, %v7588_v17  ;;  %v27747_v54 = vshll.u32 %v25418_v36, 16  ;;  %v7609_v36 = vrot.slane %v27750_v46, 3 }
 0x486   : > { %20033 = vmatprep.subr.bf16.mxu0 %v25844_v9  ;;  %v7600_v3 = vsel %vm3476_vm7, %v7595_v38, %v7599_v62  ;;  %v7617_v5 = vrot.slane %v27754_v34, 3 }
 0x487   : > { %v7602_v26 = vrot.slane %v27747_v54, 4  ;;  %v7611_v37 = vor.u32 %v7610_v58, %v7609_v36  ;;  %v27761_v58 = vshll.u32 %v25560_v43, 16  ;;  %v27764_v43 = vshrl.u32 %v25596_v39, 16 }
 0x489   : > { %v7603_v48 = vor.u32 %v7602_v26, %v7601_v6  ;;  %v7612_v47 = vsel %vm3476_vm7, %v7607_v33, %v7611_v37  ;;  %v7637_v34 = vrot.slane %v27764_v43, 3  ;;  %v27780_v43 = vld [vmem:[#allocation21_spill] sm:$0xff] }
 0x48b   : > { %v7604_v17 = vsel %vm3476_vm7, %v7599_v62, %v7603_v48  ;;  %v7608_v38 = vsel %vm3476_vm7, %v7603_v48, %v7607_v33  ;;  %v27756_v62 = vshrl.u32 %v25524_v53, 16  ;;  %v27757_v48 = vshll.u32 %v25524_v53, 16 }
 0x48c   : > { %19956 = vmatmul.mubr.msk.bf16.gmra.mrb[4].mxu0 %vm604_vm0, %v7592_v11  ;;  %v27752_v11 = vshrl.u32 %v25488_v27, 16  ;;  %v7629_v53 = vrot.slane %v27760_v19, 3  ;;  %v7630_v33 = vrot.slane %v27761_v58, 4 }
 0x48d   : > { %19959 = vmatprep.mubr.msk.bf16.mxu0 %vm604_vm0, %v7596_v18  ;;  %v27755_v18 = vshll.u32 %v25497_v57, 16  ;;  %v7621_v27 = vrot.slane %v27756_v62, 3  ;;  %v7625_v57 = vrot.slane %v27758_v23, 3  ;;  %v27769_v23 = vshll.u32 %v25632_v29, 16 }
 0x48e   : > { %v7613_v56 = vrot.slane %v27752_v11, 3  ;;  %v27763_v11 = vshll.u32 %v25569_v24, 16  ;;  %v7631_v55 = vor.u32 %v7630_v33, %v7629_v53 }
 0x48f   : > { %v7618_v28 = vrot.slane %v27755_v18, 4  ;;  %v7627_v46 = vor.u32 %v7626_v40, %v7625_v57  ;;  %v7646_v57 = vrot.slane %v27769_v23, 4  ;;  %v27770_v40 = vshrl.u32 %v25641_v20, 16 }
 0x490   : > { %v7615_v6 = vor.u32 %v7614_v16, %v7613_v56  ;;  %v7634_v56 = vrot.slane %v27763_v11, 4 }
 0x491   : > { %v7619_v54 = vor.u32 %v7618_v28, %v7617_v5  ;;  %v27765_v5 = vshll.u32 %v25596_v39, 16  ;;  %v27768_v39 = vshrl.u32 %v25632_v29, 16 }
 0x492   : > { %v7616_v26 = vsel %vm3476_vm7, %v7611_v37, %v7615_v6 }
 0x493   : > { %v7620_v45 = vsel %vm3476_vm7, %v7615_v6, %v7619_v54  ;;  %v7638_v18 = vrot.slane %v27765_v5, 4 }
 0x494   : > { %19960 = vmatmul.mubr.msk.bf16.gmra.mrb[8].mxu0 %vm604_vm0, %v7600_v3  ;;  %v7622_v3 = vrot.slane %v27757_v48, 4  ;;  %v25923_v48 = vld [vmem:[%s23419_s21 + $0xbc] sm:$0x3] }
 0x495   : > { %19963 = vmatprep.mubr.msk.bf16.mxu0 %vm604_vm0, %v7604_v17  ;;  %v7639_v62 = vor.u32 %v7638_v18, %v7637_v34  ;;  %v27781_v34 = vld [vmem:[#allocation20_spill] sm:$0xff]  ;;  %v27782_v18 = vld [vmem:[#allocation23_spill] sm:$0xff] }
 0x496   : > { %v7623_v17 = vor.u32 %v7622_v3, %v7621_v27  ;;  %v17438_v5 = vcombine.low %v27781_v34, %v27780_v43  ;;  %v26124_v34 = vld [vmem:[%s23419_s21 + $0x80] sm:$0xff]  }
 0x498   : > { %v7624_v36 = vsel %vm3476_vm7, %v7619_v54, %v7623_v17  ;;  %v7628_v37 = vsel %vm3476_vm7, %v7623_v17, %v7627_v46  ;;  %v27767_v54 = vshll.u32 %v25605_v41, 16  ;;  %v7649_v17 = vrot.slane %v27770_v40, 3 }
 0x49c   : > { %19964 = vmatmul.mubr.msk.bf16.gmra.mrb[12].mxu0 %vm604_vm0, %v7608_v38  ;;  %v27762_v38 = vshrl.u32 %v25569_v24, 16  ;;  %v27766_v24 = vshrl.u32 %v25605_v41, 16  ;;  %v17397_v41 = vcombine.low %v25923_v48, %v25923_v48 }
 0x49d   : > { %19967 = vmatprep.mubr.msk.bf16.mxu0 %vm604_vm0, %v7612_v47  ;;  %v7632_v47 = vsel %vm3476_vm7, %v7627_v46, %v7631_v55  ;;  %v27771_v46 = vshll.u32 %v25641_v20, 16 }
 0x49e   : > { %v7633_v13 = vrot.slane %v27762_v38, 3  ;;  %v7641_v6 = vrot.slane %v27766_v24, 3  ;;  %v7654_v53 = vshrl.u32 %v17397_v41, 16  ;;  %v7657_v58 = vshll.u32 %v17397_v41, 16 }
 0x4a0   : > { %v7635_v16 = vor.u32 %v7634_v56, %v7633_v13  ;;  %v7659_v38 = vrot.slane %v7657_v58, 4  ;;  %v17421_v56 = vcombine.low %v25298_v0, %v25301_v4  ;;  %v17424_v0 = vcombine.low %v25333_v15, %v25356_v25  ;;  %v26051_v58 = vld [vmem:[%s23419_s21 + $0x50] sm:$0xff]  }
 0x4a1   : > { %v17425_v4 = vcombine.low %v25359_v51, %v25362_v50  ;;  %v17430_v15 = vcombine.low %v25443_v52, %v25470_v14  ;;  %v17431_v25 = vcombine.low %v25473_v22, %v25476_v10  ;;  %v17432_v51 = vcombine.low %v25479_v21, %v25506_v8  ;;  %v25999_v8 = vld [vmem:[%s23419_s21 + $0x2c] sm:$0xf]  ;;  %v27779_v14 = vld [vmem:[#allocation18_spill] sm:$0xff] }
 0x4a2   : > { %v7636_v28 = vsel %vm3476_vm7, %v7631_v55, %v7635_v16  ;;  %v7640_v3 = vsel %vm3476_vm7, %v7635_v16, %v7639_v62  ;;  %v17422_v55 = vcombine.low %v25304_v61, %v25321_v2  ;;  %v17423_v16 = vcombine.low %v25327_v44, %v25330_v32  ;;  %v26011_v21 = vld [vmem:[%s23419_s21 + $0x30] sm:$0xff]  }
 0x4a3   : > { %v17426_v61 = vcombine.low %v25365_v63, %v25391_v59  ;;  %v17427_v2 = vcombine.low %v25394_v12, %v25397_v30  ;;  %v17428_v44 = vcombine.low %v25400_v35, %v25433_v7  ;;  %v17429_v32 = vcombine.low %v25436_v42, %v25440_v60  ;;  %v27772_v63 = vld [vmem:[#allocation13_spill] sm:$0xff]  ;;  %v27773_v59 = vld [vmem:[#allocation12_spill] sm:$0xff]  ;;  %v27774_v30 = vld [vmem:[#allocation15_spill] sm:$0xff] }
 0x4a4   : > { %19968 = vmatmul.mubr.msk.bf16.gmra.mrb[16].mxu0 %vm604_vm0, %v7616_v26  ;;  %v7642_v26 = vrot.slane %v27767_v54, 4  ;;  %v17433_v50 = vcombine.low %v25509_v1, %v25512_v49  ;;  %v17434_v12 = vcombine.low %v27773_v59, %v27772_v63  ;;  %v27775_v35 = vld [vmem:[#allocation14_spill] sm:$0xff]  ;;  %v8403_v42 = vld [vmem:[%s23419_s21 + $0x28] sm:$0xf]  ;;  %v27778_v1 = vld [vmem:[#allocation19_spill] sm:$0xff]  ;;  %v8562_v41 = vshrl.u32 %v26011_v21, 16 }
 0x4a5   : > { %19971 = vmatprep.mubr.msk.bf16.mxu0 %vm604_vm0, %v7620_v45  ;;  %v7645_v45 = vrot.slane %v27768_v39, 3  ;;  %v17435_v7 = vcombine.low %v27775_v35, %v27774_v30  ;;  %v27776_v60 = vld [vmem:[#allocation17_spill] sm:$0xff]  ;;  %v27777_v49 = vld [vmem:[#allocation16_spill] sm:$0xff]  ;;  %v17437_v22 = vcombine.low %v27779_v14, %v27778_v1  ;;  %v26006_v10 = vcombine.low %v8403_v42, %v25999_v8  ;;  %v26114_v14 = vld [vmem:[%s23419_s21 + $0x78] sm:$0xff]  }
 0x4a6   : > { %v7643_v27 = vor.u32 %v7642_v26, %v7641_v6  ;;  %v17436_v52 = vcombine.low %v27777_v49, %v27776_v60  ;;  %v8558_v26 = vshll.u32 %v26011_v21, 16  ;;  %v26028_v39 = vld [vmem:[%s23419_s21 + $0x40] sm:$0xff]   ;;  %v26102_v30 = vld [vmem:[%s23419_s21 + $0x70] sm:$0xff]  }
 0x4a7   : > { %v7647_v19 = vor.u32 %v7646_v57, %v7645_v45  ;;  %v8551_v6 = vshrl.u32 %v26006_v10, 16  ;;  %v27784_v45 = vld [vmem:[#allocation24_spill] sm:$0xff] }
 0x4a8   : > { %v7644_v31 = vsel %vm3476_vm7, %v7639_v62, %v7643_v27  ;;  %v26022_v62 = vld [vmem:[%s23419_s21 + $0x38] sm:$0xff]   ;;  %v17440_v23 = vcombine.low %v27784_v45, %v25923_v48 }
 0x4a9   : > { %v7648_v33 = vsel %vm3476_vm7, %v7643_v27, %v7647_v19  ;;  %v8566_v57 = vshll.u32 %v26022_v62, 16  ;;  %v8570_v40 = vshrl.u32 %v26022_v62, 16 }
 0x4ac   : > { %19972 = vmatmul.mubr.msk.bf16.gmra.mrb[20].mxu0 %vm604_vm0, %v7624_v36  ;;  %v7650_v36 = vrot.slane %v27771_v46, 4  ;;  %v8568_v46 = vrot.slane %v8566_v57, 1 }
 0x4ad   : > { %19975 = vmatprep.mubr.msk.bf16.mxu0 %vm604_vm0, %v7628_v37  ;;  %v7656_v37 = vrot.slane %v7654_v53, 3 }
 0x4ae   : > { %v7651_v29 = vor.u32 %v7650_v36, %v7649_v17  ;;  %v8574_v17 = vshll.u32 %v26028_v39, 16  ;;  %v26041_v36 = vld [vmem:[%s23419_s21 + $0x48] sm:$0xff]  }
 0x4af   : > { %v7660_v20 = vor.u32 %v7659_v38, %v7656_v37  ;;  %v8578_v37 = vshrl.u32 %v26028_v39, 16 }
 0x4b0   : > { %v7652_v13 = vsel %vm3476_vm7, %v7647_v19, %v7651_v29  ;;  %v8572_v19 = vor.u32 %v8570_v40, %v8568_v46  ;;  %v8576_v53 = vrot.slane %v8574_v17, 1 }
 0x4b1   : > { %v7661_v11 = vsel %vm3476_vm7, %v7651_v29, %v7660_v20  ;;  %v8582_v29 = vshll.u32 %v26041_v36, 16  ;;  %v8590_v20 = vshll.u32 %v26051_v58, 16 }
 0x4b2   : > { %v8577_v38 = vsel %vm438_vm2, %v8572_v19, %v8576_v53 }
 0x4b4   : > { %19976 = vmatmul.mubr.msk.bf16.gmra.mrb[24].mxu0 %vm604_vm0, %v7632_v47  ;;  %v25955_v47 = vld [vmem:[%s27409_s1 + $0xa0] sm:$0xff]  }
 0x4b5   : > { %19979 = vmatprep.mubr.msk.bf16.mxu0 %vm604_vm0, %v7636_v28  ;;  %v27783_v28 = vld [vmem:[#allocation22_spill] sm:$0xff] }
 0x4b6   : > { %v17439_v24 = vcombine.low %v27783_v28, %v27782_v18  ;;  %v8626_v28 = vshrl.u32 %v26102_v30, 16 }
 0x4bc   : > { %19980 = vmatmul.mubr.msk.bf16.gmra.mrb[28].mxu0 %vm604_vm0, %v7640_v3  ;;  %v8560_v3 = vrot.slane %v8558_v26, 1 }
 0x4bd   : > { %19983 = vmatprep.mubr.msk.bf16.mxu0 %vm604_vm0, %v7644_v31 }
 0x4be   : > { %v8564_v48 = vor.u32 %v8562_v41, %v8560_v3 }
 0x4c4   : > { %19984 = vmatmul.mubr.msk.bf16.gmra.mrb[32].mxu0 %vm604_vm0, %v7648_v33  ;;  %v8569_v33 = vsel %vm438_vm2, %v8564_v48, %v8568_v46  ;;  %v26146_v46 = vld [vmem:[%s23419_s21 + $0x90] sm:$0xff]  }
 0x4c5   : > { %19987 = vmatprep.mubr.msk.bf16.mxu0 %vm604_vm0, %v7652_v13  ;;  %v8586_v13 = vshrl.u32 %v26041_v36, 16 }
 0x4cc   : > { %19988 = vmatmul.mubr.msk.bf16.gmra.mrb[44].mxu0 %vm604_vm0, %v7661_v11  ;;  %v26062_v11 = vld [vmem:[%s27409_s1 + $0xb0] sm:$0xff]  }
 0x4cd   : > { %19993 = vmatprep.mubr.msk.bf16.mxu0 %vm604_vm0, %v17421_v56  ;;  %v8584_v56 = vrot.slane %v8582_v29, 1 }
 0x4d4   : > { %19994 = vmatmul.mubr.msk.bf16.vlgmr.msra.gmra.mrb[0].mxu0 %vm604_vm0, %v17422_v55  ;;  %v26068_v55 = vld [vmem:[%s23419_s21 + $0x58] sm:$0xff]  }
 0x4d5   : > { %20034 = vmatpush3.bf16.msra.mxu0 %v25844_v9  ;;  %19997 = vmatprep.mubr.msk.bf16.mxu0 %vm604_vm0, %v17423_v16  ;;  %v8553_v9 = vshll.u32 %v26006_v10, 16  ;;  %v8580_v16 = vor.u32 %v8578_v37, %v8576_v53  ;;  %v27578_v53 = vshrl.u32 %v26124_v34, 16 }
 0x4d6   : > { %20075 = vmatprep.subr.bf16.mxu0 %v25955_v47 }
 0x4d7   : > { %v8555_v54 = vrot.slane %v8553_v9, 1 }
 0x4d9   : > { %v8556_v27 = vor.u32 %v8555_v54, %v8551_v6  ;;  %v8634_v6 = vshrl.u32 %v26114_v14, 16  ;;  %v27577_v54 = vshll.u32 %v26124_v34, 16 }
 0x4db   : > { %v8561_v31 = vsel %vm438_vm2, %v8556_v27, %v8560_v3  ;;  %v26136_v3 = vld [vmem:[%s23419_s21 + $0x88] sm:$0xff]  }
 0x4dc   : > { %19998 = vmatmul.mubr.msk.bf16.gmra.mrb[4].mxu0 %vm604_vm0, %v17424_v0  ;;  %v8588_v0 = vor.u32 %v8586_v13, %v8584_v56  ;;  %v27575_v48 = vshll.u32 %v26136_v3, 16 }
 0x4dd   : > { %20001 = vmatprep.mubr.msk.bf16.mxu0 %vm604_vm0, %v17425_v4  ;;  %v8592_v4 = vrot.slane %v8590_v20, 1 }
 0x4e4   : > { %20002 = vmatmul.mubr.msk.bf16.gmra.mrb[8].mxu0 %vm604_vm0, %v17426_v61  ;;  %v26079_v61 = vld [vmem:[%s23419_s21 + $0x60] sm:$0xff]  }
 0x4e5   : > { %20005 = vmatprep.mubr.msk.bf16.mxu0 %vm604_vm0, %v17427_v2  ;;  %v8598_v2 = vshll.u32 %v26068_v55, 16  ;;  %v8610_v42 = vshrl.u32 %v26079_v61, 16 }
 0x4ec   : > { %20006 = vmatmul.mubr.msk.bf16.gmra.mrb[12].mxu0 %vm604_vm0, %v17428_v44  ;;  %v8594_v44 = vshrl.u32 %v26051_v58, 16 }
 0x4ed   : > { %20009 = vmatprep.mubr.msk.bf16.mxu0 %vm604_vm0, %v17429_v32  ;;  %v8593_v32 = vsel %vm438_vm2, %v8588_v0, %v8592_v4  ;;  %v26158_v0 = vld [vmem:[%s23419_s21 + $0x98] sm:$0xff]  }
 0x4ee   : > { %v8596_v63 = vor.u32 %v8594_v44, %v8592_v4 }
 0x4f4   : > { %20010 = vmatmul.mubr.msk.bf16.gmra.mrb[16].mxu0 %vm604_vm0, %v17430_v15  ;;  %v8602_v15 = vshrl.u32 %v26068_v55, 16 }
 0x4f5   : > { %20013 = vmatprep.mubr.msk.bf16.mxu0 %vm604_vm0, %v17431_v25  ;;  %v8606_v25 = vshll.u32 %v26079_v61, 16 }
 0x4fc   : > { %20014 = vmatmul.mubr.msk.bf16.gmra.mrb[20].mxu0 %vm604_vm0, %v17432_v51  ;;  %v8600_v51 = vrot.slane %v8598_v2, 1 }
 0x4fd   : > { %20017 = vmatprep.mubr.msk.bf16.mxu0 %vm604_vm0, %v17433_v50  ;;  %v26092_v50 = vld [vmem:[%s23419_s21 + $0x68] sm:$0xff]  }
 0x4fe   : > { %v8604_v59 = vor.u32 %v8602_v15, %v8600_v51  ;;  %v8614_v35 = vshll.u32 %v26092_v50, 16  ;;  %v8618_v49 = vshrl.u32 %v26092_v50, 16 }
 0x500   : > { %v8616_v1 = vrot.slane %v8614_v35, 1 }
 0x502   : > { %v8620_v9 = vor.u32 %v8618_v49, %v8616_v1 }
 0x504   : > { %20018 = vmatmul.mubr.msk.bf16.gmra.mrb[24].mxu0 %vm604_vm0, %v17434_v12  ;;  %v8608_v12 = vrot.slane %v8606_v25, 1 }
 0x505   : > { %20021 = vmatprep.mubr.msk.bf16.mxu0 %vm604_vm0, %v17435_v7  ;;  %v8601_v7 = vsel %vm438_vm2, %v8596_v63, %v8600_v51  ;;  %v26168_v51 = vld [vmem:[%s23419_s21 + $0xa0] sm:$0xff]   ;;  %v27565_v63 = vshll.u32 %v26158_v0, 16 }
 0x506   : > { %v8609_v60 = vsel %vm438_vm2, %v8604_v59, %v8608_v12 }
 0x50c   : > { %20022 = vmatmul.mubr.msk.bf16.gmra.mrb[28].mxu0 %vm604_vm0, %v17436_v52  ;;  %v8622_v52 = vshll.u32 %v26102_v30, 16 }
 0x50d   : > { %20025 = vmatprep.mubr.msk.bf16.mxu0 %vm604_vm0, %v17437_v22  ;;  %v8612_v22 = vor.u32 %v8610_v42, %v8608_v12  ;;  %v27574_v12 = vshrl.u32 %v26146_v46, 16 }
 0x50e   : > { %v8624_v43 = vrot.slane %v8622_v52, 1 }
 0x50f   : > { %v8617_v18 = vsel %vm438_vm2, %v8612_v22, %v8616_v1  ;;  %v27564_v1 = vshll.u32 %v26168_v51, 16  ;;  %v8664_v22 = vrot.slane %v27565_v63, 1 }
 0x510   : > { %v8628_v45 = vor.u32 %v8626_v28, %v8624_v43 }
 0x514   : > { %20026 = vmatmul.mubr.msk.bf16.gmra.mrb[32].mxu0 %vm604_vm0, %v17438_v5  ;;  %v8630_v5 = vshll.u32 %v26114_v14, 16 }
 0x515   : > { %20029 = vmatprep.mubr.msk.bf16.mxu0 %vm604_vm0, %v17439_v24  ;;  %v8625_v24 = vsel %vm438_vm2, %v8620_v9, %v8624_v43  ;;  %v26180_v9 = vld [vmem:[%s23419_s21 + $0xa8] sm:$0xff]  }
 0x516   : > { %v8632_v27 = vrot.slane %v8630_v5, 1 }
 0x518   : > { %v8633_v19 = vsel %vm438_vm2, %v8628_v45, %v8632_v27  ;;  %v27563_v45 = vshll.u32 %v26180_v9, 16 }
 0x51c   : > { %20030 = vmatmul.mubr.msk.bf16.gmra.mrb[44].mxu0 %vm604_vm0, %v17440_v23  ;;  %v8636_v23 = vor.u32 %v8634_v6, %v8632_v27  ;;  %v26190_v27 = vld [vmem:[%s23419_s21 + $0xb0] sm:$0xff]  }
 0x51d   : > { %20035 = vmatprep.mubr.msk.bf16.mxu0 %vm604_vm0, %v8561_v31  ;;  %v8640_v31 = vrot.slane %v27577_v54, 1 }
 0x51f   : > { %v8644_v4 = vor.u32 %v27578_v53, %v8640_v31 }
 0x524   : > { %20036 = vmatmul.mubr.msk.bf16.vlgmr.msra.gmra.mrb[0].mxu0 %vm604_vm0, %v8569_v33  ;;  %v8641_v33 = vsel %vm438_vm2, %v8636_v23, %v8640_v31  ;;  %v27571_v31 = vshrl.u32 %v26168_v51, 16 }
 0x525   : > { %20076 = vmatpush3.bf16.msra.mxu0 %v25955_v47  ;;  %20039 = vmatprep.mubr.msk.bf16.mxu0 %vm604_vm0, %v8577_v38  ;;  %v8585_v47 = vsel %vm438_vm2, %v8580_v16, %v8584_v56  ;;  %v27576_v38 = vshrl.u32 %v26136_v3, 16  ;;  %v27573_v56 = vshll.u32 %v26146_v46, 16  ;;  %v8648_v16 = vrot.slane %v27575_v48, 1 }
 0x526   : > { %20117 = vmatprep.subr.bf16.mxu0 %v26062_v11 }
 0x527   : > { %v8649_v59 = vsel %vm438_vm2, %v8644_v4, %v8648_v16  ;;  %v26199_v4 = vld [vmem:[%s23419_s21 + $0xc0] sm:$0xf] }
 0x52c   : > { %20040 = vmatmul.mubr.msk.bf16.gmra.mrb[4].mxu0 %vm604_vm0, %v8585_v47  ;;  %v8652_v47 = vor.u32 %v27576_v38, %v8648_v16  ;;  %v27566_v16 = vshll.u32 %v26190_v27, 16 }
 0x52d   : > { %20043 = vmatprep.mubr.msk.bf16.mxu0 %vm604_vm0, %v8593_v32  ;;  %v8656_v32 = vrot.slane %v27573_v56, 1 }
 0x52f   : > { %v8660_v43 = vor.u32 %v27574_v12, %v8656_v32 }
 0x531   : > { %v8665_v23 = vsel %vm438_vm2, %v8660_v43, %v8664_v22  ;;  %v8688_v43 = vrot.slane %v27566_v16, 1 }
 0x534   : > { %20044 = vmatmul.mubr.msk.bf16.gmra.mrb[8].mxu0 %vm604_vm0, %v8601_v7  ;;  %v8657_v7 = vsel %vm438_vm2, %v8652_v47, %v8656_v32  ;;  %v8446_v47 = vld [vmem:[%s23419_s21 + $0xc4] sm:$0x7]  ;;  %v8680_v32 = vrot.slane %v27563_v45, 1 }
 0x535   : > { %20047 = vmatprep.mubr.msk.bf16.mxu0 %vm604_vm0, %v8609_v60  ;;  %v27572_v60 = vshrl.u32 %v26158_v0, 16 }
 0x53c   : > { %20048 = vmatmul.mubr.msk.bf16.gmra.mrb[12].mxu0 %vm604_vm0, %v8617_v18  ;;  %v8668_v18 = vor.u32 %v27572_v60, %v8664_v22  ;;  %v6241_v60 = vld [vmem:[#allocation2 + $0x152] sm:$0xff] }
 0x53d   : > { %20051 = vmatprep.mubr.msk.bf16.mxu0 %vm604_vm0, %v8625_v24  ;;  %v8672_v24 = vrot.slane %v27564_v1, 1  ;;  %v27570_v1 = vshrl.u32 %v26190_v27, 16 }
 0x544   : > { %20052 = vmatmul.mubr.msk.bf16.gmra.mrb[16].mxu0 %vm604_vm0, %v8633_v19  ;;  %v8673_v19 = vsel %vm438_vm2, %v8668_v18, %v8672_v24  ;;  %v26216_v18 = vcombine.low %v26199_v4, %v8446_v47  ;;  %v8692_v47 = vor.u32 %v27570_v1, %v8688_v43 }
 0x545   : > { %20055 = vmatprep.mubr.msk.bf16.mxu0 %vm604_vm0, %v8641_v33  ;;  %v27567_v33 = vshrl.u32 %v26180_v9, 16 }
 0x547   : > { %v8684_v22 = vor.u32 %v27567_v33, %v8680_v32 }
 0x54c   : > { %20056 = vmatmul.mubr.msk.bf16.gmra.mrb[20].mxu0 %vm604_vm0, %v8649_v59  ;;  %v26206_v59 = vld [vmem:[%s23419_s21 + $0xb8] sm:$0xff]  }
 0x54d   : > { %20059 = vmatprep.mubr.msk.bf16.mxu0 %vm604_vm0, %v8657_v7  ;;  %v8676_v7 = vor.u32 %v27571_v31, %v8672_v24  ;;  %v27569_v63 = vshrl.u32 %v26206_v59, 16  ;;  %v8702_v24 = vshll.u32 %v26216_v18, 16 }
 0x54f   : > { %v8681_v45 = vsel %vm438_vm2, %v8676_v7, %v8680_v32  ;;  %v8704_v7 = vrot.slane %v8702_v24, 1 }
 0x554   : > { %20060 = vmatmul.mubr.msk.bf16.gmra.mrb[24].mxu0 %vm604_vm0, %v8665_v23  ;;  %v27568_v23 = vshll.u32 %v26206_v59, 16 }
 0x555   : > { %20063 = vmatprep.mubr.msk.bf16.mxu0 %vm604_vm0, %v8673_v19  ;;  %v8689_v19 = vsel %vm438_vm2, %v8684_v22, %v8688_v43  ;;  %v22787_v43 = vld [vmem:[%s27409_s1 + $0xb8] sm:$0xff]  }
 0x556   : > { %v8696_v16 = vrot.slane %v27568_v23, 1 }
 0x558   : > { %v8700_v32 = vor.u32 %v27569_v63, %v8696_v16  ;;  %v8697_v22 = vsel %vm438_vm2, %v8692_v47, %v8696_v16  ;;  %v9221_v47 = vrot.slane %v26022_v62, 1  ;;  %v27786_v63 = vld [vmem:[#allocation26_spill] sm:$0xff] }
 0x55a   : > { %v8705_v33 = vsel %vm438_vm2, %v8700_v32, %v8704_v7  ;;  %v9223_v32 = vrot.slane %v26028_v39, 1 }
 0x55c   : > { %20064 = vmatmul.mubr.msk.bf16.gmra.mrb[28].mxu0 %vm604_vm0, %v8681_v45  ;;  %v8706_v45 = vshrl.u32 %v26216_v18, 16 }
 0x55d   : > { %20067 = vmatprep.mubr.msk.bf16.mxu0 %vm604_vm0, %v8689_v19 }
 0x55e   : > { %v8708_v23 = vor.u32 %v8706_v45, %v8704_v7  ;;  %v26298_v45 = vld [vmem:[%s27409_s1 + $0xc0] sm:$0xff]  }
 0x564   : > { %20068 = vmatmul.mubr.msk.bf16.gmra.mrb[32].mxu0 %vm604_vm0, %v8697_v22  ;;  %v9224_v22 = vsel %vm1108_vm4, %v9221_v47, %v9223_v32 }
 0x565   : > { %20071 = vmatprep.mubr.msk.bf16.mxu0 %vm604_vm0, %v8705_v33  ;;  %v8442_v33 = vld [vmem:[%s23419_s21 + $0xc4] sm:$0x3] }
 0x566   : > { %v17507_v19 = vcombine.low %v26199_v4, %v8442_v33  ;;  %v9227_v33 = vrot.slane %v26051_v58, 1 }
 0x56c   : > { %20072 = vmatmul.mubr.msk.bf16.gmra.mrb[48].mxu0 %vm604_vm0, %v8708_v23  ;;  %v9219_v23 = vrot.slane %v26011_v21, 1 }
 0x56d   : > { %20077 = vmatprep.mubr.msk.bf16.mxu0 %vm604_vm0, %v26006_v10  ;;  %v9211_v10 = vld [vmem:[%s23419_s21 + $0x28] sm:$0xe] }
 0x56e   : > { %v9222_v7 = vsel %vm1108_vm4, %v9219_v23, %v9221_v47 }
 0x574   : > { %20078 = vmatmul.mubr.msk.bf16.vlgmr.msra.gmra.mrb[0].mxu0 %vm604_vm0, %v26011_v21 }
 0x575   : > { %20118 = vmatpush3.bf16.msra.mxu0 %v26062_v11  ;;  %20081 = vmatprep.mubr.msk.bf16.mxu0 %vm604_vm0, %v26022_v62  ;;  %v26278_v11 = vcombine.low %v9211_v10, %v25999_v8  ;;  %v9225_v10 = vrot.slane %v26041_v36, 1 }
 0x576   : > { %20159 = vmatprep.subr.bf16.mxu0 %v22787_v43 }
 0x577   : > { %v9218_v16 = vrot.slane %v26278_v11, 1 }
 0x579   : > { %v9220_v24 = vsel %vm1108_vm4, %v9218_v16, %v9219_v23  ;;  %v9226_v16 = vsel %vm1108_vm4, %v9223_v32, %v9225_v10  ;;  %v9228_v23 = vsel %vm1108_vm4, %v9225_v10, %v9227_v33  ;;  %v9233_v32 = vrot.slane %v26092_v50, 1 }
 0x57c   : > { %20082 = vmatmul.mubr.msk.bf16.gmra.mrb[4].mxu0 %vm604_vm0, %v26028_v39 }
 0x57d   : > { %20085 = vmatprep.mubr.msk.bf16.mxu0 %vm604_vm0, %v26041_v36 }
 0x584   : > { %20086 = vmatmul.mubr.msk.bf16.gmra.mrb[8].mxu0 %vm604_vm0, %v26051_v58 }
 0x585   : > { %20089 = vmatprep.mubr.msk.bf16.mxu0 %vm604_vm0, %v26068_v55 }
 0x58c   : > { %20090 = vmatmul.mubr.msk.bf16.gmra.mrb[12].mxu0 %vm604_vm0, %v26079_v61 }
 0x58d   : > { %20093 = vmatprep.mubr.msk.bf16.mxu0 %vm604_vm0, %v26092_v50 }
 0x594   : > { %20094 = vmatmul.mubr.msk.bf16.gmra.mrb[16].mxu0 %vm604_vm0, %v26102_v30 }
 0x595   : > { %20097 = vmatprep.mubr.msk.bf16.mxu0 %vm604_vm0, %v26114_v14 }
 0x59c   : > { %20098 = vmatmul.mubr.msk.bf16.gmra.mrb[20].mxu0 %vm604_vm0, %v26124_v34 }
 0x59d   : > { %20101 = vmatprep.mubr.msk.bf16.mxu0 %vm604_vm0, %v26136_v3 }
 0x5a4   : > { %20102 = vmatmul.mubr.msk.bf16.gmra.mrb[24].mxu0 %vm604_vm0, %v26146_v46 }
 0x5a5   : > { %20105 = vmatprep.mubr.msk.bf16.mxu0 %vm604_vm0, %v26158_v0 }
 0x5ac   : > { %20106 = vmatmul.mubr.msk.bf16.gmra.mrb[28].mxu0 %vm604_vm0, %v26168_v51 }
 0x5ad   : > { %20109 = vmatprep.mubr.msk.bf16.mxu0 %vm604_vm0, %v26180_v9 }
 0x5b4   : > { %20110 = vmatmul.mubr.msk.bf16.gmra.mrb[32].mxu0 %vm604_vm0, %v26190_v27 }
 0x5b5   : > { %20113 = vmatprep.mubr.msk.bf16.mxu0 %vm604_vm0, %v26206_v59 }
 0x5bc   : > { %20114 = vmatmul.mubr.msk.bf16.gmra.mrb[48].mxu0 %vm604_vm0, %v17507_v19  ;;  %v9229_v19 = vrot.slane %v26068_v55, 1 }
 0x5bd   : > { %20119 = vmatprep.mubr.msk.bf16.mxu0 %vm604_vm0, %v9220_v24 }
 0x5be   : > { %v9230_v24 = vsel %vm1108_vm4, %v9227_v33, %v9229_v19  ;;  %v9237_v33 = vrot.slane %v26114_v14, 1 }
 0x5c4   : > { %20120 = vmatmul.mubr.msk.bf16.vlgmr.msra.gmra.mrb[0].mxu0 %vm604_vm0, %v9222_v7  ;;  %v9235_v7 = vrot.slane %v26102_v30, 1 }
 0x5c5   : > { %20160 = vmatpush3.bf16.msra.mxu0 %v22787_v43  ;;  %20123 = vmatprep.mubr.msk.bf16.mxu0 %vm604_vm0, %v9224_v22  ;;  %v9231_v43 = vrot.slane %v26079_v61, 1 }
 0x5c6   : > { %20201 = vmatprep.subr.bf16.mxu0 %v26298_v45  ;;  %v9236_v10 = vsel %vm1108_vm4, %v9233_v32, %v9235_v7 }
 0x5c7   : > { %v9232_v47 = vsel %vm1108_vm4, %v9229_v19, %v9231_v43  ;;  %v9234_v22 = vsel %vm1108_vm4, %v9231_v43, %v9233_v32  ;;  %v9241_v43 = vrot.slane %v26136_v3, 1 }
 0x5cc   : > { %20124 = vmatmul.mubr.msk.bf16.gmra.mrb[4].mxu0 %vm604_vm0, %v9226_v16  ;;  %v9239_v16 = vrot.slane %v26124_v34, 1 }
 0x5cd   : > { %20127 = vmatprep.mubr.msk.bf16.mxu0 %vm604_vm0, %v9228_v23  ;;  %v9238_v23 = vsel %vm1108_vm4, %v9235_v7, %v9237_v33  ;;  %v9245_v7 = vrot.slane %v26158_v0, 1 }
 0x5ce   : > { %v9240_v19 = vsel %vm1108_vm4, %v9237_v33, %v9239_v16 }
 0x5d4   : > { %20128 = vmatmul.mubr.msk.bf16.gmra.mrb[8].mxu0 %vm604_vm0, %v9230_v24  ;;  %v9243_v24 = vrot.slane %v26146_v46, 1 }
 0x5d5   : > { %20131 = vmatprep.mubr.msk.bf16.mxu0 %vm604_vm0, %v9232_v47  ;;  %v9242_v47 = vsel %vm1108_vm4, %v9239_v16, %v9241_v43 }
 0x5d6   : > { %v9244_v32 = vsel %vm1108_vm4, %v9241_v43, %v9243_v24  ;;  %v27787_v43 = vld [vmem:[#allocation27_spill] sm:$0xff]  ;;  %v9246_v38 = vsel %vm1108_vm4, %v9243_v24, %v9245_v7 }
 0x5d7   : > { %v6281_v12 = vadd.f32 %v6241_v60, %v27787_v43  ;;  %v9251_v60 = vrot.slane %v26190_v27, 1  ;;  %v9576_v43 = vrot.slane %v8566_v57, 2  ;;  %v9584_v57 = vrot.slane %v8582_v29, 2 }
 0x5d8   : > { %v9591_v29 = vrot.slane %v8602_v15, 1  ;;  %v9599_v15 = vrot.slane %v8618_v49, 1  ;;  %v9607_v49 = vrot.slane %v8634_v6, 1  ;;  %v27790_v6 = vshrl.u32 %v26136_v3, 16 }
 0x5dc   : > { %20132 = vmatmul.mubr.msk.bf16.gmra.mrb[12].mxu0 %vm604_vm0, %v9234_v22  ;;  %v6242_v22 = vld [vmem:[#allocation2 + $0x15a] sm:$0xff] }
 0x5dd   : > { %20135 = vmatprep.mubr.msk.bf16.mxu0 %vm604_vm0, %v9236_v10  ;;  %v27785_v10 = vld [vmem:[#allocation25_spill] sm:$0xff] }
 0x5de   : > { %v6282_v33 = vadd.f32 %v27785_v10, %v6242_v22 }
 0x5e4   : > { %20136 = vmatmul.mubr.msk.bf16.gmra.mrb[16].mxu0 %vm604_vm0, %v9238_v23  ;;  %v6240_v23 = vld [vmem:[#allocation2 + $0x14a] sm:$0xff] }
 0x5e5   : > { %20139 = vmatprep.mubr.msk.bf16.mxu0 %vm604_vm0, %v9240_v19  ;;  %v9247_v19 = vrot.slane %v26168_v51, 1  ;;  %v6280_v1 = vadd.f32 %v6240_v23, %v27786_v63  ;;  %v9249_v63 = vrot.slane %v26180_v9, 1  ;;  %v9571_v23 = vrot.slane %v8562_v41, 1 }
 0x5e6   : > { %v9579_v41 = vrot.slane %v8578_v37, 1  ;;  %v9587_v37 = vrot.slane %v8594_v44, 1 }
 0x5e7   : > { %v9248_v10 = vsel %vm1108_vm4, %v9245_v7, %v9247_v19 }
 0x5ec   : > { %20140 = vmatmul.mubr.msk.bf16.gmra.mrb[20].mxu0 %vm604_vm0, %v9242_v47 }
 0x5ed   : > { %20143 = vmatprep.mubr.msk.bf16.mxu0 %vm604_vm0, %v9244_v32  ;;  %v8322_v32 = vld [vmem:[#allocation2 + $0x162] sm:$0xf] }
 0x5ef   : > { %v20031_v31 = vpop.f32.mrb[44].mxu0 }
 0x5f0   : > { %v26337_v56 = vadd.f32 %v20031_v31, %v6282_v33  ;;  %v8228_v16 = vpop.f32.mrb[45].mxu0  ;;  %v9252_v31 = vsel %vm1108_vm4, %v9249_v63, %v9251_v60 }
 0x5f1   : > { %v26340_v47 = vadd.f32 %v8228_v16, %v6280_v1  ;;  %v20032_v48 = vpop.f32.mrb[46].mxu0  ;;  %v9250_v1 = vsel %vm1108_vm4, %v9247_v19, %v9249_v63  ;;  %v9572_v19 = vrot.slane %v8558_v26, 2  ;;  %v9580_v26 = vrot.slane %v8574_v17, 2 }
 0x5f2   : > { %v8362_v54 = vadd.f32 %v20032_v48, %v8322_v32  ;;  %v8231_v22 = vpop.f32.mrb[47].mxu0  ;;  %v9253_v48 = vrot.slane %v26206_v59, 1  ;;  %v9588_v17 = vrot.slane %v8590_v20, 2  ;;  %v9595_v20 = vrot.slane %v8610_v42, 1 }
 0x5f3   : > { %v8360_v53 = vadd.f32 %v8231_v22, %v6281_v12  ;;  %v9573_v16 = vor.u32 %v9572_v19, %v9571_v23  ;;  %v9603_v42 = vrot.slane %v8626_v28, 1  ;;  %v27788_v28 = vshrl.u32 %v26124_v34, 16 }
 0x5f4   : > { %8402 = vst [vmem:[#allocation2 + $0x162] sm:$0xf] %v8362_v54  ;;  %20144 = vmatmul.mubr.msk.bf16.gmra.mrb[24].mxu0 %vm604_vm0, %v9246_v38  ;;  %v9255_v54 = vrot.slane %v26216_v18, 1  ;;  %v9567_v38 = vshll.u32 %v26278_v11, 16  ;;  %v9254_v12 = vsel %vm1108_vm4, %v9251_v60, %v9253_v48 }
 0x5f5   : > { %8400 = vst [vmem:[#allocation2 + $0x152] sm:$0xff] %v8360_v53  ;;  %20147 = vmatprep.mubr.msk.bf16.mxu0 %vm604_vm0, %v9248_v10  ;;  %v9564_v53 = vshrl.u32 %v26278_v11, 16  ;;  %v9575_v11 = vrot.slane %v8570_v40, 1  ;;  %v9581_v10 = vor.u32 %v9580_v26, %v9579_v41  ;;  %v9583_v40 = vrot.slane %v8586_v13, 1 }
 0x5f6   : > { %v9256_v24 = vsel %vm1108_vm4, %v9253_v48, %v9255_v54  ;;  %v9569_v33 = vrot.slane %v9567_v38, 2  ;;  %v9592_v48 = vrot.slane %v8598_v2, 2  ;;  %v9600_v2 = vrot.slane %v8614_v35, 2 }
 0x5f7   : > { %v9566_v7 = vrot.slane %v9564_v53, 1  ;;  %v9577_v22 = vor.u32 %v9576_v43, %v9575_v11  ;;  %v9608_v35 = vrot.slane %v8630_v5, 2  ;;  %v9611_v19 = vrot.slane %v27788_v28, 1 }
 0x5f8   : > { %v27791_v5 = vshll.u32 %v26136_v3, 16 }
 0x5f9   : > { %v9570_v18 = vor.u32 %v9569_v33, %v9566_v7  ;;  %v9578_v63 = vsel %vm1454_vm6, %v9573_v16, %v9577_v22  ;;  %v9582_v60 = vsel %vm1454_vm6, %v9577_v22, %v9581_v10  ;;  %v27792_v22 = vshrl.u32 %v26146_v46, 16 }
 0x5fa   : > { %v9616_v41 = vrot.slane %v27791_v5, 2 }
 0x5fb   : > { %v9574_v32 = vsel %vm1454_vm6, %v9570_v18, %v9573_v16  ;;  %v9609_v16 = vor.u32 %v9608_v35, %v9607_v49  ;;  %v27801_v49 = vshll.u32 %v26190_v27, 16 }
 0x5fc   : > { %20148 = vmatmul.mubr.msk.bf16.gmra.mrb[28].mxu0 %vm604_vm0, %v9250_v1  ;;  %v9585_v1 = vor.u32 %v9584_v57, %v9583_v40 }
 0x5fd   : > { %20151 = vmatprep.mubr.msk.bf16.mxu0 %vm604_vm0, %v9252_v31  ;;  %v9589_v31 = vor.u32 %v9588_v17, %v9587_v37  ;;  %v27794_v17 = vshrl.u32 %v26158_v0, 16  ;;  %v9636_v35 = vrot.slane %v27801_v49, 2 }
 0x5fe   : > { %v9586_v13 = vsel %vm1454_vm6, %v9581_v10, %v9585_v1  ;;  %v9619_v10 = vrot.slane %v27792_v22, 1 }
 0x5ff   : > { %v9590_v44 = vsel %vm1454_vm6, %v9585_v1, %v9589_v31  ;;  %v9623_v1 = vrot.slane %v27794_v17, 1 }
 0x604   : > { %20152 = vmatmul.mubr.msk.bf16.gmra.mrb[32].mxu0 %vm604_vm0, %v9254_v12 }
 0x605   : > { %20155 = vmatprep.mubr.msk.bf16.mxu0 %vm604_vm0, %v9256_v24  ;;  %v9601_v24 = vor.u32 %v9600_v2, %v9599_v15  ;;  %v27798_v2 = vshrl.u32 %v26180_v9, 16 }
 0x60c   : > { %20156 = vmatmul.mubr.msk.bf16.gmra.mrb[48].mxu0 %vm604_vm0, %v9255_v54  ;;  %v9593_v54 = vor.u32 %v9592_v48, %v9591_v29  ;;  %v27796_v48 = vshrl.u32 %v26168_v51, 16 }
 0x60d   : > { %20161 = vmatprep.mubr.msk.bf16.mxu0 %vm604_vm0, %v9574_v32  ;;  %v9615_v32 = vrot.slane %v27790_v6, 1  ;;  %v27803_v6 = vshll.u32 %v26206_v59, 16 }
 0x60e   : > { %v9594_v38 = vsel %vm1454_vm6, %v9589_v31, %v9593_v54  ;;  %v27795_v31 = vshll.u32 %v26158_v0, 16 }
 0x60f   : > { %v9617_v57 = vor.u32 %v9616_v41, %v9615_v32 }
 0x614   : > { %20162 = vmatmul.mubr.msk.bf16.vlgmr.msra.gmra.mrb[0].mxu0 %vm604_vm0, %v9578_v63  ;;  %v27793_v63 = vshll.u32 %v26146_v46, 16 }
 0x615   : > { %20202 = vmatpush3.bf16.msra.mxu0 %v26298_v45  ;;  %20165 = vmatprep.mubr.msk.bf16.mxu0 %vm604_vm0, %v9582_v60  ;;  %v9596_v45 = vrot.slane %v8606_v25, 2  ;;  %v9604_v25 = vrot.slane %v8622_v52, 2  ;;  %v27789_v52 = vshll.u32 %v26124_v34, 16 }
 0x616   : > { %v9620_v40 = vrot.slane %v27793_v63, 2 }
 0x617   : > { %v9597_v53 = vor.u32 %v9596_v45, %v9595_v20  ;;  %v9605_v7 = vor.u32 %v9604_v25, %v9603_v42  ;;  %v9612_v18 = vrot.slane %v27789_v52, 2  ;;  %v27797_v20 = vshll.u32 %v26168_v51, 16 }
 0x618   : > { %v9621_v60 = vor.u32 %v9620_v40, %v9619_v10  ;;  %v27799_v42 = vshll.u32 %v26180_v9, 16  ;;  %v9951_v10 = vld [vmem:[%s23419_s21 + $0x28] sm:$0xc] }
 0x619   : > { %v9598_v12 = vsel %vm1454_vm6, %v9593_v54, %v9597_v53  ;;  %v9602_v33 = vsel %vm1454_vm6, %v9597_v53, %v9601_v24  ;;  %v9606_v23 = vsel %vm1454_vm6, %v9601_v24, %v9605_v7  ;;  %v9613_v11 = vor.u32 %v9612_v18, %v9611_v19 }
 0x61a   : > { %v9610_v43 = vsel %vm1454_vm6, %v9605_v7, %v9609_v16  ;;  %v9622_v29 = vsel %vm1454_vm6, %v9617_v57, %v9621_v60  ;;  %v9628_v45 = vrot.slane %v27797_v20, 2  ;;  %v9632_v25 = vrot.slane %v27799_v42, 2 }
 0x61b   : > { %v9614_v26 = vsel %vm1454_vm6, %v9609_v16, %v9613_v11  ;;  %v9618_v37 = vsel %vm1454_vm6, %v9613_v11, %v9617_v57  ;;  %v27800_v7 = vshrl.u32 %v26190_v27, 16  ;;  %v27802_v11 = vshrl.u32 %v26206_v59, 16 }
 0x61c   : > { %20166 = vmatmul.mubr.msk.bf16.gmra.mrb[4].mxu0 %vm604_vm0, %v9586_v13  ;;  %v9624_v13 = vrot.slane %v27795_v31, 2  ;;  %v17579_v57 = vcombine.low %v9951_v10, %v25999_v8  ;;  %v9963_v31 = vrot.slane %v26028_v39, 2  ;;  %v9971_v39 = vrot.slane %v26079_v61, 2 }
 0x61d   : > { %20169 = vmatprep.mubr.msk.bf16.mxu0 %vm604_vm0, %v9590_v44  ;;  %v9627_v44 = vrot.slane %v27796_v48, 1  ;;  %v9979_v61 = vrot.slane %v26124_v34, 2  ;;  %v9987_v34 = vrot.slane %v26168_v51, 2 }
 0x61e   : > { %v9625_v54 = vor.u32 %v9624_v13, %v9623_v1  ;;  %v9961_v1 = vrot.slane %v26022_v62, 2  ;;  %v9969_v62 = vrot.slane %v26068_v55, 2  ;;  %v9977_v55 = vrot.slane %v26114_v14, 2 }
 0x61f   : > { %v9629_v53 = vor.u32 %v9628_v45, %v9627_v44  ;;  %v9985_v14 = vrot.slane %v26158_v0, 2  ;;  %v9993_v0 = vrot.slane %v26206_v59, 2  ;;  %v22794_v59 = vld [vmem:[#allocation6 + $0x58] sm:$0xff]  }
 0x620   : > { %v9626_v15 = vsel %vm1454_vm6, %v9621_v60, %v9625_v54  ;;  %v9958_v60 = vrot.slane %v17579_v57, 2  ;;  %v9964_v8 = vsel %vm1850_vm1, %v9961_v1, %v9963_v31  ;;  %v9972_v45 = vsel %vm1850_vm1, %v9969_v62, %v9971_v39 }
 0x621   : > { %v9630_v24 = vsel %vm1454_vm6, %v9625_v54, %v9629_v53 }
 0x624   : > { %20170 = vmatmul.mubr.msk.bf16.gmra.mrb[8].mxu0 %vm604_vm0, %v9594_v38  ;;  %v9556_v38 = vld [vmem:[%s23419_s21 + $0xc4] sm:$0xf] }
 0x625   : > { %20173 = vmatprep.mubr.msk.bf16.mxu0 %vm604_vm0, %v9598_v12  ;;  %v9631_v12 = vrot.slane %v27798_v2, 1 }
 0x627   : > { %v9633_v28 = vor.u32 %v9632_v25, %v9631_v12  ;;  %v9988_v25 = vsel %vm1850_vm1, %v9985_v14, %v9987_v34 }
 0x629   : > { %v9634_v16 = vsel %vm1454_vm6, %v9629_v53, %v9633_v28 }
 0x62c   : > { %20174 = vmatmul.mubr.msk.bf16.gmra.mrb[12].mxu0 %vm604_vm0, %v9602_v33  ;;  %v9635_v33 = vrot.slane %v27800_v7, 1 }
 0x62d   : > { %20177 = vmatprep.mubr.msk.bf16.mxu0 %vm604_vm0, %v9606_v23  ;;  %v26460_v23 = vcombine.low %v26199_v4, %v9556_v38  ;;  %v9640_v4 = vrot.slane %v27803_v6, 2  ;;  %v26557_v6 = vld [vmem:[#allocation6] sm:$0xff]  }
 0x62e   : > { %v9637_v19 = vor.u32 %v9636_v35, %v9635_v33  ;;  %v22793_v35 = vld [vmem:[#allocation6 + $0x50] sm:$0xff]  }
 0x62f   : > { %v9644_v52 = vshrl.u32 %v26460_v23, 16  ;;  %v9647_v18 = vshll.u32 %v26460_v23, 16  ;;  %v9995_v51 = vrot.slane %v26460_v23, 2  ;;  %v22795_v23 = vld [vmem:[#allocation6 + $0x60] sm:$0xff]  }
 0x630   : > { %v9638_v32 = vsel %vm1454_vm6, %v9633_v28, %v9637_v19  ;;  %v23287_v28 = vmov 0.0  }
 0x631   : > { %v9646_v5 = vrot.slane %v9644_v52, 1  ;;  %v9649_v41 = vrot.slane %v9647_v18, 2  ;;  %v9996_v49 = vsel %vm1850_vm1, %v9993_v0, %v9995_v51  ;;  %10416 = vst [vmem:[#allocation3] sm:$0xff] %v23287_v28  ;;  %10417 = vst [vmem:[#allocation3 + $0x8] sm:$0xff] %v23287_v28  ;;  %v22797_v52 = vld [vmem:[#allocation6 + $0x70] sm:$0xff]   ;;  %v22798_v18 = vld [vmem:[#allocation6 + $0x78] sm:$0xff]  }
 0x632   : > { %10418 = vst [vmem:[#allocation3 + $0x10] sm:$0xff] %v23287_v28  ;;  %10419 = vst [vmem:[#allocation3 + $0x18] sm:$0xff] %v23287_v28 }
 0x633   : > { %v9650_v22 = vor.u32 %v9649_v41, %v9646_v5  ;;  %10420 = vst [vmem:[#allocation3 + $0x20] sm:$0xff] %v23287_v28  ;;  %10421 = vst [vmem:[#allocation3 + $0x28] sm:$0xff] %v23287_v28 }
 0x634   : > { %20178 = vmatmul.mubr.msk.bf16.gmra.mrb[16].mxu0 %vm604_vm0, %v9610_v43  ;;  %v9639_v43 = vrot.slane %v27802_v11, 1  ;;  %10422 = vst [vmem:[#allocation3 + $0x30] sm:$0xff] %v23287_v28  ;;  %10423 = vst [vmem:[#allocation3 + $0x38] sm:$0xff] %v23287_v28 }
 0x635   : > { %20181 = vmatprep.mubr.msk.bf16.mxu0 %vm604_vm0, %v9614_v26  ;;  %10424 = vst [vmem:[#allocation3 + $0x40] sm:$0xff] %v23287_v28  ;;  %10425 = vst [vmem:[#allocation3 + $0x48] sm:$0xff] %v23287_v28 }
 0x636   : > { %v9641_v26 = vor.u32 %v9640_v4, %v9639_v43  ;;  %10426 = vst [vmem:[#allocation3 + $0x50] sm:$0xff] %v23287_v28  ;;  %10427 = vst [vmem:[#allocation3 + $0x58] sm:$0xff] %v23287_v28 }
 0x637   : > { %10428 = vst [vmem:[#allocation3 + $0x60] sm:$0xff] %v23287_v28  ;;  %10429 = vst [vmem:[#allocation3 + $0x68] sm:$0xff] %v23287_v28 }
 0x638   : > { %v9642_v63 = vsel %vm1454_vm6, %v9637_v19, %v9641_v26  ;;  %v9651_v40 = vsel %vm1454_vm6, %v9641_v26, %v9650_v22  ;;  %10430 = vst [vmem:[#allocation3 + $0x70] sm:$0xff] %v23287_v28  ;;  %10431 = vst [vmem:[#allocation3 + $0x78] sm:$0xff] %v23287_v28  ;;  %v22796_v19 = vld [vmem:[#allocation6 + $0x68] sm:$0xff]  }
 0x639   : > { %10432 = vst [vmem:[#allocation3 + $0x80] sm:$0xff] %v23287_v28  ;;  %10433 = vst [vmem:[#allocation3 + $0x88] sm:$0xff] %v23287_v28  ;;  %v10588_v11 = vld [vmem:[#allocation3 + $0x9] sm:$0xff]  ;;  %v21269_v26 = vld [vmem:[#allocation2 + $0x2a] sm:$0xff] }
 0x63c   : > { %20182 = vmatmul.mubr.msk.bf16.gmra.mrb[20].mxu0 %vm604_vm0, %v9618_v37  ;;  %v9959_v37 = vrot.slane %v26011_v21, 2  ;;  %v9965_v21 = vrot.slane %v26041_v36, 2  ;;  %v9973_v36 = vrot.slane %v26092_v50, 2  ;;  %v9981_v50 = vrot.slane %v26136_v3, 2 }
 0x63d   : > { %20185 = vmatprep.mubr.msk.bf16.mxu0 %vm604_vm0, %v9622_v29  ;;  %v9967_v29 = vrot.slane %v26051_v58, 2  ;;  %v9975_v58 = vrot.slane %v26102_v30, 2  ;;  %v9983_v30 = vrot.slane %v26146_v46, 2  ;;  %v9989_v3 = vrot.slane %v26180_v9, 2  ;;  %v22791_v9 = vld [vmem:[#allocation6 + $0x40] sm:$0xff]  }
 0x63e   : > { %v9960_v17 = vsel %vm1850_vm1, %v9958_v60, %v9959_v37  ;;  %v9962_v13 = vsel %vm1850_vm1, %v9959_v37, %v9961_v1  ;;  %v9966_v48 = vsel %vm1850_vm1, %v9963_v31, %v9965_v21  ;;  %v9974_v54 = vsel %vm1850_vm1, %v9971_v39, %v9973_v36  ;;  %20243 = vmatprep.subr.bf16.mxu1 %v22791_v9  ;;  %v21275_v60 = vld [vmem:[#allocation2 + $0x32] sm:$0xff]  ;;  %v21278_v1 = vld [vmem:[#allocation2 + $0x5a] sm:$0xff] }
 0x63f   : > { %v9968_v44 = vsel %vm1850_vm1, %v9965_v21, %v9967_v29  ;;  %v9970_v20 = vsel %vm1850_vm1, %v9967_v29, %v9969_v62  ;;  %v9976_v53 = vsel %vm1850_vm1, %v9973_v36, %v9975_v58  ;;  %v9978_v38 = vsel %vm1850_vm1, %v9975_v58, %v9977_v55  ;;  %20244 = vmatpush3.bf16.msra.mxu1 %v22791_v9  ;;  %v21287_v39 = vld [vmem:[#allocation2 + $0x52] sm:$0xff]  ;;  %v21290_v36 = vld [vmem:[#allocation2 + $0x7a] sm:$0xff]  ;;  %v21305_v9 = vld [vmem:[#allocation2 + $0x8a] sm:$0xff] }
 0x640   : > { %v9982_v2 = vsel %vm1850_vm1, %v9979_v61, %v9981_v50  ;;  %v9984_v12 = vsel %vm1850_vm1, %v9981_v50, %v9983_v30  ;;  %v9986_v42 = vsel %vm1850_vm1, %v9983_v30, %v9985_v14  ;;  %v9991_v46 = vrot.slane %v26190_v27, 2  ;;  %v22792_v27 = vld [vmem:[#allocation6 + $0x48] sm:$0xff]  }
 0x641   : > { %20245 = vmatprep.subr.bf16.mxu1 %v22792_v27  ;;  %v21296_v50 = vld [vmem:[#allocation2 + $0x82] sm:$0xff] }
 0x642   : > { %v9992_v7 = vsel %vm1850_vm1, %v9989_v3, %v9991_v46  ;;  %v9994_v33 = vsel %vm1850_vm1, %v9991_v46, %v9993_v0  ;;  %v26563_v46 = vld [vmem:[%s27410_s2] ss:$0 sm:$0xff] }
 0x643   : > { %20246 = vmatpush3.bf16.msra.mxu1 %v22792_v27 }
 0x644   : > { %20186 = vmatmul.mubr.msk.bf16.gmra.mrb[24].mxu0 %vm604_vm0, %v9626_v15  ;;  %v9980_v15 = vsel %vm1850_vm1, %v9977_v55, %v9979_v61  ;;  %20247 = vmatprep.subr.bf16.mxu1 %v22793_v35  ;;  %v21293_v61 = vld [vmem:[#allocation2 + $0x6a] sm:$0xff] }
 0x645   : > { %20189 = vmatprep.mubr.msk.bf16.mxu0 %vm604_vm0, %v9630_v24  ;;  %v9990_v24 = vsel %vm1850_vm1, %v9987_v34, %v9989_v3  ;;  %v21299_v34 = vld [vmem:[#allocation2 + $0x72] sm:$0xff] }
 0x647   : > { %20248 = vmatpush3.bf16.msra.mxu1 %v22793_v35 }
 0x648   : > { %20249 = vmatprep.subr.bf16.mxu1 %v22794_v59 }
 0x64b   : > { %20250 = vmatpush3.bf16.msra.mxu1 %v22794_v59 }
 0x64c   : > { %20190 = vmatmul.mubr.msk.bf16.gmra.mrb[28].mxu0 %vm604_vm0, %v9634_v16  ;;  %20251 = vmatprep.subr.bf16.mxu1 %v22795_v23  ;;  %v10587_v16 = vld [vmem:[#allocation3 + $0x1] sm:$0xff] }
 0x64d   : > { %20193 = vmatprep.mubr.msk.bf16.mxu0 %vm604_vm0, %v9638_v32  ;;  %v10599_v43 = vpack.c.bf16 %v10588_v11, %v10587_v16  ;;  %v21266_v32 = vld [vmem:[#allocation2 + $0x3a] sm:$0xff]  ;;  %v21311_v11 = vld [vmem:[#allocation2 + $0x92] sm:$0xff] }
 0x64f   : > { %20252 = vmatpush3.bf16.msra.mxu1 %v22795_v23  ;;  %20259 = vmatprep.mubr.bf16.mxu1 %v10599_v43  ;;  %v21308_v23 = vld [vmem:[#allocation2 + $0xa2] sm:$0xff] }
 0x650   : > { %20253 = vmatprep.subr.bf16.mxu1 %v22796_v19 }
 0x653   : > { %20254 = vmatpush3.bf16.msra.mxu1 %v22796_v19 }
 0x654   : > { %20194 = vmatmul.mubr.msk.bf16.gmra.mrb[32].mxu0 %vm604_vm0, %v9642_v63  ;;  %20255 = vmatprep.subr.bf16.mxu1 %v22797_v52  ;;  %v21272_v63 = vld [vmem:[#allocation2 + $0x42] sm:$0xff] }
 0x655   : > { %20197 = vmatprep.mubr.msk.bf16.mxu0 %vm604_vm0, %v9651_v40 }
 0x657   : > { %20256 = vmatpush3.bf16.msra.mxu1 %v22797_v52 }
 0x658   : > { %20257 = vmatprep.subr.bf16.mxu1 %v22798_v18 }
 0x65b   : > { %20258 = vmatpush3.bf16.msra.mxu1 %v22798_v18 }
 0x65c   : > { %20198 = vmatmul.mubr.msk.bf16.gmra.mrb[48].mxu0 %vm604_vm0, %v9650_v22  ;;  %20271 = vmatprep.subr.bf16.mxu1 %v26557_v6 }
 0x65d   : > { %20203 = vmatprep.mubr.msk.bf16.mxu0 %vm604_vm0, %v9960_v17 }
 0x664   : > { %20204 = vmatmul.mubr.msk.bf16.vlgmr.msra.gmra.mrb[0].mxu0 %vm604_vm0, %v9962_v13 }
 0x665   : > { %20207 = vmatprep.mubr.msk.bf16.mxu0 %vm604_vm0, %v9964_v8  ;;  %v21281_v8 = vld [vmem:[#allocation2 + $0x4a] sm:$0xff] }
 0x66c   : > { %20208 = vmatmul.mubr.msk.bf16.gmra.mrb[4].mxu0 %vm604_vm0, %v9966_v48  ;;  %v21284_v48 = vld [vmem:[#allocation2 + $0x62] sm:$0xff] }
 0x66d   : > { %20211 = vmatprep.mubr.msk.bf16.mxu0 %vm604_vm0, %v9968_v44 }
 0x674   : > { %20212 = vmatmul.mubr.msk.bf16.gmra.mrb[8].mxu0 %vm604_vm0, %v9970_v20 }
 0x675   : > { %20215 = vmatprep.mubr.msk.bf16.mxu0 %vm604_vm0, %v9972_v45 }
 0x67c   : > { %20216 = vmatmul.mubr.msk.bf16.gmra.mrb[12].mxu0 %vm604_vm0, %v9974_v54 }
 0x67d   : > { %20219 = vmatprep.mubr.msk.bf16.mxu0 %vm604_vm0, %v9976_v53 }
 0x684   : > { %20220 = vmatmul.mubr.msk.bf16.gmra.mrb[16].mxu0 %vm604_vm0, %v9978_v38 }
 0x685   : > { %20223 = vmatprep.mubr.msk.bf16.mxu0 %vm604_vm0, %v9980_v15 }
 0x68c   : > { %20224 = vmatmul.mubr.msk.bf16.gmra.mrb[20].mxu0 %vm604_vm0, %v9982_v2 }
 0x68d   : > { %20227 = vmatprep.mubr.msk.bf16.mxu0 %vm604_vm0, %v9984_v12 }
 0x694   : > { %20228 = vmatmul.mubr.msk.bf16.gmra.mrb[24].mxu0 %vm604_vm0, %v9986_v42 }
 0x695   : > { %20231 = vmatprep.mubr.msk.bf16.mxu0 %vm604_vm0, %v9988_v25 }
 0x69c   : > { %20232 = vmatmul.mubr.msk.bf16.gmra.mrb[28].mxu0 %vm604_vm0, %v9990_v24 }
 0x69d   : > { %20235 = vmatprep.mubr.msk.bf16.mxu0 %vm604_vm0, %v9992_v7 }
 0x6a4   : > { %20236 = vmatmul.mubr.msk.bf16.gmra.mrb[32].mxu0 %vm604_vm0, %v9994_v33 }
 0x6a5   : > { %20239 = vmatprep.mubr.msk.bf16.mxu0 %vm604_vm0, %v9996_v49 }
 0x6ac   : > { %20240 = vmatmul.mubr.msk.bf16.gmra.mrb[48].mxu0 %vm604_vm0, %v9995_v51  ;;  %v21302_v51 = vld [vmem:[#allocation2 + $0x9a] sm:$0xff] }
 0x737   : > { %v20205_v4 = vpop.f32.mrb[0].mxu0 }
 0x738   : > { %v21267_v5 = vadd.f32 %v21266_v32, %v20205_v4  ;;  %v10097_v41 = vpop.f32.mrb[1].mxu0 }
 0x739   : > { %v21270_v22 = vadd.f32 %v21269_v26, %v10097_v41  ;;  %v20206_v10 = vpop.f32.mrb[2].mxu0 }
 0x73a   : > { %10378 = vst [vmem:[#allocation2 + $0x3a] sm:$0xff] %v21267_v5  ;;  %v21273_v40 = vadd.f32 %v21272_v63, %v20206_v10  ;;  %v10100_v57 = vpop.f32.mrb[3].mxu0  ;;  %v21314_v10 = vld [vmem:[#allocation2 + $0xba] sm:$0xff] }
 0x73b   : > { %10376 = vst [vmem:[#allocation2 + $0x2a] sm:$0xff] %v21270_v22  ;;  %v21276_v37 = vadd.f32 %v21275_v60, %v10100_v57  ;;  %v21317_v57 = vld [vmem:[#allocation2 + $0xaa] sm:$0xff]  ;;  %v10589_v60 = vld [vmem:[#allocation3 + $0x11] sm:$0xff] }
 0x73c   : > { %10379 = vst [vmem:[#allocation2 + $0x42] sm:$0xff] %v21273_v40 }
 0x73d   : > { %10377 = vst [vmem:[#allocation2 + $0x32] sm:$0xff] %v21276_v37 }
 0x73f   : > { %v20209_v17 = vpop.f32.mrb[4].mxu0 }
 0x740   : > { %v21279_v31 = vadd.f32 %v21278_v1, %v20209_v17  ;;  %v10113_v13 = vpop.f32.mrb[5].mxu0 }
 0x741   : > { %v21282_v21 = vadd.f32 %v21281_v8, %v10113_v13  ;;  %v20210_v29 = vpop.f32.mrb[6].mxu0  ;;  %v21323_v13 = vld [vmem:[#allocation2 + $0xb2] sm:$0xff] }
 0x742   : > { %10382 = vst [vmem:[#allocation2 + $0x5a] sm:$0xff] %v21279_v31  ;;  %v21285_v44 = vadd.f32 %v21284_v48, %v20210_v29  ;;  %v10116_v62 = vpop.f32.mrb[7].mxu0  ;;  %v21320_v31 = vld [vmem:[#allocation2 + $0xc2] sm:$0xff] }
 0x743   : > { %10380 = vst [vmem:[#allocation2 + $0x4a] sm:$0xff] %v21282_v21  ;;  %v21288_v20 = vadd.f32 %v21287_v39, %v10116_v62 }
 0x744   : > { %10383 = vst [vmem:[#allocation2 + $0x62] sm:$0xff] %v21285_v44  ;;  %v10436_v58 = vld [vmem:[#allocation2 + $0x2a] ss:$2 sm:$0xff]  ;;  %v10438_v54 = vld [vmem:[#allocation2 + $0x2b] ss:$2 sm:$0xff] }
 0x745   : > { %10381 = vst [vmem:[#allocation2 + $0x52] sm:$0xff] %v21288_v20  ;;  %v10443_v42 = vmax.f32 %v10436_v58, %v10438_v54 }
 0x747   : > { %v20213_v45 = vpop.f32.mrb[8].mxu0 }
 0x748   : > { %v21291_v53 = vadd.f32 %v21290_v36, %v20213_v45  ;;  %v10129_v55 = vpop.f32.mrb[9].mxu0  ;;  %v22800_v45 = vld [vmem:[#allocation6 + $0x8] sm:$0xff]  }
 0x749   : > { %v21294_v38 = vadd.f32 %v21293_v61, %v10129_v55  ;;  %v20214_v15 = vpop.f32.mrb[10].mxu0 }
 0x74a   : > { %v10440_v30 = vld [vmem:[#allocation2 + $0x3e] ss:$2 sm:$0xff]  ;;  %v10442_v2 = vld [vmem:[#allocation2 + $0x3f] ss:$2 sm:$0xff]  ;;  %10386 = vst [vmem:[#allocation2 + $0x7a] sm:$0xff] %v21291_v53  ;;  %v21297_v12 = vadd.f32 %v21296_v50, %v20214_v15  ;;  %v10132_v14 = vpop.f32.mrb[11].mxu0 }
 0x74b   : > { %v10444_v25 = vmax.f32 %v10440_v30, %v10442_v2  ;;  %10384 = vst [vmem:[#allocation2 + $0x6a] sm:$0xff] %v21294_v38  ;;  %v21300_v3 = vadd.f32 %v21299_v34, %v10132_v14  ;;  %v21326_v38 = vld [vmem:[#allocation2 + $0xda] sm:$0xff]  ;;  %v22801_v15 = vld [vmem:[#allocation6 + $0x10] sm:$0xff]  }
 0x74c   : > { %10387 = vst [vmem:[#allocation2 + $0x82] sm:$0xff] %v21297_v12  ;;  %v10456_v19 = vld [vmem:[#allocation2 + $0x52] ss:$2 sm:$0xff]  ;;  %v10458_v52 = vld [vmem:[#allocation2 + $0x53] ss:$2 sm:$0xff]  ;;  %v21329_v2 = vld [vmem:[#allocation2 + $0xca] sm:$0xff] }
 0x74d   : > { %v10445_v24 = vmax.f32 %v10443_v42, %v10444_v25  ;;  %10385 = vst [vmem:[#allocation2 + $0x72] sm:$0xff] %v21300_v3  ;;  %v10463_v5 = vmax.f32 %v10456_v19, %v10458_v52  ;;  %v21332_v42 = vld [vmem:[#allocation2 + $0xe2] sm:$0xff] }
 0x74f   : > { %v26566_v7 = vadd.f32 %v26563_v46, %v10445_v24  ;;  %v20217_v0 = vpop.f32.mrb[12].mxu0 }
 0x750   : > { %v21303_v33 = vadd.f32 %v21302_v51, %v20217_v0  ;;  %v10145_v49 = vpop.f32.mrb[13].mxu0 }
 0x751   : > { %v10453_v27 = vmax.f32 %v26566_v7, 0.0  ;;  %v21306_v35 = vadd.f32 %v21305_v9, %v10145_v49  ;;  %v20218_v59 = vpop.f32.mrb[14].mxu0  ;;  %v22802_v49 = vld [vmem:[#allocation6 + $0x18] sm:$0xff]  }
 0x752   : > { %10390 = vst [vmem:[#allocation2 + $0x9a] sm:$0xff] %v21303_v33  ;;  %v21309_v18 = vadd.f32 %v21308_v23, %v20218_v59  ;;  %v10148_v16 = vpop.f32.mrb[15].mxu0 }
 0x753   : > { %10388 = vst [vmem:[#allocation2 + $0x8a] sm:$0xff] %v21306_v35  ;;  %v21312_v43 = vadd.f32 %v21311_v11, %v10148_v16  ;;  %10454 = vst [vmem:[#allocation3 + $0x1a] sm:$0xff] %v10453_v27  ;;  %v10470_v8 = vld [vmem:[#allocation2 + $0x7a] ss:$2 sm:$0xff]  ;;  %v10472_v21 = vld [vmem:[#allocation2 + $0x7b] ss:$2 sm:$0xff] }
 0x754   : > { %v10460_v4 = vld [vmem:[#allocation2 + $0x66] ss:$2 sm:$0xff]  ;;  %v10462_v32 = vld [vmem:[#allocation2 + $0x67] ss:$2 sm:$0xff]  ;;  %10391 = vst [vmem:[#allocation2 + $0xa2] sm:$0xff] %v21309_v18  ;;  %v10477_v54 = vmax.f32 %v10470_v8, %v10472_v21 }
 0x755   : > { %v10464_v41 = vmax.f32 %v10460_v4, %v10462_v32  ;;  %10389 = vst [vmem:[#allocation2 + $0x92] sm:$0xff] %v21312_v43  ;;  %v21338_v43 = vld [vmem:[#allocation2 + $0xfa] sm:$0xff]  ;;  %v22805_v8 = vld [vmem:[#allocation6 + $0x30] sm:$0xff]  }
 0x756   : > { %v22803_v4 = vld [vmem:[#allocation6 + $0x20] sm:$0xff]  }
 0x757   : > { %v10465_v26 = vmax.f32 %v10463_v5, %v10464_v41  ;;  %v20221_v22 = vpop.f32.mrb[16].mxu0  ;;  %v21341_v41 = vld [vmem:[#allocation2 + $0xea] sm:$0xff] }
 0x758   : > { %v21315_v63 = vadd.f32 %v21314_v10, %v20221_v22  ;;  %v10161_v40 = vpop.f32.mrb[17].mxu0 }
 0x759   : > { %v10466_v37 = vadd.f32 %v26563_v46, %v10465_v26  ;;  %v21318_v17 = vadd.f32 %v21317_v57, %v10161_v40  ;;  %v20222_v1 = vpop.f32.mrb[18].mxu0 }
 0x75a   : > { %10394 = vst [vmem:[#allocation2 + $0xba] sm:$0xff] %v21315_v63  ;;  %v21321_v29 = vadd.f32 %v21320_v31, %v20222_v1  ;;  %v10164_v48 = vpop.f32.mrb[19].mxu0  ;;  %v10590_v44 = vld [vmem:[#allocation3 + $0x19] sm:$0xff] }
 0x75b   : > { %v10467_v62 = vmax.f32 %v10466_v37, 0.0  ;;  %10392 = vst [vmem:[#allocation2 + $0xaa] sm:$0xff] %v21318_v17  ;;  %v21324_v39 = vadd.f32 %v21323_v13, %v10164_v48  ;;  %v10600_v20 = vpack.c.bf16 %v10590_v44, %v10589_v60  ;;  %v21344_v63 = vld [vmem:[#allocation2 + $0x102] sm:$0xff]  ;;  %v21347_v60 = vld [vmem:[#allocation2 + $0xf2] sm:$0xff]  ;;  %v21350_v13 = vld [vmem:[#allocation2 + $0x11a] sm:$0xff] }
 0x75c   : > { %v10474_v36 = vld [vmem:[#allocation2 + $0x8e] ss:$2 sm:$0xff]  ;;  %v10476_v58 = vld [vmem:[#allocation2 + $0x8f] ss:$2 sm:$0xff]  ;;  %10395 = vst [vmem:[#allocation2 + $0xc2] sm:$0xff] %v21321_v29 }
 0x75d   : > { %v10478_v53 = vmax.f32 %v10474_v36, %v10476_v58  ;;  %10393 = vst [vmem:[#allocation2 + $0xb2] sm:$0xff] %v21324_v39  ;;  %20260 = vmatmul.mubr.bf16.vlgmr.msra.gmra.mrb[40].mxu1 %v10600_v20  ;;  %10468 = vst [vmem:[#allocation3 + $0x26] sm:$0xff] %v10467_v62  ;;  %v22804_v1 = vld [vmem:[#allocation6 + $0x28] sm:$0xff]  }
 0x75e   : > { %20272 = vmatpush3.bf16.msra.mxu1 %v26557_v6  ;;  %v21335_v6 = vld [vmem:[#allocation2 + $0xd2] sm:$0xff]  ;;  %v21353_v62 = vld [vmem:[#allocation2 + $0x10a] sm:$0xff] }
 0x75f   : > { %v10479_v55 = vmax.f32 %v10477_v54, %v10478_v53  ;;  %v20225_v61 = vpop.f32.mrb[20].mxu0  ;;  %20273 = vmatprep.subr.bf16.mxu1 %v22800_v45 }
 0x760   : > { %v21327_v50 = vadd.f32 %v21326_v38, %v20225_v61  ;;  %v10177_v30 = vpop.f32.mrb[21].mxu0 }
 0x761   : > { %v26574_v12 = vadd.f32 %v26563_v46, %v10479_v55  ;;  %v21330_v14 = vadd.f32 %v21329_v2, %v10177_v30  ;;  %v20226_v34 = vpop.f32.mrb[22].mxu0  ;;  %v21359_v55 = vld [vmem:[#allocation2 + $0x112] sm:$0xff] }
 0x762   : > { %v10484_v25 = vld [vmem:[#allocation2 + $0xa2] ss:$2 sm:$0xff]  ;;  %v10486_v3 = vld [vmem:[#allocation2 + $0xa3] ss:$2 sm:$0xff]  ;;  %10398 = vst [vmem:[#allocation2 + $0xda] sm:$0xff] %v21327_v50  ;;  %v21333_v24 = vadd.f32 %v21332_v42, %v20226_v34  ;;  %v10180_v0 = vpop.f32.mrb[23].mxu0  ;;  %20274 = vmatpush3.bf16.msra.mxu1 %v22800_v45 }
 0x763   : > { %v10481_v51 = vmax.f32 %v26574_v12, 0.0  ;;  %10396 = vst [vmem:[#allocation2 + $0xca] sm:$0xff] %v21330_v14  ;;  %v21336_v33 = vadd.f32 %v21335_v6, %v10180_v0  ;;  %20275 = vmatprep.subr.bf16.mxu1 %v22801_v15  ;;  %v10491_v23 = vmax.f32 %v10484_v25, %v10486_v3  ;;  %v21356_v45 = vld [vmem:[#allocation2 + $0x122] sm:$0xff]  ;;  %v22806_v50 = vld [vmem:[#allocation6 + $0x38] sm:$0xff]  }
 0x764   : > { %v10488_v9 = vld [vmem:[#allocation2 + $0xb6] ss:$2 sm:$0xff]  ;;  %v10490_v35 = vld [vmem:[#allocation2 + $0xb7] ss:$2 sm:$0xff]  ;;  %10399 = vst [vmem:[#allocation2 + $0xe2] sm:$0xff] %v21333_v24  ;;  %v22820_v12 = vld [vmem:[#allocation6 + $0xe8] sm:$0xff]  }
 0x765   : > { %v10591_v59 = vld [vmem:[#allocation3 + $0x21] sm:$0xff]  ;;  %v10492_v19 = vmax.f32 %v10488_v9, %v10490_v35  ;;  %10482 = vst [vmem:[#allocation3 + $0x32] sm:$0xff] %v10481_v51  ;;  %10397 = vst [vmem:[#allocation2 + $0xd2] sm:$0xff] %v21336_v33  ;;  %v10592_v52 = vld [vmem:[#allocation3 + $0x29] sm:$0xff] }
 0x766   : > { %v10601_v18 = vpack.c.bf16 %v10592_v52, %v10591_v59  ;;  %20276 = vmatpush3.bf16.msra.mxu1 %v22801_v15  ;;  %v21362_v3 = vld [vmem:[#allocation2 + $0x13a] sm:$0xff]  ;;  %v21365_v33 = vld [vmem:[#allocation2 + $0x12a] sm:$0xff]  ;;  %v21368_v59 = vld [vmem:[#allocation2 + $0x142] sm:$0xff] }
 0x767   : > { %v10493_v16 = vmax.f32 %v10491_v23, %v10492_v19  ;;  %v20229_v11 = vpop.f32.mrb[24].mxu0  ;;  %20277 = vmatprep.subr.bf16.mxu1 %v22802_v49  ;;  %v26583_v24 = vld [vmem:[#allocation6 + $0x80] sm:$0xff]  }
 0x768   : > { %v21339_v32 = vadd.f32 %v21338_v43, %v20229_v11  ;;  %20263 = vmatprep.mubr.bf16.mxu1 %v10601_v18  ;;  %v10193_v5 = vpop.f32.mrb[25].mxu0 }
 0x769   : > { %v10494_v26 = vadd.f32 %v26563_v46, %v10493_v16  ;;  %v21342_v22 = vadd.f32 %v21341_v41, %v10193_v5  ;;  %v20230_v10 = vpop.f32.mrb[26].mxu0  ;;  %v21371_v16 = vld [vmem:[#allocation2 + $0x132] sm:$0xff] }
 0x76a   : > { %10402 = vst [vmem:[#allocation2 + $0xfa] sm:$0xff] %v21339_v32  ;;  %v21345_v40 = vadd.f32 %v21344_v63, %v20230_v10  ;;  %v10196_v57 = vpop.f32.mrb[27].mxu0  ;;  %20278 = vmatpush3.bf16.msra.mxu1 %v22802_v49 }
 0x76b   : > { %v10495_v37 = vmax.f32 %v10494_v26, 0.0  ;;  %10400 = vst [vmem:[#allocation2 + $0xea] sm:$0xff] %v21342_v22  ;;  %v21348_v17 = vadd.f32 %v21347_v60, %v10196_v57  ;;  %20279 = vmatprep.subr.bf16.mxu1 %v22803_v4  ;;  %v10335_v60 = vld [vmem:[#allocation2 + $0x162] sm:$0xf] }
 0x76c   : > { %10403 = vst [vmem:[#allocation2 + $0x102] sm:$0xff] %v21345_v40  ;;  %v10498_v21 = vld [vmem:[#allocation2 + $0xca] ss:$2 sm:$0xff]  ;;  %v10500_v29 = vld [vmem:[#allocation2 + $0xcb] ss:$2 sm:$0xff]  ;;  %v10593_v30 = vld [vmem:[#allocation3 + $0x31] sm:$0xff] }
 0x76d   : > { %10496 = vst [vmem:[#allocation3 + $0x3e] sm:$0xff] %v10495_v37  ;;  %10401 = vst [vmem:[#allocation2 + $0xf2] sm:$0xff] %v21348_v17  ;;  %v10505_v61 = vmax.f32 %v10498_v21, %v10500_v29  ;;  %v10333_v37 = vld [vmem:[#allocation2 + $0x152] sm:$0xff] }
 0x76e   : > { %20280 = vmatpush3.bf16.msra.mxu1 %v22803_v4 }
 0x76f   : > { %v20233_v31 = vpop.f32.mrb[28].mxu0  ;;  %20281 = vmatprep.subr.bf16.mxu1 %v22804_v1 }
 0x770   : > { %v21351_v48 = vadd.f32 %v21350_v13, %v20233_v31  ;;  %v10209_v44 = vpop.f32.mrb[29].mxu0 }
 0x771   : > { %v21354_v39 = vadd.f32 %v21353_v62, %v10209_v44  ;;  %v20234_v20 = vpop.f32.mrb[30].mxu0 }
 0x772   : > { %v10502_v36 = vld [vmem:[#allocation2 + $0xde] ss:$2 sm:$0xff]  ;;  %v10504_v58 = vld [vmem:[#allocation2 + $0xdf] ss:$2 sm:$0xff]  ;;  %10406 = vst [vmem:[#allocation2 + $0x11a] sm:$0xff] %v21351_v48  ;;  %v21357_v54 = vadd.f32 %v21356_v45, %v20234_v20  ;;  %v10212_v53 = vpop.f32.mrb[31].mxu0  ;;  %20282 = vmatpush3.bf16.msra.mxu1 %v22804_v1 }
 0x773   : > { %v10506_v38 = vmax.f32 %v10502_v36, %v10504_v58  ;;  %10404 = vst [vmem:[#allocation2 + $0x10a] sm:$0xff] %v21354_v39  ;;  %v21360_v15 = vadd.f32 %v21359_v55, %v10212_v53  ;;  %20283 = vmatprep.subr.bf16.mxu1 %v22805_v8 }
 0x774   : > { %10407 = vst [vmem:[#allocation2 + $0x122] sm:$0xff] %v21357_v54  ;;  %v10594_v2 = vld [vmem:[#allocation3 + $0x39] sm:$0xff]  ;;  %v10512_v23 = vld [vmem:[#allocation2 + $0xf2] ss:$2 sm:$0xff]  ;;  %v10514_v19 = vld [vmem:[#allocation2 + $0xf3] ss:$2 sm:$0xff] }
 0x775   : > { %v10507_v14 = vmax.f32 %v10505_v61, %v10506_v38  ;;  %10405 = vst [vmem:[#allocation2 + $0x112] sm:$0xff] %v21360_v15  ;;  %v10602_v34 = vpack.c.bf16 %v10594_v2, %v10593_v30  ;;  %v10519_v32 = vmax.f32 %v10512_v23, %v10514_v19  ;;  %v10595_v17 = vld [vmem:[#allocation3 + $0x41] sm:$0xff]  ;;  %v10559_v19 = vld [vmem:[#allocation3 + $0x30] sm:$0xff] }
 0x776   : > { %20284 = vmatpush3.bf16.msra.mxu1 %v22805_v8 }
 0x777   : > { %v26581_v42 = vadd.f32 %v26563_v46, %v10507_v14  ;;  %v20237_v25 = vpop.f32.mrb[32].mxu0  ;;  %20264 = vmatmul.mubr.bf16.gmra.mrb[44].mxu1 %v10602_v34  ;;  %20285 = vmatprep.subr.bf16.mxu1 %v22806_v50  ;;  %v23288_v34 = vmov 0.0|0.0  }
 0x778   : > { %v21363_v0 = vadd.f32 %v21362_v3, %v20237_v25  ;;  %v10225_v6 = vpop.f32.mrb[33].mxu0  ;;  %v10556_v3 = vld [vmem:[#allocation3 + $0x18] sm:$0xff] }
 0x779   : > { %v10509_v49 = vmax.f32 %v26581_v42, 0.0  ;;  %v21366_v9 = vadd.f32 %v21365_v33, %v10225_v6  ;;  %v20238_v35 = vpop.f32.mrb[34].mxu0  ;;  %v10558_v6 = vld [vmem:[#allocation3 + $0x28] sm:$0xff]  ;;  %v26595_v33 = vpack.c.bf16 %v10556_v3, %v23287_v28  ;;  %v10561_v28 = vld [vmem:[#allocation3 + $0x40] sm:$0xff] }
 0x77a   : > { %10410 = vst [vmem:[#allocation2 + $0x13a] sm:$0xff] %v21363_v0  ;;  %v21369_v52 = vadd.f32 %v21368_v59, %v20238_v35  ;;  %v10228_v18 = vpop.f32.mrb[35].mxu0  ;;  %20286 = vmatpush3.bf16.msra.mxu1 %v22806_v50  ;;  %v10557_v0 = vld [vmem:[#allocation3 + $0x20] sm:$0xff]  ;;  %v10560_v59 = vld [vmem:[#allocation3 + $0x38] sm:$0xff]  ;;  %v22822_v42 = vld [vmem:[#allocation6 + $0xf8] sm:$0xff]  }
 0x77b   : > { %10510 = vst [vmem:[#allocation3 + $0x4a] sm:$0xff] %v10509_v49  ;;  %10408 = vst [vmem:[#allocation2 + $0x12a] sm:$0xff] %v21366_v9  ;;  %v21372_v11 = vadd.f32 %v21371_v16, %v10228_v18  ;;  %20299 = vmatprep.subr.bf16.mxu1 %v26583_v24  ;;  %v10526_v1 = vld [vmem:[#allocation2 + $0x11a] ss:$2 sm:$0xff]  ;;  %v10528_v31 = vld [vmem:[#allocation2 + $0x11b] ss:$2 sm:$0xff]  ;;  %v26597_v35 = vpack.c.bf16 %v10558_v6, %v10557_v0 }
 0x77c   : > { %v10516_v43 = vld [vmem:[#allocation2 + $0x106] ss:$2 sm:$0xff]  ;;  %v10518_v4 = vld [vmem:[#allocation2 + $0x107] ss:$2 sm:$0xff]  ;;  %10411 = vst [vmem:[#allocation2 + $0x142] sm:$0xff] %v21369_v52  ;;  %v10533_v39 = vmax.f32 %v10526_v1, %v10528_v31  ;;  %v26602_v52 = vpack.c.bf16 %v10560_v59, %v10559_v19  ;;  %v22810_v18 = vld [vmem:[#allocation6 + $0x98] sm:$0xff]  }
 0x77d   : > { %v10520_v5 = vmax.f32 %v10516_v43, %v10518_v4  ;;  %10409 = vst [vmem:[#allocation2 + $0x132] sm:$0xff] %v21372_v11  ;;  %v22808_v9 = vld [vmem:[#allocation6 + $0x88] sm:$0xff]   ;;  %v10880_v11 = vld [vmem:[#allocation3 + $0x2] sm:$0xff]  ;;  %v10881_v43 = vld [vmem:[#allocation3 + $0xa] sm:$0xff] }
 0x77e   : > { %v22817_v31 = vld [vmem:[#allocation6 + $0xd0] sm:$0xff]  }
 0x77f   : > { %v10521_v41 = vmax.f32 %v10519_v32, %v10520_v5  ;;  %v20241_v26 = vpop.f32.mrb[48].mxu0  ;;  %v10892_v5 = vpack.c.bf16 %v10881_v43, %v10880_v11  ;;  %v11232_v3 = vld [vmem:[#allocation3 + $0x4] sm:$0xff]  ;;  %v26622_v11 = vld [vmem:[#allocation3 + $0x1c] sm:$0xff]  ;;  %v26624_v43 = vld [vmem:[#allocation3 + $0x2c] sm:$0xff] }
 0x780   : > { %v10374_v22 = vadd.f32 %v20241_v26, %v26337_v56  ;;  %v10241_v10 = vpop.f32.mrb[49].mxu0  ;;  %v22812_v26 = vld [vmem:[#allocation6 + $0xa8] sm:$0xff]   ;;  %v22829_v19 = vld [vmem:[#allocation6 + $0x130] sm:$0xff]  }
 0x781   : > { %v10522_v63 = vadd.f32 %v26563_v46, %v10521_v41  ;;  %v10372_v40 = vadd.f32 %v10241_v10, %v26340_v47  ;;  %v20242_v57 = vpop.f32.mrb[50].mxu0  ;;  %v22814_v10 = vld [vmem:[#allocation6 + $0xb8] sm:$0xff]  }
 0x782   : > { %10414 = vst [vmem:[#allocation2 + $0x15a] sm:$0xff] %v10374_v22  ;;  %v10375_v13 = vadd.f32 %v20242_v57, %v10335_v60  ;;  %v10244_v8 = vpop.f32.mrb[51].mxu0  ;;  %v10596_v21 = vld [vmem:[#allocation3 + $0x49] sm:$0xff]  ;;  %v22813_v22 = vld [vmem:[#allocation6 + $0xb0] sm:$0xff]  }
 0x783   : > { %v10523_v29 = vmax.f32 %v10522_v63, 0.0  ;;  %10412 = vst [vmem:[#allocation2 + $0x14a] sm:$0xff] %v10372_v40  ;;  %v10373_v48 = vadd.f32 %v10333_v37, %v10244_v8  ;;  %v10603_v44 = vpack.c.bf16 %v10596_v21, %v10595_v17  ;;  %v10562_v23 = vld [vmem:[#allocation3 + $0x48] sm:$0xff]  ;;  %v22815_v63 = vld [vmem:[#allocation6 + $0xc0] sm:$0xff]   ;;  %v22816_v17 = vld [vmem:[#allocation6 + $0xc8] sm:$0xff]  }
 0x784   : > { %v10530_v56 = vld [vmem:[#allocation2 + $0x12e] ss:$2 sm:$0xff]  ;;  %v10532_v62 = vld [vmem:[#allocation2 + $0x12f] ss:$2 sm:$0xff]  ;;  %10415 = vst [vmem:[#allocation2 + $0x162] sm:$0xf] %v10375_v13  ;;  %v26604_v16 = vpack.c.bf16 %v10562_v23, %v10561_v28 }
 0x785   : > { %10524 = vst [vmem:[#allocation3 + $0x56] sm:$0xff] %v10523_v29  ;;  %v10534_v47 = vmax.f32 %v10530_v56, %v10532_v62  ;;  %10413 = vst [vmem:[#allocation2 + $0x152] sm:$0xff] %v10373_v48  ;;  %20267 = vmatprep.mubr.bf16.mxu1 %v10603_v44  ;;  %v10882_v40 = vld [vmem:[#allocation3 + $0x12] sm:$0xff]  ;;  %v10884_v57 = vld [vmem:[#allocation3 + $0x22] sm:$0xff] }
 0x786   : > { %v10885_v60 = vld [vmem:[#allocation3 + $0x2a] sm:$0xff]  ;;  %v10893_v37 = vpack.c.bf16 %v10453_v27, %v10882_v40  ;;  %v10887_v13 = vld [vmem:[#allocation3 + $0x3a] sm:$0xff]  ;;  %v10888_v21 = vld [vmem:[#allocation3 + $0x42] sm:$0xff] }
 0x787   : > { %v10535_v20 = vmax.f32 %v10533_v39, %v10534_v47  ;;  %v10894_v1 = vpack.c.bf16 %v10885_v60, %v10884_v57  ;;  %v10895_v8 = vpack.c.bf16 %v10887_v13, %v10481_v51  ;;  %v22818_v29 = vld [vmem:[#allocation6 + $0xd8] sm:$0xff]   ;;  %v10896_v7 = vpack.c.bf16 %v10509_v49, %v10888_v21  ;;  %v22819_v27 = vld [vmem:[#allocation6 + $0xe0] sm:$0xff]   ;;  %v22821_v51 = vld [vmem:[#allocation6 + $0xf0] sm:$0xff]  }
 0x788   : > { %v11056_v48 = vld [vmem:[#allocation3 + $0x3] sm:$0xff]  ;;  %v11057_v44 = vld [vmem:[#allocation3 + $0xb] sm:$0xff]  ;;  %v22828_v23 = vld [vmem:[#allocation6 + $0x128] sm:$0xff]  }
 0x789   : > { %v10536_v45 = vadd.f32 %v26563_v46, %v10535_v20  ;;  %v11068_v39 = vpack.c.bf16 %v11057_v44, %v11056_v48  ;;  %v22823_v49 = vld [vmem:[#allocation6 + $0x100] sm:$0xff]   ;;  %v22830_v28 = vld [vmem:[#allocation6 + $0x138] sm:$0xff]   ;;  %v22837_v48 = vld [vmem:[#allocation6 + $0x1b0] sm:$0xff]  }
 0x78a   : > { %v10540_v36 = vld [vmem:[#allocation2 + $0x142] ss:$2 sm:$0xff]  ;;  %v10542_v58 = vld [vmem:[#allocation2 + $0x143] ss:$2 sm:$0xff]  ;;  %v22838_v44 = vld [vmem:[#allocation6 + $0x1b8] sm:$0xff]  }
 0x78b   : > { %v10537_v54 = vmax.f32 %v10536_v45, 0.0  ;;  %v10547_v38 = vmax.f32 %v10540_v36, %v10542_v58  ;;  %v11058_v20 = vld [vmem:[#allocation3 + $0x13] sm:$0xff]  ;;  %v11059_v45 = vld [vmem:[#allocation3 + $0x1b] sm:$0xff]  ;;  %v11061_v36 = vld [vmem:[#allocation3 + $0x2b] sm:$0xff] }
 0x78c   : > { %v10544_v53 = vld [vmem:[#allocation2 + $0x156] ss:$2 sm:$0xff]  ;;  %v10546_v55 = vld [vmem:[#allocation2 + $0x157] ss:$2 sm:$0xff]  ;;  %v10598_v50 = vld [vmem:[#allocation3 + $0x59] sm:$0xf]  ;;  %v11069_v58 = vpack.c.bf16 %v11059_v45, %v11058_v20 }
 0x78d   : > { %v10597_v61 = vld [vmem:[#allocation3 + $0x51] sm:$0xff]  ;;  %10538 = vst [vmem:[#allocation3 + $0x62] sm:$0xff] %v10537_v54  ;;  %v10548_v15 = vmax.f32 %v10544_v53, %v10546_v55  ;;  %v10891_v62 = vld [vmem:[#allocation3 + $0x5a] sm:$0xf]  ;;  %v11060_v54 = vld [vmem:[#allocation3 + $0x23] sm:$0xff] }
 0x78e   : > { %v10604_v30 = vpack.c.bf16 %v10598_v50, %v10597_v61  ;;  %v26608_v4 = vld [vmem:[#allocation3 + $0x50] sm:$0xff]  ;;  %v10564_v32 = vld [vmem:[#allocation3 + $0x58] sm:$0xf]  ;;  %v11070_v55 = vpack.c.bf16 %v11061_v36, %v11060_v54  ;;  %v22825_v61 = vld [vmem:[#allocation6 + $0x110] sm:$0xff]  }
 0x78f   : > { %v10549_v2 = vmax.f32 %v10547_v38, %v10548_v15  ;;  %v10570_v41 = vpack.c.bf16 %v10564_v32, %v26608_v4  ;;  %v10890_v56 = vld [vmem:[#allocation3 + $0x52] sm:$0xff]  ;;  %v11063_v38 = vld [vmem:[#allocation3 + $0x3b] sm:$0xff]  ;;  %v11064_v15 = vld [vmem:[#allocation3 + $0x43] sm:$0xff] }
 0x790   : > { %20268 = vmatmul.mubr.bf16.gmra.mrb[48].mxu1 %v10604_v30  ;;  %v10897_v47 = vpack.c.bf16 %v10891_v62, %v10890_v56  ;;  %v22824_v53 = vld [vmem:[#allocation6 + $0x108] sm:$0xff]   ;;  %v11065_v50 = vld [vmem:[#allocation3 + $0x4b] sm:$0xff]  ;;  %v22841_v20 = vld [vmem:[#allocation6 + $0x150] sm:$0xff]  }
 0x791   : > { %v10550_v14 = vadd.f32 %v26563_v46, %v10549_v2  ;;  %20287 = vmatprep.mubr.bf16.mxu1 %v23288_v34  ;;  %v22809_v46 = vld [vmem:[#allocation6 + $0x90] sm:$0xff]   ;;  %v11062_v30 = vld [vmem:[#allocation3 + $0x33] sm:$0xff]  ;;  %v11072_v34 = vpack.c.bf16 %v11065_v50, %v11064_v15  ;;  %v11067_v6 = vld [vmem:[#allocation3 + $0x5b] sm:$0xf] }
 0x792   : > { %v11071_v2 = vpack.c.bf16 %v11063_v38, %v11062_v30  ;;  %v11066_v0 = vld [vmem:[#allocation3 + $0x53] sm:$0xff]  ;;  %v11243_v13 = vld [vmem:[#allocation3 + $0x5c] sm:$0xf]  ;;  %v11458_v62 = vld [vmem:[#allocation3 + $0x25] sm:$0xff] }
 0x793   : > { %v10551_v25 = vmax.f32 %v10550_v14, 0.0  ;;  %v22826_v14 = vld [vmem:[#allocation6 + $0x118] sm:$0xff]   ;;  %v11073_v59 = vpack.c.bf16 %v11067_v6, %v11066_v0  ;;  %v26638_v57 = vld [vmem:[#allocation3 + $0x34] sm:$0xff] }
 0x794   : > { %v26636_v40 = vld [vmem:[#allocation3 + $0x4c] sm:$0xff]  ;;  %v11456_v21 = vld [vmem:[#allocation3 + $0x15] sm:$0xff]  ;;  %v11465_v15 = vld [vmem:[#allocation3 + $0x5d] sm:$0xff] }
 0x795   : > { %10552 = vst [vmem:[#allocation3 + $0x6e] sm:$0xff] %v10551_v25  ;;  %v22827_v25 = vld [vmem:[#allocation6 + $0x120] sm:$0xff]   ;;  %v11462_v45 = vld [vmem:[#allocation3 + $0x45] sm:$0xff]  ;;  %v22848_v6 = vld [vmem:[#allocation6 + $0x1c8] sm:$0xff]  }
 0x796   : > { %v22839_v56 = vld [vmem:[#allocation6 + $0x140] sm:$0xff]   ;;  %v11466_v50 = vld [vmem:[#allocation3 + $0x65] sm:$0xf] }
 0x797   : > { %v11464_v36 = vld [vmem:[#allocation3 + $0x55] sm:$0xff]  ;;  %v11472_v30 = vpack.c.bf16 %v11466_v50, %v11465_v15  ;;  %v22865_v15 = vld [vmem:[#allocation6 + $0x250] sm:$0xff]  }
 0x798   : > { %20288 = vmatmul.mubr.bf16.vlgmr.msra.gmra.mrb[40].mxu1 %v26595_v33  ;;  %v22843_v38 = vld [vmem:[#allocation6 + $0x160] sm:$0xff]   ;;  %v11931_v50 = vld [vmem:[#allocation3 + $0x47] sm:$0xff] }
 0x799   : > { %20300 = vmatpush3.bf16.msra.mxu1 %v26583_v24  ;;  %20291 = vmatprep.mubr.bf16.mxu1 %v26597_v35  ;;  %v22811_v24 = vld [vmem:[#allocation6 + $0xa0] sm:$0xff]  }
 0x79a   : > { %20301 = vmatprep.subr.bf16.mxu1 %v22808_v9 }
 0x79d   : > { %20302 = vmatpush3.bf16.msra.mxu1 %v22808_v9  ;;  %v26617_v9 = vld [vmem:[#allocation3 + $0xc] sm:$0xff] }
 0x79e   : > { %20303 = vmatprep.subr.bf16.mxu1 %v22809_v46 }
 0x7a0   : > { %20292 = vmatmul.mubr.bf16.gmra.mrb[44].mxu1 %v26602_v52 }
 0x7a1   : > { %20304 = vmatpush3.bf16.msra.mxu1 %v22809_v46  ;;  %20295 = vmatprep.mubr.bf16.mxu1 %v26604_v16  ;;  %v11244_v46 = vpack.c.bf16 %v26617_v9, %v11232_v3  ;;  %v22847_v3 = vld [vmem:[#allocation6 + $0x1c0] sm:$0xff]  }
 0x7a2   : > { %20305 = vmatprep.subr.bf16.mxu1 %v22810_v18 }
 0x7a5   : > { %20306 = vmatpush3.bf16.msra.mxu1 %v22810_v18  ;;  %v22831_v18 = vld [vmem:[#allocation6 + $0x180] sm:$0xff]  }
 0x7a6   : > { %20307 = vmatprep.subr.bf16.mxu1 %v22811_v24 }
 0x7a8   : > { %20296 = vmatmul.mubr.bf16.gmra.mrb[48].mxu1 %v10570_v41  ;;  %v22832_v41 = vld [vmem:[#allocation6 + $0x188] sm:$0xff]  }
 0x7a9   : > { %20308 = vmatpush3.bf16.msra.mxu1 %v22811_v24  ;;  %20315 = vmatprep.mubr.bf16.mxu1 %v10892_v5  ;;  %v26620_v24 = vld [vmem:[#allocation3 + $0x14] sm:$0xff]  ;;  %v26628_v5 = vld [vmem:[#allocation3 + $0x24] sm:$0xff] }
 0x7aa   : > { %20309 = vmatprep.subr.bf16.mxu1 %v22812_v26  ;;  %v11245_v32 = vpack.c.bf16 %v26622_v11, %v26620_v24  ;;  %v11433_v0 = vpack.c.bf16 %v26628_v5, %v26622_v11  ;;  %v11748_v11 = vld [vmem:[#allocation3 + $0xe] sm:$0xff] }
 0x7ad   : > { %20310 = vmatpush3.bf16.msra.mxu1 %v22812_v26  ;;  %v11246_v26 = vpack.c.bf16 %v26624_v43, %v26628_v5  ;;  %v22852_v5 = vld [vmem:[#allocation6 + $0x1e8] sm:$0xff]  }
 0x7ae   : > { %20311 = vmatprep.subr.bf16.mxu1 %v22813_v22 }
 0x7b1   : > { %20312 = vmatpush3.bf16.msra.mxu1 %v22813_v22  ;;  %v22833_v22 = vld [vmem:[#allocation6 + $0x190] sm:$0xff]  }
 0x7b2   : > { %20313 = vmatprep.subr.bf16.mxu1 %v22814_v10 }
 0x7b5   : > { %20314 = vmatpush3.bf16.msra.mxu1 %v22814_v10  ;;  %v26632_v10 = vld [vmem:[#allocation3 + $0x3c] sm:$0xff] }
 0x7b6   : > { %20327 = vmatprep.subr.bf16.mxu1 %v22815_v63  ;;  %v11247_v60 = vpack.c.bf16 %v26632_v10, %v26638_v57 }
 0x7b8   : > { %20316 = vmatmul.mubr.bf16.vlgmr.msra.gmra.mrb[40].mxu1 %v10893_v37  ;;  %v22834_v37 = vld [vmem:[#allocation6 + $0x198] sm:$0xff]  }
 0x7b9   : > { %20319 = vmatprep.mubr.bf16.mxu1 %v10894_v1  ;;  %20328 = vmatpush3.bf16.msra.mxu1 %v22815_v63  ;;  %v26634_v63 = vld [vmem:[#allocation3 + $0x44] sm:$0xff]  ;;  %v22835_v1 = vld [vmem:[#allocation6 + $0x1a0] sm:$0xff]  }
 0x7ba   : > { %20329 = vmatprep.subr.bf16.mxu1 %v22816_v17 }
 0x7bd   : > { %20330 = vmatpush3.bf16.msra.mxu1 %v22816_v17  ;;  %v11248_v17 = vpack.c.bf16 %v26636_v40, %v26634_v63 }
 0x7be   : > { %20331 = vmatprep.subr.bf16.mxu1 %v22817_v31 }
 0x7c0   : > { %20320 = vmatmul.mubr.bf16.gmra.mrb[44].mxu1 %v10895_v8  ;;  %v11455_v8 = vld [vmem:[#allocation3 + $0xd] sm:$0xff] }
 0x7c1   : > { %20323 = vmatprep.mubr.bf16.mxu1 %v10896_v7  ;;  %20332 = vmatpush3.bf16.msra.mxu1 %v22817_v31  ;;  %v26644_v31 = vld [vmem:[#allocation3 + $0x54] sm:$0xff] }
 0x7c2   : > { %20333 = vmatprep.subr.bf16.mxu1 %v22818_v29  ;;  %v22836_v7 = vld [vmem:[#allocation6 + $0x1a8] sm:$0xff]  }
 0x7c5   : > { %20334 = vmatpush3.bf16.msra.mxu1 %v22818_v29  ;;  %v11249_v29 = vpack.c.bf16 %v11243_v13, %v26644_v31  ;;  %v11755_v13 = vld [vmem:[#allocation3 + $0x46] sm:$0xff] }
 0x7c6   : > { %20335 = vmatprep.subr.bf16.mxu1 %v22819_v27 }
 0x7c8   : > { %20324 = vmatmul.mubr.bf16.gmra.mrb[48].mxu1 %v10897_v47  ;;  %v11460_v47 = vld [vmem:[#allocation3 + $0x35] sm:$0xff] }
 0x7c9   : > { %20336 = vmatpush3.bf16.msra.mxu1 %v22819_v27  ;;  %20343 = vmatprep.mubr.bf16.mxu1 %v11068_v39  ;;  %v11467_v27 = vpack.c.bf16 %v11456_v21, %v11455_v8  ;;  %v11459_v39 = vld [vmem:[#allocation3 + $0x2d] sm:$0xff]  ;;  %v11757_v8 = vld [vmem:[#allocation3 + $0x56] sm:$0xff]  ;;  %v11754_v21 = vld [vmem:[#allocation3 + $0x3e] sm:$0xff] }
 0x7ca   : > { %20337 = vmatprep.subr.bf16.mxu1 %v22820_v12 }
 0x7cd   : > { %20338 = vmatpush3.bf16.msra.mxu1 %v22820_v12  ;;  %v11457_v12 = vld [vmem:[#allocation3 + $0x1d] sm:$0xff] }
 0x7ce   : > { %20339 = vmatprep.subr.bf16.mxu1 %v22821_v51 }
 0x7d1   : > { %20340 = vmatpush3.bf16.msra.mxu1 %v22821_v51  ;;  %v11468_v51 = vpack.c.bf16 %v11458_v62, %v11457_v12  ;;  %v11759_v62 = vld [vmem:[#allocation3 + $0x66] sm:$0xf] }
 0x7d2   : > { %20341 = vmatprep.subr.bf16.mxu1 %v22822_v42 }
 0x7d5   : > { %20342 = vmatpush3.bf16.msra.mxu1 %v22822_v42  ;;  %v22840_v42 = vld [vmem:[#allocation6 + $0x148] sm:$0xff]  }
 0x7d6   : > { %20355 = vmatprep.subr.bf16.mxu1 %v22823_v49 }
 0x7d8   : > { %20344 = vmatmul.mubr.bf16.vlgmr.msra.gmra.mrb[40].mxu1 %v11069_v58  ;;  %v11461_v58 = vld [vmem:[#allocation3 + $0x3d] sm:$0xff] }
 0x7d9   : > { %20347 = vmatprep.mubr.bf16.mxu1 %v11070_v55  ;;  %20356 = vmatpush3.bf16.msra.mxu1 %v22823_v49  ;;  %v11469_v49 = vpack.c.bf16 %v11460_v47, %v11459_v39  ;;  %v11470_v54 = vpack.c.bf16 %v11462_v45, %v11461_v58  ;;  %v22842_v55 = vld [vmem:[#allocation6 + $0x158] sm:$0xff]   ;;  %v11925_v47 = vld [vmem:[#allocation3 + $0x17] sm:$0xff] }
 0x7da   : > { %20357 = vmatprep.subr.bf16.mxu1 %v22824_v53  ;;  %v11924_v39 = vld [vmem:[#allocation3 + $0xf] sm:$0xff]  ;;  %v11927_v58 = vld [vmem:[#allocation3 + $0x27] sm:$0xff] }
 0x7db   : > { %v22863_v45 = vld [vmem:[#allocation6 + $0x240] sm:$0xff]  }
 0x7dd   : > { %20358 = vmatpush3.bf16.msra.mxu1 %v22824_v53  ;;  %v11463_v53 = vld [vmem:[#allocation3 + $0x4d] sm:$0xff] }
 0x7de   : > { %20359 = vmatprep.subr.bf16.mxu1 %v22825_v61 }
 0x7e0   : > { %20348 = vmatmul.mubr.bf16.gmra.mrb[44].mxu1 %v11071_v2  ;;  %v22844_v2 = vld [vmem:[#allocation6 + $0x168] sm:$0xff]  }
 0x7e1   : > { %20351 = vmatprep.mubr.bf16.mxu1 %v11072_v34  ;;  %20360 = vmatpush3.bf16.msra.mxu1 %v22825_v61  ;;  %v11471_v61 = vpack.c.bf16 %v11464_v36, %v11463_v53  ;;  %v22845_v34 = vld [vmem:[#allocation6 + $0x170] sm:$0xff]  }
 0x7e2   : > { %20361 = vmatprep.subr.bf16.mxu1 %v22826_v14  ;;  %v11926_v36 = vld [vmem:[#allocation3 + $0x1f] sm:$0xff] }
 0x7e3   : > { %v11937_v53 = vpack.c.bf16 %v11927_v58, %v11926_v36  ;;  %v22886_v36 = vld [vmem:[#allocation6 + $0x2b8] sm:$0xff]   ;;  %v22887_v58 = vld [vmem:[#allocation6 + $0x300] sm:$0xff]  }
 0x7e5   : > { %20362 = vmatpush3.bf16.msra.mxu1 %v22826_v14  ;;  %v11432_v14 = vpack.c.bf16 %v26620_v24, %v26617_v9  ;;  %v11434_v9 = vpack.c.bf16 %v26638_v57, %v26624_v43  ;;  %v11431_v24 = vld [vmem:[#allocation3 + $0x64] sm:$0xf]  ;;  %v11749_v43 = vld [vmem:[#allocation3 + $0x16] sm:$0xff] }
 0x7e6   : > { %20363 = vmatprep.subr.bf16.mxu1 %v22827_v25  ;;  %v11753_v57 = vld [vmem:[#allocation3 + $0x36] sm:$0xff] }
 0x7e8   : > { %20352 = vmatmul.mubr.bf16.gmra.mrb[48].mxu1 %v11073_v59  ;;  %v11435_v59 = vpack.c.bf16 %v26634_v63, %v26632_v10  ;;  %v22855_v10 = vld [vmem:[#allocation6 + $0x200] sm:$0xff]   ;;  %v11751_v63 = vld [vmem:[#allocation3 + $0x26] sm:$0xff] }
 0x7e9   : > { %20364 = vmatpush3.bf16.msra.mxu1 %v22827_v25  ;;  %20371 = vmatprep.mubr.bf16.mxu1 %v11244_v46  ;;  %v22846_v25 = vld [vmem:[#allocation6 + $0x178] sm:$0xff]   ;;  %v22849_v46 = vld [vmem:[#allocation6 + $0x1d0] sm:$0xff]  }
 0x7ea   : > { %20365 = vmatprep.subr.bf16.mxu1 %v22828_v23 }
 0x7ed   : > { %20366 = vmatpush3.bf16.msra.mxu1 %v22828_v23  ;;  %v22850_v23 = vld [vmem:[#allocation6 + $0x1d8] sm:$0xff]  }
 0x7ee   : > { %20367 = vmatprep.subr.bf16.mxu1 %v22829_v19 }
 0x7f1   : > { %20368 = vmatpush3.bf16.msra.mxu1 %v22829_v19  ;;  %v11436_v19 = vpack.c.bf16 %v26644_v31, %v26636_v40  ;;  %v11752_v40 = vld [vmem:[#allocation3 + $0x2e] sm:$0xff]  ;;  %v22857_v31 = vld [vmem:[#allocation6 + $0x210] sm:$0xff]  }
 0x7f2   : > { %20369 = vmatprep.subr.bf16.mxu1 %v22830_v28 }
 0x7f5   : > { %20370 = vmatpush3.bf16.msra.mxu1 %v22830_v28  ;;  %v22851_v28 = vld [vmem:[#allocation6 + $0x1e0] sm:$0xff]  }
 0x7f6   : > { %20383 = vmatprep.subr.bf16.mxu1 %v22831_v18 }
 0x7f8   : > { %20372 = vmatmul.mubr.bf16.vlgmr.msra.gmra.mrb[40].mxu1 %v11245_v32 }
 0x7f9   : > { %20375 = vmatprep.mubr.bf16.mxu1 %v11246_v26  ;;  %20384 = vmatpush3.bf16.msra.mxu1 %v22831_v18  ;;  %v26657_v18 = vld [vmem:[#allocation3 + $0x5c] sm:$0xff] }
 0x7fa   : > { %20385 = vmatprep.subr.bf16.mxu1 %v22832_v41  ;;  %v11437_v32 = vpack.c.bf16 %v11431_v24, %v26657_v18  ;;  %v22853_v26 = vld [vmem:[#allocation6 + $0x1f0] sm:$0xff]   ;;  %v22872_v24 = vld [vmem:[#allocation6 + $0x2c8] sm:$0xff]  }
 0x7fd   : > { %20386 = vmatpush3.bf16.msra.mxu1 %v22832_v41  ;;  %v11760_v41 = vpack.c.bf16 %v11749_v43, %v11748_v11  ;;  %v22873_v11 = vld [vmem:[#allocation6 + $0x2d0] sm:$0xff]   ;;  %v26663_v43 = vld [vmem:[#allocation3 + $0x58] sm:$0xff] }
 0x7fe   : > { %20387 = vmatprep.subr.bf16.mxu1 %v22833_v22 }
 0x800   : > { %20376 = vmatmul.mubr.bf16.gmra.mrb[44].mxu1 %v11247_v60  ;;  %v11750_v60 = vld [vmem:[#allocation3 + $0x1e] sm:$0xff] }
 0x801   : > { %20379 = vmatprep.mubr.bf16.mxu1 %v11248_v17  ;;  %20388 = vmatpush3.bf16.msra.mxu1 %v22833_v22  ;;  %v22854_v22 = vld [vmem:[#allocation6 + $0x1f8] sm:$0xff]   ;;  %v22856_v17 = vld [vmem:[#allocation6 + $0x208] sm:$0xff]  }
 0x802   : > { %20389 = vmatprep.subr.bf16.mxu1 %v22834_v37 }
 0x805   : > { %20390 = vmatpush3.bf16.msra.mxu1 %v22834_v37  ;;  %v11761_v37 = vpack.c.bf16 %v11751_v63, %v11750_v60  ;;  %v12351_v60 = vld [vmem:[#allocation3 + $0x39] sm:$0xff] }
 0x806   : > { %20391 = vmatprep.subr.bf16.mxu1 %v22835_v1 }
 0x808   : > { %20380 = vmatmul.mubr.bf16.gmra.mrb[48].mxu1 %v11249_v29  ;;  %v11763_v29 = vpack.c.bf16 %v11755_v13, %v11754_v21  ;;  %v12354_v21 = vld [vmem:[#allocation3 + $0x51] sm:$0xff] }
 0x809   : > { %20392 = vmatpush3.bf16.msra.mxu1 %v22835_v1  ;;  %20399 = vmatprep.mubr.bf16.mxu1 %v11467_v27  ;;  %v11762_v1 = vpack.c.bf16 %v11753_v57, %v11752_v40  ;;  %v22858_v27 = vld [vmem:[#allocation6 + $0x218] sm:$0xff]   ;;  %v22879_v40 = vld [vmem:[#allocation6 + $0x280] sm:$0xff]  }
 0x80a   : > { %20393 = vmatprep.subr.bf16.mxu1 %v22836_v7  ;;  %v12350_v57 = vld [vmem:[#allocation3 + $0x31] sm:$0xff] }
 0x80d   : > { %20394 = vmatpush3.bf16.msra.mxu1 %v22836_v7  ;;  %v11756_v7 = vld [vmem:[#allocation3 + $0x4e] sm:$0xff] }
 0x80e   : > { %20395 = vmatprep.subr.bf16.mxu1 %v22837_v48 }
 0x811   : > { %20396 = vmatpush3.bf16.msra.mxu1 %v22837_v48  ;;  %v11764_v48 = vpack.c.bf16 %v11757_v8, %v11756_v7  ;;  %v22881_v8 = vld [vmem:[#allocation6 + $0x290] sm:$0xff]   ;;  %v12353_v7 = vld [vmem:[#allocation3 + $0x49] sm:$0xff] }
 0x812   : > { %20397 = vmatprep.subr.bf16.mxu1 %v22838_v44 }
 0x815   : > { %20398 = vmatpush3.bf16.msra.mxu1 %v22838_v44  ;;  %v22859_v44 = vld [vmem:[#allocation6 + $0x220] sm:$0xff]  }
 0x816   : > { %20411 = vmatprep.subr.bf16.mxu1 %v22839_v56 }
 0x818   : > { %20400 = vmatmul.mubr.bf16.vlgmr.msra.gmra.mrb[40].mxu1 %v11468_v51  ;;  %v22860_v51 = vld [vmem:[#allocation6 + $0x228] sm:$0xff]  }
 0x819   : > { %20403 = vmatprep.mubr.bf16.mxu1 %v11469_v49  ;;  %20412 = vmatpush3.bf16.msra.mxu1 %v22839_v56  ;;  %v11758_v56 = vld [vmem:[#allocation3 + $0x5e] sm:$0xff] }
 0x81a   : > { %20413 = vmatprep.subr.bf16.mxu1 %v22840_v42  ;;  %v11765_v12 = vpack.c.bf16 %v11759_v62, %v11758_v56  ;;  %v22861_v49 = vld [vmem:[#allocation6 + $0x230] sm:$0xff]   ;;  %v22883_v62 = vld [vmem:[#allocation6 + $0x2a0] sm:$0xff]  }
 0x81d   : > { %20414 = vmatpush3.bf16.msra.mxu1 %v22840_v42  ;;  %v11936_v42 = vpack.c.bf16 %v11925_v47, %v11924_v39  ;;  %v12357_v39 = vld [vmem:[#allocation3 + $0x69] sm:$0xff]  ;;  %v12358_v47 = vld [vmem:[#allocation3 + $0x71] sm:$0xf] }
 0x81e   : > { %20415 = vmatprep.subr.bf16.mxu1 %v22841_v20 }
 0x820   : > { %20404 = vmatmul.mubr.bf16.gmra.mrb[44].mxu1 %v11470_v54  ;;  %v11929_v54 = vld [vmem:[#allocation3 + $0x37] sm:$0xff] }
 0x821   : > { %20407 = vmatprep.mubr.bf16.mxu1 %v11471_v61  ;;  %20416 = vmatpush3.bf16.msra.mxu1 %v22841_v20  ;;  %v22862_v20 = vld [vmem:[#allocation6 + $0x238] sm:$0xff]   ;;  %v22864_v61 = vld [vmem:[#allocation6 + $0x248] sm:$0xff]  }
 0x822   : > { %20417 = vmatprep.subr.bf16.mxu1 %v22842_v55 }
 0x825   : > { %20418 = vmatpush3.bf16.msra.mxu1 %v22842_v55  ;;  %v11928_v55 = vld [vmem:[#allocation3 + $0x2f] sm:$0xff] }
 0x826   : > { %20419 = vmatprep.subr.bf16.mxu1 %v22843_v38 }
 0x828   : > { %20408 = vmatmul.mubr.bf16.gmra.mrb[52].mxu1 %v11472_v30  ;;  %v11932_v30 = vld [vmem:[#allocation3 + $0x4f] sm:$0xff] }
 0x829   : > { %20420 = vmatpush3.bf16.msra.mxu1 %v22843_v38  ;;  %20427 = vmatprep.mubr.bf16.mxu1 %v11432_v14  ;;  %v11938_v38 = vpack.c.bf16 %v11929_v54, %v11928_v55  ;;  %v11930_v14 = vld [vmem:[#allocation3 + $0x3f] sm:$0xff]  ;;  %v12315_v54 = vld [vmem:[#allocation3 + $0x30] sm:$0xff] }
 0x82a   : > { %20421 = vmatprep.subr.bf16.mxu1 %v22844_v2  ;;  %v12317_v55 = vld [vmem:[#allocation3 + $0x40] sm:$0xff] }
 0x82d   : > { %20422 = vmatpush3.bf16.msra.mxu1 %v22844_v2  ;;  %v11933_v2 = vld [vmem:[#allocation3 + $0x57] sm:$0xff] }
 0x82e   : > { %20423 = vmatprep.subr.bf16.mxu1 %v22845_v34 }
 0x831   : > { %20424 = vmatpush3.bf16.msra.mxu1 %v22845_v34  ;;  %v11939_v34 = vpack.c.bf16 %v11931_v50, %v11930_v14  ;;  %v12319_v14 = vld [vmem:[#allocation3 + $0x50] sm:$0xff] }
 0x832   : > { %20425 = vmatprep.subr.bf16.mxu1 %v22846_v25 }
 0x835   : > { %20426 = vmatpush3.bf16.msra.mxu1 %v22846_v25  ;;  %v22866_v25 = vld [vmem:[#allocation6 + $0x258] sm:$0xff]  }
 0x836   : > { %20439 = vmatprep.subr.bf16.mxu1 %v22847_v3 }
 0x838   : > { %20428 = vmatmul.mubr.bf16.vlgmr.msra.gmra.mrb[40].mxu1 %v11433_v0  ;;  %v22867_v0 = vld [vmem:[#allocation6 + $0x260] sm:$0xff]  }
 0x839   : > { %20431 = vmatprep.mubr.bf16.mxu1 %v11434_v9  ;;  %20440 = vmatpush3.bf16.msra.mxu1 %v22847_v3  ;;  %v11940_v3 = vpack.c.bf16 %v11933_v2, %v11932_v30  ;;  %v11935_v9 = vld [vmem:[#allocation3 + $0x67] sm:$0xf] }
 0x83a   : > { %20441 = vmatprep.subr.bf16.mxu1 %v22848_v6  ;;  %v22889_v30 = vld [vmem:[#allocation6 + $0x310] sm:$0xff]  }
 0x83d   : > { %20442 = vmatpush3.bf16.msra.mxu1 %v22848_v6  ;;  %v11934_v6 = vld [vmem:[#allocation3 + $0x5f] sm:$0xff] }
 0x83e   : > { %20443 = vmatprep.subr.bf16.mxu1 %v22849_v46 }
 0x840   : > { %20432 = vmatmul.mubr.bf16.gmra.mrb[44].mxu1 %v11435_v59  ;;  %v22868_v59 = vld [vmem:[#allocation6 + $0x268] sm:$0xff]  }
 0x841   : > { %20435 = vmatprep.mubr.bf16.mxu1 %v11436_v19  ;;  %20444 = vmatpush3.bf16.msra.mxu1 %v22849_v46  ;;  %v11941_v46 = vpack.c.bf16 %v11935_v9, %v11934_v6  ;;  %v22870_v19 = vld [vmem:[#allocation6 + $0x278] sm:$0xff]  }
 0x842   : > { %20445 = vmatprep.subr.bf16.mxu1 %v22850_v23  ;;  %v22890_v9 = vld [vmem:[#allocation6 + $0x318] sm:$0xff]  }
 0x845   : > { %20446 = vmatpush3.bf16.msra.mxu1 %v22850_v23  ;;  %v22869_v23 = vld [vmem:[#allocation6 + $0x270] sm:$0xff]  }
 0x846   : > { %20447 = vmatprep.subr.bf16.mxu1 %v22851_v28 }
 0x848   : > { %20436 = vmatmul.mubr.bf16.gmra.mrb[52].mxu1 %v11437_v32  ;;  %v12116_v32 = vpack.c.bf16 %v26663_v43, %v26608_v4  ;;  %v22878_v4 = vld [vmem:[#allocation6 + $0x2f8] sm:$0xff]  }
 0x849   : > { %20448 = vmatpush3.bf16.msra.mxu1 %v22851_v28  ;;  %20455 = vmatprep.mubr.bf16.mxu1 %v11760_v41  ;;  %v22871_v28 = vld [vmem:[#allocation6 + $0x2c0] sm:$0xff]   ;;  %v12348_v41 = vld [vmem:[#allocation3 + $0x21] sm:$0xff] }
 0x84a   : > { %20449 = vmatprep.subr.bf16.mxu1 %v22852_v5 }
 0x84d   : > { %20450 = vmatpush3.bf16.msra.mxu1 %v22852_v5  ;;  %v22875_v5 = vld [vmem:[#allocation6 + $0x2e0] sm:$0xff]  }
 0x84e   : > { %20451 = vmatprep.subr.bf16.mxu1 %v22853_v26 }
 0x851   : > { %20452 = vmatpush3.bf16.msra.mxu1 %v22853_v26 }
 0x852   : > { %20453 = vmatprep.subr.bf16.mxu1 %v22854_v22 }
 0x855   : > { %20454 = vmatpush3.bf16.msra.mxu1 %v22854_v22  ;;  %v12347_v22 = vld [vmem:[#allocation3 + $0x19] sm:$0xff] }
 0x856   : > { %20467 = vmatprep.subr.bf16.mxu1 %v22855_v10  ;;  %v12359_v63 = vpack.c.bf16 %v12348_v41, %v12347_v22  ;;  %v12644_v41 = vld [vmem:[#allocation3 + $0x3a] sm:$0xff]  ;;  %v12642_v22 = vld [vmem:[#allocation3 + $0x2a] sm:$0xff] }
 0x858   : > { %20456 = vmatmul.mubr.bf16.vlgmr.msra.gmra.mrb[40].mxu1 %v11761_v37  ;;  %v12352_v37 = vld [vmem:[#allocation3 + $0x41] sm:$0xff] }
 0x859   : > { %20459 = vmatprep.mubr.bf16.mxu1 %v11762_v1  ;;  %20468 = vmatpush3.bf16.msra.mxu1 %v22855_v10  ;;  %v22876_v10 = vld [vmem:[#allocation6 + $0x2e8] sm:$0xff]   ;;  %v12361_v13 = vpack.c.bf16 %v12352_v37, %v12351_v60  ;;  %v12646_v60 = vld [vmem:[#allocation3 + $0x4a] sm:$0xff] }
 0x85a   : > { %20469 = vmatprep.subr.bf16.mxu1 %v22856_v17 }
 0x85d   : > { %20470 = vmatpush3.bf16.msra.mxu1 %v22856_v17  ;;  %v12349_v17 = vld [vmem:[#allocation3 + $0x29] sm:$0xff] }
 0x85e   : > { %20471 = vmatprep.subr.bf16.mxu1 %v22857_v31  ;;  %v12360_v1 = vpack.c.bf16 %v12350_v57, %v12349_v17  ;;  %v12649_v57 = vld [vmem:[#allocation3 + $0x62] sm:$0xff]  ;;  %v12648_v17 = vld [vmem:[#allocation3 + $0x5a] sm:$0xff] }
 0x860   : > { %20460 = vmatmul.mubr.bf16.gmra.mrb[44].mxu1 %v11763_v29  ;;  %v12356_v29 = vld [vmem:[#allocation3 + $0x61] sm:$0xff] }
 0x861   : > { %20463 = vmatprep.mubr.bf16.mxu1 %v11764_v48  ;;  %20472 = vmatpush3.bf16.msra.mxu1 %v22857_v31  ;;  %v22880_v31 = vld [vmem:[#allocation6 + $0x288] sm:$0xff]  }
 0x862   : > { %20473 = vmatprep.subr.bf16.mxu1 %v22858_v27  ;;  %v12355_v48 = vld [vmem:[#allocation3 + $0x59] sm:$0xff] }
 0x863   : > { %v12363_v56 = vpack.c.bf16 %v12356_v29, %v12355_v48  ;;  %v12817_v29 = vld [vmem:[#allocation3 + $0x23] sm:$0xff]  ;;  %v22900_v48 = vld [vmem:[#allocation6 + $0x368] sm:$0xff]  }
 0x865   : > { %20474 = vmatpush3.bf16.msra.mxu1 %v22858_v27  ;;  %v12362_v27 = vpack.c.bf16 %v12354_v21, %v12353_v7  ;;  %v12651_v21 = vld [vmem:[#allocation3 + $0x72] sm:$0xf] }
 0x866   : > { %20475 = vmatprep.subr.bf16.mxu1 %v22859_v44 }
 0x868   : > { %20464 = vmatmul.mubr.bf16.gmra.mrb[52].mxu1 %v11765_v12  ;;  %v12313_v12 = vld [vmem:[#allocation3 + $0x20] sm:$0xff] }
 0x869   : > { %20476 = vmatpush3.bf16.msra.mxu1 %v22859_v44  ;;  %20483 = vmatprep.mubr.bf16.mxu1 %v11936_v42  ;;  %v22882_v44 = vld [vmem:[#allocation6 + $0x298] sm:$0xff]   ;;  %v12312_v42 = vld [vmem:[#allocation3 + $0x18] sm:$0xff] }
 0x86a   : > { %20477 = vmatprep.subr.bf16.mxu1 %v22860_v51 }
 0x86d   : > { %20478 = vmatpush3.bf16.msra.mxu1 %v22860_v51  ;;  %v12364_v51 = vpack.c.bf16 %v12358_v47, %v12357_v39  ;;  %v22903_v39 = vld [vmem:[#allocation6 + $0x380] sm:$0xff]  }
 0x86e   : > { %20479 = vmatprep.subr.bf16.mxu1 %v22861_v49  ;;  %v12818_v47 = vld [vmem:[#allocation3 + $0x2b] sm:$0xff] }
 0x871   : > { %20480 = vmatpush3.bf16.msra.mxu1 %v22861_v49  ;;  %v22884_v49 = vld [vmem:[#allocation6 + $0x2a8] sm:$0xff]  }
 0x872   : > { %20481 = vmatprep.subr.bf16.mxu1 %v22862_v20 }
 0x875   : > { %20482 = vmatpush3.bf16.msra.mxu1 %v22862_v20  ;;  %v12324_v20 = vpack.c.bf16 %v12313_v12, %v12312_v42  ;;  %v12819_v12 = vld [vmem:[#allocation3 + $0x33] sm:$0xff] }
 0x876   : > { %20495 = vmatprep.subr.bf16.mxu1 %v22863_v45  ;;  %v12829_v42 = vpack.c.bf16 %v12819_v12, %v12818_v47  ;;  %v13245_v47 = vld [vmem:[#allocation3 + $0x55] sm:$0xff] }
 0x878   : > { %20484 = vmatmul.mubr.bf16.vlgmr.msra.gmra.mrb[40].mxu1 %v11937_v53  ;;  %v12316_v53 = vld [vmem:[#allocation3 + $0x38] sm:$0xff] }
 0x879   : > { %20487 = vmatprep.mubr.bf16.mxu1 %v11938_v38  ;;  %20496 = vmatpush3.bf16.msra.mxu1 %v22863_v45  ;;  %v22885_v45 = vld [vmem:[#allocation6 + $0x2b0] sm:$0xff]   ;;  %v12326_v50 = vpack.c.bf16 %v12317_v55, %v12316_v53  ;;  %v12822_v55 = vld [vmem:[#allocation3 + $0x4b] sm:$0xff] }
 0x87a   : > { %20497 = vmatprep.subr.bf16.mxu1 %v22864_v61  ;;  %v12825_v53 = vld [vmem:[#allocation3 + $0x63] sm:$0xff] }
 0x87d   : > { %20498 = vmatpush3.bf16.msra.mxu1 %v22864_v61  ;;  %v12314_v61 = vld [vmem:[#allocation3 + $0x28] sm:$0xff] }
 0x87e   : > { %20499 = vmatprep.subr.bf16.mxu1 %v22865_v15  ;;  %v12325_v38 = vpack.c.bf16 %v12315_v54, %v12314_v61  ;;  %v12824_v54 = vld [vmem:[#allocation3 + $0x5b] sm:$0xff] }
 0x880   : > { %20488 = vmatmul.mubr.bf16.gmra.mrb[44].mxu1 %v11939_v34 }
 0x881   : > { %20491 = vmatprep.mubr.bf16.mxu1 %v11940_v3  ;;  %20500 = vmatpush3.bf16.msra.mxu1 %v22865_v15  ;;  %v22888_v15 = vld [vmem:[#allocation6 + $0x308] sm:$0xff]   ;;  %v12318_v3 = vld [vmem:[#allocation3 + $0x48] sm:$0xff] }
 0x882   : > { %20501 = vmatprep.subr.bf16.mxu1 %v22866_v25  ;;  %v12327_v6 = vpack.c.bf16 %v12319_v14, %v12318_v3  ;;  %v12827_v14 = vld [vmem:[#allocation3 + $0x73] sm:$0xf] }
 0x885   : > { %20502 = vmatpush3.bf16.msra.mxu1 %v22866_v25 }
 0x886   : > { %20503 = vmatprep.subr.bf16.mxu1 %v22867_v0 }
 0x888   : > { %20492 = vmatmul.mubr.bf16.gmra.mrb[52].mxu1 %v11941_v46 }
 0x889   : > { %20504 = vmatpush3.bf16.msra.mxu1 %v22867_v0  ;;  %20511 = vmatprep.mubr.bf16.mxu1 %v26595_v33  ;;  %v22874_v33 = vld [vmem:[#allocation6 + $0x2d8] sm:$0xff]  }
 0x88a   : > { %20505 = vmatprep.subr.bf16.mxu1 %v22868_v59 }
 0x88d   : > { %20506 = vmatpush3.bf16.msra.mxu1 %v22868_v59  ;;  %v22891_v59 = vld [vmem:[#allocation6 + $0x320] sm:$0xff]  }
 0x88e   : > { %20507 = vmatprep.subr.bf16.mxu1 %v22869_v23 }
 0x891   : > { %20508 = vmatpush3.bf16.msra.mxu1 %v22869_v23  ;;  %v12322_v23 = vld [vmem:[#allocation3 + $0x68] sm:$0xff] }
 0x892   : > { %20509 = vmatprep.subr.bf16.mxu1 %v22870_v19 }
 0x895   : > { %20510 = vmatpush3.bf16.msra.mxu1 %v22870_v19  ;;  %v12323_v19 = vld [vmem:[#allocation3 + $0x70] sm:$0xf] }
 0x896   : > { %20523 = vmatprep.subr.bf16.mxu1 %v22871_v28 }
 0x898   : > { %20512 = vmatmul.mubr.bf16.vlgmr.msra.gmra.mrb[40].mxu1 %v26597_v35  ;;  %v26668_v35 = vld [vmem:[#allocation3 + $0x60] sm:$0xff] }
 0x899   : > { %20515 = vmatprep.mubr.bf16.mxu1 %v26602_v52  ;;  %20524 = vmatpush3.bf16.msra.mxu1 %v22871_v28  ;;  %v12111_v52 = vld [vmem:[#allocation3 + $0x68] sm:$0xf]  ;;  %v12328_v46 = vpack.c.bf16 %v26668_v35, %v26663_v43 }
 0x89a   : > { %20525 = vmatprep.subr.bf16.mxu1 %v22872_v24  ;;  %v12117_v26 = vpack.c.bf16 %v12111_v52, %v26668_v35  ;;  %v12641_v28 = vld [vmem:[#allocation3 + $0x22] sm:$0xff]  ;;  %v22895_v35 = vld [vmem:[#allocation6 + $0x340] sm:$0xff]  }
 0x89b   : > { %v22894_v43 = vld [vmem:[#allocation6 + $0x338] sm:$0xff]   ;;  %v12643_v52 = vld [vmem:[#allocation3 + $0x32] sm:$0xff] }
 0x89d   : > { %20526 = vmatpush3.bf16.msra.mxu1 %v22872_v24  ;;  %v12329_v24 = vpack.c.bf16 %v12323_v19, %v12322_v23  ;;  %v22910_v23 = vld [vmem:[#allocation6 + $0x3b8] sm:$0xff]   ;;  %v22911_v19 = vld [vmem:[#allocation6 + $0x400] sm:$0xff]  }
 0x89e   : > { %20527 = vmatprep.subr.bf16.mxu1 %v22873_v11 }
 0x8a0   : > { %20516 = vmatmul.mubr.bf16.gmra.mrb[44].mxu1 %v26604_v16  ;;  %v22877_v16 = vld [vmem:[#allocation6 + $0x2f0] sm:$0xff]  }
 0x8a1   : > { %20519 = vmatprep.mubr.bf16.mxu1 %v12116_v32  ;;  %20528 = vmatpush3.bf16.msra.mxu1 %v22873_v11  ;;  %v12640_v11 = vld [vmem:[#allocation3 + $0x1a] sm:$0xff] }
 0x8a2   : > { %20529 = vmatprep.subr.bf16.mxu1 %v22874_v33  ;;  %v12652_v32 = vpack.c.bf16 %v12641_v28, %v12640_v11  ;;  %v26682_v28 = vld [vmem:[#allocation3 + $0x2c] sm:$0xff]  ;;  %v26686_v11 = vld [vmem:[#allocation3 + $0x44] sm:$0xff] }
 0x8a5   : > { %20530 = vmatpush3.bf16.msra.mxu1 %v22874_v33  ;;  %v22892_v33 = vld [vmem:[#allocation6 + $0x328] sm:$0xff]  }
 0x8a6   : > { %20531 = vmatprep.subr.bf16.mxu1 %v22875_v5 }
 0x8a8   : > { %20520 = vmatmul.mubr.bf16.gmra.mrb[52].mxu1 %v12117_v26  ;;  %v12645_v26 = vld [vmem:[#allocation3 + $0x42] sm:$0xff] }
 0x8a9   : > { %20532 = vmatpush3.bf16.msra.mxu1 %v22875_v5  ;;  %20539 = vmatprep.mubr.bf16.mxu1 %v12359_v63  ;;  %v22893_v5 = vld [vmem:[#allocation6 + $0x330] sm:$0xff]   ;;  %v22896_v63 = vld [vmem:[#allocation6 + $0x348] sm:$0xff]  }
 0x8aa   : > { %20533 = vmatprep.subr.bf16.mxu1 %v22876_v10 }
 0x8ad   : > { %20534 = vmatpush3.bf16.msra.mxu1 %v22876_v10  ;;  %v12653_v10 = vpack.c.bf16 %v12643_v52, %v12642_v22  ;;  %v26694_v52 = vld [vmem:[#allocation3 + $0x54] sm:$0xff] }
 0x8ae   : > { %20535 = vmatprep.subr.bf16.mxu1 %v22877_v16 }
 0x8b1   : > { %20536 = vmatpush3.bf16.msra.mxu1 %v22877_v16  ;;  %v12654_v16 = vpack.c.bf16 %v12645_v26, %v12644_v41  ;;  %v26696_v41 = vld [vmem:[#allocation3 + $0x64] sm:$0xff]  ;;  %v26698_v26 = vld [vmem:[#allocation3 + $0x4c] sm:$0xff] }
 0x8b2   : > { %20537 = vmatprep.subr.bf16.mxu1 %v22878_v4  ;;  %v13007_v22 = vpack.c.bf16 %v26694_v52, %v26698_v26 }
 0x8b5   : > { %20538 = vmatpush3.bf16.msra.mxu1 %v22878_v4  ;;  %v22897_v4 = vld [vmem:[#allocation6 + $0x350] sm:$0xff]  }
 0x8b6   : > { %20551 = vmatprep.subr.bf16.mxu1 %v22879_v40 }
 0x8b8   : > { %20540 = vmatmul.mubr.bf16.vlgmr.msra.gmra.mrb[40].mxu1 %v12360_v1  ;;  %v22898_v1 = vld [vmem:[#allocation6 + $0x358] sm:$0xff]  }
 0x8b9   : > { %20543 = vmatprep.mubr.bf16.mxu1 %v12361_v13  ;;  %20552 = vmatpush3.bf16.msra.mxu1 %v22879_v40  ;;  %v12647_v40 = vld [vmem:[#allocation3 + $0x52] sm:$0xff] }
 0x8ba   : > { %20553 = vmatprep.subr.bf16.mxu1 %v22880_v31  ;;  %v12655_v37 = vpack.c.bf16 %v12647_v40, %v12646_v60  ;;  %v22899_v13 = vld [vmem:[#allocation6 + $0x360] sm:$0xff]  }
 0x8bb   : > { %v13003_v40 = vld [vmem:[#allocation3 + $0x74] sm:$0xf] }
 0x8bd   : > { %20554 = vmatpush3.bf16.msra.mxu1 %v22880_v31  ;;  %v12656_v31 = vpack.c.bf16 %v12649_v57, %v12648_v17  ;;  %v13240_v57 = vld [vmem:[#allocation3 + $0x2d] sm:$0xff]  ;;  %v22916_v17 = vld [vmem:[#allocation6 + $0x428] sm:$0xff]  }
 0x8be   : > { %20555 = vmatprep.subr.bf16.mxu1 %v22881_v8 }
 0x8c0   : > { %20544 = vmatmul.mubr.bf16.gmra.mrb[44].mxu1 %v12362_v27  ;;  %v12816_v27 = vld [vmem:[#allocation3 + $0x1b] sm:$0xff] }
 0x8c1   : > { %20547 = vmatprep.mubr.bf16.mxu1 %v12363_v56  ;;  %20556 = vmatpush3.bf16.msra.mxu1 %v22881_v8  ;;  %v12650_v8 = vld [vmem:[#allocation3 + $0x6a] sm:$0xff]  ;;  %v22901_v56 = vld [vmem:[#allocation6 + $0x370] sm:$0xff]  }
 0x8c2   : > { %20557 = vmatprep.subr.bf16.mxu1 %v22882_v44  ;;  %v12657_v7 = vpack.c.bf16 %v12651_v21, %v12650_v8  ;;  %v13242_v8 = vld [vmem:[#allocation3 + $0x3d] sm:$0xff]  ;;  %v13243_v21 = vld [vmem:[#allocation3 + $0x45] sm:$0xff] }
 0x8c5   : > { %20558 = vmatpush3.bf16.msra.mxu1 %v22882_v44  ;;  %v12828_v44 = vpack.c.bf16 %v12817_v29, %v12816_v27  ;;  %v13244_v29 = vld [vmem:[#allocation3 + $0x4d] sm:$0xff] }
 0x8c6   : > { %20559 = vmatprep.subr.bf16.mxu1 %v22883_v62 }
 0x8c8   : > { %20548 = vmatmul.mubr.bf16.gmra.mrb[56].mxu1 %v12364_v51  ;;  %v12821_v51 = vld [vmem:[#allocation3 + $0x43] sm:$0xff] }
 0x8c9   : > { %20560 = vmatpush3.bf16.msra.mxu1 %v22883_v62  ;;  %20567 = vmatprep.mubr.bf16.mxu1 %v12324_v20  ;;  %v22902_v62 = vld [vmem:[#allocation6 + $0x378] sm:$0xff]   ;;  %v22904_v20 = vld [vmem:[#allocation6 + $0x388] sm:$0xff]  }
 0x8ca   : > { %20561 = vmatprep.subr.bf16.mxu1 %v22884_v49 }
 0x8cd   : > { %20562 = vmatpush3.bf16.msra.mxu1 %v22884_v49  ;;  %v12820_v49 = vld [vmem:[#allocation3 + $0x3b] sm:$0xff] }
 0x8ce   : > { %20563 = vmatprep.subr.bf16.mxu1 %v22885_v45 }
 0x8d1   : > { %20564 = vmatpush3.bf16.msra.mxu1 %v22885_v45  ;;  %v12830_v45 = vpack.c.bf16 %v12821_v51, %v12820_v49  ;;  %v13247_v51 = vld [vmem:[#allocation3 + $0x65] sm:$0xff] }
 0x8d2   : > { %20565 = vmatprep.subr.bf16.mxu1 %v22886_v36 }
 0x8d5   : > { %20566 = vmatpush3.bf16.msra.mxu1 %v22886_v36  ;;  %v22905_v36 = vld [vmem:[#allocation6 + $0x390] sm:$0xff]  }
 0x8d6   : > { %20579 = vmatprep.subr.bf16.mxu1 %v22887_v58 }
 0x8d8   : > { %20568 = vmatmul.mubr.bf16.vlgmr.msra.gmra.mrb[40].mxu1 %v12325_v38  ;;  %v22906_v38 = vld [vmem:[#allocation6 + $0x398] sm:$0xff]  }
 0x8d9   : > { %20571 = vmatprep.mubr.bf16.mxu1 %v12326_v50  ;;  %20580 = vmatpush3.bf16.msra.mxu1 %v22887_v58  ;;  %v12823_v58 = vld [vmem:[#allocation3 + $0x53] sm:$0xff] }
 0x8da   : > { %20581 = vmatprep.subr.bf16.mxu1 %v22888_v15  ;;  %v12831_v61 = vpack.c.bf16 %v12823_v58, %v12822_v55  ;;  %v22907_v50 = vld [vmem:[#allocation6 + $0x3a0] sm:$0xff]   ;;  %v22925_v55 = vld [vmem:[#allocation6 + $0x3f0] sm:$0xff]  }
 0x8db   : > { %v26671_v2 = vpop.f32.mrb[48].mxu1 }
 0x8dc   : > { %v26673_v34 = vpop.f32.mrb[49].mxu1 }
 0x8dd   : > { %v20382_v25 = vpop.f32.mrb[50].mxu1  ;;  %20582 = vmatpush3.bf16.msra.mxu1 %v22888_v15  ;;  %v12832_v15 = vpack.c.bf16 %v12825_v53, %v12824_v54  ;;  %v22924_v54 = vld [vmem:[#allocation6 + $0x3e8] sm:$0xff]  }
 0x8de   : > { %11419 = vst [vmem:[#allocation4 + $0x72] sm:$0xf] %v20382_v25  ;;  %v26675_v0 = vpop.f32.mrb[51].mxu1  ;;  %20583 = vmatprep.subr.bf16.mxu1 %v22889_v30  ;;  %v26679_v25 = vld [vmem:[#allocation3 + $0x24] sm:$0xff] }
 0x8df   : > { %v13216_v53 = vpack.c.bf16 %v26682_v28, %v26679_v25 }
 0x8e0   : > { %20572 = vmatmul.mubr.bf16.gmra.mrb[44].mxu1 %v12327_v6  ;;  %v12992_v6 = vld [vmem:[#allocation3 + $0x1c] sm:$0xff] }
 0x8e1   : > { %20575 = vmatprep.mubr.bf16.mxu1 %v12328_v46  ;;  %20584 = vmatpush3.bf16.msra.mxu1 %v22889_v30  ;;  %v12826_v30 = vld [vmem:[#allocation3 + $0x6b] sm:$0xff]  ;;  %v13004_v46 = vpack.c.bf16 %v26679_v25, %v12992_v6 }
 0x8e2   : > { %20585 = vmatprep.subr.bf16.mxu1 %v22890_v9  ;;  %v12833_v3 = vpack.c.bf16 %v12827_v14, %v12826_v30  ;;  %v13218_v30 = vpack.c.bf16 %v26698_v26, %v26686_v11  ;;  %v22929_v14 = vld [vmem:[#allocation6 + $0x450] sm:$0xff]  }
 0x8e5   : > { %20586 = vmatpush3.bf16.msra.mxu1 %v22890_v9  ;;  %v22908_v9 = vld [vmem:[#allocation6 + $0x3a8] sm:$0xff]  }
 0x8e6   : > { %20587 = vmatprep.subr.bf16.mxu1 %v22891_v59 }
 0x8e8   : > { %20576 = vmatmul.mubr.bf16.gmra.mrb[56].mxu1 %v12329_v24  ;;  %v26684_v24 = vld [vmem:[#allocation3 + $0x34] sm:$0xff] }
 0x8e9   : > { %20588 = vmatpush3.bf16.msra.mxu1 %v22891_v59  ;;  %20595 = vmatprep.mubr.bf16.mxu1 %v12652_v32  ;;  %v22909_v59 = vld [vmem:[#allocation6 + $0x3b0] sm:$0xff]  }
 0x8ea   : > { %20589 = vmatprep.subr.bf16.mxu1 %v22892_v33  ;;  %v26690_v32 = vld [vmem:[#allocation3 + $0x3c] sm:$0xff] }
 0x8ed   : > { %20590 = vmatpush3.bf16.msra.mxu1 %v22892_v33  ;;  %v13005_v33 = vpack.c.bf16 %v26684_v24, %v26682_v28 }
 0x8ee   : > { %20591 = vmatprep.subr.bf16.mxu1 %v22893_v5 }
 0x8f1   : > { %20592 = vmatpush3.bf16.msra.mxu1 %v22893_v5  ;;  %v22912_v5 = vld [vmem:[#allocation6 + $0x408] sm:$0xff]  }
 0x8f2   : > { %20593 = vmatprep.subr.bf16.mxu1 %v22894_v43 }
 0x8f5   : > { %20594 = vmatpush3.bf16.msra.mxu1 %v22894_v43  ;;  %v13006_v43 = vpack.c.bf16 %v26686_v11, %v26690_v32  ;;  %v22930_v11 = vld [vmem:[#allocation6 + $0x458] sm:$0xff]  }
 0x8f6   : > { %20607 = vmatprep.subr.bf16.mxu1 %v22895_v35 }
 0x8f8   : > { %20596 = vmatmul.mubr.bf16.vlgmr.msra.gmra.mrb[40].mxu1 %v12653_v10  ;;  %v22914_v10 = vld [vmem:[#allocation6 + $0x418] sm:$0xff]  }
 0x8f9   : > { %20599 = vmatprep.mubr.bf16.mxu1 %v12654_v16  ;;  %20608 = vmatpush3.bf16.msra.mxu1 %v22895_v35  ;;  %v22913_v35 = vld [vmem:[#allocation6 + $0x410] sm:$0xff]   ;;  %v22915_v16 = vld [vmem:[#allocation6 + $0x420] sm:$0xff]  }
 0x8fa   : > { %20609 = vmatprep.subr.bf16.mxu1 %v22896_v63 }
 0x8fd   : > { %20610 = vmatpush3.bf16.msra.mxu1 %v22896_v63  ;;  %v13008_v63 = vpack.c.bf16 %v26696_v41, %v26657_v18  ;;  %v22917_v18 = vld [vmem:[#allocation6 + $0x430] sm:$0xff]  }
 0x8fe   : > { %20611 = vmatprep.subr.bf16.mxu1 %v22897_v4 }
 0x900   : > { %20600 = vmatmul.mubr.bf16.gmra.mrb[44].mxu1 %v12655_v37  ;;  %v13239_v37 = vld [vmem:[#allocation3 + $0x25] sm:$0xff] }
 0x901   : > { %20603 = vmatprep.mubr.bf16.mxu1 %v12656_v31  ;;  %20612 = vmatpush3.bf16.msra.mxu1 %v22897_v4  ;;  %v26704_v4 = vld [vmem:[#allocation3 + $0x6c] sm:$0xff] }
 0x902   : > { %20613 = vmatprep.subr.bf16.mxu1 %v22898_v1  ;;  %v13009_v60 = vpack.c.bf16 %v13003_v40, %v26704_v4  ;;  %v22918_v31 = vld [vmem:[#allocation6 + $0x438] sm:$0xff]   ;;  %v13534_v40 = vld [vmem:[#allocation3 + $0x36] sm:$0xff] }
 0x905   : > { %20614 = vmatpush3.bf16.msra.mxu1 %v22898_v1  ;;  %v13251_v1 = vpack.c.bf16 %v13240_v57, %v13239_v37 }
 0x906   : > { %20615 = vmatprep.subr.bf16.mxu1 %v22899_v13 }
 0x908   : > { %20604 = vmatmul.mubr.bf16.gmra.mrb[56].mxu1 %v12657_v7  ;;  %v13241_v7 = vld [vmem:[#allocation3 + $0x35] sm:$0xff] }
 0x909   : > { %20616 = vmatpush3.bf16.msra.mxu1 %v22899_v13  ;;  %20623 = vmatprep.mubr.bf16.mxu1 %v12828_v44  ;;  %v22919_v13 = vld [vmem:[#allocation6 + $0x3c0] sm:$0xff]   ;;  %v13252_v27 = vpack.c.bf16 %v13242_v8, %v13241_v7  ;;  %v13253_v44 = vpack.c.bf16 %v13244_v29, %v13243_v21  ;;  %v13540_v8 = vld [vmem:[#allocation3 + $0x66] sm:$0xff] }
 0x90a   : > { %20617 = vmatprep.subr.bf16.mxu1 %v22900_v48  ;;  %v22938_v21 = vld [vmem:[#allocation6 + $0x498] sm:$0xff]   ;;  %v13542_v7 = vld [vmem:[#allocation3 + $0x76] sm:$0xff] }
 0x90d   : > { %20618 = vmatpush3.bf16.msra.mxu1 %v22900_v48  ;;  %v22920_v48 = vld [vmem:[#allocation6 + $0x3c8] sm:$0xff]  }
 0x90e   : > { %20619 = vmatprep.subr.bf16.mxu1 %v22901_v56 }
 0x911   : > { %20620 = vmatpush3.bf16.msra.mxu1 %v22901_v56  ;;  %v22921_v56 = vld [vmem:[#allocation6 + $0x3d0] sm:$0xff]  }
 0x912   : > { %20621 = vmatprep.subr.bf16.mxu1 %v22902_v62 }
 0x915   : > { %20622 = vmatpush3.bf16.msra.mxu1 %v22902_v62  ;;  %v13246_v62 = vld [vmem:[#allocation3 + $0x5d] sm:$0xff] }
 0x916   : > { %20635 = vmatprep.subr.bf16.mxu1 %v22903_v39  ;;  %v13254_v12 = vpack.c.bf16 %v13246_v62, %v13245_v47  ;;  %v13708_v62 = vld [vmem:[#allocation3 + $0x27] sm:$0xff] }
 0x918   : > { %20624 = vmatmul.mubr.bf16.vlgmr.msra.gmra.mrb[40].mxu1 %v12829_v42  ;;  %v22922_v42 = vld [vmem:[#allocation6 + $0x3d8] sm:$0xff]  }
 0x919   : > { %20627 = vmatprep.mubr.bf16.mxu1 %v12830_v45  ;;  %20636 = vmatpush3.bf16.msra.mxu1 %v22903_v39  ;;  %v13248_v39 = vld [vmem:[#allocation3 + $0x6d] sm:$0xff]  ;;  %v13249_v45 = vld [vmem:[#allocation3 + $0x75] sm:$0xff] }
 0x91a   : > { %20637 = vmatprep.subr.bf16.mxu1 %v22904_v20  ;;  %v13255_v49 = vpack.c.bf16 %v13248_v39, %v13247_v51  ;;  %v22940_v39 = vld [vmem:[#allocation6 + $0x4a8] sm:$0xff]   ;;  %v22942_v51 = vld [vmem:[#allocation6 + $0x4b8] sm:$0xff]  }
 0x91d   : > { %20638 = vmatpush3.bf16.msra.mxu1 %v22904_v20  ;;  %v22923_v20 = vld [vmem:[#allocation6 + $0x3e0] sm:$0xff]  }
 0x91e   : > { %20639 = vmatprep.subr.bf16.mxu1 %v22905_v36 }
 0x920   : > { %20628 = vmatmul.mubr.bf16.gmra.mrb[44].mxu1 %v12831_v61  ;;  %v22926_v61 = vld [vmem:[#allocation6 + $0x3f8] sm:$0xff]  }
 0x921   : > { %20631 = vmatprep.mubr.bf16.mxu1 %v12832_v15  ;;  %20640 = vmatpush3.bf16.msra.mxu1 %v22905_v36  ;;  %v13250_v36 = vld [vmem:[#allocation3 + $0x7d] sm:$0xf]  ;;  %v13217_v15 = vpack.c.bf16 %v26690_v32, %v26684_v24  ;;  %v26725_v32 = vld [vmem:[#allocation3 + $0x74] sm:$0xff] }
 0x922   : > { %20641 = vmatprep.subr.bf16.mxu1 %v22906_v38  ;;  %v13256_v58 = vpack.c.bf16 %v13250_v36, %v13249_v45  ;;  %v13713_v45 = vld [vmem:[#allocation3 + $0x4f] sm:$0xff] }
 0x925   : > { %20642 = vmatpush3.bf16.msra.mxu1 %v22906_v38  ;;  %v22927_v38 = vld [vmem:[#allocation6 + $0x440] sm:$0xff]  }
 0x926   : > { %20643 = vmatprep.subr.bf16.mxu1 %v22907_v50 }
 0x928   : > { %20632 = vmatmul.mubr.bf16.gmra.mrb[56].mxu1 %v12833_v3  ;;  %v13211_v3 = vld [vmem:[#allocation3 + $0x5c] sm:$0xff] }
 0x929   : > { %20644 = vmatpush3.bf16.msra.mxu1 %v22907_v50  ;;  %20651 = vmatprep.mubr.bf16.mxu1 %v13004_v46  ;;  %v22928_v50 = vld [vmem:[#allocation6 + $0x448] sm:$0xff]   ;;  %v13219_v24 = vpack.c.bf16 %v13211_v3, %v26694_v52  ;;  %v13532_v52 = vld [vmem:[#allocation3 + $0x26] sm:$0xff] }
 0x92a   : > { %20645 = vmatprep.subr.bf16.mxu1 %v22908_v9  ;;  %v13718_v3 = vld [vmem:[#allocation3 + $0x77] sm:$0xff] }
 0x92d   : > { %20646 = vmatpush3.bf16.msra.mxu1 %v22908_v9 }
 0x92e   : > { %20647 = vmatprep.subr.bf16.mxu1 %v22909_v59 }
 0x931   : > { %20648 = vmatpush3.bf16.msra.mxu1 %v22909_v59 }
 0x932   : > { %20649 = vmatprep.subr.bf16.mxu1 %v22910_v23 }
 0x935   : > { %20650 = vmatpush3.bf16.msra.mxu1 %v22910_v23  ;;  %v12287_v23 = vld [vmem:[#allocation4 + $0x72] sm:$0xf] }
 0x936   : > { %20663 = vmatprep.subr.bf16.mxu1 %v22911_v19 }
 0x938   : > { %20652 = vmatmul.mubr.bf16.vlgmr.msra.gmra.mrb[40].mxu1 %v13005_v33 }
 0x939   : > { %20655 = vmatprep.mubr.bf16.mxu1 %v13006_v43  ;;  %20664 = vmatpush3.bf16.msra.mxu1 %v22911_v19  ;;  %v13533_v43 = vld [vmem:[#allocation3 + $0x2e] sm:$0xff] }
 0x93a   : > { %20665 = vmatprep.subr.bf16.mxu1 %v22912_v5  ;;  %v13544_v26 = vpack.c.bf16 %v13533_v43, %v13532_v52  ;;  %v26731_v43 = vld [vmem:[#allocation3 + $0x38] sm:$0xff]  ;;  %v26735_v52 = vld [vmem:[#allocation3 + $0x50] sm:$0xff] }
 0x93d   : > { %20666 = vmatpush3.bf16.msra.mxu1 %v22912_v5  ;;  %v13215_v5 = vld [vmem:[#allocation3 + $0x7c] sm:$0xf] }
 0x93e   : > { %20667 = vmatprep.subr.bf16.mxu1 %v22913_v35 }
 0x940   : > { %20656 = vmatmul.mubr.bf16.gmra.mrb[44].mxu1 %v13007_v22  ;;  %v22934_v22 = vld [vmem:[#allocation6 + $0x478] sm:$0xff]  }
 0x941   : > { %20659 = vmatprep.mubr.bf16.mxu1 %v13008_v63  ;;  %20668 = vmatpush3.bf16.msra.mxu1 %v22913_v35  ;;  %v13221_v35 = vpack.c.bf16 %v13215_v5, %v26725_v32  ;;  %v13535_v63 = vld [vmem:[#allocation3 + $0x3e] sm:$0xff]  ;;  %v22951_v5 = vld [vmem:[#allocation6 + $0x540] sm:$0xff]  }
 0x942   : > { %20669 = vmatprep.subr.bf16.mxu1 %v22914_v10  ;;  %v13545_v57 = vpack.c.bf16 %v13535_v63, %v13534_v40  ;;  %v26743_v63 = vld [vmem:[#allocation3 + $0x60] sm:$0xff]  ;;  %v26749_v40 = vld [vmem:[#allocation3 + $0x58] sm:$0xff] }
 0x945   : > { %20670 = vmatpush3.bf16.msra.mxu1 %v22914_v10  ;;  %v22935_v10 = vld [vmem:[#allocation6 + $0x480] sm:$0xff]  }
 0x946   : > { %20671 = vmatprep.subr.bf16.mxu1 %v22915_v16 }
 0x948   : > { %20660 = vmatmul.mubr.bf16.gmra.mrb[56].mxu1 %v13009_v60  ;;  %v22936_v60 = vld [vmem:[#allocation6 + $0x488] sm:$0xff]  }
 0x949   : > { %20672 = vmatpush3.bf16.msra.mxu1 %v22915_v16  ;;  %20679 = vmatprep.mubr.bf16.mxu1 %v13251_v1  ;;  %v13536_v16 = vld [vmem:[#allocation3 + $0x46] sm:$0xff]  ;;  %v13539_v1 = vld [vmem:[#allocation3 + $0x5e] sm:$0xff] }
 0x94a   : > { %20673 = vmatprep.subr.bf16.mxu1 %v22916_v17 }
 0x94d   : > { %20674 = vmatpush3.bf16.msra.mxu1 %v22916_v17  ;;  %v22937_v17 = vld [vmem:[#allocation6 + $0x490] sm:$0xff]  }
 0x94e   : > { %20675 = vmatprep.subr.bf16.mxu1 %v22917_v18 }
 0x951   : > { %20676 = vmatpush3.bf16.msra.mxu1 %v22917_v18  ;;  %v13541_v18 = vld [vmem:[#allocation3 + $0x6e] sm:$0xff] }
 0x952   : > { %20677 = vmatprep.subr.bf16.mxu1 %v22918_v31  ;;  %v13548_v29 = vpack.c.bf16 %v13541_v18, %v13540_v8  ;;  %v26755_v18 = vld [vmem:[#allocation3] sm:$0xff]  ;;  %v14131_v8 = vld [vmem:[#allocation3 + $0x31] sm:$0xff] }
 0x955   : > { %20678 = vmatpush3.bf16.msra.mxu1 %v22918_v31  ;;  %v13538_v31 = vld [vmem:[#allocation3 + $0x56] sm:$0xff] }
 0x956   : > { %20691 = vmatprep.subr.bf16.mxu1 %v22919_v13 }
 0x958   : > { %20680 = vmatmul.mubr.bf16.vlgmr.msra.gmra.mrb[40].mxu1 %v13252_v27  ;;  %v13543_v27 = vld [vmem:[#allocation3 + $0x7e] sm:$0xf] }
 0x959   : > { %20683 = vmatprep.mubr.bf16.mxu1 %v13253_v44  ;;  %20692 = vmatpush3.bf16.msra.mxu1 %v22919_v13  ;;  %v13547_v13 = vpack.c.bf16 %v13539_v1, %v13538_v31  ;;  %v13549_v44 = vpack.c.bf16 %v13543_v27, %v13542_v7  ;;  %v22955_v1 = vld [vmem:[#allocation6 + $0x560] sm:$0xff]   ;;  %v22957_v7 = vld [vmem:[#allocation6 + $0x570] sm:$0xff]   ;;  %v22958_v27 = vld [vmem:[#allocation6 + $0x578] sm:$0xff]  }
 0x95a   : > { %20693 = vmatprep.subr.bf16.mxu1 %v22920_v48 }
 0x95d   : > { %20694 = vmatpush3.bf16.msra.mxu1 %v22920_v48  ;;  %v22939_v48 = vld [vmem:[#allocation6 + $0x4a0] sm:$0xff]  }
 0x95e   : > { %20695 = vmatprep.subr.bf16.mxu1 %v22921_v56 }
 0x960   : > { %20684 = vmatmul.mubr.bf16.gmra.mrb[44].mxu1 %v13254_v12  ;;  %v22941_v12 = vld [vmem:[#allocation6 + $0x4b0] sm:$0xff]  }
 0x961   : > { %20687 = vmatprep.mubr.bf16.mxu1 %v13255_v49  ;;  %20696 = vmatpush3.bf16.msra.mxu1 %v22921_v56  ;;  %v13709_v56 = vld [vmem:[#allocation3 + $0x2f] sm:$0xff]  ;;  %v13710_v49 = vld [vmem:[#allocation3 + $0x37] sm:$0xff] }
 0x962   : > { %20697 = vmatprep.subr.bf16.mxu1 %v22922_v42  ;;  %v13720_v47 = vpack.c.bf16 %v13709_v56, %v13708_v62  ;;  %v14135_v56 = vld [vmem:[#allocation3 + $0x51] sm:$0xff]  ;;  %v14136_v62 = vld [vmem:[#allocation3 + $0x59] sm:$0xff] }
 0x965   : > { %20698 = vmatpush3.bf16.msra.mxu1 %v22922_v42  ;;  %v22943_v42 = vld [vmem:[#allocation6 + $0x4c0] sm:$0xff]  }
 0x966   : > { %20699 = vmatprep.subr.bf16.mxu1 %v22923_v20 }
 0x968   : > { %20688 = vmatmul.mubr.bf16.gmra.mrb[60].mxu1 %v13256_v58  ;;  %v13712_v58 = vld [vmem:[#allocation3 + $0x47] sm:$0xff] }
 0x969   : > { %20700 = vmatpush3.bf16.msra.mxu1 %v22923_v20  ;;  %20707 = vmatprep.mubr.bf16.mxu1 %v13216_v53  ;;  %v13711_v20 = vld [vmem:[#allocation3 + $0x3f] sm:$0xff]  ;;  %v13722_v53 = vpack.c.bf16 %v13713_v45, %v13712_v58 }
 0x96a   : > { %20701 = vmatprep.subr.bf16.mxu1 %v22924_v54  ;;  %v13721_v36 = vpack.c.bf16 %v13711_v20, %v13710_v49  ;;  %v14138_v49 = vld [vmem:[#allocation3 + $0x69] sm:$0xff]  ;;  %v14139_v20 = vld [vmem:[#allocation3 + $0x71] sm:$0xff]  ;;  %v14140_v45 = vld [vmem:[#allocation3 + $0x79] sm:$0xff] }
 0x96d   : > { %20702 = vmatpush3.bf16.msra.mxu1 %v22924_v54  ;;  %v22944_v54 = vld [vmem:[#allocation6 + $0x4c8] sm:$0xff]  }
 0x96e   : > { %20703 = vmatprep.subr.bf16.mxu1 %v22925_v55 }
 0x971   : > { %20704 = vmatpush3.bf16.msra.mxu1 %v22925_v55  ;;  %v22945_v55 = vld [vmem:[#allocation6 + $0x4d0] sm:$0xff]  }
 0x972   : > { %20705 = vmatprep.subr.bf16.mxu1 %v22926_v61 }
 0x975   : > { %20706 = vmatpush3.bf16.msra.mxu1 %v22926_v61  ;;  %v13715_v61 = vld [vmem:[#allocation3 + $0x5f] sm:$0xff] }
 0x976   : > { %20719 = vmatprep.subr.bf16.mxu1 %v22927_v38 }
 0x978   : > { %20708 = vmatmul.mubr.bf16.vlgmr.msra.gmra.mrb[40].mxu1 %v13217_v15  ;;  %v13717_v15 = vld [vmem:[#allocation3 + $0x6f] sm:$0xff] }
 0x979   : > { %20711 = vmatprep.mubr.bf16.mxu1 %v13218_v30  ;;  %20720 = vmatpush3.bf16.msra.mxu1 %v22927_v38  ;;  %v13716_v38 = vld [vmem:[#allocation3 + $0x67] sm:$0xff] }
 0x97a   : > { %20721 = vmatprep.subr.bf16.mxu1 %v22928_v50 }
 0x97b   : > { %v20521_v25 = vpop.f32.mrb[52].mxu1 }
 0x97c   : > { %v26714_v6 = vadd.f32 %v20521_v25, %v26671_v2  ;;  %v12249_v9 = vpop.f32.mrb[53].mxu1  ;;  %v13220_v2 = vpack.c.bf16 %v26704_v4, %v26696_v41  ;;  %v22933_v41 = vld [vmem:[#allocation6 + $0x470] sm:$0xff]   ;;  %v13537_v4 = vld [vmem:[#allocation3 + $0x4e] sm:$0xff]  ;;  %v13724_v25 = vpack.c.bf16 %v13717_v15, %v13716_v38 }
 0x97d   : > { %v26717_v46 = vadd.f32 %v12249_v9, %v26673_v34  ;;  %v20522_v59 = vpop.f32.mrb[54].mxu1  ;;  %20722 = vmatpush3.bf16.msra.mxu1 %v22928_v50  ;;  %v22931_v34 = vld [vmem:[#allocation6 + $0x460] sm:$0xff]   ;;  %v13546_v37 = vpack.c.bf16 %v13537_v4, %v13536_v16  ;;  %v13719_v9 = vld [vmem:[#allocation3 + $0x7f] sm:$0xf]  ;;  %v26745_v16 = vld [vmem:[#allocation3 + $0x68] sm:$0xff] }
 0x97e   : > { %v12299_v19 = vadd.f32 %v20522_v59, %v12287_v23  ;;  %v12252_v28 = vpop.f32.mrb[55].mxu1  ;;  %20723 = vmatprep.subr.bf16.mxu1 %v22929_v14  ;;  %v13714_v50 = vld [vmem:[#allocation3 + $0x57] sm:$0xff]  ;;  %v13725_v23 = vpack.c.bf16 %v13719_v9, %v13718_v3 }
 0x97f   : > { %v26721_v33 = vadd.f32 %v12252_v28, %v26675_v0  ;;  %v22932_v0 = vld [vmem:[#allocation6 + $0x468] sm:$0xff]   ;;  %v13723_v30 = vpack.c.bf16 %v13715_v61, %v13714_v50  ;;  %v22947_v59 = vld [vmem:[#allocation6 + $0x4e0] sm:$0xff]   ;;  %v13884_v28 = vld [vmem:[#allocation3 + $0x28] sm:$0xff] }
 0x980   : > { %12311 = vst [vmem:[#allocation4 + $0x72] sm:$0xf] %v12299_v19  ;;  %20712 = vmatmul.mubr.bf16.gmra.mrb[44].mxu1 %v13219_v24  ;;  %v26728_v19 = vld [vmem:[#allocation3 + $0x30] sm:$0xff]  ;;  %v22948_v24 = vld [vmem:[#allocation6 + $0x4e8] sm:$0xff]   ;;  %v14142_v61 = vld [vmem:[#allocation3 + $0x89] sm:$0xf] }
 0x981   : > { %20715 = vmatprep.mubr.bf16.mxu1 %v13220_v2  ;;  %20724 = vmatpush3.bf16.msra.mxu1 %v22929_v14  ;;  %v22946_v14 = vld [vmem:[#allocation6 + $0x4d8] sm:$0xff]   ;;  %v22949_v2 = vld [vmem:[#allocation6 + $0x4f0] sm:$0xff]   ;;  %v26747_v4 = vld [vmem:[#allocation3 + $0x70] sm:$0xff] }
 0x982   : > { %20725 = vmatprep.subr.bf16.mxu1 %v22930_v11  ;;  %v22963_v38 = vld [vmem:[#allocation6 + $0x520] sm:$0xff]   ;;  %v22964_v50 = vld [vmem:[#allocation6 + $0x528] sm:$0xff]  }
 0x983   : > { %v22967_v3 = vld [vmem:[#allocation6 + $0x580] sm:$0xff]  }
 0x985   : > { %20726 = vmatpush3.bf16.msra.mxu1 %v22930_v11  ;;  %v13896_v11 = vpack.c.bf16 %v26728_v19, %v13884_v28 }
 0x986   : > { %20727 = vmatprep.subr.bf16.mxu1 %v22931_v34 }
 0x988   : > { %20716 = vmatmul.mubr.bf16.gmra.mrb[60].mxu1 %v13221_v35  ;;  %v26733_v35 = vld [vmem:[#allocation3 + $0x40] sm:$0xff] }
 0x989   : > { %20728 = vmatpush3.bf16.msra.mxu1 %v22931_v34  ;;  %20735 = vmatprep.mubr.bf16.mxu1 %v13544_v26  ;;  %v22950_v34 = vld [vmem:[#allocation6 + $0x4f8] sm:$0xff]  }
 0x98a   : > { %20729 = vmatprep.subr.bf16.mxu1 %v22932_v0  ;;  %v26739_v26 = vld [vmem:[#allocation3 + $0x48] sm:$0xff] }
 0x98b   : > { %v14109_v9 = vpack.c.bf16 %v26739_v26, %v26733_v35 }
 0x98d   : > { %20730 = vmatpush3.bf16.msra.mxu1 %v22932_v0  ;;  %v13897_v0 = vpack.c.bf16 %v26733_v35, %v26731_v43 }
 0x98e   : > { %20731 = vmatprep.subr.bf16.mxu1 %v22933_v41 }
 0x991   : > { %20732 = vmatpush3.bf16.msra.mxu1 %v22933_v41  ;;  %v22952_v41 = vld [vmem:[#allocation6 + $0x548] sm:$0xff]  }
 0x992   : > { %20733 = vmatprep.subr.bf16.mxu1 %v22934_v22 }
 0x995   : > { %20734 = vmatpush3.bf16.msra.mxu1 %v22934_v22  ;;  %v13898_v22 = vpack.c.bf16 %v26735_v52, %v26739_v26 }
 0x996   : > { %20747 = vmatprep.subr.bf16.mxu1 %v22935_v10 }
 0x998   : > { %20736 = vmatmul.mubr.bf16.vlgmr.msra.gmra.mrb[40].mxu1 %v13545_v57  ;;  %v13899_v57 = vpack.c.bf16 %v26743_v63, %v26749_v40 }
 0x999   : > { %20739 = vmatprep.mubr.bf16.mxu1 %v13546_v37  ;;  %20748 = vmatpush3.bf16.msra.mxu1 %v22935_v10  ;;  %v22953_v10 = vld [vmem:[#allocation6 + $0x550] sm:$0xff]   ;;  %v13900_v37 = vpack.c.bf16 %v26747_v4, %v26745_v16 }
 0x99a   : > { %20749 = vmatprep.subr.bf16.mxu1 %v22936_v60 }
 0x99d   : > { %20750 = vmatpush3.bf16.msra.mxu1 %v22936_v60  ;;  %v22954_v60 = vld [vmem:[#allocation6 + $0x558] sm:$0xff]  }
 0x99e   : > { %20751 = vmatprep.subr.bf16.mxu1 %v22937_v17 }
 0x9a0   : > { %20740 = vmatmul.mubr.bf16.gmra.mrb[44].mxu1 %v13547_v13  ;;  %v14132_v13 = vld [vmem:[#allocation3 + $0x39] sm:$0xff] }
 0x9a1   : > { %20743 = vmatprep.mubr.bf16.mxu1 %v13548_v29  ;;  %20752 = vmatpush3.bf16.msra.mxu1 %v22937_v17  ;;  %v13895_v17 = vld [vmem:[#allocation3 + $0x80] sm:$0xf]  ;;  %v14143_v29 = vpack.c.bf16 %v14132_v13, %v14131_v8  ;;  %v22976_v13 = vld [vmem:[#allocation6 + $0x5c8] sm:$0xff]  }
 0x9a2   : > { %20753 = vmatprep.subr.bf16.mxu1 %v22938_v21  ;;  %v13901_v31 = vpack.c.bf16 %v13895_v17, %v26755_v18  ;;  %v14429_v17 = vld [vmem:[#allocation3 + $0x5a] sm:$0xff] }
 0x9a5   : > { %20754 = vmatpush3.bf16.msra.mxu1 %v22938_v21  ;;  %v22956_v21 = vld [vmem:[#allocation6 + $0x568] sm:$0xff]  }
 0x9a6   : > { %20755 = vmatprep.subr.bf16.mxu1 %v22939_v48 }
 0x9a8   : > { %20744 = vmatmul.mubr.bf16.gmra.mrb[60].mxu1 %v13549_v44  ;;  %v14134_v44 = vld [vmem:[#allocation3 + $0x49] sm:$0xff] }
 0x9a9   : > { %20756 = vmatpush3.bf16.msra.mxu1 %v22939_v48  ;;  %20763 = vmatprep.mubr.bf16.mxu1 %v13720_v47  ;;  %v22959_v48 = vld [vmem:[#allocation6 + $0x500] sm:$0xff]  }
 0x9aa   : > { %20757 = vmatprep.subr.bf16.mxu1 %v22940_v39 }
 0x9ad   : > { %20758 = vmatpush3.bf16.msra.mxu1 %v22940_v39  ;;  %v14133_v39 = vld [vmem:[#allocation3 + $0x41] sm:$0xff] }
 0x9ae   : > { %20759 = vmatprep.subr.bf16.mxu1 %v22941_v12  ;;  %v14144_v47 = vpack.c.bf16 %v14134_v44, %v14133_v39  ;;  %v14434_v39 = vld [vmem:[#allocation3 + $0x82] sm:$0xff] }
 0x9b1   : > { %20760 = vmatpush3.bf16.msra.mxu1 %v22941_v12  ;;  %v22960_v12 = vld [vmem:[#allocation6 + $0x508] sm:$0xff]  }
 0x9b2   : > { %20761 = vmatprep.subr.bf16.mxu1 %v22942_v51 }
 0x9b5   : > { %20762 = vmatpush3.bf16.msra.mxu1 %v22942_v51  ;;  %v14145_v51 = vpack.c.bf16 %v14136_v62, %v14135_v56  ;;  %v22978_v56 = vld [vmem:[#allocation6 + $0x5d8] sm:$0xff]  }
 0x9b6   : > { %20775 = vmatprep.subr.bf16.mxu1 %v22943_v42 }
 0x9b8   : > { %20764 = vmatmul.mubr.bf16.vlgmr.msra.gmra.mrb[40].mxu1 %v13721_v36  ;;  %v14137_v36 = vld [vmem:[#allocation3 + $0x61] sm:$0xff] }
 0x9b9   : > { %20767 = vmatprep.mubr.bf16.mxu1 %v13722_v53  ;;  %20776 = vmatpush3.bf16.msra.mxu1 %v22943_v42  ;;  %v22961_v42 = vld [vmem:[#allocation6 + $0x510] sm:$0xff]   ;;  %v14146_v58 = vpack.c.bf16 %v14138_v49, %v14137_v36  ;;  %v14147_v53 = vpack.c.bf16 %v14140_v45, %v14139_v20  ;;  %v14600_v49 = vld [vmem:[#allocation3 + $0x33] sm:$0xff] }
 0x9ba   : > { %20777 = vmatprep.subr.bf16.mxu1 %v22944_v54  ;;  %v22980_v20 = vld [vmem:[#allocation6 + $0x5e8] sm:$0xff]   ;;  %v22981_v36 = vld [vmem:[#allocation6 + $0x5f0] sm:$0xff]  }
 0x9bd   : > { %20778 = vmatpush3.bf16.msra.mxu1 %v22944_v54  ;;  %v22962_v54 = vld [vmem:[#allocation6 + $0x518] sm:$0xff]  }
 0x9be   : > { %20779 = vmatprep.subr.bf16.mxu1 %v22945_v55 }
 0x9c0   : > { %20768 = vmatmul.mubr.bf16.gmra.mrb[44].mxu1 %v13723_v30  ;;  %v14108_v30 = vpack.c.bf16 %v26731_v43, %v26728_v19  ;;  %v22969_v19 = vld [vmem:[#allocation6 + $0x590] sm:$0xff]  }
 0x9c1   : > { %20771 = vmatprep.mubr.bf16.mxu1 %v13724_v25  ;;  %20780 = vmatpush3.bf16.msra.mxu1 %v22945_v55  ;;  %v14141_v55 = vld [vmem:[#allocation3 + $0x81] sm:$0xff] }
 0x9c2   : > { %20781 = vmatprep.subr.bf16.mxu1 %v22946_v14  ;;  %v14148_v15 = vpack.c.bf16 %v14142_v61, %v14141_v55  ;;  %v22966_v25 = vld [vmem:[#allocation6 + $0x538] sm:$0xff]   ;;  %v14605_v61 = vld [vmem:[#allocation3 + $0x5b] sm:$0xff] }
 0x9c3   : > { %v14603_v55 = vld [vmem:[#allocation3 + $0x4b] sm:$0xff] }
 0x9c5   : > { %20782 = vmatpush3.bf16.msra.mxu1 %v22946_v14  ;;  %v22965_v14 = vld [vmem:[#allocation6 + $0x530] sm:$0xff]  }
 0x9c6   : > { %20783 = vmatprep.subr.bf16.mxu1 %v22947_v59 }
 0x9c8   : > { %20772 = vmatmul.mubr.bf16.gmra.mrb[60].mxu1 %v13725_v23  ;;  %v14110_v23 = vpack.c.bf16 %v26749_v40, %v26735_v52  ;;  %v14111_v52 = vpack.c.bf16 %v26745_v16, %v26743_v63  ;;  %v14424_v63 = vld [vmem:[#allocation3 + $0x32] sm:$0xff] }
 0x9c9   : > { %20784 = vmatpush3.bf16.msra.mxu1 %v22947_v59  ;;  %20791 = vmatprep.mubr.bf16.mxu1 %v13896_v11  ;;  %v22968_v59 = vld [vmem:[#allocation6 + $0x588] sm:$0xff]  }
 0x9ca   : > { %20785 = vmatprep.subr.bf16.mxu1 %v22948_v24  ;;  %v22972_v16 = vld [vmem:[#allocation6 + $0x5a8] sm:$0xff]  }
 0x9cd   : > { %20786 = vmatpush3.bf16.msra.mxu1 %v22948_v24 }
 0x9ce   : > { %20787 = vmatprep.subr.bf16.mxu1 %v22949_v2 }
 0x9d1   : > { %20788 = vmatpush3.bf16.msra.mxu1 %v22949_v2 }
 0x9d2   : > { %20789 = vmatprep.subr.bf16.mxu1 %v22950_v34 }
 0x9d5   : > { %20790 = vmatpush3.bf16.msra.mxu1 %v22950_v34 }
 0x9d6   : > { %20803 = vmatprep.subr.bf16.mxu1 %v22951_v5 }
 0x9d8   : > { %20792 = vmatmul.mubr.bf16.vlgmr.msra.gmra.mrb[40].mxu1 %v13897_v0  ;;  %v22970_v0 = vld [vmem:[#allocation6 + $0x598] sm:$0xff]  }
 0x9d9   : > { %20795 = vmatprep.mubr.bf16.mxu1 %v13898_v22  ;;  %20804 = vmatpush3.bf16.msra.mxu1 %v22951_v5  ;;  %v13179_v5 = vld [vmem:[#allocation4 + $0x72] sm:$0xf] }
 0x9da   : > { %20805 = vmatprep.subr.bf16.mxu1 %v22952_v41 }
 0x9dd   : > { %20806 = vmatpush3.bf16.msra.mxu1 %v22952_v41  ;;  %v22971_v41 = vld [vmem:[#allocation6 + $0x5a0] sm:$0xff]  }
 0x9de   : > { %20807 = vmatprep.subr.bf16.mxu1 %v22953_v10 }
 0x9e0   : > { %20796 = vmatmul.mubr.bf16.gmra.mrb[44].mxu1 %v13899_v57  ;;  %v22975_v57 = vld [vmem:[#allocation6 + $0x5c0] sm:$0xff]  }
 0x9e1   : > { %20799 = vmatprep.mubr.bf16.mxu1 %v13900_v37  ;;  %20808 = vmatpush3.bf16.msra.mxu1 %v22953_v10  ;;  %v14425_v10 = vld [vmem:[#allocation3 + $0x3a] sm:$0xff]  ;;  %v14428_v37 = vld [vmem:[#allocation3 + $0x52] sm:$0xff] }
 0x9e2   : > { %20809 = vmatprep.subr.bf16.mxu1 %v22954_v60  ;;  %v14436_v40 = vpack.c.bf16 %v14425_v10, %v14424_v63  ;;  %v14438_v8 = vpack.c.bf16 %v14429_v17, %v14428_v37  ;;  %v14779_v10 = vld [vmem:[#allocation3 + $0x4c] sm:$0xff]  ;;  %v14781_v63 = vld [vmem:[#allocation3 + $0x5c] sm:$0xff] }
 0x9e5   : > { %20810 = vmatpush3.bf16.msra.mxu1 %v22954_v60  ;;  %v14427_v60 = vld [vmem:[#allocation3 + $0x4a] sm:$0xff] }
 0x9e6   : > { %20811 = vmatprep.subr.bf16.mxu1 %v22955_v1 }
 0x9e8   : > { %20800 = vmatmul.mubr.bf16.gmra.mrb[60].mxu1 %v13901_v31 }
 0x9e9   : > { %20812 = vmatpush3.bf16.msra.mxu1 %v22955_v1  ;;  %20819 = vmatprep.mubr.bf16.mxu1 %v14143_v29  ;;  %v14426_v1 = vld [vmem:[#allocation3 + $0x42] sm:$0xff]  ;;  %v14431_v29 = vld [vmem:[#allocation3 + $0x6a] sm:$0xff] }
 0x9ea   : > { %20813 = vmatprep.subr.bf16.mxu1 %v22956_v21  ;;  %v14437_v31 = vpack.c.bf16 %v14427_v60, %v14426_v1  ;;  %v14782_v60 = vld [vmem:[#allocation3 + $0x64] sm:$0xff] }
 0x9eb   : > { %v14786_v1 = vld [vmem:[#allocation3 + $0x84] sm:$0xff] }
 0x9ed   : > { %20814 = vmatpush3.bf16.msra.mxu1 %v22956_v21  ;;  %v22977_v21 = vld [vmem:[#allocation6 + $0x5d0] sm:$0xff]  }
 0x9ee   : > { %20815 = vmatprep.subr.bf16.mxu1 %v22957_v7 }
 0x9f1   : > { %20816 = vmatpush3.bf16.msra.mxu1 %v22957_v7  ;;  %v14432_v7 = vld [vmem:[#allocation3 + $0x72] sm:$0xff] }
 0x9f2   : > { %20817 = vmatprep.subr.bf16.mxu1 %v22958_v27 }
 0x9f5   : > { %20818 = vmatpush3.bf16.msra.mxu1 %v22958_v27  ;;  %v14433_v27 = vld [vmem:[#allocation3 + $0x7a] sm:$0xff] }
 0x9f6   : > { %20831 = vmatprep.subr.bf16.mxu1 %v22959_v48  ;;  %v14440_v62 = vpack.c.bf16 %v14433_v27, %v14432_v7 }
 0x9f8   : > { %20820 = vmatmul.mubr.bf16.vlgmr.msra.gmra.mrb[40].mxu1 %v14144_v47  ;;  %v14435_v47 = vld [vmem:[#allocation3 + $0x8a] sm:$0xf] }
 0x9f9   : > { %20823 = vmatprep.mubr.bf16.mxu1 %v14145_v51  ;;  %20832 = vmatpush3.bf16.msra.mxu1 %v22959_v48  ;;  %v14430_v48 = vld [vmem:[#allocation3 + $0x62] sm:$0xff]  ;;  %v14441_v51 = vpack.c.bf16 %v14435_v47, %v14434_v39  ;;  %v22995_v39 = vld [vmem:[%s27413_s5 + $0x60] sm:$0xff]   ;;  %v22996_v47 = vld [vmem:[%s27413_s5 + $0x68] sm:$0xff]  }
 0x9fa   : > { %20833 = vmatprep.subr.bf16.mxu1 %v22960_v12  ;;  %v14439_v44 = vpack.c.bf16 %v14431_v29, %v14430_v48 }
 0x9fd   : > { %20834 = vmatpush3.bf16.msra.mxu1 %v22960_v12  ;;  %v22979_v12 = vld [vmem:[#allocation6 + $0x5e0] sm:$0xff]  }
 0x9fe   : > { %20835 = vmatprep.subr.bf16.mxu1 %v22961_v42 }
 0xa00   : > { %20824 = vmatmul.mubr.bf16.gmra.mrb[44].mxu1 %v14146_v58  ;;  %v22982_v58 = vld [vmem:[#allocation6 + $0x5f8] sm:$0xff]  }
 0xa01   : > { %20827 = vmatprep.mubr.bf16.mxu1 %v14147_v53  ;;  %20836 = vmatpush3.bf16.msra.mxu1 %v22961_v42  ;;  %v14601_v42 = vld [vmem:[#allocation3 + $0x3b] sm:$0xff]  ;;  %v14602_v53 = vld [vmem:[#allocation3 + $0x43] sm:$0xff] }
 0xa02   : > { %20837 = vmatprep.subr.bf16.mxu1 %v22962_v54  ;;  %v14612_v45 = vpack.c.bf16 %v14601_v42, %v14600_v49 }
 0xa05   : > { %20838 = vmatpush3.bf16.msra.mxu1 %v22962_v54  ;;  %v22983_v54 = vld [vmem:[#allocation6 + $0x600] sm:$0xff]  }
 0xa06   : > { %20839 = vmatprep.subr.bf16.mxu1 %v22963_v38 }
 0xa08   : > { %20828 = vmatmul.mubr.bf16.gmra.mrb[64].mxu1 %v14148_v15  ;;  %v14604_v15 = vld [vmem:[#allocation3 + $0x53] sm:$0xff] }
 0xa09   : > { %20840 = vmatpush3.bf16.msra.mxu1 %v22963_v38  ;;  %20847 = vmatprep.mubr.bf16.mxu1 %v14108_v30  ;;  %v14613_v38 = vpack.c.bf16 %v14603_v55, %v14602_v53  ;;  %v14614_v30 = vpack.c.bf16 %v14605_v61, %v14604_v15 }
 0xa0a   : > { %20841 = vmatprep.subr.bf16.mxu1 %v22964_v50 }
 0xa0d   : > { %20842 = vmatpush3.bf16.msra.mxu1 %v22964_v50  ;;  %v22984_v50 = vld [vmem:[#allocation6 + $0x608] sm:$0xff]  }
 0xa0e   : > { %20843 = vmatprep.subr.bf16.mxu1 %v22965_v14 }
 0xa11   : > { %20844 = vmatpush3.bf16.msra.mxu1 %v22965_v14  ;;  %v22985_v14 = vld [vmem:[#allocation6 + $0x610] sm:$0xff]  }
 0xa12   : > { %20845 = vmatprep.subr.bf16.mxu1 %v22966_v25 }
 0xa15   : > { %20846 = vmatpush3.bf16.msra.mxu1 %v22966_v25  ;;  %v14607_v25 = vld [vmem:[#allocation3 + $0x6b] sm:$0xff] }
 0xa16   : > { %20859 = vmatprep.subr.bf16.mxu1 %v22967_v3 }
 0xa18   : > { %20848 = vmatmul.mubr.bf16.vlgmr.msra.gmra.mrb[40].mxu1 %v14109_v9  ;;  %v14609_v9 = vld [vmem:[#allocation3 + $0x7b] sm:$0xff] }
 0xa19   : > { %20851 = vmatprep.mubr.bf16.mxu1 %v14110_v23  ;;  %20860 = vmatpush3.bf16.msra.mxu1 %v22967_v3  ;;  %v14608_v3 = vld [vmem:[#allocation3 + $0x73] sm:$0xff] }
 0xa1a   : > { %20861 = vmatprep.subr.bf16.mxu1 %v22968_v59 }
 0xa1b   : > { %v20661_v28 = vpop.f32.mrb[56].mxu1 }
 0xa1c   : > { %v26765_v24 = vadd.f32 %v20661_v28, %v26714_v6  ;;  %v13141_v11 = vpop.f32.mrb[57].mxu1  ;;  %v14112_v6 = vpack.c.bf16 %v26755_v18, %v26747_v4  ;;  %v22974_v4 = vld [vmem:[#allocation6 + $0x5b8] sm:$0xff]   ;;  %v14616_v28 = vpack.c.bf16 %v14609_v9, %v14608_v3 }
 0xa1d   : > { %v26768_v2 = vadd.f32 %v13141_v11, %v26717_v46  ;;  %v20662_v34 = vpop.f32.mrb[58].mxu1  ;;  %20862 = vmatpush3.bf16.msra.mxu1 %v22968_v59  ;;  %v14107_v46 = vld [vmem:[#allocation3 + $0x88] sm:$0xf] }
 0xa1e   : > { %v13191_v43 = vadd.f32 %v20662_v34, %v13179_v5  ;;  %v13144_v35 = vpop.f32.mrb[59].mxu1  ;;  %20863 = vmatprep.subr.bf16.mxu1 %v22969_v19  ;;  %v14113_v22 = vpack.c.bf16 %v14107_v46, %v26755_v18  ;;  %v14606_v59 = vld [vmem:[#allocation3 + $0x63] sm:$0xff]  ;;  %v14611_v34 = vld [vmem:[#allocation3 + $0x8b] sm:$0xf]  ;;  %v22987_v5 = vld [vmem:[#allocation6 + $0x620] sm:$0xff]  }
 0xa1f   : > { %v26773_v26 = vadd.f32 %v13144_v35, %v26721_v33  ;;  %v22973_v33 = vld [vmem:[#allocation6 + $0x5b0] sm:$0xff]   ;;  %v14615_v23 = vpack.c.bf16 %v14607_v25, %v14606_v59 }
 0xa20   : > { %13203 = vst [vmem:[#allocation4 + $0x72] sm:$0xf] %v13191_v43  ;;  %20852 = vmatmul.mubr.bf16.gmra.mrb[44].mxu1 %v14111_v52  ;;  %v14610_v11 = vld [vmem:[#allocation3 + $0x83] sm:$0xff]  ;;  %v14776_v52 = vld [vmem:[#allocation3 + $0x34] sm:$0xff] }
 0xa21   : > { %20855 = vmatprep.mubr.bf16.mxu1 %v14112_v6  ;;  %20864 = vmatpush3.bf16.msra.mxu1 %v22969_v19  ;;  %v22986_v19 = vld [vmem:[#allocation6 + $0x618] sm:$0xff]   ;;  %v14617_v43 = vpack.c.bf16 %v14611_v34, %v14610_v11  ;;  %v14777_v35 = vld [vmem:[#allocation3 + $0x3c] sm:$0xff] }
 0xa22   : > { %20865 = vmatprep.subr.bf16.mxu1 %v22970_v0  ;;  %v14788_v6 = vpack.c.bf16 %v14777_v35, %v14776_v52  ;;  %v22989_v46 = vld [vmem:[#allocation6 + $0x630] sm:$0xff]  }
 0xa25   : > { %20866 = vmatpush3.bf16.msra.mxu1 %v22970_v0  ;;  %v22988_v0 = vld [vmem:[#allocation6 + $0x628] sm:$0xff]  }
 0xa26   : > { %20867 = vmatprep.subr.bf16.mxu1 %v22971_v41 }
 0xa27   : > { %v14071_v48 = vld [vmem:[#allocation4 + $0x72] sm:$0xf] }
 0xa28   : > { %20856 = vmatmul.mubr.bf16.gmra.mrb[64].mxu1 %v14113_v22  ;;  %v14778_v22 = vld [vmem:[#allocation3 + $0x44] sm:$0xff] }
 0xa29   : > { %20868 = vmatpush3.bf16.msra.mxu1 %v22971_v41  ;;  %20875 = vmatprep.mubr.bf16.mxu1 %v14436_v40  ;;  %v22990_v41 = vld [vmem:[#allocation6 + $0x638] sm:$0xff]   ;;  %v14780_v40 = vld [vmem:[#allocation3 + $0x54] sm:$0xff] }
 0xa2a   : > { %20869 = vmatprep.subr.bf16.mxu1 %v22972_v16 }
 0xa2d   : > { %20870 = vmatpush3.bf16.msra.mxu1 %v22972_v16  ;;  %v14789_v16 = vpack.c.bf16 %v14779_v10, %v14778_v22 }
 0xa2e   : > { %20871 = vmatprep.subr.bf16.mxu1 %v22973_v33 }
 0xa31   : > { %20872 = vmatpush3.bf16.msra.mxu1 %v22973_v33  ;;  %v14790_v33 = vpack.c.bf16 %v14781_v63, %v14780_v40 }
 0xa32   : > { %20873 = vmatprep.subr.bf16.mxu1 %v22974_v4 }
 0xa35   : > { %20874 = vmatpush3.bf16.msra.mxu1 %v22974_v4  ;;  %v14783_v4 = vld [vmem:[#allocation3 + $0x6c] sm:$0xff] }
 0xa36   : > { %20887 = vmatprep.subr.bf16.mxu1 %v22975_v57  ;;  %v14791_v37 = vpack.c.bf16 %v14783_v4, %v14782_v60 }
 0xa38   : > { %20876 = vmatmul.mubr.bf16.vlgmr.msra.gmra.mrb[40].mxu1 %v14437_v31  ;;  %v14787_v31 = vld [vmem:[#allocation3 + $0x8c] sm:$0xf] }
 0xa39   : > { %20879 = vmatprep.mubr.bf16.mxu1 %v14438_v8  ;;  %20888 = vmatpush3.bf16.msra.mxu1 %v22975_v57  ;;  %v14785_v57 = vld [vmem:[#allocation3 + $0x7c] sm:$0xff] }
 0xa3a   : > { %20889 = vmatprep.subr.bf16.mxu1 %v22976_v13  ;;  %v14792_v17 = vpack.c.bf16 %v14785_v57, %v26725_v32  ;;  %v22991_v32 = vld [vmem:[%s27413_s5 + $0x40] sm:$0xff]  }
 0xa3d   : > { %20890 = vmatpush3.bf16.msra.mxu1 %v22976_v13  ;;  %v14793_v13 = vpack.c.bf16 %v14787_v31, %v14786_v1 }
 0xa3e   : > { %20891 = vmatprep.subr.bf16.mxu1 %v22977_v21 }
 0xa40   : > { %20880 = vmatmul.mubr.bf16.gmra.mrb[44].mxu1 %v14439_v44 }
 0xa41   : > { %20883 = vmatprep.mubr.bf16.mxu1 %v14440_v62  ;;  %20892 = vmatpush3.bf16.msra.mxu1 %v22977_v21 }
 0xa42   : > { %20893 = vmatprep.subr.bf16.mxu1 %v22978_v56 }
 0xa45   : > { %20894 = vmatpush3.bf16.msra.mxu1 %v22978_v56 }
 0xa46   : > { %20895 = vmatprep.subr.bf16.mxu1 %v22979_v12 }
 0xa48   : > { %20884 = vmatmul.mubr.bf16.gmra.mrb[64].mxu1 %v14441_v51  ;;  %v22998_v51 = vld [vmem:[%s27413_s5 + $0x78] sm:$0xff]  }
 0xa49   : > { %20896 = vmatpush3.bf16.msra.mxu1 %v22979_v12  ;;  %20903 = vmatprep.mubr.bf16.mxu1 %v14612_v45  ;;  %v22997_v12 = vld [vmem:[%s27413_s5 + $0x70] sm:$0xff]  }
 0xa4a   : > { %20897 = vmatprep.subr.bf16.mxu1 %v22980_v20 }
 0xa4d   : > { %20898 = vmatpush3.bf16.msra.mxu1 %v22980_v20 }
 0xa4e   : > { %20899 = vmatprep.subr.bf16.mxu1 %v22981_v36 }
 0xa51   : > { %20900 = vmatpush3.bf16.msra.mxu1 %v22981_v36 }
 0xa52   : > { %20901 = vmatprep.subr.bf16.mxu1 %v22982_v58 }
 0xa55   : > { %20902 = vmatpush3.bf16.msra.mxu1 %v22982_v58 }
 0xa56   : > { %20915 = vmatprep.subr.bf16.mxu1 %v22983_v54 }
 0xa58   : > { %20904 = vmatmul.mubr.bf16.vlgmr.msra.gmra.mrb[40].mxu1 %v14613_v38 }
 0xa59   : > { %20907 = vmatprep.mubr.bf16.mxu1 %v14614_v30  ;;  %20916 = vmatpush3.bf16.msra.mxu1 %v22983_v54 }
 0xa5a   : > { %20917 = vmatprep.subr.bf16.mxu1 %v22984_v50 }
 0xa5d   : > { %20918 = vmatpush3.bf16.msra.mxu1 %v22984_v50  ;;  %v17802_v50 = vld [vmem:[%s27412_s4] ss:$0 sm:$0xff] }
 0xa5e   : > { %20919 = vmatprep.subr.bf16.mxu1 %v22985_v14 }
 0xa60   : > { %20908 = vmatmul.mubr.bf16.gmra.mrb[44].mxu1 %v14615_v23 }
 0xa61   : > { %20911 = vmatprep.mubr.bf16.mxu1 %v14616_v28  ;;  %20920 = vmatpush3.bf16.msra.mxu1 %v22985_v14 }
 0xa62   : > { %20921 = vmatprep.subr.bf16.mxu1 %v22986_v19 }
 0xa65   : > { %20922 = vmatpush3.bf16.msra.mxu1 %v22986_v19 }
 0xa66   : > { %20923 = vmatprep.subr.bf16.mxu1 %v22987_v5 }
 0xa68   : > { %20912 = vmatmul.mubr.bf16.gmra.mrb[64].mxu1 %v14617_v43 }
 0xa69   : > { %20924 = vmatpush3.bf16.msra.mxu1 %v22987_v5  ;;  %20931 = vmatprep.mubr.bf16.mxu1 %v14788_v6 }
 0xa6a   : > { %20925 = vmatprep.subr.bf16.mxu1 %v22988_v0 }
 0xa6d   : > { %20926 = vmatpush3.bf16.msra.mxu1 %v22988_v0 }
 0xa6e   : > { %20927 = vmatprep.subr.bf16.mxu1 %v22989_v46 }
 0xa71   : > { %20928 = vmatpush3.bf16.msra.mxu1 %v22989_v46 }
 0xa72   : > { %20929 = vmatprep.subr.bf16.mxu1 %v22990_v41 }
 0xa75   : > { %20930 = vmatpush3.bf16.msra.mxu1 %v22990_v41 }
 0xa76   : > { %20943 = vmatprep.subr.bf16.mxu1 %v26755_v18 }
 0xa78   : > { %20932 = vmatmul.mubr.bf16.vlgmr.msra.gmra.mrb[40].mxu1 %v14789_v16 }
 0xa79   : > { %20935 = vmatprep.mubr.bf16.mxu1 %v14790_v33  ;;  %20944 = vmatpush3.bf16.msra.mxu1 %v22991_v32 }
 0xa7a   : > { %20945 = vmatprep.subr.bf16.mxu1 %v26755_v18 }
 0xa80   : > { %20936 = vmatmul.mubr.bf16.gmra.mrb[44].mxu1 %v14791_v37 }
 0xa81   : > { %20939 = vmatprep.mubr.bf16.mxu1 %v14792_v17 }
 0xa88   : > { %20940 = vmatmul.mubr.bf16.gmra.mrb[64].mxu1 %v14793_v13 }
 0xa89   : > { %20959 = vmatprep.mubr.msk.bf16.mxu1 %vm23289_vm8, %v26755_v18 }
 0xabb   : > { %v20801_v8 = vpop.f32.mrb[60].mxu1 }
 0xabc   : > { %v14082_v21 = vadd.f32 %v20801_v8, %v26765_v24  ;;  %v14033_v29 = vpop.f32.mrb[61].mxu1  ;;  %v22992_v24 = vld [vmem:[%s27413_s5 + $0x48] sm:$0xff]  }
 0xabd   : > { %v26782_v7 = vadd.f32 %v14033_v29, %v26768_v2  ;;  %v20802_v27 = vpop.f32.mrb[62].mxu1  ;;  %20946 = vmatpush3.bf16.msra.mxu1 %v22992_v24  ;;  %v22993_v2 = vld [vmem:[%s27413_s5 + $0x50] sm:$0xff]  }
 0xabe   : > { %v14083_v44 = vadd.f32 %v20802_v27, %v14071_v48  ;;  %v14036_v56 = vpop.f32.mrb[63].mxu1  ;;  %20947 = vmatprep.subr.bf16.mxu1 %v26755_v18 }
 0xabf   : > { %v26785_v62 = vadd.f32 %v14036_v56, %v26773_v26  ;;  %v22994_v26 = vld [vmem:[%s27413_s5 + $0x58] sm:$0xff]  }
 0xac0   : > { %14095 = vst [vmem:[#allocation4 + $0x72] sm:$0xf] %v14083_v44 }
 0xac1   : > { %20948 = vmatpush3.bf16.msra.mxu1 %v22993_v2  ;;  %v22999_v2 = vld [vmem:[%s27413_s5] sm:$0xff]  }
 0xac2   : > { %20949 = vmatprep.subr.bf16.mxu1 %v26755_v18 }
 0xac5   : > { %20950 = vmatpush3.bf16.msra.mxu1 %v22994_v26 }
 0xac6   : > { %20951 = vmatprep.subr.bf16.mxu1 %v26755_v18 }
 0xac7   : > { %v14963_v5 = vld [vmem:[#allocation4 + $0x72] sm:$0xf] }
 0xac9   : > { %20952 = vmatpush3.bf16.msra.mxu1 %v22995_v39  ;;  %v23000_v39 = vld [vmem:[%s27413_s5 + $0x8] sm:$0xff]  }
 0xaca   : > { %20953 = vmatprep.subr.bf16.mxu1 %v26755_v18 }
 0xacd   : > { %20954 = vmatpush3.bf16.msra.mxu1 %v22996_v47  ;;  %v23001_v47 = vld [vmem:[%s27413_s5 + $0x10] sm:$0xff]  }
 0xace   : > { %20955 = vmatprep.subr.bf16.mxu1 %v26755_v18 }
 0xad1   : > { %20956 = vmatpush3.bf16.msra.mxu1 %v22997_v12  ;;  %v23002_v12 = vld [vmem:[%s27413_s5 + $0x18] sm:$0xff]  }
 0xad2   : > { %20957 = vmatprep.subr.bf16.mxu1 %v26755_v18 }
 0xad5   : > { %20958 = vmatpush3.bf16.msra.mxu1 %v22998_v51  ;;  %v23003_v51 = vld [vmem:[%s27413_s5 + $0x20] sm:$0xff]  }
 0xad6   : > { %20963 = vmatprep.subr.bf16.mxu1 %v26755_v18 }
 0xb4b   : > { %v20933_v42 = vpop.f32.mrb[40].mxu1 }
 0xb4c   : > { %14978 = vst [vmem:[#allocation4 + $0x2a] sm:$0xff] %v20933_v42  ;;  %v14893_v49 = vpop.f32.mrb[41].mxu1  ;;  %v23004_v42 = vld [vmem:[%s27413_s5 + $0x28] sm:$0xff]  }
 0xb4d   : > { %14976 = vst [vmem:[#allocation4 + $0x1a] sm:$0xff] %v14893_v49  ;;  %v20934_v20 = vpop.f32.mrb[42].mxu1  ;;  %v23005_v49 = vld [vmem:[%s27413_s5 + $0x30] sm:$0xff]  }
 0xb4e   : > { %14979 = vst [vmem:[#allocation4 + $0x32] sm:$0xff] %v20934_v20  ;;  %v14896_v45 = vpop.f32.mrb[43].mxu1  ;;  %v23006_v20 = vld [vmem:[%s27413_s5 + $0x38] sm:$0xff]  }
 0xb4f   : > { %14977 = vst [vmem:[#allocation4 + $0x22] sm:$0xff] %v14896_v45  ;;  %v23007_v45 = vld [vmem:[%s27413_s5 + $0x80] sm:$0xff]  }
 0xb53   : > { %v20937_v36 = vpop.f32.mrb[44].mxu1 }
 0xb54   : > { %v14990_v58 = vld [vmem:[#allocation4 + $0x1a] ss:$2 sm:$0xf]  ;;  %v14992_v54 = vld [vmem:[#allocation4 + $0x1b] ss:$2 sm:$0xf] }
 0xb55   : > { %14982 = vst [vmem:[#allocation4 + $0x4a] sm:$0xff] %v20937_v36  ;;  %v14997_v61 = vmax.f32 %v14990_v58, %v14992_v54  ;;  %v14909_v15 = vpop.f32.mrb[45].mxu1  ;;  %v15010_v28 = vld [vmem:[#allocation4 + $0x32] ss:$2 sm:$0xf]  ;;  %v23008_v36 = vld [vmem:[%s27413_s5 + $0x88] sm:$0xff]  }
 0xb56   : > { %v14994_v53 = vld [vmem:[#allocation4 + $0x26] ss:$2 sm:$0xf]  ;;  %v14996_v55 = vld [vmem:[#allocation4 + $0x27] ss:$2 sm:$0xf] }
 0xb57   : > { %v14998_v38 = vmax.f32 %v14994_v53, %v14996_v55  ;;  %14980 = vst [vmem:[#allocation4 + $0x3a] sm:$0xff] %v14909_v15  ;;  %v20938_v30 = vpop.f32.mrb[46].mxu1  ;;  %v15012_v43 = vld [vmem:[#allocation4 + $0x33] ss:$2 sm:$0xf]  ;;  %v23011_v53 = vld [vmem:[%s27413_s5 + $0xa0] sm:$0xff]  }
 0xb58   : > { %14983 = vst [vmem:[#allocation4 + $0x52] sm:$0xff] %v20938_v30  ;;  %v14912_v25 = vpop.f32.mrb[47].mxu1  ;;  %v15017_v41 = vmax.f32 %v15010_v28, %v15012_v43  ;;  %v23009_v58 = vld [vmem:[%s27413_s5 + $0x90] sm:$0xff]   ;;  %v23010_v54 = vld [vmem:[%s27413_s5 + $0x98] sm:$0xff]   ;;  %v23012_v55 = vld [vmem:[%s27413_s5 + $0xa8] sm:$0xff]  }
 0xb59   : > { %v14999_v14 = vmax.f32 %v14997_v61, %v14998_v38  ;;  %14981 = vst [vmem:[#allocation4 + $0x42] sm:$0xff] %v14912_v25  ;;  %v23013_v61 = vld [vmem:[%s27413_s5 + $0xb0] sm:$0xff]   ;;  %v23014_v38 = vld [vmem:[%s27413_s5 + $0xb8] sm:$0xff]   ;;  %v23015_v15 = vld [vmem:[%s27413_s5 + $0xc0] sm:$0xff]  }
 0xb5a   : > { %v23016_v30 = vld [vmem:[%s27413_s5 + $0xc8] sm:$0xff]   ;;  %v23018_v25 = vld [vmem:[%s27413_s5 + $0xd8] sm:$0xff]   ;;  %v23027_v43 = vld [vmem:[%s27413_s5 + $0x120] sm:$0xff]  }
 0xb5b   : > { %v15006_v3 = vadd.f32 %v17802_v50, %v14999_v14  ;;  %v20941_v9 = vpop.f32.mrb[64].mxu1  ;;  %v23017_v14 = vld [vmem:[%s27413_s5 + $0xd0] sm:$0xff]  }
 0xb5c   : > { %v14974_v23 = vadd.f32 %v20941_v9, %v14082_v21  ;;  %v14925_v19 = vpop.f32.mrb[65].mxu1  ;;  %v15024_v63 = vld [vmem:[#allocation4 + $0x4a] ss:$2 sm:$0xf] }
 0xb5d   : > { %v15007_v59 = vmax.f32 %v15006_v3, 0.0  ;;  %v14972_v11 = vadd.f32 %v14925_v19, %v26782_v7  ;;  %v20942_v34 = vpop.f32.mrb[66].mxu1  ;;  %v15026_v16 = vld [vmem:[#allocation4 + $0x4b] ss:$2 sm:$0xf]  ;;  %v23019_v3 = vld [vmem:[%s27413_s5 + $0xe0] sm:$0xff]  }
 0xb5e   : > { %14986 = vst [vmem:[#allocation4 + $0x6a] sm:$0xff] %v14974_v23  ;;  %v14975_v35 = vadd.f32 %v20942_v34, %v14963_v5  ;;  %v14928_v52 = vpop.f32.mrb[67].mxu1  ;;  %v15031_v57 = vmax.f32 %v15024_v63, %v15026_v16  ;;  %v23020_v9 = vld [vmem:[%s27413_s5 + $0xe8] sm:$0xff]   ;;  %v23022_v23 = vld [vmem:[%s27413_s5 + $0xf8] sm:$0xff]   ;;  %v23023_v19 = vld [vmem:[%s27413_s5 + $0x100] sm:$0xff]  }
 0xb5f   : > { %15008 = vst [vmem:[#allocation5] sm:$0xf] %v15007_v59  ;;  %14984 = vst [vmem:[#allocation4 + $0x5a] sm:$0xff] %v14972_v11  ;;  %v14973_v0 = vadd.f32 %v14928_v52, %v26785_v62  ;;  %v23021_v59 = vld [vmem:[%s27413_s5 + $0xf0] sm:$0xff]   ;;  %v23024_v11 = vld [vmem:[%s27413_s5 + $0x108] sm:$0xff]  }
 0xb60   : > { %v15014_v6 = vld [vmem:[#allocation4 + $0x3e] ss:$2 sm:$0xf]  ;;  %v15016_v46 = vld [vmem:[#allocation4 + $0x3f] ss:$2 sm:$0xf] }
 0xb61   : > { %14987 = vst [vmem:[#allocation4 + $0x72] sm:$0xf] %v14975_v35  ;;  %v15018_v22 = vmax.f32 %v15014_v6, %v15016_v46  ;;  %14985 = vst [vmem:[#allocation4 + $0x62] sm:$0xff] %v14973_v0  ;;  %v23025_v34 = vld [vmem:[%s27413_s5 + $0x110] sm:$0xff]   ;;  %v23026_v5 = vld [vmem:[%s27413_s5 + $0x118] sm:$0xff]  }
 0xb62   : > { %v23028_v35 = vld [vmem:[%s27413_s5 + $0x128] sm:$0xff]   ;;  %v23029_v52 = vld [vmem:[%s27413_s5 + $0x130] sm:$0xff]   ;;  %v23030_v0 = vld [vmem:[%s27413_s5 + $0x138] sm:$0xff]  }
 0xb63   : > { %v15019_v10 = vmax.f32 %v15017_v41, %v15018_v22  ;;  %v23031_v6 = vld [vmem:[%s27413_s5 + $0x140] sm:$0xff]   ;;  %v23032_v41 = vld [vmem:[%s27413_s5 + $0x148] sm:$0xff]   ;;  %v23033_v22 = vld [vmem:[%s27413_s5 + $0x150] sm:$0xff]  }
 0xb64   : > { %v23035_v63 = vld [vmem:[%s27413_s5 + $0x160] sm:$0xff]   ;;  %v23036_v16 = vld [vmem:[%s27413_s5 + $0x168] sm:$0xff]  }
 0xb65   : > { %v15020_v40 = vadd.f32 %v17802_v50, %v15019_v10  ;;  %v23034_v10 = vld [vmem:[%s27413_s5 + $0x158] sm:$0xff]  }
 0xb66   : > { %v15028_v33 = vld [vmem:[#allocation4 + $0x56] ss:$2 sm:$0xf]  ;;  %v15030_v4 = vld [vmem:[#allocation4 + $0x57] ss:$2 sm:$0xf] }
 0xb67   : > { %v15021_v60 = vmax.f32 %v15020_v40, 0.0  ;;  %v15032_v37 = vmax.f32 %v15028_v33, %v15030_v4  ;;  %v23037_v40 = vld [vmem:[%s27413_s5 + $0x170] sm:$0xff]   ;;  %v23038_v33 = vld [vmem:[%s27413_s5 + $0x178] sm:$0xff]   ;;  %v23039_v4 = vld [vmem:[%s27413_s5 + $0x180] sm:$0xff]  }
 0xb68   : > { %v15042_v17 = vld [vmem:[#allocation4 + $0x6e] ss:$2 sm:$0xf]  ;;  %v15038_v1 = vld [vmem:[#allocation4 + $0x62] ss:$2 sm:$0xf] }
 0xb69   : > { %v15040_v31 = vld [vmem:[#allocation4 + $0x63] ss:$2 sm:$0xf]  ;;  %15022 = vst [vmem:[#allocation5 + $0x4] sm:$0xf] %v15021_v60  ;;  %v15033_v13 = vmax.f32 %v15031_v57, %v15032_v37  ;;  %v23041_v37 = vld [vmem:[%s27413_s5 + $0x190] sm:$0xff]  }
 0xb6a   : > { %v15044_v8 = vld [vmem:[#allocation4 + $0x6f] ss:$2 sm:$0xf]  ;;  %v15045_v21 = vmax.f32 %v15038_v1, %v15040_v31  ;;  %v23043_v1 = vld [vmem:[%s27413_s5 + $0x1a0] sm:$0xff]  }
 0xb6b   : > { %v15046_v29 = vmax.f32 %v15042_v17, %v15044_v8  ;;  %v15034_v7 = vadd.f32 %v17802_v50, %v15033_v13  ;;  %v23040_v60 = vld [vmem:[%s27413_s5 + $0x188] sm:$0xff]   ;;  %v23042_v17 = vld [vmem:[%s27413_s5 + $0x198] sm:$0xff]   ;;  %v23045_v13 = vld [vmem:[%s27413_s5 + $0x1b0] sm:$0xff]  }
 0xb6c   : > { %v23044_v31 = vld [vmem:[%s27413_s5 + $0x1a8] sm:$0xff]   ;;  %v23046_v8 = vld [vmem:[%s27413_s5 + $0x1b8] sm:$0xff]  }
 0xb6d   : > { %v15047_v27 = vmax.f32 %v15045_v21, %v15046_v29  ;;  %v15035_v48 = vmax.f32 %v15034_v7, 0.0  ;;  %v23047_v21 = vld [vmem:[%s27413_s5 + $0x1c0] sm:$0xff]   ;;  %v23048_v7 = vld [vmem:[%s27413_s5 + $0x1c8] sm:$0xff]  }
 0xb6f   : > { %v15048_v44 = vadd.f32 %v17802_v50, %v15047_v27  ;;  %15036 = vst [vmem:[#allocation5 + $0x8] sm:$0xf] %v15035_v48  ;;  %v23049_v27 = vld [vmem:[%s27413_s5 + $0x1d0] sm:$0xff]   ;;  %v23050_v48 = vld [vmem:[%s27413_s5 + $0x1d8] sm:$0xff]  }
 0xb70   : > { %v15051_v62 = vld [vmem:[#allocation5] sm:$0xff] }
 0xb71   : > { %v15049_v56 = vmax.f32 %v15048_v44, 0.0  ;;  %v23051_v44 = vld [vmem:[%s27413_s5 + $0x1e0] sm:$0xff]  }
 0xb73   : > { %15050 = vst [vmem:[#allocation5 + $0xc] sm:$0xf] %v15049_v56  ;;  %v27062_v56 = vld [vmem:[#allocation3] sm:$0xff] }
 0xb7a   : > { %v15052_v32 = vld [vmem:[#allocation5 + $0x8] sm:$0xff] }
 0xb7b   : > { %v26826_v24 = vpack.c.bf16 %v15052_v32, %v15051_v62  ;;  %v23052_v62 = vld [vmem:[%s27413_s5 + $0x1e8] sm:$0xff]  }
 0xb7d   : > { %v26832_v26 = vshrl.u32 %v26826_v24, 16  ;;  %v15285_v50 = vrot.slane %v26826_v24, 1  ;;  %v15501_v46 = vrot.slane %v26826_v24, 2  ;;  %v15717_v29 = vrot.slane %v26826_v24, 3 }
 0xb7f   : > { %20960 = vmatmul.mubr.bf16.vlgmr.msra.gmra.mrb[68].mxu1 %v26832_v26  ;;  %v15393_v28 = vrot.slane %v26832_v26, 1  ;;  %v15609_v57 = vrot.slane %v26832_v26, 2 }
 0xb80   : > { %20964 = vmatpush3.bf16.msra.mxu1 %v22999_v2  ;;  %20979 = vmatprep.mubr.msk.bf16.mxu1 %vm23289_vm8, %v26755_v18 }
 0xb81   : > { %20965 = vmatprep.subr.bf16.mxu1 %v26755_v18 }
 0xb84   : > { %20966 = vmatpush3.bf16.msra.mxu1 %v23000_v39  ;;  %v23053_v39 = vld [vmem:[%s27413_s5 + $0x1f0] sm:$0xff]  }
 0xb85   : > { %20967 = vmatprep.subr.bf16.mxu1 %v26755_v18 }
 0xb88   : > { %20968 = vmatpush3.bf16.msra.mxu1 %v23001_v47 }
 0xb89   : > { %20969 = vmatprep.subr.bf16.mxu1 %v26755_v18 }
 0xb8c   : > { %20970 = vmatpush3.bf16.msra.mxu1 %v23002_v12  ;;  %v23054_v12 = vld [vmem:[%s27413_s5 + $0x1f8] sm:$0xff]  }
 0xb8d   : > { %20971 = vmatprep.subr.bf16.mxu1 %v26755_v18 }
 0xb90   : > { %20972 = vmatpush3.bf16.msra.mxu1 %v23003_v51  ;;  %v23055_v51 = vld [vmem:[%s27413_s5 + $0x200] sm:$0xff]  }
 0xb91   : > { %20973 = vmatprep.subr.bf16.mxu1 %v26755_v18 }
 0xb94   : > { %20974 = vmatpush3.bf16.msra.mxu1 %v23004_v42  ;;  %v15825_v42 = vrot.slane %v26832_v26, 3 }
 0xb95   : > { %20975 = vmatprep.subr.bf16.mxu1 %v26755_v18 }
 0xb98   : > { %20976 = vmatpush3.bf16.msra.mxu1 %v23005_v49  ;;  %v23056_v49 = vld [vmem:[%s27413_s5 + $0x208] sm:$0xff]  }
 0xb99   : > { %20977 = vmatprep.subr.bf16.mxu1 %v26755_v18 }
 0xb9c   : > { %20978 = vmatpush3.bf16.msra.mxu1 %v23006_v20  ;;  %v23057_v20 = vld [vmem:[%s27413_s5 + $0x210] sm:$0xff]  }
 0xb9d   : > { %20983 = vmatprep.subr.bf16.mxu1 %v26755_v18 }
 0xb9f   : > { %20980 = vmatmul.mubr.bf16.vlgmr.msra.gmra.mrb[72].mxu1 %v26826_v24 }
 0xba0   : > { %20984 = vmatpush3.bf16.msra.mxu1 %v23007_v45  ;;  %20999 = vmatprep.mubr.msk.bf16.mxu1 %vm23289_vm8, %v26755_v18  ;;  %v23058_v45 = vld [vmem:[%s27413_s5 + $0x218] sm:$0xff]  }
 0xba1   : > { %20985 = vmatprep.subr.bf16.mxu1 %v26755_v18 }
 0xba4   : > { %20986 = vmatpush3.bf16.msra.mxu1 %v23008_v36  ;;  %v23059_v36 = vld [vmem:[%s27413_s5 + $0x220] sm:$0xff]  }
 0xba5   : > { %20987 = vmatprep.subr.bf16.mxu1 %v26755_v18 }
 0xba8   : > { %20988 = vmatpush3.bf16.msra.mxu1 %v23009_v58  ;;  %v23060_v58 = vld [vmem:[%s27413_s5 + $0x228] sm:$0xff]  }
 0xba9   : > { %20989 = vmatprep.subr.bf16.mxu1 %v26755_v18 }
 0xbac   : > { %20990 = vmatpush3.bf16.msra.mxu1 %v23010_v54 }
 0xbad   : > { %20991 = vmatprep.subr.bf16.mxu1 %v26755_v18 }
 0xbb0   : > { %20992 = vmatpush3.bf16.msra.mxu1 %v23011_v53 }
 0xbb1   : > { %20993 = vmatprep.subr.bf16.mxu1 %v26755_v18 }
 0xbb4   : > { %20994 = vmatpush3.bf16.msra.mxu1 %v23012_v55 }
 0xbb5   : > { %20995 = vmatprep.subr.bf16.mxu1 %v26755_v18 }
 0xbb8   : > { %20996 = vmatpush3.bf16.msra.mxu1 %v23013_v61 }
 0xbb9   : > { %20997 = vmatprep.subr.bf16.mxu1 %v26755_v18 }
 0xbbc   : > { %20998 = vmatpush3.bf16.msra.mxu1 %v23014_v38  ;;  %v23061_v38 = vld [vmem:[%s27413_s5 + $0x230] sm:$0xff]  }
 0xbbd   : > { %21003 = vmatprep.subr.bf16.mxu1 %v26755_v18 }
 0xbbf   : > { %21000 = vmatmul.mubr.bf16.vlgmr.msra.gmra.mrb[76].mxu1 %v15285_v50  ;;  %v23062_v50 = vld [vmem:[%s27413_s5 + $0x238] sm:$0xff]  }
 0xbc0   : > { %21004 = vmatpush3.bf16.msra.mxu1 %v23015_v15  ;;  %21019 = vmatprep.mubr.msk.bf16.mxu1 %vm23289_vm8, %v26755_v18 }
 0xbc1   : > { %21005 = vmatprep.subr.bf16.mxu1 %v26755_v18 }
 0xbc4   : > { %21006 = vmatpush3.bf16.msra.mxu1 %v23016_v30  ;;  %v23063_v30 = vld [vmem:[%s27413_s5 + $0x240] sm:$0xff]  }
 0xbc5   : > { %21007 = vmatprep.subr.bf16.mxu1 %v26755_v18 }
 0xbc8   : > { %21008 = vmatpush3.bf16.msra.mxu1 %v23017_v14  ;;  %v15933_v14 = vrot.slane %v26826_v24, 4 }
 0xbc9   : > { %21009 = vmatprep.subr.bf16.mxu1 %v26755_v18 }
 0xbcc   : > { %21010 = vmatpush3.bf16.msra.mxu1 %v23018_v25  ;;  %v23064_v25 = vld [vmem:[%s27413_s5 + $0x248] sm:$0xff]  }
 0xbcd   : > { %21011 = vmatprep.subr.bf16.mxu1 %v26755_v18 }
 0xbd0   : > { %21012 = vmatpush3.bf16.msra.mxu1 %v23019_v3  ;;  %v23065_v3 = vld [vmem:[%s27413_s5 + $0x250] sm:$0xff]  }
 0xbd1   : > { %21013 = vmatprep.subr.bf16.mxu1 %v26755_v18 }
 0xbd4   : > { %21014 = vmatpush3.bf16.msra.mxu1 %v23020_v9  ;;  %v23066_v9 = vld [vmem:[%s27413_s5 + $0x258] sm:$0xff]  }
 0xbd5   : > { %21015 = vmatprep.subr.bf16.mxu1 %v26755_v18 }
 0xbd8   : > { %21016 = vmatpush3.bf16.msra.mxu1 %v23021_v59  ;;  %v23067_v59 = vld [vmem:[%s27413_s5 + $0x260] sm:$0xff]  }
 0xbd9   : > { %21017 = vmatprep.subr.bf16.mxu1 %v26755_v18 }
 0xbdc   : > { %21018 = vmatpush3.bf16.msra.mxu1 %v23022_v23  ;;  %v23068_v23 = vld [vmem:[%s27413_s5 + $0x268] sm:$0xff]  }
 0xbdd   : > { %21023 = vmatprep.subr.bf16.mxu1 %v26755_v18 }
 0xbdf   : > { %21020 = vmatmul.mubr.bf16.vlgmr.msra.gmra.mrb[80].mxu1 %v15393_v28 }
 0xbe0   : > { %21024 = vmatpush3.bf16.msra.mxu1 %v23023_v19  ;;  %21039 = vmatprep.mubr.msk.bf16.mxu1 %vm23289_vm8, %v26755_v18 }
 0xbe1   : > { %21025 = vmatprep.subr.bf16.mxu1 %v26755_v18 }
 0xbe4   : > { %21026 = vmatpush3.bf16.msra.mxu1 %v23024_v11 }
 0xbe5   : > { %21027 = vmatprep.subr.bf16.mxu1 %v26755_v18 }
 0xbe8   : > { %21028 = vmatpush3.bf16.msra.mxu1 %v23025_v34 }
 0xbe9   : > { %21029 = vmatprep.subr.bf16.mxu1 %v26755_v18 }
 0xbec   : > { %21030 = vmatpush3.bf16.msra.mxu1 %v23026_v5  ;;  %v23069_v5 = vld [vmem:[%s27413_s5 + $0x270] sm:$0xff]  }
 0xbed   : > { %21031 = vmatprep.subr.bf16.mxu1 %v26755_v18 }
 0xbf0   : > { %21032 = vmatpush3.bf16.msra.mxu1 %v23027_v43 }
 0xbf1   : > { %21033 = vmatprep.subr.bf16.mxu1 %v26755_v18 }
 0xbf4   : > { %21034 = vmatpush3.bf16.msra.mxu1 %v23028_v35  ;;  %v23070_v35 = vld [vmem:[%s27413_s5 + $0x278] sm:$0xff]  }
 0xbf5   : > { %21035 = vmatprep.subr.bf16.mxu1 %v26755_v18 }
 0xbf8   : > { %21036 = vmatpush3.bf16.msra.mxu1 %v23029_v52  ;;  %v23071_v52 = vld [vmem:[%s27413_s5 + $0x280] sm:$0xff]  }
 0xbf9   : > { %21037 = vmatprep.subr.bf16.mxu1 %v26755_v18 }
 0xbfc   : > { %21038 = vmatpush3.bf16.msra.mxu1 %v23030_v0  ;;  %v16041_v0 = vrot.slane %v26832_v26, 4 }
 0xbfd   : > { %21043 = vmatprep.subr.bf16.mxu1 %v26755_v18 }
 0xbff   : > { %21040 = vmatmul.mubr.bf16.vlgmr.msra.gmra.mrb[84].mxu1 %v15501_v46  ;;  %v23073_v46 = vld [vmem:[%s27413_s5 + $0x290] sm:$0xff]  }
 0xc00   : > { %21044 = vmatpush3.bf16.msra.mxu1 %v23031_v6  ;;  %21059 = vmatprep.mubr.msk.bf16.mxu1 %vm23289_vm8, %v26755_v18  ;;  %v23072_v6 = vld [vmem:[%s27413_s5 + $0x288] sm:$0xff]  }
 0xc01   : > { %21045 = vmatprep.subr.bf16.mxu1 %v26755_v18 }
 0xc04   : > { %21046 = vmatpush3.bf16.msra.mxu1 %v23032_v41  ;;  %v23074_v41 = vld [vmem:[%s27413_s5 + $0x298] sm:$0xff]  }
 0xc05   : > { %21047 = vmatprep.subr.bf16.mxu1 %v26755_v18 }
 0xc08   : > { %21048 = vmatpush3.bf16.msra.mxu1 %v23033_v22  ;;  %v23075_v22 = vld [vmem:[%s27413_s5 + $0x2a0] sm:$0xff]  }
 0xc09   : > { %21049 = vmatprep.subr.bf16.mxu1 %v26755_v18 }
 0xc0c   : > { %21050 = vmatpush3.bf16.msra.mxu1 %v23034_v10  ;;  %v23076_v10 = vld [vmem:[%s27413_s5 + $0x2a8] sm:$0xff]  }
 0xc0d   : > { %21051 = vmatprep.subr.bf16.mxu1 %v26755_v18 }
 0xc10   : > { %21052 = vmatpush3.bf16.msra.mxu1 %v23035_v63 }
 0xc11   : > { %21053 = vmatprep.subr.bf16.mxu1 %v26755_v18 }
 0xc14   : > { %21054 = vmatpush3.bf16.msra.mxu1 %v23036_v16 }
 0xc15   : > { %21055 = vmatprep.subr.bf16.mxu1 %v26755_v18 }
 0xc18   : > { %21056 = vmatpush3.bf16.msra.mxu1 %v23037_v40 }
 0xc19   : > { %21057 = vmatprep.subr.bf16.mxu1 %v26755_v18 }
 0xc1c   : > { %21058 = vmatpush3.bf16.msra.mxu1 %v23038_v33 }
 0xc1d   : > { %21063 = vmatprep.subr.bf16.mxu1 %v26755_v18 }
 0xc1f   : > { %21060 = vmatmul.mubr.bf16.vlgmr.msra.gmra.mrb[88].mxu1 %v15609_v57 }
 0xc20   : > { %21064 = vmatpush3.bf16.msra.mxu1 %v23039_v4  ;;  %21079 = vmatprep.mubr.msk.bf16.mxu1 %vm23289_vm8, %v26755_v18  ;;  %v23077_v4 = vld [vmem:[%s27413_s5 + $0x2b0] sm:$0xff]  }
 0xc21   : > { %21065 = vmatprep.subr.bf16.mxu1 %v26755_v18 }
 0xc24   : > { %21066 = vmatpush3.bf16.msra.mxu1 %v23040_v60  ;;  %v23078_v60 = vld [vmem:[%s27413_s5 + $0x2b8] sm:$0xff]  }
 0xc25   : > { %21067 = vmatprep.subr.bf16.mxu1 %v26755_v18 }
 0xc28   : > { %21068 = vmatpush3.bf16.msra.mxu1 %v23041_v37  ;;  %v23079_v37 = vld [vmem:[%s27413_s5 + $0x2c0] sm:$0xff]  }
 0xc29   : > { %21069 = vmatprep.subr.bf16.mxu1 %v26755_v18 }
 0xc2c   : > { %21070 = vmatpush3.bf16.msra.mxu1 %v23042_v17  ;;  %v16149_v17 = vrot.slane %v26826_v24, 5 }
 0xc2d   : > { %21071 = vmatprep.subr.bf16.mxu1 %v26755_v18 }
 0xc30   : > { %21072 = vmatpush3.bf16.msra.mxu1 %v23043_v1  ;;  %v23080_v1 = vld [vmem:[%s27413_s5 + $0x2c8] sm:$0xff]  }
 0xc31   : > { %21073 = vmatprep.subr.bf16.mxu1 %v26755_v18 }
 0xc34   : > { %21074 = vmatpush3.bf16.msra.mxu1 %v23044_v31  ;;  %v23081_v31 = vld [vmem:[%s27413_s5 + $0x2d0] sm:$0xff]  }
 0xc35   : > { %21075 = vmatprep.subr.bf16.mxu1 %v26755_v18 }
 0xc38   : > { %21076 = vmatpush3.bf16.msra.mxu1 %v23045_v13  ;;  %v23082_v13 = vld [vmem:[%s27413_s5 + $0x2d8] sm:$0xff]  }
 0xc39   : > { %21077 = vmatprep.subr.bf16.mxu1 %v26755_v18 }
 0xc3c   : > { %21078 = vmatpush3.bf16.msra.mxu1 %v23046_v8  ;;  %v23083_v8 = vld [vmem:[%s27413_s5 + $0x2e0] sm:$0xff]  }
 0xc3d   : > { %21083 = vmatprep.subr.bf16.mxu1 %v26755_v18 }
 0xc3f   : > { %21080 = vmatmul.mubr.bf16.vlgmr.msra.gmra.mrb[92].mxu1 %v15717_v29 }
 0xc40   : > { %21084 = vmatpush3.bf16.msra.mxu1 %v23047_v21  ;;  %21099 = vmatprep.mubr.msk.bf16.mxu1 %vm23289_vm8, %v26755_v18  ;;  %v23084_v21 = vld [vmem:[%s27413_s5 + $0x2e8] sm:$0xff]  }
 0xc41   : > { %21085 = vmatprep.subr.bf16.mxu1 %v26755_v18 }
 0xc44   : > { %21086 = vmatpush3.bf16.msra.mxu1 %v23048_v7 }
 0xc45   : > { %21087 = vmatprep.subr.bf16.mxu1 %v26755_v18 }
 0xc48   : > { %21088 = vmatpush3.bf16.msra.mxu1 %v23049_v27 }
 0xc49   : > { %21089 = vmatprep.subr.bf16.mxu1 %v26755_v18 }
 0xc4c   : > { %21090 = vmatpush3.bf16.msra.mxu1 %v23050_v48 }
 0xc4d   : > { %21091 = vmatprep.subr.bf16.mxu1 %v27062_v56 }
 0xc50   : > { %21092 = vmatpush3.bf16.msra.mxu1 %v23051_v44  ;;  %v23085_v44 = vld [vmem:[%s27413_s5 + $0x2f0] sm:$0xff]  }
 0xc51   : > { %21093 = vmatprep.subr.bf16.mxu1 %v27062_v56 }
 0xc52   : > { %v15173_v32 = vpop.f32.mrb[68].mxu1 }
 0xc53   : > { %v20961_v2 = vpop.f32.mrb[69].mxu1 }
 0xc54   : > { %21094 = vmatpush3.bf16.msra.mxu1 %v23052_v62  ;;  %v15176_v18 = vpop.f32.mrb[70].mxu1  ;;  %v23087_v2 = vld [vmem:[%s27413_s5 + $0x300] sm:$0xff]  }
 0xc55   : > { %v20962_v47 = vpop.f32.mrb[71].mxu1  ;;  %21095 = vmatprep.subr.bf16.mxu1 %v27062_v56  ;;  %v16257_v18 = vrot.slane %v26832_v26, 5 }
 0xc56   : > { %v23089_v47 = vld [vmem:[%s27413_s5 + $0x310] sm:$0xff]  }
 0xc58   : > { %21096 = vmatpush3.bf16.msra.mxu1 %v23053_v39  ;;  %v23088_v39 = vld [vmem:[%s27413_s5 + $0x308] sm:$0xff]  }
 0xc59   : > { %21097 = vmatprep.subr.bf16.mxu1 %v27062_v56 }
 0xc5c   : > { %21098 = vmatpush3.bf16.msra.mxu1 %v23054_v12  ;;  %v23090_v12 = vld [vmem:[%s27413_s5 + $0x318] sm:$0xff]  }
 0xc5d   : > { %21103 = vmatprep.subr.bf16.mxu1 %v27062_v56 }
 0xc5f   : > { %21100 = vmatmul.mubr.bf16.vlgmr.msra.gmra.mrb[96].mxu1 %v15825_v42  ;;  %v23092_v42 = vld [vmem:[%s27413_s5 + $0x328] sm:$0xff]  }
 0xc60   : > { %21104 = vmatpush3.bf16.msra.mxu1 %v23055_v51  ;;  %21119 = vmatprep.mubr.msk.bf16.mxu1 %vm23289_vm8, %v27062_v56  ;;  %v23091_v51 = vld [vmem:[%s27413_s5 + $0x320] sm:$0xff]  }
 0xc61   : > { %21105 = vmatprep.subr.bf16.mxu1 %v27062_v56 }
 0xc64   : > { %21106 = vmatpush3.bf16.msra.mxu1 %v23056_v49 }
 0xc65   : > { %21107 = vmatprep.subr.bf16.mxu1 %v27062_v56 }
 0xc68   : > { %21108 = vmatpush3.bf16.msra.mxu1 %v23057_v20 }
 0xc69   : > { %21109 = vmatprep.subr.bf16.mxu1 %v27062_v56 }
 0xc6c   : > { %21110 = vmatpush3.bf16.msra.mxu1 %v23058_v45 }
 0xc6d   : > { %21111 = vmatprep.subr.bf16.mxu1 %v27062_v56 }
 0xc70   : > { %21112 = vmatpush3.bf16.msra.mxu1 %v23059_v36 }
 0xc71   : > { %21113 = vmatprep.subr.bf16.mxu1 %v27062_v56 }
 0xc72   : > { %v15261_v54 = vpop.f32.mrb[72].mxu1 }
 0xc73   : > { %v15262_v53 = vadd.f32 %v15261_v54, %v15173_v32  ;;  %v20981_v55 = vpop.f32.mrb[73].mxu1  ;;  %v23086_v32 = vld [vmem:[%s27413_s5 + $0x2f8] sm:$0xff]  }
 0xc74   : > { %v15264_v61 = vpop.f32.mrb[74].mxu1  ;;  %21114 = vmatpush3.bf16.msra.mxu1 %v23060_v58  ;;  %v23093_v58 = vld [vmem:[%s27413_s5 + $0x330] sm:$0xff]   ;;  %v23095_v55 = vld [vmem:[%s27413_s5 + $0x340] sm:$0xff]  }
 0xc75   : > { %v20982_v15 = vpop.f32.mrb[75].mxu1  ;;  %21115 = vmatprep.subr.bf16.mxu1 %v27062_v56  ;;  %v16365_v61 = vrot.slane %v26826_v24, 6 }
 0xc76   : > { %v23097_v15 = vld [vmem:[%s27413_s5 + $0x350] sm:$0xff]  }
 0xc78   : > { %21116 = vmatpush3.bf16.msra.mxu1 %v23061_v38  ;;  %v23096_v38 = vld [vmem:[%s27413_s5 + $0x348] sm:$0xff]  }
 0xc79   : > { %21117 = vmatprep.subr.bf16.mxu1 %v27062_v56 }
 0xc7c   : > { %21118 = vmatpush3.bf16.msra.mxu1 %v23062_v50  ;;  %v23098_v50 = vld [vmem:[%s27413_s5 + $0x358] sm:$0xff]  }
 0xc7d   : > { %21123 = vmatprep.subr.bf16.mxu1 %v27062_v56 }
 0xc7f   : > { %21120 = vmatmul.mubr.bf16.vlgmr.msra.gmra.mrb[100].mxu1 %v15933_v14  ;;  %v23100_v14 = vld [vmem:[%s27413_s5 + $0x368] sm:$0xff]  }
 0xc80   : > { %21124 = vmatpush3.bf16.msra.mxu1 %v23063_v30  ;;  %21139 = vmatprep.mubr.msk.bf16.mxu1 %vm23289_vm8, %v27062_v56  ;;  %v23099_v30 = vld [vmem:[%s27413_s5 + $0x360] sm:$0xff]  }
 0xc81   : > { %21125 = vmatprep.subr.bf16.mxu1 %v27062_v56 }
 0xc84   : > { %21126 = vmatpush3.bf16.msra.mxu1 %v23064_v25 }
 0xc85   : > { %21127 = vmatprep.subr.bf16.mxu1 %v27062_v56 }
 0xc88   : > { %21128 = vmatpush3.bf16.msra.mxu1 %v23065_v3 }
 0xc89   : > { %21129 = vmatprep.subr.bf16.mxu1 %v27062_v56 }
 0xc8c   : > { %21130 = vmatpush3.bf16.msra.mxu1 %v23066_v9 }
 0xc8d   : > { %21131 = vmatprep.subr.bf16.mxu1 %v27062_v56 }
 0xc90   : > { %21132 = vmatpush3.bf16.msra.mxu1 %v23067_v59 }
 0xc91   : > { %21133 = vmatprep.subr.bf16.mxu1 %v27062_v56 }
 0xc92   : > { %v15369_v19 = vpop.f32.mrb[76].mxu1 }
 0xc93   : > { %v15375_v28 = vadd.f32 %v15369_v19, %v15262_v53  ;;  %v21001_v11 = vpop.f32.mrb[77].mxu1  ;;  %v23094_v53 = vld [vmem:[%s27413_s5 + $0x338] sm:$0xff]  }
 0xc94   : > { %v15372_v34 = vpop.f32.mrb[78].mxu1  ;;  %21134 = vmatpush3.bf16.msra.mxu1 %v23068_v23  ;;  %v23101_v23 = vld [vmem:[%s27413_s5 + $0x370] sm:$0xff]   ;;  %v23103_v11 = vld [vmem:[%s27413_s5 + $0x380] sm:$0xff]  }
 0xc95   : > { %v21002_v43 = vpop.f32.mrb[79].mxu1  ;;  %21135 = vmatprep.subr.bf16.mxu1 %v27062_v56  ;;  %v16473_v34 = vrot.slane %v26832_v26, 6 }
 0xc96   : > { %v23105_v43 = vld [vmem:[%s27413_s5 + $0x390] sm:$0xff]  }
 0xc98   : > { %21136 = vmatpush3.bf16.msra.mxu1 %v23069_v5  ;;  %v23104_v5 = vld [vmem:[%s27413_s5 + $0x388] sm:$0xff]  }
 0xc99   : > { %21137 = vmatprep.subr.bf16.mxu1 %v27062_v56 }
 0xc9c   : > { %21138 = vmatpush3.bf16.msra.mxu1 %v23070_v35  ;;  %v23106_v35 = vld [vmem:[%s27413_s5 + $0x398] sm:$0xff]  }
 0xc9d   : > { %21143 = vmatprep.subr.bf16.mxu1 %v27062_v56 }
 0xc9f   : > { %21140 = vmatmul.mubr.bf16.vlgmr.msra.gmra.mrb[104].mxu1 %v16041_v0  ;;  %v23108_v0 = vld [vmem:[%s27413_s5 + $0x3a8] sm:$0xff]  }
 0xca0   : > { %21144 = vmatpush3.bf16.msra.mxu1 %v23071_v52  ;;  %21159 = vmatprep.mubr.msk.bf16.mxu1 %vm23289_vm8, %v27062_v56  ;;  %v23107_v52 = vld [vmem:[%s27413_s5 + $0x3a0] sm:$0xff]  }
 0xca1   : > { %21145 = vmatprep.subr.bf16.mxu1 %v27062_v56 }
 0xca4   : > { %21146 = vmatpush3.bf16.msra.mxu1 %v23072_v6 }
 0xca5   : > { %21147 = vmatprep.subr.bf16.mxu1 %v27062_v56 }
 0xca8   : > { %21148 = vmatpush3.bf16.msra.mxu1 %v23073_v46 }
 0xca9   : > { %21149 = vmatprep.subr.bf16.mxu1 %v27062_v56 }
 0xcac   : > { %21150 = vmatpush3.bf16.msra.mxu1 %v23074_v41 }
 0xcad   : > { %21151 = vmatprep.subr.bf16.mxu1 %v27062_v56 }
 0xcb0   : > { %21152 = vmatpush3.bf16.msra.mxu1 %v23075_v22 }
 0xcb1   : > { %21153 = vmatprep.subr.bf16.mxu1 %v27062_v56 }
 0xcb2   : > { %v15477_v63 = vpop.f32.mrb[80].mxu1 }
 0xcb3   : > { %v15483_v16 = vadd.f32 %v15477_v63, %v15375_v28  ;;  %v21021_v40 = vpop.f32.mrb[81].mxu1  ;;  %v23102_v28 = vld [vmem:[%s27413_s5 + $0x378] sm:$0xff]  }
 0xcb4   : > { %v15480_v33 = vpop.f32.mrb[82].mxu1  ;;  %21154 = vmatpush3.bf16.msra.mxu1 %v23076_v10  ;;  %v23109_v10 = vld [vmem:[%s27413_s5 + $0x3b0] sm:$0xff]   ;;  %v23111_v40 = vld [vmem:[%s27413_s5 + $0x3c0] sm:$0xff]  }
 0xcb5   : > { %v21022_v57 = vpop.f32.mrb[83].mxu1  ;;  %21155 = vmatprep.subr.bf16.mxu1 %v27062_v56  ;;  %v16581_v33 = vrot.slane %v26826_v24, 7  ;;  %v23114_v24 = vld [vmem:[%s27413_s5 + $0x3d8] sm:$0xff]  }
 0xcb6   : > { %v23113_v57 = vld [vmem:[%s27413_s5 + $0x3d0] sm:$0xff]  }
 0xcb8   : > { %21156 = vmatpush3.bf16.msra.mxu1 %v23077_v4  ;;  %v23112_v4 = vld [vmem:[%s27413_s5 + $0x3c8] sm:$0xff]  }
 0xcb9   : > { %21157 = vmatprep.subr.bf16.mxu1 %v27062_v56 }
 0xcbc   : > { %21158 = vmatpush3.bf16.msra.mxu1 %v23078_v60  ;;  %v23115_v60 = vld [vmem:[%s27413_s5 + $0x3e0] sm:$0xff]  }
 0xcbd   : > { %21163 = vmatprep.subr.bf16.mxu1 %v27062_v56 }
 0xcbf   : > { %21160 = vmatmul.mubr.bf16.vlgmr.msra.gmra.mrb[108].mxu1 %v16149_v17 }
 0xcc0   : > { %21164 = vmatpush3.bf16.msra.mxu1 %v23079_v37  ;;  %21179 = vmatprep.mubr.msk.bf16.mxu1 %vm23289_vm8, %v27062_v56  ;;  %v23116_v37 = vld [vmem:[%s27413_s5 + $0x3e8] sm:$0xff]  }
 0xcc1   : > { %21165 = vmatprep.subr.bf16.mxu1 %v27062_v56 }
 0xcc4   : > { %21166 = vmatpush3.bf16.msra.mxu1 %v23080_v1 }
 0xcc5   : > { %21167 = vmatprep.subr.bf16.mxu1 %v27062_v56 }
 0xcc8   : > { %21168 = vmatpush3.bf16.msra.mxu1 %v23081_v31 }
 0xcc9   : > { %21169 = vmatprep.subr.bf16.mxu1 %v27062_v56 }
 0xccc   : > { %21170 = vmatpush3.bf16.msra.mxu1 %v23082_v13 }
 0xccd   : > { %21171 = vmatprep.subr.bf16.mxu1 %v27062_v56 }
 0xcd0   : > { %21172 = vmatpush3.bf16.msra.mxu1 %v23083_v8  ;;  %v23117_v8 = vld [vmem:[%s27413_s5 + $0x3f0] sm:$0xff]  }
 0xcd1   : > { %21173 = vmatprep.subr.bf16.mxu1 %v27062_v56 }
 0xcd2   : > { %v15585_v29 = vpop.f32.mrb[84].mxu1 }
 0xcd3   : > { %v15591_v7 = vadd.f32 %v15585_v29, %v15483_v16  ;;  %v21041_v27 = vpop.f32.mrb[85].mxu1  ;;  %v23110_v16 = vld [vmem:[%s27413_s5 + $0x3b8] sm:$0xff]  }
 0xcd4   : > { %v15588_v48 = vpop.f32.mrb[86].mxu1  ;;  %21174 = vmatpush3.bf16.msra.mxu1 %v23084_v21  ;;  %v23118_v29 = vld [vmem:[%s27413_s5 + $0x3f8] sm:$0xff]  }
 0xcd5   : > { %v21042_v62 = vpop.f32.mrb[87].mxu1  ;;  %21175 = vmatprep.subr.bf16.mxu1 %v27062_v56 }
 0xcd8   : > { %21176 = vmatpush3.bf16.msra.mxu1 %v23085_v44 }
 0xcd9   : > { %21177 = vmatprep.subr.bf16.mxu1 %v27062_v56 }
 0xcdc   : > { %21178 = vmatpush3.bf16.msra.mxu1 %v23086_v32 }
 0xcdd   : > { %21183 = vmatprep.subr.bf16.mxu1 %v27062_v56 }
 0xcdf   : > { %21180 = vmatmul.mubr.bf16.vlgmr.msra.gmra.mrb[112].mxu1 %v16257_v18 }
 0xce0   : > { %21184 = vmatpush3.bf16.msra.mxu1 %v23087_v2  ;;  %21199 = vmatprep.mubr.msk.bf16.mxu1 %vm23289_vm8, %v27062_v56 }
 0xce1   : > { %21185 = vmatprep.subr.bf16.mxu1 %v27062_v56 }
 0xce4   : > { %21186 = vmatpush3.bf16.msra.mxu1 %v23088_v39 }
 0xce5   : > { %21187 = vmatprep.subr.bf16.mxu1 %v27062_v56 }
 0xce8   : > { %21188 = vmatpush3.bf16.msra.mxu1 %v23089_v47 }
 0xce9   : > { %21189 = vmatprep.subr.bf16.mxu1 %v27062_v56 }
 0xcec   : > { %21190 = vmatpush3.bf16.msra.mxu1 %v23090_v12 }
 0xced   : > { %21191 = vmatprep.subr.bf16.mxu1 %v27062_v56 }
 0xcf0   : > { %21192 = vmatpush3.bf16.msra.mxu1 %v23091_v51 }
 0xcf1   : > { %21193 = vmatprep.subr.bf16.mxu1 %v27062_v56 }
 0xcf2   : > { %v15693_v49 = vpop.f32.mrb[88].mxu1 }
 0xcf3   : > { %v15699_v20 = vadd.f32 %v15693_v49, %v15591_v7  ;;  %v21061_v45 = vpop.f32.mrb[89].mxu1  ;;  %v16689_v7 = vrot.slane %v26832_v26, 7 }
 0xcf4   : > { %v15696_v36 = vpop.f32.mrb[90].mxu1  ;;  %21194 = vmatpush3.bf16.msra.mxu1 %v23092_v42 }
 0xcf5   : > { %v21062_v54 = vpop.f32.mrb[91].mxu1  ;;  %21195 = vmatprep.subr.bf16.mxu1 %v27062_v56 }
 0xcf8   : > { %21196 = vmatpush3.bf16.msra.mxu1 %v23093_v58 }
 0xcf9   : > { %21197 = vmatprep.subr.bf16.mxu1 %v27062_v56 }
 0xcfc   : > { %21198 = vmatpush3.bf16.msra.mxu1 %v23094_v53 }
 0xcfd   : > { %21203 = vmatprep.subr.bf16.mxu1 %v27062_v56 }
 0xcff   : > { %21200 = vmatmul.mubr.bf16.vlgmr.msra.gmra.mrb[116].mxu1 %v16365_v61 }
 0xd00   : > { %21204 = vmatpush3.bf16.msra.mxu1 %v23095_v55  ;;  %21219 = vmatprep.mubr.msk.bf16.mxu1 %vm23289_vm8, %v27062_v56 }
 0xd01   : > { %21205 = vmatprep.subr.bf16.mxu1 %v27062_v56 }
 0xd04   : > { %21206 = vmatpush3.bf16.msra.mxu1 %v23096_v38 }
 0xd05   : > { %21207 = vmatprep.subr.bf16.mxu1 %v27062_v56 }
 0xd08   : > { %21208 = vmatpush3.bf16.msra.mxu1 %v23097_v15 }
 0xd09   : > { %21209 = vmatprep.subr.bf16.mxu1 %v27062_v56 }
 0xd0c   : > { %21210 = vmatpush3.bf16.msra.mxu1 %v23098_v50 }
 0xd0d   : > { %21211 = vmatprep.subr.bf16.mxu1 %v27062_v56 }
 0xd10   : > { %21212 = vmatpush3.bf16.msra.mxu1 %v23099_v30 }
 0xd11   : > { %21213 = vmatprep.subr.bf16.mxu1 %v27062_v56 }
 0xd12   : > { %v15801_v25 = vpop.f32.mrb[92].mxu1 }
 0xd13   : > { %v15807_v3 = vadd.f32 %v15801_v25, %v15699_v20  ;;  %v21081_v9 = vpop.f32.mrb[93].mxu1 }
 0xd14   : > { %v15804_v59 = vpop.f32.mrb[94].mxu1  ;;  %21214 = vmatpush3.bf16.msra.mxu1 %v23100_v14 }
 0xd15   : > { %v21082_v19 = vpop.f32.mrb[95].mxu1  ;;  %21215 = vmatprep.subr.bf16.mxu1 %v27062_v56  ;;  %v16780_v59 = vld [vmem:[%s27414_s6] sm:$0x1] }
 0xd18   : > { %21216 = vmatpush3.bf16.msra.mxu1 %v23101_v23 }
 0xd19   : > { %21217 = vmatprep.subr.bf16.mxu1 %v27062_v56 }
 0xd1c   : > { %21218 = vmatpush3.bf16.msra.mxu1 %v23102_v28 }
 0xd1d   : > { %21223 = vmatprep.subr.bf16.mxu1 %v27062_v56 }
 0xd1f   : > { %21220 = vmatmul.mubr.bf16.vlgmr.msra.gmra.mrb[120].mxu1 %v16473_v34 }
 0xd20   : > { %21224 = vmatpush3.bf16.msra.mxu1 %v23103_v11  ;;  %21239 = vmatprep.mubr.msk.bf16.mxu1 %vm23289_vm8, %v27062_v56 }
 0xd21   : > { %21225 = vmatprep.subr.bf16.mxu1 %v27062_v56 }
 0xd24   : > { %21226 = vmatpush3.bf16.msra.mxu1 %v23104_v5 }
 0xd25   : > { %21227 = vmatprep.subr.bf16.mxu1 %v27062_v56 }
 0xd28   : > { %21228 = vmatpush3.bf16.msra.mxu1 %v23105_v43 }
 0xd29   : > { %21229 = vmatprep.subr.bf16.mxu1 %v27062_v56 }
 0xd2c   : > { %21230 = vmatpush3.bf16.msra.mxu1 %v23106_v35 }
 0xd2d   : > { %21231 = vmatprep.subr.bf16.mxu1 %v27062_v56 }
 0xd30   : > { %21232 = vmatpush3.bf16.msra.mxu1 %v23107_v52 }
 0xd31   : > { %21233 = vmatprep.subr.bf16.mxu1 %v27062_v56 }
 0xd32   : > { %v15909_v6 = vpop.f32.mrb[96].mxu1 }
 0xd33   : > { %v15915_v46 = vadd.f32 %v15909_v6, %v15807_v3  ;;  %v21101_v41 = vpop.f32.mrb[97].mxu1 }
 0xd34   : > { %v15912_v22 = vpop.f32.mrb[98].mxu1  ;;  %21234 = vmatpush3.bf16.msra.mxu1 %v23108_v0 }
 0xd35   : > { %v21102_v63 = vpop.f32.mrb[99].mxu1  ;;  %21235 = vmatprep.subr.bf16.mxu1 %v27062_v56 }
 0xd38   : > { %21236 = vmatpush3.bf16.msra.mxu1 %v23109_v10 }
 0xd39   : > { %21237 = vmatprep.subr.bf16.mxu1 %v27062_v56 }
 0xd3c   : > { %21238 = vmatpush3.bf16.msra.mxu1 %v23110_v16 }
 0xd3d   : > { %21243 = vmatprep.subr.bf16.mxu1 %v27062_v56 }
 0xd3f   : > { %21240 = vmatmul.mubr.bf16.vlgmr.msra.gmra.mrb[124].mxu1 %v16581_v33 }
 0xd40   : > { %21244 = vmatpush3.bf16.msra.mxu1 %v23111_v40  ;;  %21259 = vmatprep.mubr.msk.bf16.mxu1 %vm23289_vm8, %v27062_v56 }
 0xd41   : > { %21245 = vmatprep.subr.bf16.mxu1 %v27062_v56 }
 0xd44   : > { %21246 = vmatpush3.bf16.msra.mxu1 %v23112_v4 }
 0xd45   : > { %21247 = vmatprep.subr.bf16.mxu1 %v27062_v56 }
 0xd48   : > { %21248 = vmatpush3.bf16.msra.mxu1 %v23113_v57 }
 0xd49   : > { %21249 = vmatprep.subr.bf16.mxu1 %v27062_v56 }
 0xd4c   : > { %21250 = vmatpush3.bf16.msra.mxu1 %v23114_v24 }
 0xd4d   : > { %21251 = vmatprep.subr.bf16.mxu1 %v27062_v56 }
 0xd50   : > { %21252 = vmatpush3.bf16.msra.mxu1 %v23115_v60 }
 0xd51   : > { %21253 = vmatprep.subr.bf16.mxu1 %v27062_v56 }
 0xd52   : > { %v16017_v17 = vpop.f32.mrb[100].mxu1 }
 0xd53   : > { %v16023_v1 = vadd.f32 %v16017_v17, %v15915_v46  ;;  %v21121_v31 = vpop.f32.mrb[101].mxu1 }
 0xd54   : > { %v16020_v13 = vpop.f32.mrb[102].mxu1  ;;  %21254 = vmatpush3.bf16.msra.mxu1 %v23116_v37 }
 0xd55   : > { %v21122_v21 = vpop.f32.mrb[103].mxu1  ;;  %21255 = vmatprep.subr.bf16.mxu1 %v27062_v56 }
 0xd58   : > { %21256 = vmatpush3.bf16.msra.mxu1 %v23117_v8 }
 0xd59   : > { %21257 = vmatprep.subr.bf16.mxu1 %v27062_v56 }
 0xd5c   : > { %21258 = vmatpush3.bf16.msra.mxu1 %v23118_v29 }
 0xd5f   : > { %21260 = vmatmul.mubr.bf16.vlgmr.msra.gmra.mrb[128].mxu1 %v16689_v7 }
 0xd72   : > { %v16125_v27 = vpop.f32.mrb[104].mxu1 }
 0xd73   : > { %v16131_v48 = vadd.f32 %v16125_v27, %v16023_v1  ;;  %v21141_v44 = vpop.f32.mrb[105].mxu1 }
 0xd74   : > { %v16128_v62 = vpop.f32.mrb[106].mxu1 }
 0xd75   : > { %v21142_v32 = vpop.f32.mrb[107].mxu1 }
 0xd92   : > { %v16233_v2 = vpop.f32.mrb[108].mxu1 }
 0xd93   : > { %v16239_v18 = vadd.f32 %v16233_v2, %v16131_v48  ;;  %v21161_v39 = vpop.f32.mrb[109].mxu1 }
 0xd94   : > { %v16236_v47 = vpop.f32.mrb[110].mxu1 }
 0xd95   : > { %v21162_v12 = vpop.f32.mrb[111].mxu1 }
 0xdb2   : > { %v16341_v51 = vpop.f32.mrb[112].mxu1 }
 0xdb3   : > { %v16347_v42 = vadd.f32 %v16341_v51, %v16239_v18  ;;  %v21181_v49 = vpop.f32.mrb[113].mxu1 }
 0xdb4   : > { %v16344_v20 = vpop.f32.mrb[114].mxu1 }
 0xdb5   : > { %v21182_v45 = vpop.f32.mrb[115].mxu1 }
 0xdd2   : > { %v16449_v56 = vpop.f32.mrb[116].mxu1 }
 0xdd3   : > { %v16455_v36 = vadd.f32 %v16449_v56, %v16347_v42  ;;  %v21201_v26 = vpop.f32.mrb[117].mxu1 }
 0xdd4   : > { %v16452_v58 = vpop.f32.mrb[118].mxu1 }
 0xdd5   : > { %v21202_v54 = vpop.f32.mrb[119].mxu1 }
 0xdf2   : > { %v16557_v53 = vpop.f32.mrb[120].mxu1 }
 0xdf3   : > { %v16563_v55 = vadd.f32 %v16557_v53, %v16455_v36  ;;  %v21221_v61 = vpop.f32.mrb[121].mxu1 }
 0xdf4   : > { %v16560_v38 = vpop.f32.mrb[122].mxu1 }
 0xdf5   : > { %v21222_v15 = vpop.f32.mrb[123].mxu1 }
 0xe12   : > { %v16665_v50 = vpop.f32.mrb[124].mxu1 }
 0xe13   : > { %v16671_v30 = vadd.f32 %v16665_v50, %v16563_v55  ;;  %v21241_v14 = vpop.f32.mrb[125].mxu1 }
 0xe14   : > { %v16668_v25 = vpop.f32.mrb[126].mxu1 }
 0xe15   : > { %v21242_v3 = vpop.f32.mrb[127].mxu1 }
 0xe32   : > { %v16773_v9 = vpop.f32.mrb[128].mxu1 }
 0xe33   : > { %v16779_v23 = vadd.f32 %v16773_v9, %v16671_v30  ;;  %v21261_v19 = vpop.f32.mrb[129].mxu1 }
 0xe34   : > { %v16776_v28 = vpop.f32.mrb[130].mxu1 }
 0xe35   : > { %v16781_v11 = vadd.f32 %v16780_v59, %v16779_v23  ;;  %v21262_v34 = vpop.f32.mrb[131].mxu1 }
 0xe37   : > { %16782 = vst [vmem:[%s285_s20] sm:$0x1] %v16781_v11 }
 0xe38   : > { %23229 = shalt.err (!%p23226_p7)
}
 0xe39   : > { %s23230_s9 = scalar_lea.hbm %s27366_s22, 16  ;;  %s23234_s18 = scalar_lea.hbm %s27415_s7, 32 }
 0xe3a   : > { %p23231_p8 = scmp.ne.s32.totalorder %s27366_s22, %s23230_s9  ;;  %p23235_p1 = scmp.lt.u32.totalorder %s27366_s22, %s27415_s7 }
 0xe3b   : > { %p23236_p0 = scmp.lt.u32.totalorder %s23234_s18, %s23230_s9  ;;  %p23238_p6 = scmp.lt.u32.totalorder %s23230_s9, %s27366_s22 }
 0xe3c   : > { %p23232_p11 = pnand %p23231_p8, %p27804_p9 }
 0xe3d   : > { %p23237_p5 = por %p23236_p0, %p23235_p1 }
 0xe3e   : > { %p23233_p13 = pneg %p23232_p11 }
 0xe3f   : > { %p23239_p10 = por %p23238_p6, %p23237_p5 }
 0xe41   : > { %p23240_p12 = pnand %p23239_p10, %p23233_p13 }
 0xe43   : > { %23243 = shalt.err (!%p23240_p12)
}
 0xe44   : > { %22558 = dma.vmem_to_hbm [thread:$0]  (%p27804_p9), %s27368_s16, 16, %s27366_s22, %s16784_s13  }
 0xe45 PF: > { %p22570_p2 = scmp.ge.s32.totalorder %s23282_s27, 2  ;;  %s16808_s21 = sand.u32 1, %s23270_s24  }
 0xe46   : > { %p27805_p3 = scmp.ne.s32.totalorder %s27580_s12, 0  ;;  %s16809_s15 = scalar_lea.sflag [#allocation8], %s16808_s21 }
 0xe48   : > { %p22565_p4 = pnand %p22570_p2, %p27805_p3 }
 0xe4a   : > { %23265 = dma.done.wait (!%p22565_p4), %s16809_s15, 16  }
 0xe4b   : > { %23267 = vsyncadd (!%p22565_p4), %s16809_s15, 4294967280  ;;  %p18_p7 = scmp.ge.s32.totalorder %s23356_s30, 4   ;;  %s27806_s24 = smov %s23274_s25 }
 0xe4c   : > { %s27807_s25 = smov %s23278_s26  ;;  %s27808_s26 = smov %s23367_s10 }
 0xe4d   : > { %s27809_s27 = smov %s23356_s30  ;;  %20 = sbr.rel (!%p18_p7) target bundleno = 4 (0x4), region = 199 }
 0xe54   :  { %16813 = vsyncpa [#allocation7], 1 }
 0xe55   :  { %16815 = vsyncpa [#allocation7 + $0x1], 1 }
 0xe56   :  { %16816 = vsyncpa [#allocation8], 1 }
 0xe57   :  { %16818 = vsyncpa [#allocation8 + $0x1], 1 }

</bundles_post_ra>
